<compile_context>
chip_gen: v6e
topology: v6e:2x2x1
jax: 0.10.0
libtpu: 0.0.40
codegen_flags: <defaults>
</compile_context>

<pallas_src>
import functools
import math

import jax
import jax.numpy as jnp
from jax.experimental import pallas as pl
from jax.experimental.pallas import tpu as pltpu


BN_EPS = 1e-5
ACT_DTYPE = jnp.bfloat16
VMEM_LIMIT = 32 * 1024 * 1024  # safe on v5e/v6e (128 MiB) and v7x (64 MiB)


def _cparams(*sem):
    return pltpu.CompilerParams(dimension_semantics=sem,
                                vmem_limit_bytes=VMEM_LIMIT)


def _round_up(x, m):
    return ((x + m - 1) // m) * m


def _pow2_divisor(n, cap):
    t = 1
    while t * 2 <= cap and n % (t * 2) == 0:
        t *= 2
    return t


# ---------------------------------------------------------------------------
# Pallas kernels
# ---------------------------------------------------------------------------

def _mm_kernel(x_ref, w_ref, scale_ref, shift_ref, o_ref, *, relu):
    acc = jnp.dot(x_ref[...], w_ref[...], preferred_element_type=jnp.float32)
    y = acc * scale_ref[...] + shift_ref[...]
    if relu:
        y = jnp.maximum(y, 0.0)
    o_ref[...] = y.astype(o_ref.dtype)


def _mm_res_kernel(x_ref, w_ref, scale_ref, shift_ref, res_ref, o_ref, *, relu):
    acc = jnp.dot(x_ref[...], w_ref[...], preferred_element_type=jnp.float32)
    y = acc * scale_ref[...] + shift_ref[...] + res_ref[...].astype(jnp.float32)
    if relu:
        y = jnp.maximum(y, 0.0)
    o_ref[...] = y.astype(o_ref.dtype)


def _conv_row_kernel(x_ref, w_ref, scale_ref, shift_ref, o_ref, acc_ref, *,
                     kw, delta, wo, relu):
    ki = pl.program_id(2)

    @pl.when(ki == 0)
    def _():
        acc_ref[...] = jnp.zeros_like(acc_ref)

    for kj in range(kw):
        lhs = x_ref[pl.ds(kj * delta, wo), :]               # (Wo, Cin)
        acc_ref[...] += jnp.dot(lhs, w_ref[kj],
                                preferred_element_type=jnp.float32)

    @pl.when(ki == pl.num_programs(2) - 1)
    def _():
        y = acc_ref[...] * scale_ref[...] + shift_ref[...]
        if relu:
            y = jnp.maximum(y, 0.0)
        o_ref[...] = y.astype(o_ref.dtype)


def _conv_row_res_kernel(x_ref, w_ref, scale_ref, shift_ref, res_ref, o_ref,
                         acc_ref, *, kw, delta, wo, relu):
    ki = pl.program_id(2)

    @pl.when(ki == 0)
    def _():
        acc_ref[...] = jnp.zeros_like(acc_ref)

    for kj in range(kw):
        lhs = x_ref[pl.ds(kj * delta, wo), :]
        acc_ref[...] += jnp.dot(lhs, w_ref[kj],
                                preferred_element_type=jnp.float32)

    @pl.when(ki == pl.num_programs(2) - 1)
    def _():
        y = acc_ref[...] * scale_ref[...] + shift_ref[...]
        y = y + res_ref[...].astype(jnp.float32)
        if relu:
            y = jnp.maximum(y, 0.0)
        o_ref[...] = y.astype(o_ref.dtype)


def _maxpool_kernel(x_ref, o_ref, *, c):
    xb = x_ref[...]                       # (TR, 2, Wo, 2C)
    m = jnp.maximum(xb[:, 0], xb[:, 1])   # max over H pair -> (TR, Wo, 2C)
    o_ref[...] = jnp.maximum(m[..., :c], m[..., c:])


def _interp_kernel(m_ref, x_ref, o_ref, *, tb):
    m = m_ref[...]
    for r in range(tb):
        xr = x_ref[r]
        if m.shape[1] == 1:
            y = m.astype(jnp.float32) * xr.astype(jnp.float32)
        else:
            y = jnp.dot(m, xr, preferred_element_type=jnp.float32)
        o_ref[r] = y.astype(o_ref.dtype)


# ---------------------------------------------------------------------------
# Pallas wrappers
# ---------------------------------------------------------------------------

def matmul_affine(x2d, w2d, scale, shift, *, relu=False, residual=None):
    """(M,K)@(K,N) * scale + shift [+residual] [relu]; M always tiled."""
    M, K = x2d.shape
    Cout = w2d.shape[1]
    TM = 512 if M >= 512 else _round_up(M, 8)
    Mp = _round_up(M, TM)
    if Mp != M:
        x2d = jnp.pad(x2d, ((0, Mp - M), (0, 0)))
        if residual is not None:
            residual = jnp.pad(residual, ((0, Mp - M), (0, 0)))

    in_specs = [
        pl.BlockSpec((TM, K), lambda i: (i, 0)),
        pl.BlockSpec((K, Cout), lambda i: (0, 0)),
        pl.BlockSpec((1, Cout), lambda i: (0, 0)),
        pl.BlockSpec((1, Cout), lambda i: (0, 0)),
    ]
    args = [x2d.astype(ACT_DTYPE), w2d.astype(ACT_DTYPE),
            scale.reshape(1, Cout).astype(jnp.float32),
            shift.reshape(1, Cout).astype(jnp.float32)]
    if residual is not None:
        in_specs.append(pl.BlockSpec((TM, Cout), lambda i: (i, 0)))
        args.append(residual.astype(ACT_DTYPE))
        kernel = functools.partial(_mm_res_kernel, relu=relu)
    else:
        kernel = functools.partial(_mm_kernel, relu=relu)

    out = pl.pallas_call(
        kernel,
        out_shape=jax.ShapeDtypeStruct((Mp, Cout), ACT_DTYPE),
        grid=(Mp // TM,),
        in_specs=in_specs,
        out_specs=pl.BlockSpec((TM, Cout), lambda i: (i, 0)),
        compiler_params=_cparams("parallel"),
    )(*args)
    return out[:M]


def space_to_depth(x, s):
    N, H, W, C = x.shape
    x = x.reshape(N, H // s, s, W // s, s, C)
    x = x.transpose(0, 1, 3, 2, 4, 5)
    return x.reshape(N, H // s, W // s, s * s * C)


def _weight_to_stride1(w_hwio, stride, dilation):
    """Rewrite a stride-s conv weight for the space-to-depth'd input."""
    kh, kw, Cin, Cout = w_hwio.shape
    s = stride
    kh2 = ((kh - 1) * dilation) // s + 1
    kw2 = ((kw - 1) * dilation) // s + 1
    w2 = jnp.zeros((kh2, kw2, s, s, Cin, Cout), w_hwio.dtype)
    for ki in range(kh):
        a, p = (ki * dilation) // s, (ki * dilation) % s
        for kj in range(kw):
            b, q = (kj * dilation) // s, (kj * dilation) % s
            w2 = w2.at[a, b, p, q].set(w_hwio[ki, kj])
    return w2.reshape(kh2, kw2, s * s * Cin, Cout)


def _conv_s1_pallas(xp, w_hwio, scale, shift, Ho, Wo, delta, relu, residual):
    """Stride-1 conv on pre-padded NHWC input.  Grid (N, Ho, kh); kw taps
    unrolled in-kernel; f32 VMEM accumulator across the kh grid axis."""
    N, Hp, Wp, Cin = xp.shape
    kh, kw, _, Cout = w_hwio.shape

    in_specs = [
        pl.BlockSpec((None, None, Wp, Cin),
                     lambda n, ho, ki: (n, ho + ki * delta, 0, 0)),
        pl.BlockSpec((None, kw, Cin, Cout), lambda n, ho, ki: (ki, 0, 0, 0)),
        pl.BlockSpec((1, Cout), lambda n, ho, ki: (0, 0)),
        pl.BlockSpec((1, Cout), lambda n, ho, ki: (0, 0)),
    ]
    args = [xp.astype(ACT_DTYPE), w_hwio.astype(ACT_DTYPE),
            scale.reshape(1, Cout).astype(jnp.float32),
            shift.reshape(1, Cout).astype(jnp.float32)]
    if residual is not None:
        in_specs.append(pl.BlockSpec((None, None, Wo, Cout),
                                     lambda n, ho, ki: (n, ho, 0, 0)))
        args.append(residual.astype(ACT_DTYPE))
        kernel = functools.partial(_conv_row_res_kernel, kw=kw, delta=delta,
                                   wo=Wo, relu=relu)
    else:
        kernel = functools.partial(_conv_row_kernel, kw=kw, delta=delta,
                                   wo=Wo, relu=relu)

    return pl.pallas_call(
        kernel,
        out_shape=jax.ShapeDtypeStruct((N, Ho, Wo, Cout), ACT_DTYPE),
        grid=(N, Ho, kh),
        in_specs=in_specs,
        out_specs=pl.BlockSpec((None, None, Wo, Cout),
                               lambda n, ho, ki: (n, ho, 0, 0)),
        scratch_shapes=[pltpu.VMEM((Wo, Cout), jnp.float32)],
        compiler_params=_cparams("parallel", "parallel", "arbitrary"),
    )(*args)


def conv2d_fused(x, weight, scale, shift, *, stride=1, padding=0, dilation=1,
                 relu=False, residual=None):
    """Conv2d (no bias) + per-channel affine (folded BN / bias) [+residual]
    [+ReLU].  x: NHWC bf16, weight: (Cout, Cin, kh, kw), residual: NHWC."""
    N, H, W, Cin = x.shape
    Cout, _, kh, kw = weight.shape
    Ho = (H + 2 * padding - dilation * (kh - 1) - 1) // stride + 1
    Wo = (W + 2 * padding - dilation * (kw - 1) - 1) // stride + 1

    if kh == 1 and kw == 1:
        assert padding == 0
        xs = x if stride == 1 else x[:, ::stride, ::stride, :]
        x2d = xs.reshape(N * Ho * Wo, Cin)
        w2d = weight[:, :, 0, 0].T                      # (Cin, Cout)
        res2d = None if residual is None else residual.reshape(N * Ho * Wo, Cout)
        out = matmul_affine(x2d, w2d, scale, shift, relu=relu, residual=res2d)
        return out.reshape(N, Ho, Wo, Cout)

    w_hwio = jnp.transpose(weight, (2, 3, 1, 0))        # (kh, kw, Cin, Cout)
    xp = jnp.pad(x, ((0, 0), (padding, padding), (padding, padding), (0, 0)))
    if stride == 1:
        delta = dilation
    elif dilation % stride == 0:
        # taps only touch phase (0, 0): just subsample the padded input.
        xp = xp[:, ::stride, ::stride, :]
        delta = dilation // stride
    else:
        s = stride
        Hp, Wp = xp.shape[1], xp.shape[2]
        eh, ew = (-Hp) % s, (-Wp) % s
        if eh or ew:
            xp = jnp.pad(xp, ((0, 0), (0, eh), (0, ew), (0, 0)))
        xp = space_to_depth(xp, s)
        w_hwio = _weight_to_stride1(w_hwio, s, dilation)
        delta = 1

    kh_t, kw_t = w_hwio.shape[0], w_hwio.shape[1]
    assert xp.shape[1] >= Ho + (kh_t - 1) * delta
    assert xp.shape[2] >= Wo + (kw_t - 1) * delta
    return _conv_s1_pallas(xp, w_hwio, scale, shift, Ho, Wo, delta, relu,
                           residual)


def maxpool2x2(x):
    """nn.MaxPool2d(kernel_size=2) on NHWC; 2x2 split done in-kernel from a
    free (N*Ho, 2, Wo, 2C) view."""
    N, H, W, C = x.shape
    Ho, Wo = H // 2, W // 2
    R = N * Ho
    xv = x.reshape(R, 2, Wo, 2 * C)
    TR = _pow2_divisor(R, 64)
    out = pl.pallas_call(
        functools.partial(_maxpool_kernel, c=C),
        out_shape=jax.ShapeDtypeStruct((R, Wo, C), x.dtype),
        grid=(R // TR,),
        in_specs=[pl.BlockSpec((TR, 2, Wo, 2 * C), lambda i: (i, 0, 0, 0))],
        out_specs=pl.BlockSpec((TR, Wo, C), lambda i: (i, 0, 0)),
        compiler_params=_cparams("parallel"),
    )(xv)
    return out.reshape(N, Ho, Wo, C)


def _bilinear_matrix(in_size, out_size):
    """PyTorch bilinear (align_corners=False) as (out,in) matrix."""
    dst = jnp.arange(out_size, dtype=jnp.float32)
    src = (dst + 0.5) * (in_size / out_size) - 0.5
    src = jnp.clip(src, 0.0, float(in_size - 1))
    i0 = jnp.floor(src).astype(jnp.int32)
    i1 = jnp.minimum(i0 + 1, in_size - 1)
    frac = src - i0.astype(jnp.float32)
    m = jnp.zeros((out_size, in_size), jnp.float32)
    rows = jnp.arange(out_size)
    m = m.at[rows, i0].add(1.0 - frac)
    m = m.at[rows, i1].add(frac)
    return m


def _interp_leading(x3, m):
    """y[b, o, d] = sum_k m[o, k] * x3[b, k, d]  (B, K, D) -> (B, K2, D)."""
    B, K, D = x3.shape
    K2 = m.shape[0]
    TB = _pow2_divisor(B, 8)
    return pl.pallas_call(
        functools.partial(_interp_kernel, tb=TB),
        out_shape=jax.ShapeDtypeStruct((B, K2, D), x3.dtype),
        grid=(B // TB,),
        in_specs=[pl.BlockSpec((K2, K), lambda i: (0, 0)),
                  pl.BlockSpec((TB, K, D), lambda i: (i, 0, 0))],
        out_specs=pl.BlockSpec((TB, K2, D), lambda i: (i, 0, 0)),
        compiler_params=_cparams("parallel"),
    )(m, x3)


def upsample_bilinear(x, factor):
    """nn.Upsample(scale_factor, 'bilinear', align_corners=False) on NHWC;
    two interpolation matmuls on free NHWC views (no transposes)."""
    N, H, W, C = x.shape
    Ho, Wo = H * factor, W * factor
    Mh = _bilinear_matrix(H, Ho).astype(ACT_DTYPE)
    Mw = _bilinear_matrix(W, Wo).astype(ACT_DTYPE)
    y = _interp_leading(x.reshape(N, H, W * C), Mh)       # (N, Ho, W*C)
    z = _interp_leading(y.reshape(N * Ho, W, C), Mw)      # (N*Ho, Wo, C)
    return z.reshape(N, Ho, Wo, C)


# ---------------------------------------------------------------------------
# Parameter init (deterministic, synthetic) — BatchNorm in eval mode (folded)
# ---------------------------------------------------------------------------

def bn_fold(bn):
    scale = bn['gamma'] * jax.lax.rsqrt(bn['var'] + BN_EPS)
    shift = bn['beta'] - bn['mean'] * scale
    return scale, shift


def init_conv(key, cout, cin, kh, kw):
    fan_in = cin * kh * kw
    return jax.random.normal(key, (cout, cin, kh, kw), jnp.float32) / math.sqrt(fan_in)


def init_bn(key, c):
    k1, k2, k3, k4 = jax.random.split(key, 4)
    return dict(
        gamma=1.0 + 0.1 * jax.random.normal(k1, (c,), jnp.float32),
        beta=0.1 * jax.random.normal(k2, (c,), jnp.float32),
        mean=0.1 * jax.random.normal(k3, (c,), jnp.float32),
        var=jnp.abs(1.0 + 0.1 * jax.random.normal(k4, (c,), jnp.float32)),
    )


def init_block(key, cin, cout, stride, dilation):
    keys = jax.random.split(key, 6)
    p = dict(stride=stride, dilation=dilation,
             w1=init_conv(keys[0], cout, cin, 3, 3), bn1=init_bn(keys[1], cout),
             w2=init_conv(keys[2], cout, cout, 3, 3), bn2=init_bn(keys[3], cout))
    if cin == cout and stride == 1:
        p['shortcut'] = None
    else:
        p['shortcut'] = dict(w=init_conv(keys[4], cout, cin, 1, 1),
                             bn=init_bn(keys[5], cout))
    return p


def init_group(key, cin, cout, stride, num_blocks, dilation_rates):
    keys = jax.random.split(key, num_blocks)
    blocks = [init_block(keys[0], cin, cout, stride, dilation_rates[0])]
    for i in range(1, num_blocks):
        blocks.append(init_block(keys[i], cout, cout, 1,
                                 dilation_rates[i % len(dilation_rates)]))
    return blocks


def init_basic_resnet(key, *, num_blocks, num_channels, dilation_rates, num_classes):
    keys = jax.random.split(key, 8)
    params = dict(
        conv_in=init_conv(keys[0], num_channels[0], 3, 7, 7),
        norm_in=init_bn(keys[1], num_channels[0]),
        group1=init_group(keys[2], num_channels[0], num_channels[0], 1,
                          num_blocks[0], dilation_rates[0]),
        group2=init_group(keys[3], num_channels[0], num_channels[1], 2,
                          num_blocks[1], dilation_rates[1]),
        group3=init_group(keys[4], num_channels[1], num_channels[2], 2,
                          num_blocks[2], dilation_rates[2]),
        group4=init_group(keys[5], num_channels[2], num_channels[3], 2,
                          num_blocks[3], dilation_rates[3]),
    )
    fpn_keys = jax.random.split(keys[6], 2 * len(num_channels))
    fpn = []
    for i, ch in enumerate(reversed(num_channels)):
        fpn.append(dict(
            w=init_conv(fpn_keys[2 * i], num_classes, ch, 1, 1),
            b=0.1 * jax.random.normal(fpn_keys[2 * i + 1], (num_classes,), jnp.float32)))
    params['fpn'] = fpn
    params['num_classes'] = num_classes
    return params


# ---------------------------------------------------------------------------
# Forward pass (mirrors BasicResNet.forward) — NHWC internally
# ---------------------------------------------------------------------------

def run_block(bp, x):
    s1, b1 = bn_fold(bp['bn1'])
    s2, b2 = bn_fold(bp['bn2'])
    if bp['shortcut'] is None:
        shortcut = x
    else:
        ss, sb = bn_fold(bp['shortcut']['bn'])
        shortcut = conv2d_fused(x, bp['shortcut']['w'], ss, sb,
                                stride=bp['stride'], padding=0)
    out = conv2d_fused(x, bp['w1'], s1, b1, stride=bp['stride'],
                       padding=bp['dilation'], dilation=bp['dilation'], relu=True)
    # norm2(conv2(out)) + shortcut, then ReLU — fused in one kernel.
    out = conv2d_fused(out, bp['w2'], s2, b2, stride=1,
                       padding=bp['dilation'], dilation=bp['dilation'],
                       relu=True, residual=shortcut)
    return out


def run_group(group_params, x):
    for bp in group_params:
        x = run_block(bp, x)
    return x


def basic_resnet_forward(params, inputs):
    num_classes = params['num_classes']
    _, _, h, w = inputs.shape
    vpad = math.ceil(h / 32) * 32 - h
    top_pad, bottom_pad = vpad // 2, vpad - vpad // 2
    hpad = math.ceil(w / 32) * 32 - w
    left_pad, right_pad = hpad // 2, hpad - hpad // 2

    # NCHW -> NHWC once; bf16 activations.
    x = jnp.transpose(inputs, (0, 2, 3, 1)).astype(ACT_DTYPE)
    x = jnp.pad(x, ((0, 0), (top_pad, bottom_pad), (left_pad, right_pad), (0, 0)))

    # stem: conv 7x7 s2 + BN + ReLU (fused), then MaxPool2d(2)
    s_in, b_in = bn_fold(params['norm_in'])
    out = conv2d_fused(x, params['conv_in'], s_in, b_in,
                       stride=2, padding=3, relu=True)
    out = maxpool2x2(out)

    g1 = run_group(params['group1'], out)
    g2 = run_group(params['group2'], g1)
    g3 = run_group(params['group3'], g2)
    g4 = run_group(params['group4'], g3)
    groups = [g1, g2, g3, g4]

    # FPN head: reversed 1x1 convs; x2 bilinear upsample + add fused as residual
    ones = jnp.ones((num_classes,), jnp.float32)
    outputs = None
    for conv_p, idx in zip(params['fpn'], [3, 2, 1, 0]):
        src = groups[idx]
        if outputs is None:
            outputs = conv2d_fused(src, conv_p['w'], ones, conv_p['b'])
        else:
            up = upsample_bilinear(outputs, 2)
            outputs = conv2d_fused(src, conv_p['w'], ones, conv_p['b'],
                                   residual=up)

    logits = upsample_bilinear(outputs, 4)
    logits = logits[:, top_pad:top_pad + h, left_pad:left_pad + w, :]
    return jnp.transpose(logits, (0, 3, 1, 2)).astype(jnp.float32)


# ---------------------------------------------------------------------------
# Main
# ---------------------------------------------------------------------------

if __name__ == "__main__":
    key = jax.random.PRNGKey(0)
    pkey, xkey = jax.random.split(key)

    num_blocks = [1, 1, 1, 1]
    num_channels = [8, 16, 32, 64]
    dilation_rates = [[1], [1], [2], [2]]
    num_classes = 3

    params = init_basic_resnet(pkey, num_blocks=num_blocks,
                               num_channels=num_channels,
                               dilation_rates=dilation_rates,
                               num_classes=num_classes)

    # small NCHW input; 30x30 exercises the pad-to-32 + crop path
    x = jax.random.normal(xkey, (2, 3, 30, 30), jnp.float32)

    fwd = jax.jit(lambda inp: basic_resnet_forward(params, inp))
    logits = fwd(x)
    jax.block_until_ready(logits)

    assert logits.shape == (2, num_classes, 30, 30), logits.shape
    assert bool(jnp.all(jnp.isfinite(logits)))
    print("KERNEL_OK")
</pallas_src>

<mosaic_0001>
module attributes {stable_mosaic.version = 11 : i64} {
  func.func private @main(%arg0: i32) attributes {dimension_semantics = [#tpu.dimension_semantics<core_parallel>], iteration_bounds = array<i64: 2>, tpu.core_type = #tpu.core_type<sc_scalar_subcore>, window_params = []} {
    return
  }
}

module attributes {stable_mosaic.version = 11 : i64} {
  func.func private @main(%arg0: i32) attributes {dimension_semantics = [#tpu.dimension_semantics<core_parallel>], iteration_bounds = array<i64: 2>, tpu.core_type = #tpu.core_type<sc_scalar_subcore>, window_params = []} {
    return
  }
}

module attributes {stable_mosaic.version = 11 : i64} {
  func.func @_conv_row_kernel(%arg0: i32, %arg1: i32, %arg2: i32, %arg3: memref<1x1x19x12xbf16, #tpu.memory_space<vmem>>, %arg4: memref<1x4x12x8xbf16, #tpu.memory_space<vmem>>, %arg5: memref<1x8xf32, #tpu.memory_space<vmem>>, %arg6: memref<1x8xf32, #tpu.memory_space<vmem>>, %arg7: memref<1x1x16x8xbf16, #tpu.memory_space<vmem>>, %arg8: memref<16x8xf32, #tpu.memory_space<vmem>>) attributes {dimension_semantics = [#tpu.dimension_semantics<parallel>, #tpu.dimension_semantics<parallel>, #tpu.dimension_semantics<arbitrary>], iteration_bounds = array<i64: 2, 16, 4>, scalar_prefetch = 0 : i64, scratch_operands = 1 : i64, tpu.core_type = #tpu.core_type<tc>, window_params = [{transform_indices = @transform_0, window_bounds = array<i64: 1, 1, 19, 12>}, {transform_indices = @transform_1, window_bounds = array<i64: 1, 4, 12, 8>}, {pipeline_mode = #tpu.pipeline_mode<synchronous>, transform_indices = @transform_2, window_bounds = array<i64: 1, 8>}, {pipeline_mode = #tpu.pipeline_mode<synchronous>, transform_indices = @transform_3, window_bounds = array<i64: 1, 8>}, {transform_indices = @transform_4, window_bounds = array<i64: 1, 1, 16, 8>}]} {
    %c0_i32 = arith.constant 0 : i32
    %0 = arith.cmpi eq, %arg2, %c0_i32 : i32
    %1 = arith.extui %0 : i1 to i32
    %c0_i32_0 = arith.constant 0 : i32
    %2 = arith.cmpi ne, %1, %c0_i32_0 : i32
    scf.if %2 {
      %cst_49 = arith.constant 0.000000e+00 : f32
      %38 = vector.broadcast %cst_49 : f32 to vector<16x8xf32>
      %c0_50 = arith.constant 0 : index
      %c0_51 = arith.constant 0 : index
      %39 = vector.load %arg8[%c0_50, %c0_51] : memref<16x8xf32, #tpu.memory_space<vmem>>, vector<16x8xf32>
      tpu.vector_store %arg8[%c0_50, %c0_51], %38 {strides = array<i32>} : memref<16x8xf32, #tpu.memory_space<vmem>>, vector<16x8xf32>,
    } else {
    }
    %c0 = arith.constant 0 : index
    %c0_1 = arith.constant 0 : index
    %c0_2 = arith.constant 0 : index
    %c0_3 = arith.constant 0 : index
    %3 = vector.load %arg3[%c0, %c0_1, %c0_2, %c0_3] : memref<1x1x19x12xbf16, #tpu.memory_space<vmem>>, vector<1x1x16x12xbf16>
    %4 = vector.shape_cast %3 : vector<1x1x16x12xbf16> to vector<16x12xbf16>
    %c0_4 = arith.constant 0 : index
    %c0_5 = arith.constant 0 : index
    %5 = vector.load %arg8[%c0_4, %c0_5] : memref<16x8xf32, #tpu.memory_space<vmem>>, vector<16x8xf32>
    %c0_6 = arith.constant 0 : index
    %c0_7 = arith.constant 0 : index
    %c0_8 = arith.constant 0 : index
    %c0_9 = arith.constant 0 : index
    %6 = vector.load %arg4[%c0_6, %c0_7, %c0_8, %c0_9] : memref<1x4x12x8xbf16, #tpu.memory_space<vmem>>, vector<1x1x12x8xbf16>
    %7 = vector.shape_cast %6 : vector<1x1x12x8xbf16> to vector<12x8xbf16>
    %cst = arith.constant dense<0.000000e+00> : vector<16x8xf32>
    %8 = tpu.matmul %4, %7, %cst {dimension_numbers = #tpu.dot_dimension_numbers<[1], [0], [0], [1], [0, 0, 1, 1], [], []>} : vector<16x12xbf16>, vector<12x8xbf16>, vector<16x8xf32> -> vector<16x8xf32>
    %9 = arith.addf %5, %8 : vector<16x8xf32>
    %c0_10 = arith.constant 0 : index
    %c0_11 = arith.constant 0 : index
    %10 = vector.load %arg8[%c0_10, %c0_11] : memref<16x8xf32, #tpu.memory_space<vmem>>, vector<16x8xf32>
    tpu.vector_store %arg8[%c0_10, %c0_11], %9 {strides = array<i32>} : memref<16x8xf32, #tpu.memory_space<vmem>>, vector<16x8xf32>,
    %c0_12 = arith.constant 0 : index
    %c0_13 = arith.constant 0 : index
    %c1 = arith.constant 1 : index
    %c0_14 = arith.constant 0 : index
    %11 = vector.load %arg3[%c0_12, %c0_13, %c1, %c0_14] : memref<1x1x19x12xbf16, #tpu.memory_space<vmem>>, vector<1x1x16x12xbf16>
    %12 = vector.shape_cast %11 : vector<1x1x16x12xbf16> to vector<16x12xbf16>
    %c0_15 = arith.constant 0 : index
    %c0_16 = arith.constant 0 : index
    %13 = vector.load %arg8[%c0_15, %c0_16] : memref<16x8xf32, #tpu.memory_space<vmem>>, vector<16x8xf32>
    %c0_17 = arith.constant 0 : index
    %c1_18 = arith.constant 1 : index
    %c0_19 = arith.constant 0 : index
    %c0_20 = arith.constant 0 : index
    %14 = vector.load %arg4[%c0_17, %c1_18, %c0_19, %c0_20] : memref<1x4x12x8xbf16, #tpu.memory_space<vmem>>, vector<1x1x12x8xbf16>
    %15 = vector.shape_cast %14 : vector<1x1x12x8xbf16> to vector<12x8xbf16>
    %cst_21 = arith.constant dense<0.000000e+00> : vector<16x8xf32>
    %16 = tpu.matmul %12, %15, %cst_21 {dimension_numbers = #tpu.dot_dimension_numbers<[1], [0], [0], [1], [0, 0, 1, 1], [], []>} : vector<16x12xbf16>, vector<12x8xbf16>, vector<16x8xf32> -> vector<16x8xf32>
    %17 = arith.addf %13, %16 : vector<16x8xf32>
    %c0_22 = arith.constant 0 : index
    %c0_23 = arith.constant 0 : index
    %18 = vector.load %arg8[%c0_22, %c0_23] : memref<16x8xf32, #tpu.memory_space<vmem>>, vector<16x8xf32>
    tpu.vector_store %arg8[%c0_22, %c0_23], %17 {strides = array<i32>} : memref<16x8xf32, #tpu.memory_space<vmem>>, vector<16x8xf32>,
    %c0_24 = arith.constant 0 : index
    %c0_25 = arith.constant 0 : index
    %c2 = arith.constant 2 : index
    %c0_26 = arith.constant 0 : index
    %19 = vector.load %arg3[%c0_24, %c0_25, %c2, %c0_26] : memref<1x1x19x12xbf16, #tpu.memory_space<vmem>>, vector<1x1x16x12xbf16>
    %20 = vector.shape_cast %19 : vector<1x1x16x12xbf16> to vector<16x12xbf16>
    %c0_27 = arith.constant 0 : index
    %c0_28 = arith.constant 0 : index
    %21 = vector.load %arg8[%c0_27, %c0_28] : memref<16x8xf32, #tpu.memory_space<vmem>>, vector<16x8xf32>
    %c0_29 = arith.constant 0 : index
    %c2_30 = arith.constant 2 : index
    %c0_31 = arith.constant 0 : index
    %c0_32 = arith.constant 0 : index
    %22 = vector.load %arg4[%c0_29, %c2_30, %c0_31, %c0_32] : memref<1x4x12x8xbf16, #tpu.memory_space<vmem>>, vector<1x1x12x8xbf16>
    %23 = vector.shape_cast %22 : vector<1x1x12x8xbf16> to vector<12x8xbf16>
    %cst_33 = arith.constant dense<0.000000e+00> : vector<16x8xf32>
    %24 = tpu.matmul %20, %23, %cst_33 {dimension_numbers = #tpu.dot_dimension_numbers<[1], [0], [0], [1], [0, 0, 1, 1], [], []>} : vector<16x12xbf16>, vector<12x8xbf16>, vector<16x8xf32> -> vector<16x8xf32>
    %25 = arith.addf %21, %24 : vector<16x8xf32>
    %c0_34 = arith.constant 0 : index
    %c0_35 = arith.constant 0 : index
    %26 = vector.load %arg8[%c0_34, %c0_35] : memref<16x8xf32, #tpu.memory_space<vmem>>, vector<16x8xf32>
    tpu.vector_store %arg8[%c0_34, %c0_35], %25 {strides = array<i32>} : memref<16x8xf32, #tpu.memory_space<vmem>>, vector<16x8xf32>,
    %c0_36 = arith.constant 0 : index
    %c0_37 = arith.constant 0 : index
    %c3 = arith.constant 3 : index
    %c0_38 = arith.constant 0 : index
    %27 = vector.load %arg3[%c0_36, %c0_37, %c3, %c0_38] : memref<1x1x19x12xbf16, #tpu.memory_space<vmem>>, vector<1x1x16x12xbf16>
    %28 = vector.shape_cast %27 : vector<1x1x16x12xbf16> to vector<16x12xbf16>
    %c0_39 = arith.constant 0 : index
    %c0_40 = arith.constant 0 : index
    %29 = vector.load %arg8[%c0_39, %c0_40] : memref<16x8xf32, #tpu.memory_space<vmem>>, vector<16x8xf32>
    %c0_41 = arith.constant 0 : index
    %c3_42 = arith.constant 3 : index
    %c0_43 = arith.constant 0 : index
    %c0_44 = arith.constant 0 : index
    %30 = vector.load %arg4[%c0_41, %c3_42, %c0_43, %c0_44] : memref<1x4x12x8xbf16, #tpu.memory_space<vmem>>, vector<1x1x12x8xbf16>
    %31 = vector.shape_cast %30 : vector<1x1x12x8xbf16> to vector<12x8xbf16>
    %cst_45 = arith.constant dense<0.000000e+00> : vector<16x8xf32>
    %32 = tpu.matmul %28, %31, %cst_45 {dimension_numbers = #tpu.dot_dimension_numbers<[1], [0], [0], [1], [0, 0, 1, 1], [], []>} : vector<16x12xbf16>, vector<12x8xbf16>, vector<16x8xf32> -> vector<16x8xf32>
    %33 = arith.addf %29, %32 : vector<16x8xf32>
    %c0_46 = arith.constant 0 : index
    %c0_47 = arith.constant 0 : index
    %34 = vector.load %arg8[%c0_46, %c0_47] : memref<16x8xf32, #tpu.memory_space<vmem>>, vector<16x8xf32>
    tpu.vector_store %arg8[%c0_46, %c0_47], %33 {strides = array<i32>} : memref<16x8xf32, #tpu.memory_space<vmem>>, vector<16x8xf32>,
    %c3_i32 = arith.constant 3 : i32
    %35 = arith.cmpi eq, %arg2, %c3_i32 : i32
    %36 = arith.extui %35 : i1 to i32
    %c0_i32_48 = arith.constant 0 : i32
    %37 = arith.cmpi ne, %36, %c0_i32_48 : i32
    scf.if %37 {
      %c0_49 = arith.constant 0 : index
      %c0_50 = arith.constant 0 : index
      %38 = vector.load %arg8[%c0_49, %c0_50] : memref<16x8xf32, #tpu.memory_space<vmem>>, vector<16x8xf32>
      %c0_51 = arith.constant 0 : index
      %c0_52 = arith.constant 0 : index
      %39 = vector.load %arg5[%c0_51, %c0_52] : memref<1x8xf32, #tpu.memory_space<vmem>>, vector<1x8xf32>
      %40 = vector.broadcast %39 : vector<1x8xf32> to vector<16x8xf32>
      %41 = arith.mulf %38, %40 : vector<16x8xf32>
      %c0_53 = arith.constant 0 : index
      %c0_54 = arith.constant 0 : index
      %42 = vector.load %arg6[%c0_53, %c0_54] : memref<1x8xf32, #tpu.memory_space<vmem>>, vector<1x8xf32>
      %43 = vector.broadcast %42 : vector<1x8xf32> to vector<16x8xf32>
      %44 = arith.addf %41, %43 : vector<16x8xf32>
      %cst_55 = arith.constant 0.000000e+00 : f32
      %45 = vector.broadcast %cst_55 : f32 to vector<16x8xf32>
      %46 = arith.maximumf %44, %45 : vector<16x8xf32>
      %47 = arith.truncf %46 : vector<16x8xf32> to vector<16x8xbf16>
      %c0_56 = arith.constant 0 : index
      %c0_57 = arith.constant 0 : index
      %c0_58 = arith.constant 0 : index
      %c0_59 = arith.constant 0 : index
      %48 = vector.load %arg7[%c0_56, %c0_57, %c0_58, %c0_59] : memref<1x1x16x8xbf16, #tpu.memory_space<vmem>>, vector<1x1x16x8xbf16>
      %49 = vector.shape_cast %48 : vector<1x1x16x8xbf16> to vector<16x8xbf16>
      %50 = vector.shape_cast %47 : vector<16x8xbf16> to vector<1x1x16x8xbf16>
      tpu.vector_store %arg7[%c0_56, %c0_57, %c0_58, %c0_59], %50 {strides = array<i32>} : memref<1x1x16x8xbf16, #tpu.memory_space<vmem>>, vector<1x1x16x8xbf16>,
    } else {
    }
    return
  }
  func.func @transform_0(%arg0: i32, %arg1: i32, %arg2: i32) -> (i32, i32, i32, i32) {
    %c1_i32 = arith.constant 1 : i32
    %0 = arith.muli %arg2, %c1_i32 : i32
    %1 = arith.addi %arg1, %0 : i32
    %c0_i32 = arith.constant 0 : i32
    %c0_i32_0 = arith.constant 0 : i32
    %c0_i32_1 = arith.constant 0 : i32
    return %arg0, %1, %c0_i32, %c0_i32_0 : i32, i32, i32, i32
  }
  func.func @transform_1(%arg0: i32, %arg1: i32, %arg2: i32) -> (i32, i32, i32, i32) {
    %c0_i32 = arith.constant 0 : i32
    %c0_i32_0 = arith.constant 0 : i32
    %c0_i32_1 = arith.constant 0 : i32
    %c0_i32_2 = arith.constant 0 : i32
    return %arg2, %c0_i32, %c0_i32_0, %c0_i32_1 : i32, i32, i32, i32
  }
  func.func @transform_2(%arg0: i32, %arg1: i32, %arg2: i32) -> (i32, i32) {
    %c0_i32 = arith.constant 0 : i32
    %c0_i32_0 = arith.constant 0 : i32
    %c0_i32_1 = arith.constant 0 : i32
    return %c0_i32, %c0_i32_0 : i32, i32
  }
  func.func @transform_3(%arg0: i32, %arg1: i32, %arg2: i32) -> (i32, i32) {
    %c0_i32 = arith.constant 0 : i32
    %c0_i32_0 = arith.constant 0 : i32
    %c0_i32_1 = arith.constant 0 : i32
    return %c0_i32, %c0_i32_0 : i32, i32
  }
  func.func @transform_4(%arg0: i32, %arg1: i32, %arg2: i32) -> (i32, i32, i32, i32) {
    %c0_i32 = arith.constant 0 : i32
    %c0_i32_0 = arith.constant 0 : i32
    %c0_i32_1 = arith.constant 0 : i32
    return %arg0, %arg1, %c0_i32, %c0_i32_0 : i32, i32, i32, i32
  }
}

module attributes {stable_mosaic.version = 11 : i64} {
  func.func @_maxpool_kernel(%arg0: i32, %arg1: memref<16x2x8x16xbf16, #tpu.memory_space<vmem>>, %arg2: memref<16x8x8xbf16, #tpu.memory_space<vmem>>) attributes {dimension_semantics = [#tpu.dimension_semantics<parallel>], iteration_bounds = array<i64: 1>, scalar_prefetch = 0 : i64, scratch_operands = 0 : i64, tpu.core_type = #tpu.core_type<tc>, window_params = [{transform_indices = @transform_0, window_bounds = array<i64: 16, 2, 8, 16>}, {transform_indices = @transform_1, window_bounds = array<i64: 16, 8, 8>}]} {
    %c0 = arith.constant 0 : index
    %c0_0 = arith.constant 0 : index
    %c0_1 = arith.constant 0 : index
    %c0_2 = arith.constant 0 : index
    %0 = vector.load %arg1[%c0, %c0_0, %c0_1, %c0_2] : memref<16x2x8x16xbf16, #tpu.memory_space<vmem>>, vector<16x2x8x16xbf16>
    %1 = vector.extract_strided_slice %0 {offsets = [0, 0, 0, 0], sizes = [16, 1, 8, 16], strides = [1, 1, 1, 1]} : vector<16x2x8x16xbf16> to vector<16x1x8x16xbf16>
    %2 = vector.shape_cast %1 : vector<16x1x8x16xbf16> to vector<16x8x16xbf16>
    %3 = vector.extract_strided_slice %0 {offsets = [0, 1, 0, 0], sizes = [16, 1, 8, 16], strides = [1, 1, 1, 1]} : vector<16x2x8x16xbf16> to vector<16x1x8x16xbf16>
    %4 = vector.shape_cast %3 : vector<16x1x8x16xbf16> to vector<16x8x16xbf16>
    %5 = arith.maximumf %2, %4 : vector<16x8x16xbf16>
    %6 = vector.extract_strided_slice %5 {offsets = [0, 0, 0], sizes = [16, 8, 8], strides = [1, 1, 1]} : vector<16x8x16xbf16> to vector<16x8x8xbf16>
    %7 = vector.extract_strided_slice %5 {offsets = [0, 0, 8], sizes = [16, 8, 8], strides = [1, 1, 1]} : vector<16x8x16xbf16> to vector<16x8x8xbf16>
    %8 = arith.maximumf %6, %7 : vector<16x8x8xbf16>
    %c0_3 = arith.constant 0 : index
    %c0_4 = arith.constant 0 : index
    %c0_5 = arith.constant 0 : index
    %9 = vector.load %arg2[%c0_3, %c0_4, %c0_5] : memref<16x8x8xbf16, #tpu.memory_space<vmem>>, vector<16x8x8xbf16>
    tpu.vector_store %arg2[%c0_3, %c0_4, %c0_5], %8 {strides = array<i32>} : memref<16x8x8xbf16, #tpu.memory_space<vmem>>, vector<16x8x8xbf16>,
    return
  }
  func.func @transform_0(%arg0: i32) -> (i32, i32, i32, i32) {
    %c0_i32 = arith.constant 0 : i32
    %c0_i32_0 = arith.constant 0 : i32
    %c0_i32_1 = arith.constant 0 : i32
    %c0_i32_2 = arith.constant 0 : i32
    return %arg0, %c0_i32, %c0_i32_0, %c0_i32_1 : i32, i32, i32, i32
  }
  func.func @transform_1(%arg0: i32) -> (i32, i32, i32) {
    %c0_i32 = arith.constant 0 : i32
    %c0_i32_0 = arith.constant 0 : i32
    %c0_i32_1 = arith.constant 0 : i32
    return %arg0, %c0_i32, %c0_i32_0 : i32, i32, i32
  }
}

module attributes {stable_mosaic.version = 11 : i64} {
  func.func @_conv_row_kernel(%arg0: i32, %arg1: i32, %arg2: i32, %arg3: memref<1x1x10x8xbf16, #tpu.memory_space<vmem>>, %arg4: memref<1x3x8x8xbf16, #tpu.memory_space<vmem>>, %arg5: memref<1x8xf32, #tpu.memory_space<vmem>>, %arg6: memref<1x8xf32, #tpu.memory_space<vmem>>, %arg7: memref<1x1x8x8xbf16, #tpu.memory_space<vmem>>, %arg8: memref<8x8xf32, #tpu.memory_space<vmem>>) attributes {dimension_semantics = [#tpu.dimension_semantics<parallel>, #tpu.dimension_semantics<parallel>, #tpu.dimension_semantics<arbitrary>], iteration_bounds = array<i64: 2, 8, 3>, scalar_prefetch = 0 : i64, scratch_operands = 1 : i64, tpu.core_type = #tpu.core_type<tc>, window_params = [{transform_indices = @transform_0, window_bounds = array<i64: 1, 1, 10, 8>}, {transform_indices = @transform_1, window_bounds = array<i64: 1, 3, 8, 8>}, {pipeline_mode = #tpu.pipeline_mode<synchronous>, transform_indices = @transform_2, window_bounds = array<i64: 1, 8>}, {pipeline_mode = #tpu.pipeline_mode<synchronous>, transform_indices = @transform_3, window_bounds = array<i64: 1, 8>}, {transform_indices = @transform_4, window_bounds = array<i64: 1, 1, 8, 8>}]} {
    %c0_i32 = arith.constant 0 : i32
    %0 = arith.cmpi eq, %arg2, %c0_i32 : i32
    %1 = arith.extui %0 : i1 to i32
    %c0_i32_0 = arith.constant 0 : i32
    %2 = arith.cmpi ne, %1, %c0_i32_0 : i32
    scf.if %2 {
      %cst_37 = arith.constant 0.000000e+00 : f32
      %30 = vector.broadcast %cst_37 : f32 to vector<8x8xf32>
      %c0_38 = arith.constant 0 : index
      %c0_39 = arith.constant 0 : index
      %31 = vector.load %arg8[%c0_38, %c0_39] : memref<8x8xf32, #tpu.memory_space<vmem>>, vector<8x8xf32>
      tpu.vector_store %arg8[%c0_38, %c0_39], %30 {strides = array<i32>} : memref<8x8xf32, #tpu.memory_space<vmem>>, vector<8x8xf32>,
    } else {
    }
    %c0 = arith.constant 0 : index
    %c0_1 = arith.constant 0 : index
    %c0_2 = arith.constant 0 : index
    %c0_3 = arith.constant 0 : index
    %3 = vector.load %arg3[%c0, %c0_1, %c0_2, %c0_3] : memref<1x1x10x8xbf16, #tpu.memory_space<vmem>>, vector<1x1x8x8xbf16>
    %4 = vector.shape_cast %3 : vector<1x1x8x8xbf16> to vector<8x8xbf16>
    %c0_4 = arith.constant 0 : index
    %c0_5 = arith.constant 0 : index
    %5 = vector.load %arg8[%c0_4, %c0_5] : memref<8x8xf32, #tpu.memory_space<vmem>>, vector<8x8xf32>
    %c0_6 = arith.constant 0 : index
    %c0_7 = arith.constant 0 : index
    %c0_8 = arith.constant 0 : index
    %c0_9 = arith.constant 0 : index
    %6 = vector.load %arg4[%c0_6, %c0_7, %c0_8, %c0_9] : memref<1x3x8x8xbf16, #tpu.memory_space<vmem>>, vector<1x1x8x8xbf16>
    %7 = vector.shape_cast %6 : vector<1x1x8x8xbf16> to vector<8x8xbf16>
    %cst = arith.constant dense<0.000000e+00> : vector<8x8xf32>
    %8 = tpu.matmul %4, %7, %cst {dimension_numbers = #tpu.dot_dimension_numbers<[1], [0], [0], [1], [0, 0, 1, 1], [], []>} : vector<8x8xbf16>, vector<8x8xbf16>, vector<8x8xf32> -> vector<8x8xf32>
    %9 = arith.addf %5, %8 : vector<8x8xf32>
    %c0_10 = arith.constant 0 : index
    %c0_11 = arith.constant 0 : index
    %10 = vector.load %arg8[%c0_10, %c0_11] : memref<8x8xf32, #tpu.memory_space<vmem>>, vector<8x8xf32>
    tpu.vector_store %arg8[%c0_10, %c0_11], %9 {strides = array<i32>} : memref<8x8xf32, #tpu.memory_space<vmem>>, vector<8x8xf32>,
    %c0_12 = arith.constant 0 : index
    %c0_13 = arith.constant 0 : index
    %c1 = arith.constant 1 : index
    %c0_14 = arith.constant 0 : index
    %11 = vector.load %arg3[%c0_12, %c0_13, %c1, %c0_14] : memref<1x1x10x8xbf16, #tpu.memory_space<vmem>>, vector<1x1x8x8xbf16>
    %12 = vector.shape_cast %11 : vector<1x1x8x8xbf16> to vector<8x8xbf16>
    %c0_15 = arith.constant 0 : index
    %c0_16 = arith.constant 0 : index
    %13 = vector.load %arg8[%c0_15, %c0_16] : memref<8x8xf32, #tpu.memory_space<vmem>>, vector<8x8xf32>
    %c0_17 = arith.constant 0 : index
    %c1_18 = arith.constant 1 : index
    %c0_19 = arith.constant 0 : index
    %c0_20 = arith.constant 0 : index
    %14 = vector.load %arg4[%c0_17, %c1_18, %c0_19, %c0_20] : memref<1x3x8x8xbf16, #tpu.memory_space<vmem>>, vector<1x1x8x8xbf16>
    %15 = vector.shape_cast %14 : vector<1x1x8x8xbf16> to vector<8x8xbf16>
    %cst_21 = arith.constant dense<0.000000e+00> : vector<8x8xf32>
    %16 = tpu.matmul %12, %15, %cst_21 {dimension_numbers = #tpu.dot_dimension_numbers<[1], [0], [0], [1], [0, 0, 1, 1], [], []>} : vector<8x8xbf16>, vector<8x8xbf16>, vector<8x8xf32> -> vector<8x8xf32>
    %17 = arith.addf %13, %16 : vector<8x8xf32>
    %c0_22 = arith.constant 0 : index
    %c0_23 = arith.constant 0 : index
    %18 = vector.load %arg8[%c0_22, %c0_23] : memref<8x8xf32, #tpu.memory_space<vmem>>, vector<8x8xf32>
    tpu.vector_store %arg8[%c0_22, %c0_23], %17 {strides = array<i32>} : memref<8x8xf32, #tpu.memory_space<vmem>>, vector<8x8xf32>,
    %c0_24 = arith.constant 0 : index
    %c0_25 = arith.constant 0 : index
    %c2 = arith.constant 2 : index
    %c0_26 = arith.constant 0 : index
    %19 = vector.load %arg3[%c0_24, %c0_25, %c2, %c0_26] : memref<1x1x10x8xbf16, #tpu.memory_space<vmem>>, vector<1x1x8x8xbf16>
    %20 = vector.shape_cast %19 : vector<1x1x8x8xbf16> to vector<8x8xbf16>
    %c0_27 = arith.constant 0 : index
    %c0_28 = arith.constant 0 : index
    %21 = vector.load %arg8[%c0_27, %c0_28] : memref<8x8xf32, #tpu.memory_space<vmem>>, vector<8x8xf32>
    %c0_29 = arith.constant 0 : index
    %c2_30 = arith.constant 2 : index
    %c0_31 = arith.constant 0 : index
    %c0_32 = arith.constant 0 : index
    %22 = vector.load %arg4[%c0_29, %c2_30, %c0_31, %c0_32] : memref<1x3x8x8xbf16, #tpu.memory_space<vmem>>, vector<1x1x8x8xbf16>
    %23 = vector.shape_cast %22 : vector<1x1x8x8xbf16> to vector<8x8xbf16>
    %cst_33 = arith.constant dense<0.000000e+00> : vector<8x8xf32>
    %24 = tpu.matmul %20, %23, %cst_33 {dimension_numbers = #tpu.dot_dimension_numbers<[1], [0], [0], [1], [0, 0, 1, 1], [], []>} : vector<8x8xbf16>, vector<8x8xbf16>, vector<8x8xf32> -> vector<8x8xf32>
    %25 = arith.addf %21, %24 : vector<8x8xf32>
    %c0_34 = arith.constant 0 : index
    %c0_35 = arith.constant 0 : index
    %26 = vector.load %arg8[%c0_34, %c0_35] : memref<8x8xf32, #tpu.memory_space<vmem>>, vector<8x8xf32>
    tpu.vector_store %arg8[%c0_34, %c0_35], %25 {strides = array<i32>} : memref<8x8xf32, #tpu.memory_space<vmem>>, vector<8x8xf32>,
    %c2_i32 = arith.constant 2 : i32
    %27 = arith.cmpi eq, %arg2, %c2_i32 : i32
    %28 = arith.extui %27 : i1 to i32
    %c0_i32_36 = arith.constant 0 : i32
    %29 = arith.cmpi ne, %28, %c0_i32_36 : i32
    scf.if %29 {
      %c0_37 = arith.constant 0 : index
      %c0_38 = arith.constant 0 : index
      %30 = vector.load %arg8[%c0_37, %c0_38] : memref<8x8xf32, #tpu.memory_space<vmem>>, vector<8x8xf32>
      %c0_39 = arith.constant 0 : index
      %c0_40 = arith.constant 0 : index
      %31 = vector.load %arg5[%c0_39, %c0_40] : memref<1x8xf32, #tpu.memory_space<vmem>>, vector<1x8xf32>
      %32 = vector.broadcast %31 : vector<1x8xf32> to vector<8x8xf32>
      %33 = arith.mulf %30, %32 : vector<8x8xf32>
      %c0_41 = arith.constant 0 : index
      %c0_42 = arith.constant 0 : index
      %34 = vector.load %arg6[%c0_41, %c0_42] : memref<1x8xf32, #tpu.memory_space<vmem>>, vector<1x8xf32>
      %35 = vector.broadcast %34 : vector<1x8xf32> to vector<8x8xf32>
      %36 = arith.addf %33, %35 : vector<8x8xf32>
      %cst_43 = arith.constant 0.000000e+00 : f32
      %37 = vector.broadcast %cst_43 : f32 to vector<8x8xf32>
      %38 = arith.maximumf %36, %37 : vector<8x8xf32>
      %39 = arith.truncf %38 : vector<8x8xf32> to vector<8x8xbf16>
      %c0_44 = arith.constant 0 : index
      %c0_45 = arith.constant 0 : index
      %c0_46 = arith.constant 0 : index
      %c0_47 = arith.constant 0 : index
      %40 = vector.load %arg7[%c0_44, %c0_45, %c0_46, %c0_47] : memref<1x1x8x8xbf16, #tpu.memory_space<vmem>>, vector<1x1x8x8xbf16>
      %41 = vector.shape_cast %40 : vector<1x1x8x8xbf16> to vector<8x8xbf16>
      %42 = vector.shape_cast %39 : vector<8x8xbf16> to vector<1x1x8x8xbf16>
      tpu.vector_store %arg7[%c0_44, %c0_45, %c0_46, %c0_47], %42 {strides = array<i32>} : memref<1x1x8x8xbf16, #tpu.memory_space<vmem>>, vector<1x1x8x8xbf16>,
    } else {
    }
    return
  }
  func.func @transform_0(%arg0: i32, %arg1: i32, %arg2: i32) -> (i32, i32, i32, i32) {
    %c1_i32 = arith.constant 1 : i32
    %0 = arith.muli %arg2, %c1_i32 : i32
    %1 = arith.addi %arg1, %0 : i32
    %c0_i32 = arith.constant 0 : i32
    %c0_i32_0 = arith.constant 0 : i32
    %c0_i32_1 = arith.constant 0 : i32
    return %arg0, %1, %c0_i32, %c0_i32_0 : i32, i32, i32, i32
  }
  func.func @transform_1(%arg0: i32, %arg1: i32, %arg2: i32) -> (i32, i32, i32, i32) {
    %c0_i32 = arith.constant 0 : i32
    %c0_i32_0 = arith.constant 0 : i32
    %c0_i32_1 = arith.constant 0 : i32
    %c0_i32_2 = arith.constant 0 : i32
    return %arg2, %c0_i32, %c0_i32_0, %c0_i32_1 : i32, i32, i32, i32
  }
  func.func @transform_2(%arg0: i32, %arg1: i32, %arg2: i32) -> (i32, i32) {
    %c0_i32 = arith.constant 0 : i32
    %c0_i32_0 = arith.constant 0 : i32
    %c0_i32_1 = arith.constant 0 : i32
    return %c0_i32, %c0_i32_0 : i32, i32
  }
  func.func @transform_3(%arg0: i32, %arg1: i32, %arg2: i32) -> (i32, i32) {
    %c0_i32 = arith.constant 0 : i32
    %c0_i32_0 = arith.constant 0 : i32
    %c0_i32_1 = arith.constant 0 : i32
    return %c0_i32, %c0_i32_0 : i32, i32
  }
  func.func @transform_4(%arg0: i32, %arg1: i32, %arg2: i32) -> (i32, i32, i32, i32) {
    %c0_i32 = arith.constant 0 : i32
    %c0_i32_0 = arith.constant 0 : i32
    %c0_i32_1 = arith.constant 0 : i32
    return %arg0, %arg1, %c0_i32, %c0_i32_0 : i32, i32, i32, i32
  }
}

module attributes {stable_mosaic.version = 11 : i64} {
  func.func @_conv_row_res_kernel(%arg0: i32, %arg1: i32, %arg2: i32, %arg3: memref<1x1x10x8xbf16, #tpu.memory_space<vmem>>, %arg4: memref<1x3x8x8xbf16, #tpu.memory_space<vmem>>, %arg5: memref<1x8xf32, #tpu.memory_space<vmem>>, %arg6: memref<1x8xf32, #tpu.memory_space<vmem>>, %arg7: memref<1x1x8x8xbf16, #tpu.memory_space<vmem>>, %arg8: memref<1x1x8x8xbf16, #tpu.memory_space<vmem>>, %arg9: memref<8x8xf32, #tpu.memory_space<vmem>>) attributes {dimension_semantics = [#tpu.dimension_semantics<parallel>, #tpu.dimension_semantics<parallel>, #tpu.dimension_semantics<arbitrary>], iteration_bounds = array<i64: 2, 8, 3>, scalar_prefetch = 0 : i64, scratch_operands = 1 : i64, tpu.core_type = #tpu.core_type<tc>, window_params = [{transform_indices = @transform_0, window_bounds = array<i64: 1, 1, 10, 8>}, {transform_indices = @transform_1, window_bounds = array<i64: 1, 3, 8, 8>}, {pipeline_mode = #tpu.pipeline_mode<synchronous>, transform_indices = @transform_2, window_bounds = array<i64: 1, 8>}, {pipeline_mode = #tpu.pipeline_mode<synchronous>, transform_indices = @transform_3, window_bounds = array<i64: 1, 8>}, {transform_indices = @transform_4, window_bounds = array<i64: 1, 1, 8, 8>}, {transform_indices = @transform_5, window_bounds = array<i64: 1, 1, 8, 8>}]} {
    %c0_i32 = arith.constant 0 : i32
    %0 = arith.cmpi eq, %arg2, %c0_i32 : i32
    %1 = arith.extui %0 : i1 to i32
    %c0_i32_0 = arith.constant 0 : i32
    %2 = arith.cmpi ne, %1, %c0_i32_0 : i32
    scf.if %2 {
      %cst_37 = arith.constant 0.000000e+00 : f32
      %30 = vector.broadcast %cst_37 : f32 to vector<8x8xf32>
      %c0_38 = arith.constant 0 : index
      %c0_39 = arith.constant 0 : index
      %31 = vector.load %arg9[%c0_38, %c0_39] : memref<8x8xf32, #tpu.memory_space<vmem>>, vector<8x8xf32>
      tpu.vector_store %arg9[%c0_38, %c0_39], %30 {strides = array<i32>} : memref<8x8xf32, #tpu.memory_space<vmem>>, vector<8x8xf32>,
    } else {
    }
    %c0 = arith.constant 0 : index
    %c0_1 = arith.constant 0 : index
    %c0_2 = arith.constant 0 : index
    %c0_3 = arith.constant 0 : index
    %3 = vector.load %arg3[%c0, %c0_1, %c0_2, %c0_3] : memref<1x1x10x8xbf16, #tpu.memory_space<vmem>>, vector<1x1x8x8xbf16>
    %4 = vector.shape_cast %3 : vector<1x1x8x8xbf16> to vector<8x8xbf16>
    %c0_4 = arith.constant 0 : index
    %c0_5 = arith.constant 0 : index
    %5 = vector.load %arg9[%c0_4, %c0_5] : memref<8x8xf32, #tpu.memory_space<vmem>>, vector<8x8xf32>
    %c0_6 = arith.constant 0 : index
    %c0_7 = arith.constant 0 : index
    %c0_8 = arith.constant 0 : index
    %c0_9 = arith.constant 0 : index
    %6 = vector.load %arg4[%c0_6, %c0_7, %c0_8, %c0_9] : memref<1x3x8x8xbf16, #tpu.memory_space<vmem>>, vector<1x1x8x8xbf16>
    %7 = vector.shape_cast %6 : vector<1x1x8x8xbf16> to vector<8x8xbf16>
    %cst = arith.constant dense<0.000000e+00> : vector<8x8xf32>
    %8 = tpu.matmul %4, %7, %cst {dimension_numbers = #tpu.dot_dimension_numbers<[1], [0], [0], [1], [0, 0, 1, 1], [], []>} : vector<8x8xbf16>, vector<8x8xbf16>, vector<8x8xf32> -> vector<8x8xf32>
    %9 = arith.addf %5, %8 : vector<8x8xf32>
    %c0_10 = arith.constant 0 : index
    %c0_11 = arith.constant 0 : index
    %10 = vector.load %arg9[%c0_10, %c0_11] : memref<8x8xf32, #tpu.memory_space<vmem>>, vector<8x8xf32>
    tpu.vector_store %arg9[%c0_10, %c0_11], %9 {strides = array<i32>} : memref<8x8xf32, #tpu.memory_space<vmem>>, vector<8x8xf32>,
    %c0_12 = arith.constant 0 : index
    %c0_13 = arith.constant 0 : index
    %c1 = arith.constant 1 : index
    %c0_14 = arith.constant 0 : index
    %11 = vector.load %arg3[%c0_12, %c0_13, %c1, %c0_14] : memref<1x1x10x8xbf16, #tpu.memory_space<vmem>>, vector<1x1x8x8xbf16>
    %12 = vector.shape_cast %11 : vector<1x1x8x8xbf16> to vector<8x8xbf16>
    %c0_15 = arith.constant 0 : index
    %c0_16 = arith.constant 0 : index
    %13 = vector.load %arg9[%c0_15, %c0_16] : memref<8x8xf32, #tpu.memory_space<vmem>>, vector<8x8xf32>
    %c0_17 = arith.constant 0 : index
    %c1_18 = arith.constant 1 : index
    %c0_19 = arith.constant 0 : index
    %c0_20 = arith.constant 0 : index
    %14 = vector.load %arg4[%c0_17, %c1_18, %c0_19, %c0_20] : memref<1x3x8x8xbf16, #tpu.memory_space<vmem>>, vector<1x1x8x8xbf16>
    %15 = vector.shape_cast %14 : vector<1x1x8x8xbf16> to vector<8x8xbf16>
    %cst_21 = arith.constant dense<0.000000e+00> : vector<8x8xf32>
    %16 = tpu.matmul %12, %15, %cst_21 {dimension_numbers = #tpu.dot_dimension_numbers<[1], [0], [0], [1], [0, 0, 1, 1], [], []>} : vector<8x8xbf16>, vector<8x8xbf16>, vector<8x8xf32> -> vector<8x8xf32>
    %17 = arith.addf %13, %16 : vector<8x8xf32>
    %c0_22 = arith.constant 0 : index
    %c0_23 = arith.constant 0 : index
    %18 = vector.load %arg9[%c0_22, %c0_23] : memref<8x8xf32, #tpu.memory_space<vmem>>, vector<8x8xf32>
    tpu.vector_store %arg9[%c0_22, %c0_23], %17 {strides = array<i32>} : memref<8x8xf32, #tpu.memory_space<vmem>>, vector<8x8xf32>,
    %c0_24 = arith.constant 0 : index
    %c0_25 = arith.constant 0 : index
    %c2 = arith.constant 2 : index
    %c0_26 = arith.constant 0 : index
    %19 = vector.load %arg3[%c0_24, %c0_25, %c2, %c0_26] : memref<1x1x10x8xbf16, #tpu.memory_space<vmem>>, vector<1x1x8x8xbf16>
    %20 = vector.shape_cast %19 : vector<1x1x8x8xbf16> to vector<8x8xbf16>
    %c0_27 = arith.constant 0 : index
    %c0_28 = arith.constant 0 : index
    %21 = vector.load %arg9[%c0_27, %c0_28] : memref<8x8xf32, #tpu.memory_space<vmem>>, vector<8x8xf32>
    %c0_29 = arith.constant 0 : index
    %c2_30 = arith.constant 2 : index
    %c0_31 = arith.constant 0 : index
    %c0_32 = arith.constant 0 : index
    %22 = vector.load %arg4[%c0_29, %c2_30, %c0_31, %c0_32] : memref<1x3x8x8xbf16, #tpu.memory_space<vmem>>, vector<1x1x8x8xbf16>
    %23 = vector.shape_cast %22 : vector<1x1x8x8xbf16> to vector<8x8xbf16>
    %cst_33 = arith.constant dense<0.000000e+00> : vector<8x8xf32>
    %24 = tpu.matmul %20, %23, %cst_33 {dimension_numbers = #tpu.dot_dimension_numbers<[1], [0], [0], [1], [0, 0, 1, 1], [], []>} : vector<8x8xbf16>, vector<8x8xbf16>, vector<8x8xf32> -> vector<8x8xf32>
    %25 = arith.addf %21, %24 : vector<8x8xf32>
    %c0_34 = arith.constant 0 : index
    %c0_35 = arith.constant 0 : index
    %26 = vector.load %arg9[%c0_34, %c0_35] : memref<8x8xf32, #tpu.memory_space<vmem>>, vector<8x8xf32>
    tpu.vector_store %arg9[%c0_34, %c0_35], %25 {strides = array<i32>} : memref<8x8xf32, #tpu.memory_space<vmem>>, vector<8x8xf32>,
    %c2_i32 = arith.constant 2 : i32
    %27 = arith.cmpi eq, %arg2, %c2_i32 : i32
    %28 = arith.extui %27 : i1 to i32
    %c0_i32_36 = arith.constant 0 : i32
    %29 = arith.cmpi ne, %28, %c0_i32_36 : i32
    scf.if %29 {
      %c0_37 = arith.constant 0 : index
      %c0_38 = arith.constant 0 : index
      %30 = vector.load %arg9[%c0_37, %c0_38] : memref<8x8xf32, #tpu.memory_space<vmem>>, vector<8x8xf32>
      %c0_39 = arith.constant 0 : index
      %c0_40 = arith.constant 0 : index
      %31 = vector.load %arg5[%c0_39, %c0_40] : memref<1x8xf32, #tpu.memory_space<vmem>>, vector<1x8xf32>
      %32 = vector.broadcast %31 : vector<1x8xf32> to vector<8x8xf32>
      %33 = arith.mulf %30, %32 : vector<8x8xf32>
      %c0_41 = arith.constant 0 : index
      %c0_42 = arith.constant 0 : index
      %34 = vector.load %arg6[%c0_41, %c0_42] : memref<1x8xf32, #tpu.memory_space<vmem>>, vector<1x8xf32>
      %35 = vector.broadcast %34 : vector<1x8xf32> to vector<8x8xf32>
      %36 = arith.addf %33, %35 : vector<8x8xf32>
      %c0_43 = arith.constant 0 : index
      %c0_44 = arith.constant 0 : index
      %c0_45 = arith.constant 0 : index
      %c0_46 = arith.constant 0 : index
      %37 = vector.load %arg7[%c0_43, %c0_44, %c0_45, %c0_46] : memref<1x1x8x8xbf16, #tpu.memory_space<vmem>>, vector<1x1x8x8xbf16>
      %38 = vector.shape_cast %37 : vector<1x1x8x8xbf16> to vector<8x8xbf16>
      %39 = arith.extf %38 : vector<8x8xbf16> to vector<8x8xf32>
      %40 = arith.addf %36, %39 : vector<8x8xf32>
      %cst_47 = arith.constant 0.000000e+00 : f32
      %41 = vector.broadcast %cst_47 : f32 to vector<8x8xf32>
      %42 = arith.maximumf %40, %41 : vector<8x8xf32>
      %43 = arith.truncf %42 : vector<8x8xf32> to vector<8x8xbf16>
      %c0_48 = arith.constant 0 : index
      %c0_49 = arith.constant 0 : index
      %c0_50 = arith.constant 0 : index
      %c0_51 = arith.constant 0 : index
      %44 = vector.load %arg8[%c0_48, %c0_49, %c0_50, %c0_51] : memref<1x1x8x8xbf16, #tpu.memory_space<vmem>>, vector<1x1x8x8xbf16>
      %45 = vector.shape_cast %44 : vector<1x1x8x8xbf16> to vector<8x8xbf16>
      %46 = vector.shape_cast %43 : vector<8x8xbf16> to vector<1x1x8x8xbf16>
      tpu.vector_store %arg8[%c0_48, %c0_49, %c0_50, %c0_51], %46 {strides = array<i32>} : memref<1x1x8x8xbf16, #tpu.memory_space<vmem>>, vector<1x1x8x8xbf16>,
    } else {
    }
    return
  }
  func.func @transform_0(%arg0: i32, %arg1: i32, %arg2: i32) -> (i32, i32, i32, i32) {
    %c1_i32 = arith.constant 1 : i32
    %0 = arith.muli %arg2, %c1_i32 : i32
    %1 = arith.addi %arg1, %0 : i32
    %c0_i32 = arith.constant 0 : i32
    %c0_i32_0 = arith.constant 0 : i32
    %c0_i32_1 = arith.constant 0 : i32
    return %arg0, %1, %c0_i32, %c0_i32_0 : i32, i32, i32, i32
  }
  func.func @transform_1(%arg0: i32, %arg1: i32, %arg2: i32) -> (i32, i32, i32, i32) {
    %c0_i32 = arith.constant 0 : i32
    %c0_i32_0 = arith.constant 0 : i32
    %c0_i32_1 = arith.constant 0 : i32
    %c0_i32_2 = arith.constant 0 : i32
    return %arg2, %c0_i32, %c0_i32_0, %c0_i32_1 : i32, i32, i32, i32
  }
  func.func @transform_2(%arg0: i32, %arg1: i32, %arg2: i32) -> (i32, i32) {
    %c0_i32 = arith.constant 0 : i32
    %c0_i32_0 = arith.constant 0 : i32
    %c0_i32_1 = arith.constant 0 : i32
    return %c0_i32, %c0_i32_0 : i32, i32
  }
  func.func @transform_3(%arg0: i32, %arg1: i32, %arg2: i32) -> (i32, i32) {
    %c0_i32 = arith.constant 0 : i32
    %c0_i32_0 = arith.constant 0 : i32
    %c0_i32_1 = arith.constant 0 : i32
    return %c0_i32, %c0_i32_0 : i32, i32
  }
  func.func @transform_4(%arg0: i32, %arg1: i32, %arg2: i32) -> (i32, i32, i32, i32) {
    %c0_i32 = arith.constant 0 : i32
    %c0_i32_0 = arith.constant 0 : i32
    %c0_i32_1 = arith.constant 0 : i32
    return %arg0, %arg1, %c0_i32, %c0_i32_0 : i32, i32, i32, i32
  }
  func.func @transform_5(%arg0: i32, %arg1: i32, %arg2: i32) -> (i32, i32, i32, i32) {
    %c0_i32 = arith.constant 0 : i32
    %c0_i32_0 = arith.constant 0 : i32
    %c0_i32_1 = arith.constant 0 : i32
    return %arg0, %arg1, %c0_i32, %c0_i32_0 : i32, i32, i32, i32
  }
}

module attributes {stable_mosaic.version = 11 : i64} {
  func.func @_mm_kernel(%arg0: i32, %arg1: memref<32x8xbf16, #tpu.memory_space<vmem>>, %arg2: memref<8x16xbf16, #tpu.memory_space<vmem>>, %arg3: memref<1x16xf32, #tpu.memory_space<vmem>>, %arg4: memref<1x16xf32, #tpu.memory_space<vmem>>, %arg5: memref<32x16xbf16, #tpu.memory_space<vmem>>) attributes {dimension_semantics = [#tpu.dimension_semantics<parallel>], iteration_bounds = array<i64: 1>, scalar_prefetch = 0 : i64, scratch_operands = 0 : i64, tpu.core_type = #tpu.core_type<tc>, window_params = [{transform_indices = @transform_0, window_bounds = array<i64: 32, 8>}, {pipeline_mode = #tpu.pipeline_mode<synchronous>, transform_indices = @transform_1, window_bounds = array<i64: 8, 16>}, {pipeline_mode = #tpu.pipeline_mode<synchronous>, transform_indices = @transform_2, window_bounds = array<i64: 1, 16>}, {pipeline_mode = #tpu.pipeline_mode<synchronous>, transform_indices = @transform_3, window_bounds = array<i64: 1, 16>}, {transform_indices = @transform_4, window_bounds = array<i64: 32, 16>}]} {
    %c0 = arith.constant 0 : index
    %c0_0 = arith.constant 0 : index
    %0 = vector.load %arg1[%c0, %c0_0] : memref<32x8xbf16, #tpu.memory_space<vmem>>, vector<32x8xbf16>
    %c0_1 = arith.constant 0 : index
    %c0_2 = arith.constant 0 : index
    %1 = vector.load %arg2[%c0_1, %c0_2] : memref<8x16xbf16, #tpu.memory_space<vmem>>, vector<8x16xbf16>
    %cst = arith.constant dense<0.000000e+00> : vector<32x16xf32>
    %2 = tpu.matmul %0, %1, %cst {dimension_numbers = #tpu.dot_dimension_numbers<[1], [0], [0], [1], [0, 0, 1, 1], [], []>} : vector<32x8xbf16>, vector<8x16xbf16>, vector<32x16xf32> -> vector<32x16xf32>
    %c0_3 = arith.constant 0 : index
    %c0_4 = arith.constant 0 : index
    %3 = vector.load %arg3[%c0_3, %c0_4] : memref<1x16xf32, #tpu.memory_space<vmem>>, vector<1x16xf32>
    %4 = vector.broadcast %3 : vector<1x16xf32> to vector<32x16xf32>
    %5 = arith.mulf %2, %4 : vector<32x16xf32>
    %c0_5 = arith.constant 0 : index
    %c0_6 = arith.constant 0 : index
    %6 = vector.load %arg4[%c0_5, %c0_6] : memref<1x16xf32, #tpu.memory_space<vmem>>, vector<1x16xf32>
    %7 = vector.broadcast %6 : vector<1x16xf32> to vector<32x16xf32>
    %8 = arith.addf %5, %7 : vector<32x16xf32>
    %9 = arith.truncf %8 : vector<32x16xf32> to vector<32x16xbf16>
    %c0_7 = arith.constant 0 : index
    %c0_8 = arith.constant 0 : index
    %10 = vector.load %arg5[%c0_7, %c0_8] : memref<32x16xbf16, #tpu.memory_space<vmem>>, vector<32x16xbf16>
    tpu.vector_store %arg5[%c0_7, %c0_8], %9 {strides = array<i32>} : memref<32x16xbf16, #tpu.memory_space<vmem>>, vector<32x16xbf16>,
    return
  }
  func.func @transform_0(%arg0: i32) -> (i32, i32) {
    %c0_i32 = arith.constant 0 : i32
    %c0_i32_0 = arith.constant 0 : i32
    return %arg0, %c0_i32 : i32, i32
  }
  func.func @transform_1(%arg0: i32) -> (i32, i32) {
    %c0_i32 = arith.constant 0 : i32
    %c0_i32_0 = arith.constant 0 : i32
    %c0_i32_1 = arith.constant 0 : i32
    return %c0_i32, %c0_i32_0 : i32, i32
  }
  func.func @transform_2(%arg0: i32) -> (i32, i32) {
    %c0_i32 = arith.constant 0 : i32
    %c0_i32_0 = arith.constant 0 : i32
    %c0_i32_1 = arith.constant 0 : i32
    return %c0_i32, %c0_i32_0 : i32, i32
  }
  func.func @transform_3(%arg0: i32) -> (i32, i32) {
    %c0_i32 = arith.constant 0 : i32
    %c0_i32_0 = arith.constant 0 : i32
    %c0_i32_1 = arith.constant 0 : i32
    return %c0_i32, %c0_i32_0 : i32, i32
  }
  func.func @transform_4(%arg0: i32) -> (i32, i32) {
    %c0_i32 = arith.constant 0 : i32
    %c0_i32_0 = arith.constant 0 : i32
    return %arg0, %c0_i32 : i32, i32
  }
}

module attributes {stable_mosaic.version = 11 : i64} {
  func.func @_conv_row_kernel(%arg0: i32, %arg1: i32, %arg2: i32, %arg3: memref<1x1x5x32xbf16, #tpu.memory_space<vmem>>, %arg4: memref<1x2x32x16xbf16, #tpu.memory_space<vmem>>, %arg5: memref<1x16xf32, #tpu.memory_space<vmem>>, %arg6: memref<1x16xf32, #tpu.memory_space<vmem>>, %arg7: memref<1x1x4x16xbf16, #tpu.memory_space<vmem>>, %arg8: memref<4x16xf32, #tpu.memory_space<vmem>>) attributes {dimension_semantics = [#tpu.dimension_semantics<parallel>, #tpu.dimension_semantics<parallel>, #tpu.dimension_semantics<arbitrary>], iteration_bounds = array<i64: 2, 4, 2>, scalar_prefetch = 0 : i64, scratch_operands = 1 : i64, tpu.core_type = #tpu.core_type<tc>, window_params = [{transform_indices = @transform_0, window_bounds = array<i64: 1, 1, 5, 32>}, {transform_indices = @transform_1, window_bounds = array<i64: 1, 2, 32, 16>}, {pipeline_mode = #tpu.pipeline_mode<synchronous>, transform_indices = @transform_2, window_bounds = array<i64: 1, 16>}, {pipeline_mode = #tpu.pipeline_mode<synchronous>, transform_indices = @transform_3, window_bounds = array<i64: 1, 16>}, {transform_indices = @transform_4, window_bounds = array<i64: 1, 1, 4, 16>}]} {
    %c0_i32 = arith.constant 0 : i32
    %0 = arith.cmpi eq, %arg2, %c0_i32 : i32
    %1 = arith.extui %0 : i1 to i32
    %c0_i32_0 = arith.constant 0 : i32
    %2 = arith.cmpi ne, %1, %c0_i32_0 : i32
    scf.if %2 {
      %cst_25 = arith.constant 0.000000e+00 : f32
      %22 = vector.broadcast %cst_25 : f32 to vector<4x16xf32>
      %c0_26 = arith.constant 0 : index
      %c0_27 = arith.constant 0 : index
      %23 = vector.load %arg8[%c0_26, %c0_27] : memref<4x16xf32, #tpu.memory_space<vmem>>, vector<4x16xf32>
      tpu.vector_store %arg8[%c0_26, %c0_27], %22 {strides = array<i32>} : memref<4x16xf32, #tpu.memory_space<vmem>>, vector<4x16xf32>,
    } else {
    }
    %c0 = arith.constant 0 : index
    %c0_1 = arith.constant 0 : index
    %c0_2 = arith.constant 0 : index
    %c0_3 = arith.constant 0 : index
    %3 = vector.load %arg3[%c0, %c0_1, %c0_2, %c0_3] : memref<1x1x5x32xbf16, #tpu.memory_space<vmem>>, vector<1x1x4x32xbf16>
    %4 = vector.shape_cast %3 : vector<1x1x4x32xbf16> to vector<4x32xbf16>
    %c0_4 = arith.constant 0 : index
    %c0_5 = arith.constant 0 : index
    %5 = vector.load %arg8[%c0_4, %c0_5] : memref<4x16xf32, #tpu.memory_space<vmem>>, vector<4x16xf32>
    %c0_6 = arith.constant 0 : index
    %c0_7 = arith.constant 0 : index
    %c0_8 = arith.constant 0 : index
    %c0_9 = arith.constant 0 : index
    %6 = vector.load %arg4[%c0_6, %c0_7, %c0_8, %c0_9] : memref<1x2x32x16xbf16, #tpu.memory_space<vmem>>, vector<1x1x32x16xbf16>
    %7 = vector.shape_cast %6 : vector<1x1x32x16xbf16> to vector<32x16xbf16>
    %cst = arith.constant dense<0.000000e+00> : vector<4x16xf32>
    %8 = tpu.matmul %4, %7, %cst {dimension_numbers = #tpu.dot_dimension_numbers<[1], [0], [0], [1], [0, 0, 1, 1], [], []>} : vector<4x32xbf16>, vector<32x16xbf16>, vector<4x16xf32> -> vector<4x16xf32>
    %9 = arith.addf %5, %8 : vector<4x16xf32>
    %c0_10 = arith.constant 0 : index
    %c0_11 = arith.constant 0 : index
    %10 = vector.load %arg8[%c0_10, %c0_11] : memref<4x16xf32, #tpu.memory_space<vmem>>, vector<4x16xf32>
    tpu.vector_store %arg8[%c0_10, %c0_11], %9 {strides = array<i32>} : memref<4x16xf32, #tpu.memory_space<vmem>>, vector<4x16xf32>,
    %c0_12 = arith.constant 0 : index
    %c0_13 = arith.constant 0 : index
    %c1 = arith.constant 1 : index
    %c0_14 = arith.constant 0 : index
    %11 = vector.load %arg3[%c0_12, %c0_13, %c1, %c0_14] : memref<1x1x5x32xbf16, #tpu.memory_space<vmem>>, vector<1x1x4x32xbf16>
    %12 = vector.shape_cast %11 : vector<1x1x4x32xbf16> to vector<4x32xbf16>
    %c0_15 = arith.constant 0 : index
    %c0_16 = arith.constant 0 : index
    %13 = vector.load %arg8[%c0_15, %c0_16] : memref<4x16xf32, #tpu.memory_space<vmem>>, vector<4x16xf32>
    %c0_17 = arith.constant 0 : index
    %c1_18 = arith.constant 1 : index
    %c0_19 = arith.constant 0 : index
    %c0_20 = arith.constant 0 : index
    %14 = vector.load %arg4[%c0_17, %c1_18, %c0_19, %c0_20] : memref<1x2x32x16xbf16, #tpu.memory_space<vmem>>, vector<1x1x32x16xbf16>
    %15 = vector.shape_cast %14 : vector<1x1x32x16xbf16> to vector<32x16xbf16>
    %cst_21 = arith.constant dense<0.000000e+00> : vector<4x16xf32>
    %16 = tpu.matmul %12, %15, %cst_21 {dimension_numbers = #tpu.dot_dimension_numbers<[1], [0], [0], [1], [0, 0, 1, 1], [], []>} : vector<4x32xbf16>, vector<32x16xbf16>, vector<4x16xf32> -> vector<4x16xf32>
    %17 = arith.addf %13, %16 : vector<4x16xf32>
    %c0_22 = arith.constant 0 : index
    %c0_23 = arith.constant 0 : index
    %18 = vector.load %arg8[%c0_22, %c0_23] : memref<4x16xf32, #tpu.memory_space<vmem>>, vector<4x16xf32>
    tpu.vector_store %arg8[%c0_22, %c0_23], %17 {strides = array<i32>} : memref<4x16xf32, #tpu.memory_space<vmem>>, vector<4x16xf32>,
    %c1_i32 = arith.constant 1 : i32
    %19 = arith.cmpi eq, %arg2, %c1_i32 : i32
    %20 = arith.extui %19 : i1 to i32
    %c0_i32_24 = arith.constant 0 : i32
    %21 = arith.cmpi ne, %20, %c0_i32_24 : i32
    scf.if %21 {
      %c0_25 = arith.constant 0 : index
      %c0_26 = arith.constant 0 : index
      %22 = vector.load %arg8[%c0_25, %c0_26] : memref<4x16xf32, #tpu.memory_space<vmem>>, vector<4x16xf32>
      %c0_27 = arith.constant 0 : index
      %c0_28 = arith.constant 0 : index
      %23 = vector.load %arg5[%c0_27, %c0_28] : memref<1x16xf32, #tpu.memory_space<vmem>>, vector<1x16xf32>
      %24 = vector.broadcast %23 : vector<1x16xf32> to vector<4x16xf32>
      %25 = arith.mulf %22, %24 : vector<4x16xf32>
      %c0_29 = arith.constant 0 : index
      %c0_30 = arith.constant 0 : index
      %26 = vector.load %arg6[%c0_29, %c0_30] : memref<1x16xf32, #tpu.memory_space<vmem>>, vector<1x16xf32>
      %27 = vector.broadcast %26 : vector<1x16xf32> to vector<4x16xf32>
      %28 = arith.addf %25, %27 : vector<4x16xf32>
      %cst_31 = arith.constant 0.000000e+00 : f32
      %29 = vector.broadcast %cst_31 : f32 to vector<4x16xf32>
      %30 = arith.maximumf %28, %29 : vector<4x16xf32>
      %31 = arith.truncf %30 : vector<4x16xf32> to vector<4x16xbf16>
      %c0_32 = arith.constant 0 : index
      %c0_33 = arith.constant 0 : index
      %c0_34 = arith.constant 0 : index
      %c0_35 = arith.constant 0 : index
      %32 = vector.load %arg7[%c0_32, %c0_33, %c0_34, %c0_35] : memref<1x1x4x16xbf16, #tpu.memory_space<vmem>>, vector<1x1x4x16xbf16>
      %33 = vector.shape_cast %32 : vector<1x1x4x16xbf16> to vector<4x16xbf16>
      %34 = vector.shape_cast %31 : vector<4x16xbf16> to vector<1x1x4x16xbf16>
      tpu.vector_store %arg7[%c0_32, %c0_33, %c0_34, %c0_35], %34 {strides = array<i32>} : memref<1x1x4x16xbf16, #tpu.memory_space<vmem>>, vector<1x1x4x16xbf16>,
    } else {
    }
    return
  }
  func.func @transform_0(%arg0: i32, %arg1: i32, %arg2: i32) -> (i32, i32, i32, i32) {
    %c1_i32 = arith.constant 1 : i32
    %0 = arith.muli %arg2, %c1_i32 : i32
    %1 = arith.addi %arg1, %0 : i32
    %c0_i32 = arith.constant 0 : i32
    %c0_i32_0 = arith.constant 0 : i32
    %c0_i32_1 = arith.constant 0 : i32
    return %arg0, %1, %c0_i32, %c0_i32_0 : i32, i32, i32, i32
  }
  func.func @transform_1(%arg0: i32, %arg1: i32, %arg2: i32) -> (i32, i32, i32, i32) {
    %c0_i32 = arith.constant 0 : i32
    %c0_i32_0 = arith.constant 0 : i32
    %c0_i32_1 = arith.constant 0 : i32
    %c0_i32_2 = arith.constant 0 : i32
    return %arg2, %c0_i32, %c0_i32_0, %c0_i32_1 : i32, i32, i32, i32
  }
  func.func @transform_2(%arg0: i32, %arg1: i32, %arg2: i32) -> (i32, i32) {
    %c0_i32 = arith.constant 0 : i32
    %c0_i32_0 = arith.constant 0 : i32
    %c0_i32_1 = arith.constant 0 : i32
    return %c0_i32, %c0_i32_0 : i32, i32
  }
  func.func @transform_3(%arg0: i32, %arg1: i32, %arg2: i32) -> (i32, i32) {
    %c0_i32 = arith.constant 0 : i32
    %c0_i32_0 = arith.constant 0 : i32
    %c0_i32_1 = arith.constant 0 : i32
    return %c0_i32, %c0_i32_0 : i32, i32
  }
  func.func @transform_4(%arg0: i32, %arg1: i32, %arg2: i32) -> (i32, i32, i32, i32) {
    %c0_i32 = arith.constant 0 : i32
    %c0_i32_0 = arith.constant 0 : i32
    %c0_i32_1 = arith.constant 0 : i32
    return %arg0, %arg1, %c0_i32, %c0_i32_0 : i32, i32, i32, i32
  }
}

module attributes {stable_mosaic.version = 11 : i64} {
  func.func @_conv_row_res_kernel(%arg0: i32, %arg1: i32, %arg2: i32, %arg3: memref<1x1x6x16xbf16, #tpu.memory_space<vmem>>, %arg4: memref<1x3x16x16xbf16, #tpu.memory_space<vmem>>, %arg5: memref<1x16xf32, #tpu.memory_space<vmem>>, %arg6: memref<1x16xf32, #tpu.memory_space<vmem>>, %arg7: memref<1x1x4x16xbf16, #tpu.memory_space<vmem>>, %arg8: memref<1x1x4x16xbf16, #tpu.memory_space<vmem>>, %arg9: memref<4x16xf32, #tpu.memory_space<vmem>>) attributes {dimension_semantics = [#tpu.dimension_semantics<parallel>, #tpu.dimension_semantics<parallel>, #tpu.dimension_semantics<arbitrary>], iteration_bounds = array<i64: 2, 4, 3>, scalar_prefetch = 0 : i64, scratch_operands = 1 : i64, tpu.core_type = #tpu.core_type<tc>, window_params = [{transform_indices = @transform_0, window_bounds = array<i64: 1, 1, 6, 16>}, {transform_indices = @transform_1, window_bounds = array<i64: 1, 3, 16, 16>}, {pipeline_mode = #tpu.pipeline_mode<synchronous>, transform_indices = @transform_2, window_bounds = array<i64: 1, 16>}, {pipeline_mode = #tpu.pipeline_mode<synchronous>, transform_indices = @transform_3, window_bounds = array<i64: 1, 16>}, {transform_indices = @transform_4, window_bounds = array<i64: 1, 1, 4, 16>}, {transform_indices = @transform_5, window_bounds = array<i64: 1, 1, 4, 16>}]} {
    %c0_i32 = arith.constant 0 : i32
    %0 = arith.cmpi eq, %arg2, %c0_i32 : i32
    %1 = arith.extui %0 : i1 to i32
    %c0_i32_0 = arith.constant 0 : i32
    %2 = arith.cmpi ne, %1, %c0_i32_0 : i32
    scf.if %2 {
      %cst_37 = arith.constant 0.000000e+00 : f32
      %30 = vector.broadcast %cst_37 : f32 to vector<4x16xf32>
      %c0_38 = arith.constant 0 : index
      %c0_39 = arith.constant 0 : index
      %31 = vector.load %arg9[%c0_38, %c0_39] : memref<4x16xf32, #tpu.memory_space<vmem>>, vector<4x16xf32>
      tpu.vector_store %arg9[%c0_38, %c0_39], %30 {strides = array<i32>} : memref<4x16xf32, #tpu.memory_space<vmem>>, vector<4x16xf32>,
    } else {
    }
    %c0 = arith.constant 0 : index
    %c0_1 = arith.constant 0 : index
    %c0_2 = arith.constant 0 : index
    %c0_3 = arith.constant 0 : index
    %3 = vector.load %arg3[%c0, %c0_1, %c0_2, %c0_3] : memref<1x1x6x16xbf16, #tpu.memory_space<vmem>>, vector<1x1x4x16xbf16>
    %4 = vector.shape_cast %3 : vector<1x1x4x16xbf16> to vector<4x16xbf16>
    %c0_4 = arith.constant 0 : index
    %c0_5 = arith.constant 0 : index
    %5 = vector.load %arg9[%c0_4, %c0_5] : memref<4x16xf32, #tpu.memory_space<vmem>>, vector<4x16xf32>
    %c0_6 = arith.constant 0 : index
    %c0_7 = arith.constant 0 : index
    %c0_8 = arith.constant 0 : index
    %c0_9 = arith.constant 0 : index
    %6 = vector.load %arg4[%c0_6, %c0_7, %c0_8, %c0_9] : memref<1x3x16x16xbf16, #tpu.memory_space<vmem>>, vector<1x1x16x16xbf16>
    %7 = vector.shape_cast %6 : vector<1x1x16x16xbf16> to vector<16x16xbf16>
    %cst = arith.constant dense<0.000000e+00> : vector<4x16xf32>
    %8 = tpu.matmul %4, %7, %cst {dimension_numbers = #tpu.dot_dimension_numbers<[1], [0], [0], [1], [0, 0, 1, 1], [], []>} : vector<4x16xbf16>, vector<16x16xbf16>, vector<4x16xf32> -> vector<4x16xf32>
    %9 = arith.addf %5, %8 : vector<4x16xf32>
    %c0_10 = arith.constant 0 : index
    %c0_11 = arith.constant 0 : index
    %10 = vector.load %arg9[%c0_10, %c0_11] : memref<4x16xf32, #tpu.memory_space<vmem>>, vector<4x16xf32>
    tpu.vector_store %arg9[%c0_10, %c0_11], %9 {strides = array<i32>} : memref<4x16xf32, #tpu.memory_space<vmem>>, vector<4x16xf32>,
    %c0_12 = arith.constant 0 : index
    %c0_13 = arith.constant 0 : index
    %c1 = arith.constant 1 : index
    %c0_14 = arith.constant 0 : index
    %11 = vector.load %arg3[%c0_12, %c0_13, %c1, %c0_14] : memref<1x1x6x16xbf16, #tpu.memory_space<vmem>>, vector<1x1x4x16xbf16>
    %12 = vector.shape_cast %11 : vector<1x1x4x16xbf16> to vector<4x16xbf16>
    %c0_15 = arith.constant 0 : index
    %c0_16 = arith.constant 0 : index
    %13 = vector.load %arg9[%c0_15, %c0_16] : memref<4x16xf32, #tpu.memory_space<vmem>>, vector<4x16xf32>
    %c0_17 = arith.constant 0 : index
    %c1_18 = arith.constant 1 : index
    %c0_19 = arith.constant 0 : index
    %c0_20 = arith.constant 0 : index
    %14 = vector.load %arg4[%c0_17, %c1_18, %c0_19, %c0_20] : memref<1x3x16x16xbf16, #tpu.memory_space<vmem>>, vector<1x1x16x16xbf16>
    %15 = vector.shape_cast %14 : vector<1x1x16x16xbf16> to vector<16x16xbf16>
    %cst_21 = arith.constant dense<0.000000e+00> : vector<4x16xf32>
    %16 = tpu.matmul %12, %15, %cst_21 {dimension_numbers = #tpu.dot_dimension_numbers<[1], [0], [0], [1], [0, 0, 1, 1], [], []>} : vector<4x16xbf16>, vector<16x16xbf16>, vector<4x16xf32> -> vector<4x16xf32>
    %17 = arith.addf %13, %16 : vector<4x16xf32>
    %c0_22 = arith.constant 0 : index
    %c0_23 = arith.constant 0 : index
    %18 = vector.load %arg9[%c0_22, %c0_23] : memref<4x16xf32, #tpu.memory_space<vmem>>, vector<4x16xf32>
    tpu.vector_store %arg9[%c0_22, %c0_23], %17 {strides = array<i32>} : memref<4x16xf32, #tpu.memory_space<vmem>>, vector<4x16xf32>,
    %c0_24 = arith.constant 0 : index
    %c0_25 = arith.constant 0 : index
    %c2 = arith.constant 2 : index
    %c0_26 = arith.constant 0 : index
    %19 = vector.load %arg3[%c0_24, %c0_25, %c2, %c0_26] : memref<1x1x6x16xbf16, #tpu.memory_space<vmem>>, vector<1x1x4x16xbf16>
    %20 = vector.shape_cast %19 : vector<1x1x4x16xbf16> to vector<4x16xbf16>
    %c0_27 = arith.constant 0 : index
    %c0_28 = arith.constant 0 : index
    %21 = vector.load %arg9[%c0_27, %c0_28] : memref<4x16xf32, #tpu.memory_space<vmem>>, vector<4x16xf32>
    %c0_29 = arith.constant 0 : index
    %c2_30 = arith.constant 2 : index
    %c0_31 = arith.constant 0 : index
    %c0_32 = arith.constant 0 : index
    %22 = vector.load %arg4[%c0_29, %c2_30, %c0_31, %c0_32] : memref<1x3x16x16xbf16, #tpu.memory_space<vmem>>, vector<1x1x16x16xbf16>
    %23 = vector.shape_cast %22 : vector<1x1x16x16xbf16> to vector<16x16xbf16>
    %cst_33 = arith.constant dense<0.000000e+00> : vector<4x16xf32>
    %24 = tpu.matmul %20, %23, %cst_33 {dimension_numbers = #tpu.dot_dimension_numbers<[1], [0], [0], [1], [0, 0, 1, 1], [], []>} : vector<4x16xbf16>, vector<16x16xbf16>, vector<4x16xf32> -> vector<4x16xf32>
    %25 = arith.addf %21, %24 : vector<4x16xf32>
    %c0_34 = arith.constant 0 : index
    %c0_35 = arith.constant 0 : index
    %26 = vector.load %arg9[%c0_34, %c0_35] : memref<4x16xf32, #tpu.memory_space<vmem>>, vector<4x16xf32>
    tpu.vector_store %arg9[%c0_34, %c0_35], %25 {strides = array<i32>} : memref<4x16xf32, #tpu.memory_space<vmem>>, vector<4x16xf32>,
    %c2_i32 = arith.constant 2 : i32
    %27 = arith.cmpi eq, %arg2, %c2_i32 : i32
    %28 = arith.extui %27 : i1 to i32
    %c0_i32_36 = arith.constant 0 : i32
    %29 = arith.cmpi ne, %28, %c0_i32_36 : i32
    scf.if %29 {
      %c0_37 = arith.constant 0 : index
      %c0_38 = arith.constant 0 : index
      %30 = vector.load %arg9[%c0_37, %c0_38] : memref<4x16xf32, #tpu.memory_space<vmem>>, vector<4x16xf32>
      %c0_39 = arith.constant 0 : index
      %c0_40 = arith.constant 0 : index
      %31 = vector.load %arg5[%c0_39, %c0_40] : memref<1x16xf32, #tpu.memory_space<vmem>>, vector<1x16xf32>
      %32 = vector.broadcast %31 : vector<1x16xf32> to vector<4x16xf32>
      %33 = arith.mulf %30, %32 : vector<4x16xf32>
      %c0_41 = arith.constant 0 : index
      %c0_42 = arith.constant 0 : index
      %34 = vector.load %arg6[%c0_41, %c0_42] : memref<1x16xf32, #tpu.memory_space<vmem>>, vector<1x16xf32>
      %35 = vector.broadcast %34 : vector<1x16xf32> to vector<4x16xf32>
      %36 = arith.addf %33, %35 : vector<4x16xf32>
      %c0_43 = arith.constant 0 : index
      %c0_44 = arith.constant 0 : index
      %c0_45 = arith.constant 0 : index
      %c0_46 = arith.constant 0 : index
      %37 = vector.load %arg7[%c0_43, %c0_44, %c0_45, %c0_46] : memref<1x1x4x16xbf16, #tpu.memory_space<vmem>>, vector<1x1x4x16xbf16>
      %38 = vector.shape_cast %37 : vector<1x1x4x16xbf16> to vector<4x16xbf16>
      %39 = arith.extf %38 : vector<4x16xbf16> to vector<4x16xf32>
      %40 = arith.addf %36, %39 : vector<4x16xf32>
      %cst_47 = arith.constant 0.000000e+00 : f32
      %41 = vector.broadcast %cst_47 : f32 to vector<4x16xf32>
      %42 = arith.maximumf %40, %41 : vector<4x16xf32>
      %43 = arith.truncf %42 : vector<4x16xf32> to vector<4x16xbf16>
      %c0_48 = arith.constant 0 : index
      %c0_49 = arith.constant 0 : index
      %c0_50 = arith.constant 0 : index
      %c0_51 = arith.constant 0 : index
      %44 = vector.load %arg8[%c0_48, %c0_49, %c0_50, %c0_51] : memref<1x1x4x16xbf16, #tpu.memory_space<vmem>>, vector<1x1x4x16xbf16>
      %45 = vector.shape_cast %44 : vector<1x1x4x16xbf16> to vector<4x16xbf16>
      %46 = vector.shape_cast %43 : vector<4x16xbf16> to vector<1x1x4x16xbf16>
      tpu.vector_store %arg8[%c0_48, %c0_49, %c0_50, %c0_51], %46 {strides = array<i32>} : memref<1x1x4x16xbf16, #tpu.memory_space<vmem>>, vector<1x1x4x16xbf16>,
    } else {
    }
    return
  }
  func.func @transform_0(%arg0: i32, %arg1: i32, %arg2: i32) -> (i32, i32, i32, i32) {
    %c1_i32 = arith.constant 1 : i32
    %0 = arith.muli %arg2, %c1_i32 : i32
    %1 = arith.addi %arg1, %0 : i32
    %c0_i32 = arith.constant 0 : i32
    %c0_i32_0 = arith.constant 0 : i32
    %c0_i32_1 = arith.constant 0 : i32
    return %arg0, %1, %c0_i32, %c0_i32_0 : i32, i32, i32, i32
  }
  func.func @transform_1(%arg0: i32, %arg1: i32, %arg2: i32) -> (i32, i32, i32, i32) {
    %c0_i32 = arith.constant 0 : i32
    %c0_i32_0 = arith.constant 0 : i32
    %c0_i32_1 = arith.constant 0 : i32
    %c0_i32_2 = arith.constant 0 : i32
    return %arg2, %c0_i32, %c0_i32_0, %c0_i32_1 : i32, i32, i32, i32
  }
  func.func @transform_2(%arg0: i32, %arg1: i32, %arg2: i32) -> (i32, i32) {
    %c0_i32 = arith.constant 0 : i32
    %c0_i32_0 = arith.constant 0 : i32
    %c0_i32_1 = arith.constant 0 : i32
    return %c0_i32, %c0_i32_0 : i32, i32
  }
  func.func @transform_3(%arg0: i32, %arg1: i32, %arg2: i32) -> (i32, i32) {
    %c0_i32 = arith.constant 0 : i32
    %c0_i32_0 = arith.constant 0 : i32
    %c0_i32_1 = arith.constant 0 : i32
    return %c0_i32, %c0_i32_0 : i32, i32
  }
  func.func @transform_4(%arg0: i32, %arg1: i32, %arg2: i32) -> (i32, i32, i32, i32) {
    %c0_i32 = arith.constant 0 : i32
    %c0_i32_0 = arith.constant 0 : i32
    %c0_i32_1 = arith.constant 0 : i32
    return %arg0, %arg1, %c0_i32, %c0_i32_0 : i32, i32, i32, i32
  }
  func.func @transform_5(%arg0: i32, %arg1: i32, %arg2: i32) -> (i32, i32, i32, i32) {
    %c0_i32 = arith.constant 0 : i32
    %c0_i32_0 = arith.constant 0 : i32
    %c0_i32_1 = arith.constant 0 : i32
    return %arg0, %arg1, %c0_i32, %c0_i32_0 : i32, i32, i32, i32
  }
}

module attributes {stable_mosaic.version = 11 : i64} {
  func.func @_conv_row_kernel(%arg0: i32, %arg1: i32, %arg2: i32, %arg3: memref<1x1x4x16xbf16, #tpu.memory_space<vmem>>, %arg4: memref<1x3x16x32xbf16, #tpu.memory_space<vmem>>, %arg5: memref<1x32xf32, #tpu.memory_space<vmem>>, %arg6: memref<1x32xf32, #tpu.memory_space<vmem>>, %arg7: memref<1x1x2x32xbf16, #tpu.memory_space<vmem>>, %arg8: memref<2x32xf32, #tpu.memory_space<vmem>>) attributes {dimension_semantics = [#tpu.dimension_semantics<parallel>, #tpu.dimension_semantics<parallel>, #tpu.dimension_semantics<arbitrary>], iteration_bounds = array<i64: 2, 2, 3>, scalar_prefetch = 0 : i64, scratch_operands = 1 : i64, tpu.core_type = #tpu.core_type<tc>, window_params = [{transform_indices = @transform_0, window_bounds = array<i64: 1, 1, 4, 16>}, {transform_indices = @transform_1, window_bounds = array<i64: 1, 3, 16, 32>}, {pipeline_mode = #tpu.pipeline_mode<synchronous>, transform_indices = @transform_2, window_bounds = array<i64: 1, 32>}, {pipeline_mode = #tpu.pipeline_mode<synchronous>, transform_indices = @transform_3, window_bounds = array<i64: 1, 32>}, {transform_indices = @transform_4, window_bounds = array<i64: 1, 1, 2, 32>}]} {
    %c0_i32 = arith.constant 0 : i32
    %0 = arith.cmpi eq, %arg2, %c0_i32 : i32
    %1 = arith.extui %0 : i1 to i32
    %c0_i32_0 = arith.constant 0 : i32
    %2 = arith.cmpi ne, %1, %c0_i32_0 : i32
    scf.if %2 {
      %cst_37 = arith.constant 0.000000e+00 : f32
      %30 = vector.broadcast %cst_37 : f32 to vector<2x32xf32>
      %c0_38 = arith.constant 0 : index
      %c0_39 = arith.constant 0 : index
      %31 = vector.load %arg8[%c0_38, %c0_39] : memref<2x32xf32, #tpu.memory_space<vmem>>, vector<2x32xf32>
      tpu.vector_store %arg8[%c0_38, %c0_39], %30 {strides = array<i32>} : memref<2x32xf32, #tpu.memory_space<vmem>>, vector<2x32xf32>,
    } else {
    }
    %c0 = arith.constant 0 : index
    %c0_1 = arith.constant 0 : index
    %c0_2 = arith.constant 0 : index
    %c0_3 = arith.constant 0 : index
    %3 = vector.load %arg3[%c0, %c0_1, %c0_2, %c0_3] : memref<1x1x4x16xbf16, #tpu.memory_space<vmem>>, vector<1x1x2x16xbf16>
    %4 = vector.shape_cast %3 : vector<1x1x2x16xbf16> to vector<2x16xbf16>
    %c0_4 = arith.constant 0 : index
    %c0_5 = arith.constant 0 : index
    %5 = vector.load %arg8[%c0_4, %c0_5] : memref<2x32xf32, #tpu.memory_space<vmem>>, vector<2x32xf32>
    %c0_6 = arith.constant 0 : index
    %c0_7 = arith.constant 0 : index
    %c0_8 = arith.constant 0 : index
    %c0_9 = arith.constant 0 : index
    %6 = vector.load %arg4[%c0_6, %c0_7, %c0_8, %c0_9] : memref<1x3x16x32xbf16, #tpu.memory_space<vmem>>, vector<1x1x16x32xbf16>
    %7 = vector.shape_cast %6 : vector<1x1x16x32xbf16> to vector<16x32xbf16>
    %cst = arith.constant dense<0.000000e+00> : vector<2x32xf32>
    %8 = tpu.matmul %4, %7, %cst {dimension_numbers = #tpu.dot_dimension_numbers<[1], [0], [0], [1], [0, 0, 1, 1], [], []>} : vector<2x16xbf16>, vector<16x32xbf16>, vector<2x32xf32> -> vector<2x32xf32>
    %9 = arith.addf %5, %8 : vector<2x32xf32>
    %c0_10 = arith.constant 0 : index
    %c0_11 = arith.constant 0 : index
    %10 = vector.load %arg8[%c0_10, %c0_11] : memref<2x32xf32, #tpu.memory_space<vmem>>, vector<2x32xf32>
    tpu.vector_store %arg8[%c0_10, %c0_11], %9 {strides = array<i32>} : memref<2x32xf32, #tpu.memory_space<vmem>>, vector<2x32xf32>,
    %c0_12 = arith.constant 0 : index
    %c0_13 = arith.constant 0 : index
    %c1 = arith.constant 1 : index
    %c0_14 = arith.constant 0 : index
    %11 = vector.load %arg3[%c0_12, %c0_13, %c1, %c0_14] : memref<1x1x4x16xbf16, #tpu.memory_space<vmem>>, vector<1x1x2x16xbf16>
    %12 = vector.shape_cast %11 : vector<1x1x2x16xbf16> to vector<2x16xbf16>
    %c0_15 = arith.constant 0 : index
    %c0_16 = arith.constant 0 : index
    %13 = vector.load %arg8[%c0_15, %c0_16] : memref<2x32xf32, #tpu.memory_space<vmem>>, vector<2x32xf32>
    %c0_17 = arith.constant 0 : index
    %c1_18 = arith.constant 1 : index
    %c0_19 = arith.constant 0 : index
    %c0_20 = arith.constant 0 : index
    %14 = vector.load %arg4[%c0_17, %c1_18, %c0_19, %c0_20] : memref<1x3x16x32xbf16, #tpu.memory_space<vmem>>, vector<1x1x16x32xbf16>
    %15 = vector.shape_cast %14 : vector<1x1x16x32xbf16> to vector<16x32xbf16>
    %cst_21 = arith.constant dense<0.000000e+00> : vector<2x32xf32>
    %16 = tpu.matmul %12, %15, %cst_21 {dimension_numbers = #tpu.dot_dimension_numbers<[1], [0], [0], [1], [0, 0, 1, 1], [], []>} : vector<2x16xbf16>, vector<16x32xbf16>, vector<2x32xf32> -> vector<2x32xf32>
    %17 = arith.addf %13, %16 : vector<2x32xf32>
    %c0_22 = arith.constant 0 : index
    %c0_23 = arith.constant 0 : index
    %18 = vector.load %arg8[%c0_22, %c0_23] : memref<2x32xf32, #tpu.memory_space<vmem>>, vector<2x32xf32>
    tpu.vector_store %arg8[%c0_22, %c0_23], %17 {strides = array<i32>} : memref<2x32xf32, #tpu.memory_space<vmem>>, vector<2x32xf32>,
    %c0_24 = arith.constant 0 : index
    %c0_25 = arith.constant 0 : index
    %c2 = arith.constant 2 : index
    %c0_26 = arith.constant 0 : index
    %19 = vector.load %arg3[%c0_24, %c0_25, %c2, %c0_26] : memref<1x1x4x16xbf16, #tpu.memory_space<vmem>>, vector<1x1x2x16xbf16>
    %20 = vector.shape_cast %19 : vector<1x1x2x16xbf16> to vector<2x16xbf16>
    %c0_27 = arith.constant 0 : index
    %c0_28 = arith.constant 0 : index
    %21 = vector.load %arg8[%c0_27, %c0_28] : memref<2x32xf32, #tpu.memory_space<vmem>>, vector<2x32xf32>
    %c0_29 = arith.constant 0 : index
    %c2_30 = arith.constant 2 : index
    %c0_31 = arith.constant 0 : index
    %c0_32 = arith.constant 0 : index
    %22 = vector.load %arg4[%c0_29, %c2_30, %c0_31, %c0_32] : memref<1x3x16x32xbf16, #tpu.memory_space<vmem>>, vector<1x1x16x32xbf16>
    %23 = vector.shape_cast %22 : vector<1x1x16x32xbf16> to vector<16x32xbf16>
    %cst_33 = arith.constant dense<0.000000e+00> : vector<2x32xf32>
    %24 = tpu.matmul %20, %23, %cst_33 {dimension_numbers = #tpu.dot_dimension_numbers<[1], [0], [0], [1], [0, 0, 1, 1], [], []>} : vector<2x16xbf16>, vector<16x32xbf16>, vector<2x32xf32> -> vector<2x32xf32>
    %25 = arith.addf %21, %24 : vector<2x32xf32>
    %c0_34 = arith.constant 0 : index
    %c0_35 = arith.constant 0 : index
    %26 = vector.load %arg8[%c0_34, %c0_35] : memref<2x32xf32, #tpu.memory_space<vmem>>, vector<2x32xf32>
    tpu.vector_store %arg8[%c0_34, %c0_35], %25 {strides = array<i32>} : memref<2x32xf32, #tpu.memory_space<vmem>>, vector<2x32xf32>,
    %c2_i32 = arith.constant 2 : i32
    %27 = arith.cmpi eq, %arg2, %c2_i32 : i32
    %28 = arith.extui %27 : i1 to i32
    %c0_i32_36 = arith.constant 0 : i32
    %29 = arith.cmpi ne, %28, %c0_i32_36 : i32
    scf.if %29 {
      %c0_37 = arith.constant 0 : index
      %c0_38 = arith.constant 0 : index
      %30 = vector.load %arg8[%c0_37, %c0_38] : memref<2x32xf32, #tpu.memory_space<vmem>>, vector<2x32xf32>
      %c0_39 = arith.constant 0 : index
      %c0_40 = arith.constant 0 : index
      %31 = vector.load %arg5[%c0_39, %c0_40] : memref<1x32xf32, #tpu.memory_space<vmem>>, vector<1x32xf32>
      %32 = vector.broadcast %31 : vector<1x32xf32> to vector<2x32xf32>
      %33 = arith.mulf %30, %32 : vector<2x32xf32>
      %c0_41 = arith.constant 0 : index
      %c0_42 = arith.constant 0 : index
      %34 = vector.load %arg6[%c0_41, %c0_42] : memref<1x32xf32, #tpu.memory_space<vmem>>, vector<1x32xf32>
      %35 = vector.broadcast %34 : vector<1x32xf32> to vector<2x32xf32>
      %36 = arith.addf %33, %35 : vector<2x32xf32>
      %cst_43 = arith.constant 0.000000e+00 : f32
      %37 = vector.broadcast %cst_43 : f32 to vector<2x32xf32>
      %38 = arith.maximumf %36, %37 : vector<2x32xf32>
      %39 = arith.truncf %38 : vector<2x32xf32> to vector<2x32xbf16>
      %c0_44 = arith.constant 0 : index
      %c0_45 = arith.constant 0 : index
      %c0_46 = arith.constant 0 : index
      %c0_47 = arith.constant 0 : index
      %40 = vector.load %arg7[%c0_44, %c0_45, %c0_46, %c0_47] : memref<1x1x2x32xbf16, #tpu.memory_space<vmem>>, vector<1x1x2x32xbf16>
      %41 = vector.shape_cast %40 : vector<1x1x2x32xbf16> to vector<2x32xbf16>
      %42 = vector.shape_cast %39 : vector<2x32xbf16> to vector<1x1x2x32xbf16>
      tpu.vector_store %arg7[%c0_44, %c0_45, %c0_46, %c0_47], %42 {strides = array<i32>} : memref<1x1x2x32xbf16, #tpu.memory_space<vmem>>, vector<1x1x2x32xbf16>,
    } else {
    }
    return
  }
  func.func @transform_0(%arg0: i32, %arg1: i32, %arg2: i32) -> (i32, i32, i32, i32) {
    %c1_i32 = arith.constant 1 : i32
    %0 = arith.muli %arg2, %c1_i32 : i32
    %1 = arith.addi %arg1, %0 : i32
    %c0_i32 = arith.constant 0 : i32
    %c0_i32_0 = arith.constant 0 : i32
    %c0_i32_1 = arith.constant 0 : i32
    return %arg0, %1, %c0_i32, %c0_i32_0 : i32, i32, i32, i32
  }
  func.func @transform_1(%arg0: i32, %arg1: i32, %arg2: i32) -> (i32, i32, i32, i32) {
    %c0_i32 = arith.constant 0 : i32
    %c0_i32_0 = arith.constant 0 : i32
    %c0_i32_1 = arith.constant 0 : i32
    %c0_i32_2 = arith.constant 0 : i32
    return %arg2, %c0_i32, %c0_i32_0, %c0_i32_1 : i32, i32, i32, i32
  }
  func.func @transform_2(%arg0: i32, %arg1: i32, %arg2: i32) -> (i32, i32) {
    %c0_i32 = arith.constant 0 : i32
    %c0_i32_0 = arith.constant 0 : i32
    %c0_i32_1 = arith.constant 0 : i32
    return %c0_i32, %c0_i32_0 : i32, i32
  }
  func.func @transform_3(%arg0: i32, %arg1: i32, %arg2: i32) -> (i32, i32) {
    %c0_i32 = arith.constant 0 : i32
    %c0_i32_0 = arith.constant 0 : i32
    %c0_i32_1 = arith.constant 0 : i32
    return %c0_i32, %c0_i32_0 : i32, i32
  }
  func.func @transform_4(%arg0: i32, %arg1: i32, %arg2: i32) -> (i32, i32, i32, i32) {
    %c0_i32 = arith.constant 0 : i32
    %c0_i32_0 = arith.constant 0 : i32
    %c0_i32_1 = arith.constant 0 : i32
    return %arg0, %arg1, %c0_i32, %c0_i32_0 : i32, i32, i32, i32
  }
}

module attributes {stable_mosaic.version = 11 : i64} {
  func.func @_mm_kernel(%arg0: i32, %arg1: memref<8x16xbf16, #tpu.memory_space<vmem>>, %arg2: memref<16x32xbf16, #tpu.memory_space<vmem>>, %arg3: memref<1x32xf32, #tpu.memory_space<vmem>>, %arg4: memref<1x32xf32, #tpu.memory_space<vmem>>, %arg5: memref<8x32xbf16, #tpu.memory_space<vmem>>) attributes {dimension_semantics = [#tpu.dimension_semantics<parallel>], iteration_bounds = array<i64: 1>, scalar_prefetch = 0 : i64, scratch_operands = 0 : i64, tpu.core_type = #tpu.core_type<tc>, window_params = [{transform_indices = @transform_0, window_bounds = array<i64: 8, 16>}, {pipeline_mode = #tpu.pipeline_mode<synchronous>, transform_indices = @transform_1, window_bounds = array<i64: 16, 32>}, {pipeline_mode = #tpu.pipeline_mode<synchronous>, transform_indices = @transform_2, window_bounds = array<i64: 1, 32>}, {pipeline_mode = #tpu.pipeline_mode<synchronous>, transform_indices = @transform_3, window_bounds = array<i64: 1, 32>}, {transform_indices = @transform_4, window_bounds = array<i64: 8, 32>}]} {
    %c0 = arith.constant 0 : index
    %c0_0 = arith.constant 0 : index
    %0 = vector.load %arg1[%c0, %c0_0] : memref<8x16xbf16, #tpu.memory_space<vmem>>, vector<8x16xbf16>
    %c0_1 = arith.constant 0 : index
    %c0_2 = arith.constant 0 : index
    %1 = vector.load %arg2[%c0_1, %c0_2] : memref<16x32xbf16, #tpu.memory_space<vmem>>, vector<16x32xbf16>
    %cst = arith.constant dense<0.000000e+00> : vector<8x32xf32>
    %2 = tpu.matmul %0, %1, %cst {dimension_numbers = #tpu.dot_dimension_numbers<[1], [0], [0], [1], [0, 0, 1, 1], [], []>} : vector<8x16xbf16>, vector<16x32xbf16>, vector<8x32xf32> -> vector<8x32xf32>
    %c0_3 = arith.constant 0 : index
    %c0_4 = arith.constant 0 : index
    %3 = vector.load %arg3[%c0_3, %c0_4] : memref<1x32xf32, #tpu.memory_space<vmem>>, vector<1x32xf32>
    %4 = vector.broadcast %3 : vector<1x32xf32> to vector<8x32xf32>
    %5 = arith.mulf %2, %4 : vector<8x32xf32>
    %c0_5 = arith.constant 0 : index
    %c0_6 = arith.constant 0 : index
    %6 = vector.load %arg4[%c0_5, %c0_6] : memref<1x32xf32, #tpu.memory_space<vmem>>, vector<1x32xf32>
    %7 = vector.broadcast %6 : vector<1x32xf32> to vector<8x32xf32>
    %8 = arith.addf %5, %7 : vector<8x32xf32>
    %9 = arith.truncf %8 : vector<8x32xf32> to vector<8x32xbf16>
    %c0_7 = arith.constant 0 : index
    %c0_8 = arith.constant 0 : index
    %10 = vector.load %arg5[%c0_7, %c0_8] : memref<8x32xbf16, #tpu.memory_space<vmem>>, vector<8x32xbf16>
    tpu.vector_store %arg5[%c0_7, %c0_8], %9 {strides = array<i32>} : memref<8x32xbf16, #tpu.memory_space<vmem>>, vector<8x32xbf16>,
    return
  }
  func.func @transform_0(%arg0: i32) -> (i32, i32) {
    %c0_i32 = arith.constant 0 : i32
    %c0_i32_0 = arith.constant 0 : i32
    return %arg0, %c0_i32 : i32, i32
  }
  func.func @transform_1(%arg0: i32) -> (i32, i32) {
    %c0_i32 = arith.constant 0 : i32
    %c0_i32_0 = arith.constant 0 : i32
    %c0_i32_1 = arith.constant 0 : i32
    return %c0_i32, %c0_i32_0 : i32, i32
  }
  func.func @transform_2(%arg0: i32) -> (i32, i32) {
    %c0_i32 = arith.constant 0 : i32
    %c0_i32_0 = arith.constant 0 : i32
    %c0_i32_1 = arith.constant 0 : i32
    return %c0_i32, %c0_i32_0 : i32, i32
  }
  func.func @transform_3(%arg0: i32) -> (i32, i32) {
    %c0_i32 = arith.constant 0 : i32
    %c0_i32_0 = arith.constant 0 : i32
    %c0_i32_1 = arith.constant 0 : i32
    return %c0_i32, %c0_i32_0 : i32, i32
  }
  func.func @transform_4(%arg0: i32) -> (i32, i32) {
    %c0_i32 = arith.constant 0 : i32
    %c0_i32_0 = arith.constant 0 : i32
    return %arg0, %c0_i32 : i32, i32
  }
}

module attributes {stable_mosaic.version = 11 : i64} {
  func.func @_conv_row_res_kernel(%arg0: i32, %arg1: i32, %arg2: i32, %arg3: memref<1x1x6x32xbf16, #tpu.memory_space<vmem>>, %arg4: memref<1x3x32x32xbf16, #tpu.memory_space<vmem>>, %arg5: memref<1x32xf32, #tpu.memory_space<vmem>>, %arg6: memref<1x32xf32, #tpu.memory_space<vmem>>, %arg7: memref<1x1x2x32xbf16, #tpu.memory_space<vmem>>, %arg8: memref<1x1x2x32xbf16, #tpu.memory_space<vmem>>, %arg9: memref<2x32xf32, #tpu.memory_space<vmem>>) attributes {dimension_semantics = [#tpu.dimension_semantics<parallel>, #tpu.dimension_semantics<parallel>, #tpu.dimension_semantics<arbitrary>], iteration_bounds = array<i64: 2, 2, 3>, scalar_prefetch = 0 : i64, scratch_operands = 1 : i64, tpu.core_type = #tpu.core_type<tc>, window_params = [{transform_indices = @transform_0, window_bounds = array<i64: 1, 1, 6, 32>}, {transform_indices = @transform_1, window_bounds = array<i64: 1, 3, 32, 32>}, {pipeline_mode = #tpu.pipeline_mode<synchronous>, transform_indices = @transform_2, window_bounds = array<i64: 1, 32>}, {pipeline_mode = #tpu.pipeline_mode<synchronous>, transform_indices = @transform_3, window_bounds = array<i64: 1, 32>}, {transform_indices = @transform_4, window_bounds = array<i64: 1, 1, 2, 32>}, {transform_indices = @transform_5, window_bounds = array<i64: 1, 1, 2, 32>}]} {
    %c0_i32 = arith.constant 0 : i32
    %0 = arith.cmpi eq, %arg2, %c0_i32 : i32
    %1 = arith.extui %0 : i1 to i32
    %c0_i32_0 = arith.constant 0 : i32
    %2 = arith.cmpi ne, %1, %c0_i32_0 : i32
    scf.if %2 {
      %cst_36 = arith.constant 0.000000e+00 : f32
      %30 = vector.broadcast %cst_36 : f32 to vector<2x32xf32>
      %c0_37 = arith.constant 0 : index
      %c0_38 = arith.constant 0 : index
      %31 = vector.load %arg9[%c0_37, %c0_38] : memref<2x32xf32, #tpu.memory_space<vmem>>, vector<2x32xf32>
      tpu.vector_store %arg9[%c0_37, %c0_38], %30 {strides = array<i32>} : memref<2x32xf32, #tpu.memory_space<vmem>>, vector<2x32xf32>,
    } else {
    }
    %c0 = arith.constant 0 : index
    %c0_1 = arith.constant 0 : index
    %c0_2 = arith.constant 0 : index
    %c0_3 = arith.constant 0 : index
    %3 = vector.load %arg3[%c0, %c0_1, %c0_2, %c0_3] : memref<1x1x6x32xbf16, #tpu.memory_space<vmem>>, vector<1x1x2x32xbf16>
    %4 = vector.shape_cast %3 : vector<1x1x2x32xbf16> to vector<2x32xbf16>
    %c0_4 = arith.constant 0 : index
    %c0_5 = arith.constant 0 : index
    %5 = vector.load %arg9[%c0_4, %c0_5] : memref<2x32xf32, #tpu.memory_space<vmem>>, vector<2x32xf32>
    %c0_6 = arith.constant 0 : index
    %c0_7 = arith.constant 0 : index
    %c0_8 = arith.constant 0 : index
    %c0_9 = arith.constant 0 : index
    %6 = vector.load %arg4[%c0_6, %c0_7, %c0_8, %c0_9] : memref<1x3x32x32xbf16, #tpu.memory_space<vmem>>, vector<1x1x32x32xbf16>
    %7 = vector.shape_cast %6 : vector<1x1x32x32xbf16> to vector<32x32xbf16>
    %cst = arith.constant dense<0.000000e+00> : vector<2x32xf32>
    %8 = tpu.matmul %4, %7, %cst {dimension_numbers = #tpu.dot_dimension_numbers<[1], [0], [0], [1], [0, 0, 1, 1], [], []>} : vector<2x32xbf16>, vector<32x32xbf16>, vector<2x32xf32> -> vector<2x32xf32>
    %9 = arith.addf %5, %8 : vector<2x32xf32>
    %c0_10 = arith.constant 0 : index
    %c0_11 = arith.constant 0 : index
    %10 = vector.load %arg9[%c0_10, %c0_11] : memref<2x32xf32, #tpu.memory_space<vmem>>, vector<2x32xf32>
    tpu.vector_store %arg9[%c0_10, %c0_11], %9 {strides = array<i32>} : memref<2x32xf32, #tpu.memory_space<vmem>>, vector<2x32xf32>,
    %c0_12 = arith.constant 0 : index
    %c0_13 = arith.constant 0 : index
    %c2 = arith.constant 2 : index
    %c0_14 = arith.constant 0 : index
    %11 = vector.load %arg3[%c0_12, %c0_13, %c2, %c0_14] : memref<1x1x6x32xbf16, #tpu.memory_space<vmem>>, vector<1x1x2x32xbf16>
    %12 = vector.shape_cast %11 : vector<1x1x2x32xbf16> to vector<2x32xbf16>
    %c0_15 = arith.constant 0 : index
    %c0_16 = arith.constant 0 : index
    %13 = vector.load %arg9[%c0_15, %c0_16] : memref<2x32xf32, #tpu.memory_space<vmem>>, vector<2x32xf32>
    %c0_17 = arith.constant 0 : index
    %c1 = arith.constant 1 : index
    %c0_18 = arith.constant 0 : index
    %c0_19 = arith.constant 0 : index
    %14 = vector.load %arg4[%c0_17, %c1, %c0_18, %c0_19] : memref<1x3x32x32xbf16, #tpu.memory_space<vmem>>, vector<1x1x32x32xbf16>
    %15 = vector.shape_cast %14 : vector<1x1x32x32xbf16> to vector<32x32xbf16>
    %cst_20 = arith.constant dense<0.000000e+00> : vector<2x32xf32>
    %16 = tpu.matmul %12, %15, %cst_20 {dimension_numbers = #tpu.dot_dimension_numbers<[1], [0], [0], [1], [0, 0, 1, 1], [], []>} : vector<2x32xbf16>, vector<32x32xbf16>, vector<2x32xf32> -> vector<2x32xf32>
    %17 = arith.addf %13, %16 : vector<2x32xf32>
    %c0_21 = arith.constant 0 : index
    %c0_22 = arith.constant 0 : index
    %18 = vector.load %arg9[%c0_21, %c0_22] : memref<2x32xf32, #tpu.memory_space<vmem>>, vector<2x32xf32>
    tpu.vector_store %arg9[%c0_21, %c0_22], %17 {strides = array<i32>} : memref<2x32xf32, #tpu.memory_space<vmem>>, vector<2x32xf32>,
    %c0_23 = arith.constant 0 : index
    %c0_24 = arith.constant 0 : index
    %c4 = arith.constant 4 : index
    %c0_25 = arith.constant 0 : index
    %19 = vector.load %arg3[%c0_23, %c0_24, %c4, %c0_25] : memref<1x1x6x32xbf16, #tpu.memory_space<vmem>>, vector<1x1x2x32xbf16>
    %20 = vector.shape_cast %19 : vector<1x1x2x32xbf16> to vector<2x32xbf16>
    %c0_26 = arith.constant 0 : index
    %c0_27 = arith.constant 0 : index
    %21 = vector.load %arg9[%c0_26, %c0_27] : memref<2x32xf32, #tpu.memory_space<vmem>>, vector<2x32xf32>
    %c0_28 = arith.constant 0 : index
    %c2_29 = arith.constant 2 : index
    %c0_30 = arith.constant 0 : index
    %c0_31 = arith.constant 0 : index
    %22 = vector.load %arg4[%c0_28, %c2_29, %c0_30, %c0_31] : memref<1x3x32x32xbf16, #tpu.memory_space<vmem>>, vector<1x1x32x32xbf16>
    %23 = vector.shape_cast %22 : vector<1x1x32x32xbf16> to vector<32x32xbf16>
    %cst_32 = arith.constant dense<0.000000e+00> : vector<2x32xf32>
    %24 = tpu.matmul %20, %23, %cst_32 {dimension_numbers = #tpu.dot_dimension_numbers<[1], [0], [0], [1], [0, 0, 1, 1], [], []>} : vector<2x32xbf16>, vector<32x32xbf16>, vector<2x32xf32> -> vector<2x32xf32>
    %25 = arith.addf %21, %24 : vector<2x32xf32>
    %c0_33 = arith.constant 0 : index
    %c0_34 = arith.constant 0 : index
    %26 = vector.load %arg9[%c0_33, %c0_34] : memref<2x32xf32, #tpu.memory_space<vmem>>, vector<2x32xf32>
    tpu.vector_store %arg9[%c0_33, %c0_34], %25 {strides = array<i32>} : memref<2x32xf32, #tpu.memory_space<vmem>>, vector<2x32xf32>,
    %c2_i32 = arith.constant 2 : i32
    %27 = arith.cmpi eq, %arg2, %c2_i32 : i32
    %28 = arith.extui %27 : i1 to i32
    %c0_i32_35 = arith.constant 0 : i32
    %29 = arith.cmpi ne, %28, %c0_i32_35 : i32
    scf.if %29 {
      %c0_36 = arith.constant 0 : index
      %c0_37 = arith.constant 0 : index
      %30 = vector.load %arg9[%c0_36, %c0_37] : memref<2x32xf32, #tpu.memory_space<vmem>>, vector<2x32xf32>
      %c0_38 = arith.constant 0 : index
      %c0_39 = arith.constant 0 : index
      %31 = vector.load %arg5[%c0_38, %c0_39] : memref<1x32xf32, #tpu.memory_space<vmem>>, vector<1x32xf32>
      %32 = vector.broadcast %31 : vector<1x32xf32> to vector<2x32xf32>
      %33 = arith.mulf %30, %32 : vector<2x32xf32>
      %c0_40 = arith.constant 0 : index
      %c0_41 = arith.constant 0 : index
      %34 = vector.load %arg6[%c0_40, %c0_41] : memref<1x32xf32, #tpu.memory_space<vmem>>, vector<1x32xf32>
      %35 = vector.broadcast %34 : vector<1x32xf32> to vector<2x32xf32>
      %36 = arith.addf %33, %35 : vector<2x32xf32>
      %c0_42 = arith.constant 0 : index
      %c0_43 = arith.constant 0 : index
      %c0_44 = arith.constant 0 : index
      %c0_45 = arith.constant 0 : index
      %37 = vector.load %arg7[%c0_42, %c0_43, %c0_44, %c0_45] : memref<1x1x2x32xbf16, #tpu.memory_space<vmem>>, vector<1x1x2x32xbf16>
      %38 = vector.shape_cast %37 : vector<1x1x2x32xbf16> to vector<2x32xbf16>
      %39 = arith.extf %38 : vector<2x32xbf16> to vector<2x32xf32>
      %40 = arith.addf %36, %39 : vector<2x32xf32>
      %cst_46 = arith.constant 0.000000e+00 : f32
      %41 = vector.broadcast %cst_46 : f32 to vector<2x32xf32>
      %42 = arith.maximumf %40, %41 : vector<2x32xf32>
      %43 = arith.truncf %42 : vector<2x32xf32> to vector<2x32xbf16>
      %c0_47 = arith.constant 0 : index
      %c0_48 = arith.constant 0 : index
      %c0_49 = arith.constant 0 : index
      %c0_50 = arith.constant 0 : index
      %44 = vector.load %arg8[%c0_47, %c0_48, %c0_49, %c0_50] : memref<1x1x2x32xbf16, #tpu.memory_space<vmem>>, vector<1x1x2x32xbf16>
      %45 = vector.shape_cast %44 : vector<1x1x2x32xbf16> to vector<2x32xbf16>
      %46 = vector.shape_cast %43 : vector<2x32xbf16> to vector<1x1x2x32xbf16>
      tpu.vector_store %arg8[%c0_47, %c0_48, %c0_49, %c0_50], %46 {strides = array<i32>} : memref<1x1x2x32xbf16, #tpu.memory_space<vmem>>, vector<1x1x2x32xbf16>,
    } else {
    }
    return
  }
  func.func @transform_0(%arg0: i32, %arg1: i32, %arg2: i32) -> (i32, i32, i32, i32) {
    %c2_i32 = arith.constant 2 : i32
    %0 = arith.muli %arg2, %c2_i32 : i32
    %1 = arith.addi %arg1, %0 : i32
    %c0_i32 = arith.constant 0 : i32
    %c0_i32_0 = arith.constant 0 : i32
    %c0_i32_1 = arith.constant 0 : i32
    return %arg0, %1, %c0_i32, %c0_i32_0 : i32, i32, i32, i32
  }
  func.func @transform_1(%arg0: i32, %arg1: i32, %arg2: i32) -> (i32, i32, i32, i32) {
    %c0_i32 = arith.constant 0 : i32
    %c0_i32_0 = arith.constant 0 : i32
    %c0_i32_1 = arith.constant 0 : i32
    %c0_i32_2 = arith.constant 0 : i32
    return %arg2, %c0_i32, %c0_i32_0, %c0_i32_1 : i32, i32, i32, i32
  }
  func.func @transform_2(%arg0: i32, %arg1: i32, %arg2: i32) -> (i32, i32) {
    %c0_i32 = arith.constant 0 : i32
    %c0_i32_0 = arith.constant 0 : i32
    %c0_i32_1 = arith.constant 0 : i32
    return %c0_i32, %c0_i32_0 : i32, i32
  }
  func.func @transform_3(%arg0: i32, %arg1: i32, %arg2: i32) -> (i32, i32) {
    %c0_i32 = arith.constant 0 : i32
    %c0_i32_0 = arith.constant 0 : i32
    %c0_i32_1 = arith.constant 0 : i32
    return %c0_i32, %c0_i32_0 : i32, i32
  }
  func.func @transform_4(%arg0: i32, %arg1: i32, %arg2: i32) -> (i32, i32, i32, i32) {
    %c0_i32 = arith.constant 0 : i32
    %c0_i32_0 = arith.constant 0 : i32
    %c0_i32_1 = arith.constant 0 : i32
    return %arg0, %arg1, %c0_i32, %c0_i32_0 : i32, i32, i32, i32
  }
  func.func @transform_5(%arg0: i32, %arg1: i32, %arg2: i32) -> (i32, i32, i32, i32) {
    %c0_i32 = arith.constant 0 : i32
    %c0_i32_0 = arith.constant 0 : i32
    %c0_i32_1 = arith.constant 0 : i32
    return %arg0, %arg1, %c0_i32, %c0_i32_0 : i32, i32, i32, i32
  }
}

module attributes {stable_mosaic.version = 11 : i64} {
  func.func @_conv_row_kernel(%arg0: i32, %arg1: i32, %arg2: i32, %arg3: memref<1x1x3x32xbf16, #tpu.memory_space<vmem>>, %arg4: memref<1x3x32x64xbf16, #tpu.memory_space<vmem>>, %arg5: memref<1x64xf32, #tpu.memory_space<vmem>>, %arg6: memref<1x64xf32, #tpu.memory_space<vmem>>, %arg7: memref<1x1x1x64xbf16, #tpu.memory_space<vmem>>, %arg8: memref<1x64xf32, #tpu.memory_space<vmem>>) attributes {dimension_semantics = [#tpu.dimension_semantics<parallel>, #tpu.dimension_semantics<parallel>, #tpu.dimension_semantics<arbitrary>], iteration_bounds = array<i64: 2, 1, 3>, scalar_prefetch = 0 : i64, scratch_operands = 1 : i64, tpu.core_type = #tpu.core_type<tc>, window_params = [{transform_indices = @transform_0, window_bounds = array<i64: 1, 1, 3, 32>}, {transform_indices = @transform_1, window_bounds = array<i64: 1, 3, 32, 64>}, {pipeline_mode = #tpu.pipeline_mode<synchronous>, transform_indices = @transform_2, window_bounds = array<i64: 1, 64>}, {pipeline_mode = #tpu.pipeline_mode<synchronous>, transform_indices = @transform_3, window_bounds = array<i64: 1, 64>}, {transform_indices = @transform_4, window_bounds = array<i64: 1, 1, 1, 64>}]} {
    %c0_i32 = arith.constant 0 : i32
    %0 = arith.cmpi eq, %arg2, %c0_i32 : i32
    %1 = arith.extui %0 : i1 to i32
    %c0_i32_0 = arith.constant 0 : i32
    %2 = arith.cmpi ne, %1, %c0_i32_0 : i32
    scf.if %2 {
      %cst_37 = arith.constant 0.000000e+00 : f32
      %30 = vector.broadcast %cst_37 : f32 to vector<1x64xf32>
      %c0_38 = arith.constant 0 : index
      %c0_39 = arith.constant 0 : index
      %31 = vector.load %arg8[%c0_38, %c0_39] : memref<1x64xf32, #tpu.memory_space<vmem>>, vector<1x64xf32>
      tpu.vector_store %arg8[%c0_38, %c0_39], %30 {strides = array<i32>} : memref<1x64xf32, #tpu.memory_space<vmem>>, vector<1x64xf32>,
    } else {
    }
    %c0 = arith.constant 0 : index
    %c0_1 = arith.constant 0 : index
    %c0_2 = arith.constant 0 : index
    %c0_3 = arith.constant 0 : index
    %3 = vector.load %arg3[%c0, %c0_1, %c0_2, %c0_3] : memref<1x1x3x32xbf16, #tpu.memory_space<vmem>>, vector<1x1x1x32xbf16>
    %4 = vector.shape_cast %3 : vector<1x1x1x32xbf16> to vector<1x32xbf16>
    %c0_4 = arith.constant 0 : index
    %c0_5 = arith.constant 0 : index
    %5 = vector.load %arg8[%c0_4, %c0_5] : memref<1x64xf32, #tpu.memory_space<vmem>>, vector<1x64xf32>
    %c0_6 = arith.constant 0 : index
    %c0_7 = arith.constant 0 : index
    %c0_8 = arith.constant 0 : index
    %c0_9 = arith.constant 0 : index
    %6 = vector.load %arg4[%c0_6, %c0_7, %c0_8, %c0_9] : memref<1x3x32x64xbf16, #tpu.memory_space<vmem>>, vector<1x1x32x64xbf16>
    %7 = vector.shape_cast %6 : vector<1x1x32x64xbf16> to vector<32x64xbf16>
    %cst = arith.constant dense<0.000000e+00> : vector<1x64xf32>
    %8 = tpu.matmul %4, %7, %cst {dimension_numbers = #tpu.dot_dimension_numbers<[1], [0], [0], [1], [0, 0, 1, 1], [], []>} : vector<1x32xbf16>, vector<32x64xbf16>, vector<1x64xf32> -> vector<1x64xf32>
    %9 = arith.addf %5, %8 : vector<1x64xf32>
    %c0_10 = arith.constant 0 : index
    %c0_11 = arith.constant 0 : index
    %10 = vector.load %arg8[%c0_10, %c0_11] : memref<1x64xf32, #tpu.memory_space<vmem>>, vector<1x64xf32>
    tpu.vector_store %arg8[%c0_10, %c0_11], %9 {strides = array<i32>} : memref<1x64xf32, #tpu.memory_space<vmem>>, vector<1x64xf32>,
    %c0_12 = arith.constant 0 : index
    %c0_13 = arith.constant 0 : index
    %c1 = arith.constant 1 : index
    %c0_14 = arith.constant 0 : index
    %11 = vector.load %arg3[%c0_12, %c0_13, %c1, %c0_14] : memref<1x1x3x32xbf16, #tpu.memory_space<vmem>>, vector<1x1x1x32xbf16>
    %12 = vector.shape_cast %11 : vector<1x1x1x32xbf16> to vector<1x32xbf16>
    %c0_15 = arith.constant 0 : index
    %c0_16 = arith.constant 0 : index
    %13 = vector.load %arg8[%c0_15, %c0_16] : memref<1x64xf32, #tpu.memory_space<vmem>>, vector<1x64xf32>
    %c0_17 = arith.constant 0 : index
    %c1_18 = arith.constant 1 : index
    %c0_19 = arith.constant 0 : index
    %c0_20 = arith.constant 0 : index
    %14 = vector.load %arg4[%c0_17, %c1_18, %c0_19, %c0_20] : memref<1x3x32x64xbf16, #tpu.memory_space<vmem>>, vector<1x1x32x64xbf16>
    %15 = vector.shape_cast %14 : vector<1x1x32x64xbf16> to vector<32x64xbf16>
    %cst_21 = arith.constant dense<0.000000e+00> : vector<1x64xf32>
    %16 = tpu.matmul %12, %15, %cst_21 {dimension_numbers = #tpu.dot_dimension_numbers<[1], [0], [0], [1], [0, 0, 1, 1], [], []>} : vector<1x32xbf16>, vector<32x64xbf16>, vector<1x64xf32> -> vector<1x64xf32>
    %17 = arith.addf %13, %16 : vector<1x64xf32>
    %c0_22 = arith.constant 0 : index
    %c0_23 = arith.constant 0 : index
    %18 = vector.load %arg8[%c0_22, %c0_23] : memref<1x64xf32, #tpu.memory_space<vmem>>, vector<1x64xf32>
    tpu.vector_store %arg8[%c0_22, %c0_23], %17 {strides = array<i32>} : memref<1x64xf32, #tpu.memory_space<vmem>>, vector<1x64xf32>,
    %c0_24 = arith.constant 0 : index
    %c0_25 = arith.constant 0 : index
    %c2 = arith.constant 2 : index
    %c0_26 = arith.constant 0 : index
    %19 = vector.load %arg3[%c0_24, %c0_25, %c2, %c0_26] : memref<1x1x3x32xbf16, #tpu.memory_space<vmem>>, vector<1x1x1x32xbf16>
    %20 = vector.shape_cast %19 : vector<1x1x1x32xbf16> to vector<1x32xbf16>
    %c0_27 = arith.constant 0 : index
    %c0_28 = arith.constant 0 : index
    %21 = vector.load %arg8[%c0_27, %c0_28] : memref<1x64xf32, #tpu.memory_space<vmem>>, vector<1x64xf32>
    %c0_29 = arith.constant 0 : index
    %c2_30 = arith.constant 2 : index
    %c0_31 = arith.constant 0 : index
    %c0_32 = arith.constant 0 : index
    %22 = vector.load %arg4[%c0_29, %c2_30, %c0_31, %c0_32] : memref<1x3x32x64xbf16, #tpu.memory_space<vmem>>, vector<1x1x32x64xbf16>
    %23 = vector.shape_cast %22 : vector<1x1x32x64xbf16> to vector<32x64xbf16>
    %cst_33 = arith.constant dense<0.000000e+00> : vector<1x64xf32>
    %24 = tpu.matmul %20, %23, %cst_33 {dimension_numbers = #tpu.dot_dimension_numbers<[1], [0], [0], [1], [0, 0, 1, 1], [], []>} : vector<1x32xbf16>, vector<32x64xbf16>, vector<1x64xf32> -> vector<1x64xf32>
    %25 = arith.addf %21, %24 : vector<1x64xf32>
    %c0_34 = arith.constant 0 : index
    %c0_35 = arith.constant 0 : index
    %26 = vector.load %arg8[%c0_34, %c0_35] : memref<1x64xf32, #tpu.memory_space<vmem>>, vector<1x64xf32>
    tpu.vector_store %arg8[%c0_34, %c0_35], %25 {strides = array<i32>} : memref<1x64xf32, #tpu.memory_space<vmem>>, vector<1x64xf32>,
    %c2_i32 = arith.constant 2 : i32
    %27 = arith.cmpi eq, %arg2, %c2_i32 : i32
    %28 = arith.extui %27 : i1 to i32
    %c0_i32_36 = arith.constant 0 : i32
    %29 = arith.cmpi ne, %28, %c0_i32_36 : i32
    scf.if %29 {
      %c0_37 = arith.constant 0 : index
      %c0_38 = arith.constant 0 : index
      %30 = vector.load %arg8[%c0_37, %c0_38] : memref<1x64xf32, #tpu.memory_space<vmem>>, vector<1x64xf32>
      %c0_39 = arith.constant 0 : index
      %c0_40 = arith.constant 0 : index
      %31 = vector.load %arg5[%c0_39, %c0_40] : memref<1x64xf32, #tpu.memory_space<vmem>>, vector<1x64xf32>
      %32 = arith.mulf %30, %31 : vector<1x64xf32>
      %c0_41 = arith.constant 0 : index
      %c0_42 = arith.constant 0 : index
      %33 = vector.load %arg6[%c0_41, %c0_42] : memref<1x64xf32, #tpu.memory_space<vmem>>, vector<1x64xf32>
      %34 = arith.addf %32, %33 : vector<1x64xf32>
      %cst_43 = arith.constant 0.000000e+00 : f32
      %35 = vector.broadcast %cst_43 : f32 to vector<1x64xf32>
      %36 = arith.maximumf %34, %35 : vector<1x64xf32>
      %37 = arith.truncf %36 : vector<1x64xf32> to vector<1x64xbf16>
      %c0_44 = arith.constant 0 : index
      %c0_45 = arith.constant 0 : index
      %c0_46 = arith.constant 0 : index
      %c0_47 = arith.constant 0 : index
      %38 = vector.load %arg7[%c0_44, %c0_45, %c0_46, %c0_47] : memref<1x1x1x64xbf16, #tpu.memory_space<vmem>>, vector<1x1x1x64xbf16>
      %39 = vector.shape_cast %38 : vector<1x1x1x64xbf16> to vector<1x64xbf16>
      %40 = vector.shape_cast %37 : vector<1x64xbf16> to vector<1x1x1x64xbf16>
      tpu.vector_store %arg7[%c0_44, %c0_45, %c0_46, %c0_47], %40 {strides = array<i32>} : memref<1x1x1x64xbf16, #tpu.memory_space<vmem>>, vector<1x1x1x64xbf16>,
    } else {
    }
    return
  }
  func.func @transform_0(%arg0: i32, %arg1: i32, %arg2: i32) -> (i32, i32, i32, i32) {
    %c1_i32 = arith.constant 1 : i32
    %0 = arith.muli %arg2, %c1_i32 : i32
    %1 = arith.addi %arg1, %0 : i32
    %c0_i32 = arith.constant 0 : i32
    %c0_i32_0 = arith.constant 0 : i32
    %c0_i32_1 = arith.constant 0 : i32
    return %arg0, %1, %c0_i32, %c0_i32_0 : i32, i32, i32, i32
  }
  func.func @transform_1(%arg0: i32, %arg1: i32, %arg2: i32) -> (i32, i32, i32, i32) {
    %c0_i32 = arith.constant 0 : i32
    %c0_i32_0 = arith.constant 0 : i32
    %c0_i32_1 = arith.constant 0 : i32
    %c0_i32_2 = arith.constant 0 : i32
    return %arg2, %c0_i32, %c0_i32_0, %c0_i32_1 : i32, i32, i32, i32
  }
  func.func @transform_2(%arg0: i32, %arg1: i32, %arg2: i32) -> (i32, i32) {
    %c0_i32 = arith.constant 0 : i32
    %c0_i32_0 = arith.constant 0 : i32
    %c0_i32_1 = arith.constant 0 : i32
    return %c0_i32, %c0_i32_0 : i32, i32
  }
  func.func @transform_3(%arg0: i32, %arg1: i32, %arg2: i32) -> (i32, i32) {
    %c0_i32 = arith.constant 0 : i32
    %c0_i32_0 = arith.constant 0 : i32
    %c0_i32_1 = arith.constant 0 : i32
    return %c0_i32, %c0_i32_0 : i32, i32
  }
  func.func @transform_4(%arg0: i32, %arg1: i32, %arg2: i32) -> (i32, i32, i32, i32) {
    %c0_i32 = arith.constant 0 : i32
    %c0_i32_0 = arith.constant 0 : i32
    %c0_i32_1 = arith.constant 0 : i32
    return %arg0, %arg1, %c0_i32, %c0_i32_0 : i32, i32, i32, i32
  }
}

module attributes {stable_mosaic.version = 11 : i64} {
  func.func @_mm_kernel(%arg0: i32, %arg1: memref<8x32xbf16, #tpu.memory_space<vmem>>, %arg2: memref<32x64xbf16, #tpu.memory_space<vmem>>, %arg3: memref<1x64xf32, #tpu.memory_space<vmem>>, %arg4: memref<1x64xf32, #tpu.memory_space<vmem>>, %arg5: memref<8x64xbf16, #tpu.memory_space<vmem>>) attributes {dimension_semantics = [#tpu.dimension_semantics<parallel>], iteration_bounds = array<i64: 1>, scalar_prefetch = 0 : i64, scratch_operands = 0 : i64, tpu.core_type = #tpu.core_type<tc>, window_params = [{transform_indices = @transform_0, window_bounds = array<i64: 8, 32>}, {pipeline_mode = #tpu.pipeline_mode<synchronous>, transform_indices = @transform_1, window_bounds = array<i64: 32, 64>}, {pipeline_mode = #tpu.pipeline_mode<synchronous>, transform_indices = @transform_2, window_bounds = array<i64: 1, 64>}, {pipeline_mode = #tpu.pipeline_mode<synchronous>, transform_indices = @transform_3, window_bounds = array<i64: 1, 64>}, {transform_indices = @transform_4, window_bounds = array<i64: 8, 64>}]} {
    %c0 = arith.constant 0 : index
    %c0_0 = arith.constant 0 : index
    %0 = vector.load %arg1[%c0, %c0_0] : memref<8x32xbf16, #tpu.memory_space<vmem>>, vector<8x32xbf16>
    %c0_1 = arith.constant 0 : index
    %c0_2 = arith.constant 0 : index
    %1 = vector.load %arg2[%c0_1, %c0_2] : memref<32x64xbf16, #tpu.memory_space<vmem>>, vector<32x64xbf16>
    %cst = arith.constant dense<0.000000e+00> : vector<8x64xf32>
    %2 = tpu.matmul %0, %1, %cst {dimension_numbers = #tpu.dot_dimension_numbers<[1], [0], [0], [1], [0, 0, 1, 1], [], []>} : vector<8x32xbf16>, vector<32x64xbf16>, vector<8x64xf32> -> vector<8x64xf32>
    %c0_3 = arith.constant 0 : index
    %c0_4 = arith.constant 0 : index
    %3 = vector.load %arg3[%c0_3, %c0_4] : memref<1x64xf32, #tpu.memory_space<vmem>>, vector<1x64xf32>
    %4 = vector.broadcast %3 : vector<1x64xf32> to vector<8x64xf32>
    %5 = arith.mulf %2, %4 : vector<8x64xf32>
    %c0_5 = arith.constant 0 : index
    %c0_6 = arith.constant 0 : index
    %6 = vector.load %arg4[%c0_5, %c0_6] : memref<1x64xf32, #tpu.memory_space<vmem>>, vector<1x64xf32>
    %7 = vector.broadcast %6 : vector<1x64xf32> to vector<8x64xf32>
    %8 = arith.addf %5, %7 : vector<8x64xf32>
    %9 = arith.truncf %8 : vector<8x64xf32> to vector<8x64xbf16>
    %c0_7 = arith.constant 0 : index
    %c0_8 = arith.constant 0 : index
    %10 = vector.load %arg5[%c0_7, %c0_8] : memref<8x64xbf16, #tpu.memory_space<vmem>>, vector<8x64xbf16>
    tpu.vector_store %arg5[%c0_7, %c0_8], %9 {strides = array<i32>} : memref<8x64xbf16, #tpu.memory_space<vmem>>, vector<8x64xbf16>,
    return
  }
  func.func @transform_0(%arg0: i32) -> (i32, i32) {
    %c0_i32 = arith.constant 0 : i32
    %c0_i32_0 = arith.constant 0 : i32
    return %arg0, %c0_i32 : i32, i32
  }
  func.func @transform_1(%arg0: i32) -> (i32, i32) {
    %c0_i32 = arith.constant 0 : i32
    %c0_i32_0 = arith.constant 0 : i32
    %c0_i32_1 = arith.constant 0 : i32
    return %c0_i32, %c0_i32_0 : i32, i32
  }
  func.func @transform_2(%arg0: i32) -> (i32, i32) {
    %c0_i32 = arith.constant 0 : i32
    %c0_i32_0 = arith.constant 0 : i32
    %c0_i32_1 = arith.constant 0 : i32
    return %c0_i32, %c0_i32_0 : i32, i32
  }
  func.func @transform_3(%arg0: i32) -> (i32, i32) {
    %c0_i32 = arith.constant 0 : i32
    %c0_i32_0 = arith.constant 0 : i32
    %c0_i32_1 = arith.constant 0 : i32
    return %c0_i32, %c0_i32_0 : i32, i32
  }
  func.func @transform_4(%arg0: i32) -> (i32, i32) {
    %c0_i32 = arith.constant 0 : i32
    %c0_i32_0 = arith.constant 0 : i32
    return %arg0, %c0_i32 : i32, i32
  }
}

module attributes {stable_mosaic.version = 11 : i64} {
  func.func @_conv_row_res_kernel(%arg0: i32, %arg1: i32, %arg2: i32, %arg3: memref<1x1x5x64xbf16, #tpu.memory_space<vmem>>, %arg4: memref<1x3x64x64xbf16, #tpu.memory_space<vmem>>, %arg5: memref<1x64xf32, #tpu.memory_space<vmem>>, %arg6: memref<1x64xf32, #tpu.memory_space<vmem>>, %arg7: memref<1x1x1x64xbf16, #tpu.memory_space<vmem>>, %arg8: memref<1x1x1x64xbf16, #tpu.memory_space<vmem>>, %arg9: memref<1x64xf32, #tpu.memory_space<vmem>>) attributes {dimension_semantics = [#tpu.dimension_semantics<parallel>, #tpu.dimension_semantics<parallel>, #tpu.dimension_semantics<arbitrary>], iteration_bounds = array<i64: 2, 1, 3>, scalar_prefetch = 0 : i64, scratch_operands = 1 : i64, tpu.core_type = #tpu.core_type<tc>, window_params = [{transform_indices = @transform_0, window_bounds = array<i64: 1, 1, 5, 64>}, {transform_indices = @transform_1, window_bounds = array<i64: 1, 3, 64, 64>}, {pipeline_mode = #tpu.pipeline_mode<synchronous>, transform_indices = @transform_2, window_bounds = array<i64: 1, 64>}, {pipeline_mode = #tpu.pipeline_mode<synchronous>, transform_indices = @transform_3, window_bounds = array<i64: 1, 64>}, {transform_indices = @transform_4, window_bounds = array<i64: 1, 1, 1, 64>}, {transform_indices = @transform_5, window_bounds = array<i64: 1, 1, 1, 64>}]} {
    %c0_i32 = arith.constant 0 : i32
    %0 = arith.cmpi eq, %arg2, %c0_i32 : i32
    %1 = arith.extui %0 : i1 to i32
    %c0_i32_0 = arith.constant 0 : i32
    %2 = arith.cmpi ne, %1, %c0_i32_0 : i32
    scf.if %2 {
      %cst_36 = arith.constant 0.000000e+00 : f32
      %30 = vector.broadcast %cst_36 : f32 to vector<1x64xf32>
      %c0_37 = arith.constant 0 : index
      %c0_38 = arith.constant 0 : index
      %31 = vector.load %arg9[%c0_37, %c0_38] : memref<1x64xf32, #tpu.memory_space<vmem>>, vector<1x64xf32>
      tpu.vector_store %arg9[%c0_37, %c0_38], %30 {strides = array<i32>} : memref<1x64xf32, #tpu.memory_space<vmem>>, vector<1x64xf32>,
    } else {
    }
    %c0 = arith.constant 0 : index
    %c0_1 = arith.constant 0 : index
    %c0_2 = arith.constant 0 : index
    %c0_3 = arith.constant 0 : index
    %3 = vector.load %arg3[%c0, %c0_1, %c0_2, %c0_3] : memref<1x1x5x64xbf16, #tpu.memory_space<vmem>>, vector<1x1x1x64xbf16>
    %4 = vector.shape_cast %3 : vector<1x1x1x64xbf16> to vector<1x64xbf16>
    %c0_4 = arith.constant 0 : index
    %c0_5 = arith.constant 0 : index
    %5 = vector.load %arg9[%c0_4, %c0_5] : memref<1x64xf32, #tpu.memory_space<vmem>>, vector<1x64xf32>
    %c0_6 = arith.constant 0 : index
    %c0_7 = arith.constant 0 : index
    %c0_8 = arith.constant 0 : index
    %c0_9 = arith.constant 0 : index
    %6 = vector.load %arg4[%c0_6, %c0_7, %c0_8, %c0_9] : memref<1x3x64x64xbf16, #tpu.memory_space<vmem>>, vector<1x1x64x64xbf16>
    %7 = vector.shape_cast %6 : vector<1x1x64x64xbf16> to vector<64x64xbf16>
    %cst = arith.constant dense<0.000000e+00> : vector<1x64xf32>
    %8 = tpu.matmul %4, %7, %cst {dimension_numbers = #tpu.dot_dimension_numbers<[1], [0], [0], [1], [0, 0, 1, 1], [], []>} : vector<1x64xbf16>, vector<64x64xbf16>, vector<1x64xf32> -> vector<1x64xf32>
    %9 = arith.addf %5, %8 : vector<1x64xf32>
    %c0_10 = arith.constant 0 : index
    %c0_11 = arith.constant 0 : index
    %10 = vector.load %arg9[%c0_10, %c0_11] : memref<1x64xf32, #tpu.memory_space<vmem>>, vector<1x64xf32>
    tpu.vector_store %arg9[%c0_10, %c0_11], %9 {strides = array<i32>} : memref<1x64xf32, #tpu.memory_space<vmem>>, vector<1x64xf32>,
    %c0_12 = arith.constant 0 : index
    %c0_13 = arith.constant 0 : index
    %c2 = arith.constant 2 : index
    %c0_14 = arith.constant 0 : index
    %11 = vector.load %arg3[%c0_12, %c0_13, %c2, %c0_14] : memref<1x1x5x64xbf16, #tpu.memory_space<vmem>>, vector<1x1x1x64xbf16>
    %12 = vector.shape_cast %11 : vector<1x1x1x64xbf16> to vector<1x64xbf16>
    %c0_15 = arith.constant 0 : index
    %c0_16 = arith.constant 0 : index
    %13 = vector.load %arg9[%c0_15, %c0_16] : memref<1x64xf32, #tpu.memory_space<vmem>>, vector<1x64xf32>
    %c0_17 = arith.constant 0 : index
    %c1 = arith.constant 1 : index
    %c0_18 = arith.constant 0 : index
    %c0_19 = arith.constant 0 : index
    %14 = vector.load %arg4[%c0_17, %c1, %c0_18, %c0_19] : memref<1x3x64x64xbf16, #tpu.memory_space<vmem>>, vector<1x1x64x64xbf16>
    %15 = vector.shape_cast %14 : vector<1x1x64x64xbf16> to vector<64x64xbf16>
    %cst_20 = arith.constant dense<0.000000e+00> : vector<1x64xf32>
    %16 = tpu.matmul %12, %15, %cst_20 {dimension_numbers = #tpu.dot_dimension_numbers<[1], [0], [0], [1], [0, 0, 1, 1], [], []>} : vector<1x64xbf16>, vector<64x64xbf16>, vector<1x64xf32> -> vector<1x64xf32>
    %17 = arith.addf %13, %16 : vector<1x64xf32>
    %c0_21 = arith.constant 0 : index
    %c0_22 = arith.constant 0 : index
    %18 = vector.load %arg9[%c0_21, %c0_22] : memref<1x64xf32, #tpu.memory_space<vmem>>, vector<1x64xf32>
    tpu.vector_store %arg9[%c0_21, %c0_22], %17 {strides = array<i32>} : memref<1x64xf32, #tpu.memory_space<vmem>>, vector<1x64xf32>,
    %c0_23 = arith.constant 0 : index
    %c0_24 = arith.constant 0 : index
    %c4 = arith.constant 4 : index
    %c0_25 = arith.constant 0 : index
    %19 = vector.load %arg3[%c0_23, %c0_24, %c4, %c0_25] : memref<1x1x5x64xbf16, #tpu.memory_space<vmem>>, vector<1x1x1x64xbf16>
    %20 = vector.shape_cast %19 : vector<1x1x1x64xbf16> to vector<1x64xbf16>
    %c0_26 = arith.constant 0 : index
    %c0_27 = arith.constant 0 : index
    %21 = vector.load %arg9[%c0_26, %c0_27] : memref<1x64xf32, #tpu.memory_space<vmem>>, vector<1x64xf32>
    %c0_28 = arith.constant 0 : index
    %c2_29 = arith.constant 2 : index
    %c0_30 = arith.constant 0 : index
    %c0_31 = arith.constant 0 : index
    %22 = vector.load %arg4[%c0_28, %c2_29, %c0_30, %c0_31] : memref<1x3x64x64xbf16, #tpu.memory_space<vmem>>, vector<1x1x64x64xbf16>
    %23 = vector.shape_cast %22 : vector<1x1x64x64xbf16> to vector<64x64xbf16>
    %cst_32 = arith.constant dense<0.000000e+00> : vector<1x64xf32>
    %24 = tpu.matmul %20, %23, %cst_32 {dimension_numbers = #tpu.dot_dimension_numbers<[1], [0], [0], [1], [0, 0, 1, 1], [], []>} : vector<1x64xbf16>, vector<64x64xbf16>, vector<1x64xf32> -> vector<1x64xf32>
    %25 = arith.addf %21, %24 : vector<1x64xf32>
    %c0_33 = arith.constant 0 : index
    %c0_34 = arith.constant 0 : index
    %26 = vector.load %arg9[%c0_33, %c0_34] : memref<1x64xf32, #tpu.memory_space<vmem>>, vector<1x64xf32>
    tpu.vector_store %arg9[%c0_33, %c0_34], %25 {strides = array<i32>} : memref<1x64xf32, #tpu.memory_space<vmem>>, vector<1x64xf32>,
    %c2_i32 = arith.constant 2 : i32
    %27 = arith.cmpi eq, %arg2, %c2_i32 : i32
    %28 = arith.extui %27 : i1 to i32
    %c0_i32_35 = arith.constant 0 : i32
    %29 = arith.cmpi ne, %28, %c0_i32_35 : i32
    scf.if %29 {
      %c0_36 = arith.constant 0 : index
      %c0_37 = arith.constant 0 : index
      %30 = vector.load %arg9[%c0_36, %c0_37] : memref<1x64xf32, #tpu.memory_space<vmem>>, vector<1x64xf32>
      %c0_38 = arith.constant 0 : index
      %c0_39 = arith.constant 0 : index
      %31 = vector.load %arg5[%c0_38, %c0_39] : memref<1x64xf32, #tpu.memory_space<vmem>>, vector<1x64xf32>
      %32 = arith.mulf %30, %31 : vector<1x64xf32>
      %c0_40 = arith.constant 0 : index
      %c0_41 = arith.constant 0 : index
      %33 = vector.load %arg6[%c0_40, %c0_41] : memref<1x64xf32, #tpu.memory_space<vmem>>, vector<1x64xf32>
      %34 = arith.addf %32, %33 : vector<1x64xf32>
      %c0_42 = arith.constant 0 : index
      %c0_43 = arith.constant 0 : index
      %c0_44 = arith.constant 0 : index
      %c0_45 = arith.constant 0 : index
      %35 = vector.load %arg7[%c0_42, %c0_43, %c0_44, %c0_45] : memref<1x1x1x64xbf16, #tpu.memory_space<vmem>>, vector<1x1x1x64xbf16>
      %36 = vector.shape_cast %35 : vector<1x1x1x64xbf16> to vector<1x64xbf16>
      %37 = arith.extf %36 : vector<1x64xbf16> to vector<1x64xf32>
      %38 = arith.addf %34, %37 : vector<1x64xf32>
      %cst_46 = arith.constant 0.000000e+00 : f32
      %39 = vector.broadcast %cst_46 : f32 to vector<1x64xf32>
      %40 = arith.maximumf %38, %39 : vector<1x64xf32>
      %41 = arith.truncf %40 : vector<1x64xf32> to vector<1x64xbf16>
      %c0_47 = arith.constant 0 : index
      %c0_48 = arith.constant 0 : index
      %c0_49 = arith.constant 0 : index
      %c0_50 = arith.constant 0 : index
      %42 = vector.load %arg8[%c0_47, %c0_48, %c0_49, %c0_50] : memref<1x1x1x64xbf16, #tpu.memory_space<vmem>>, vector<1x1x1x64xbf16>
      %43 = vector.shape_cast %42 : vector<1x1x1x64xbf16> to vector<1x64xbf16>
      %44 = vector.shape_cast %41 : vector<1x64xbf16> to vector<1x1x1x64xbf16>
      tpu.vector_store %arg8[%c0_47, %c0_48, %c0_49, %c0_50], %44 {strides = array<i32>} : memref<1x1x1x64xbf16, #tpu.memory_space<vmem>>, vector<1x1x1x64xbf16>,
    } else {
    }
    return
  }
  func.func @transform_0(%arg0: i32, %arg1: i32, %arg2: i32) -> (i32, i32, i32, i32) {
    %c2_i32 = arith.constant 2 : i32
    %0 = arith.muli %arg2, %c2_i32 : i32
    %1 = arith.addi %arg1, %0 : i32
    %c0_i32 = arith.constant 0 : i32
    %c0_i32_0 = arith.constant 0 : i32
    %c0_i32_1 = arith.constant 0 : i32
    return %arg0, %1, %c0_i32, %c0_i32_0 : i32, i32, i32, i32
  }
  func.func @transform_1(%arg0: i32, %arg1: i32, %arg2: i32) -> (i32, i32, i32, i32) {
    %c0_i32 = arith.constant 0 : i32
    %c0_i32_0 = arith.constant 0 : i32
    %c0_i32_1 = arith.constant 0 : i32
    %c0_i32_2 = arith.constant 0 : i32
    return %arg2, %c0_i32, %c0_i32_0, %c0_i32_1 : i32, i32, i32, i32
  }
  func.func @transform_2(%arg0: i32, %arg1: i32, %arg2: i32) -> (i32, i32) {
    %c0_i32 = arith.constant 0 : i32
    %c0_i32_0 = arith.constant 0 : i32
    %c0_i32_1 = arith.constant 0 : i32
    return %c0_i32, %c0_i32_0 : i32, i32
  }
  func.func @transform_3(%arg0: i32, %arg1: i32, %arg2: i32) -> (i32, i32) {
    %c0_i32 = arith.constant 0 : i32
    %c0_i32_0 = arith.constant 0 : i32
    %c0_i32_1 = arith.constant 0 : i32
    return %c0_i32, %c0_i32_0 : i32, i32
  }
  func.func @transform_4(%arg0: i32, %arg1: i32, %arg2: i32) -> (i32, i32, i32, i32) {
    %c0_i32 = arith.constant 0 : i32
    %c0_i32_0 = arith.constant 0 : i32
    %c0_i32_1 = arith.constant 0 : i32
    return %arg0, %arg1, %c0_i32, %c0_i32_0 : i32, i32, i32, i32
  }
  func.func @transform_5(%arg0: i32, %arg1: i32, %arg2: i32) -> (i32, i32, i32, i32) {
    %c0_i32 = arith.constant 0 : i32
    %c0_i32_0 = arith.constant 0 : i32
    %c0_i32_1 = arith.constant 0 : i32
    return %arg0, %arg1, %c0_i32, %c0_i32_0 : i32, i32, i32, i32
  }
}

module attributes {stable_mosaic.version = 11 : i64} {
  func.func @_mm_kernel(%arg0: i32, %arg1: memref<8x64xbf16, #tpu.memory_space<vmem>>, %arg2: memref<64x3xbf16, #tpu.memory_space<vmem>>, %arg3: memref<1x3xf32, #tpu.memory_space<vmem>>, %arg4: memref<1x3xf32, #tpu.memory_space<vmem>>, %arg5: memref<8x3xbf16, #tpu.memory_space<vmem>>) attributes {dimension_semantics = [#tpu.dimension_semantics<parallel>], iteration_bounds = array<i64: 1>, scalar_prefetch = 0 : i64, scratch_operands = 0 : i64, tpu.core_type = #tpu.core_type<tc>, window_params = [{transform_indices = @transform_0, window_bounds = array<i64: 8, 64>}, {pipeline_mode = #tpu.pipeline_mode<synchronous>, transform_indices = @transform_1, window_bounds = array<i64: 64, 3>}, {pipeline_mode = #tpu.pipeline_mode<synchronous>, transform_indices = @transform_2, window_bounds = array<i64: 1, 3>}, {pipeline_mode = #tpu.pipeline_mode<synchronous>, transform_indices = @transform_3, window_bounds = array<i64: 1, 3>}, {transform_indices = @transform_4, window_bounds = array<i64: 8, 3>}]} {
    %c0 = arith.constant 0 : index
    %c0_0 = arith.constant 0 : index
    %0 = vector.load %arg1[%c0, %c0_0] : memref<8x64xbf16, #tpu.memory_space<vmem>>, vector<8x64xbf16>
    %c0_1 = arith.constant 0 : index
    %c0_2 = arith.constant 0 : index
    %1 = vector.load %arg2[%c0_1, %c0_2] : memref<64x3xbf16, #tpu.memory_space<vmem>>, vector<64x3xbf16>
    %cst = arith.constant dense<0.000000e+00> : vector<8x3xf32>
    %2 = tpu.matmul %0, %1, %cst {dimension_numbers = #tpu.dot_dimension_numbers<[1], [0], [0], [1], [0, 0, 1, 1], [], []>} : vector<8x64xbf16>, vector<64x3xbf16>, vector<8x3xf32> -> vector<8x3xf32>
    %c0_3 = arith.constant 0 : index
    %c0_4 = arith.constant 0 : index
    %3 = vector.load %arg3[%c0_3, %c0_4] : memref<1x3xf32, #tpu.memory_space<vmem>>, vector<1x3xf32>
    %4 = vector.broadcast %3 : vector<1x3xf32> to vector<8x3xf32>
    %5 = arith.mulf %2, %4 : vector<8x3xf32>
    %c0_5 = arith.constant 0 : index
    %c0_6 = arith.constant 0 : index
    %6 = vector.load %arg4[%c0_5, %c0_6] : memref<1x3xf32, #tpu.memory_space<vmem>>, vector<1x3xf32>
    %7 = vector.broadcast %6 : vector<1x3xf32> to vector<8x3xf32>
    %8 = arith.addf %5, %7 : vector<8x3xf32>
    %9 = arith.truncf %8 : vector<8x3xf32> to vector<8x3xbf16>
    %c0_7 = arith.constant 0 : index
    %c0_8 = arith.constant 0 : index
    %10 = vector.load %arg5[%c0_7, %c0_8] : memref<8x3xbf16, #tpu.memory_space<vmem>>, vector<8x3xbf16>
    tpu.vector_store %arg5[%c0_7, %c0_8], %9 {strides = array<i32>} : memref<8x3xbf16, #tpu.memory_space<vmem>>, vector<8x3xbf16>,
    return
  }
  func.func @transform_0(%arg0: i32) -> (i32, i32) {
    %c0_i32 = arith.constant 0 : i32
    %c0_i32_0 = arith.constant 0 : i32
    return %arg0, %c0_i32 : i32, i32
  }
  func.func @transform_1(%arg0: i32) -> (i32, i32) {
    %c0_i32 = arith.constant 0 : i32
    %c0_i32_0 = arith.constant 0 : i32
    %c0_i32_1 = arith.constant 0 : i32
    return %c0_i32, %c0_i32_0 : i32, i32
  }
  func.func @transform_2(%arg0: i32) -> (i32, i32) {
    %c0_i32 = arith.constant 0 : i32
    %c0_i32_0 = arith.constant 0 : i32
    %c0_i32_1 = arith.constant 0 : i32
    return %c0_i32, %c0_i32_0 : i32, i32
  }
  func.func @transform_3(%arg0: i32) -> (i32, i32) {
    %c0_i32 = arith.constant 0 : i32
    %c0_i32_0 = arith.constant 0 : i32
    %c0_i32_1 = arith.constant 0 : i32
    return %c0_i32, %c0_i32_0 : i32, i32
  }
  func.func @transform_4(%arg0: i32) -> (i32, i32) {
    %c0_i32 = arith.constant 0 : i32
    %c0_i32_0 = arith.constant 0 : i32
    return %arg0, %c0_i32 : i32, i32
  }
}

module attributes {stable_mosaic.version = 11 : i64} {
  func.func @_interp_kernel(%arg0: i32, %arg1: memref<2x1xbf16, #tpu.memory_space<vmem>>, %arg2: memref<4x1x3xbf16, #tpu.memory_space<vmem>>, %arg3: memref<4x2x3xbf16, #tpu.memory_space<vmem>>) attributes {dimension_semantics = [#tpu.dimension_semantics<parallel>], iteration_bounds = array<i64: 1>, scalar_prefetch = 0 : i64, scratch_operands = 0 : i64, tpu.core_type = #tpu.core_type<tc>, window_params = [{pipeline_mode = #tpu.pipeline_mode<synchronous>, transform_indices = @transform_0, window_bounds = array<i64: 2, 1>}, {transform_indices = @transform_1, window_bounds = array<i64: 4, 1, 3>}, {transform_indices = @transform_2, window_bounds = array<i64: 4, 2, 3>}]} {
    %c0 = arith.constant 0 : index
    %c0_0 = arith.constant 0 : index
    %0 = vector.load %arg1[%c0, %c0_0] : memref<2x1xbf16, #tpu.memory_space<vmem>>, vector<2x1xbf16>
    %c0_1 = arith.constant 0 : index
    %c0_2 = arith.constant 0 : index
    %c0_3 = arith.constant 0 : index
    %1 = vector.load %arg2[%c0_1, %c0_2, %c0_3] : memref<4x1x3xbf16, #tpu.memory_space<vmem>>, vector<1x1x3xbf16>
    %2 = vector.shape_cast %1 : vector<1x1x3xbf16> to vector<1x3xbf16>
    %3 = arith.extf %0 : vector<2x1xbf16> to vector<2x1xf32>
    %4 = arith.extf %2 : vector<1x3xbf16> to vector<1x3xf32>
    %5 = vector.broadcast %3 : vector<2x1xf32> to vector<2x3xf32>
    %6 = vector.broadcast %4 : vector<1x3xf32> to vector<2x3xf32>
    %7 = arith.mulf %5, %6 : vector<2x3xf32>
    %8 = arith.truncf %7 : vector<2x3xf32> to vector<2x3xbf16>
    %c0_4 = arith.constant 0 : index
    %c0_5 = arith.constant 0 : index
    %c0_6 = arith.constant 0 : index
    %9 = vector.load %arg3[%c0_4, %c0_5, %c0_6] : memref<4x2x3xbf16, #tpu.memory_space<vmem>>, vector<1x2x3xbf16>
    %10 = vector.shape_cast %9 : vector<1x2x3xbf16> to vector<2x3xbf16>
    %11 = vector.shape_cast %8 : vector<2x3xbf16> to vector<1x2x3xbf16>
    tpu.vector_store %arg3[%c0_4, %c0_5, %c0_6], %11 {strides = array<i32>} : memref<4x2x3xbf16, #tpu.memory_space<vmem>>, vector<1x2x3xbf16>,
    %c1 = arith.constant 1 : index
    %c0_7 = arith.constant 0 : index
    %c0_8 = arith.constant 0 : index
    %12 = vector.load %arg2[%c1, %c0_7, %c0_8] : memref<4x1x3xbf16, #tpu.memory_space<vmem>>, vector<1x1x3xbf16>
    %13 = vector.shape_cast %12 : vector<1x1x3xbf16> to vector<1x3xbf16>
    %14 = arith.extf %0 : vector<2x1xbf16> to vector<2x1xf32>
    %15 = arith.extf %13 : vector<1x3xbf16> to vector<1x3xf32>
    %16 = vector.broadcast %14 : vector<2x1xf32> to vector<2x3xf32>
    %17 = vector.broadcast %15 : vector<1x3xf32> to vector<2x3xf32>
    %18 = arith.mulf %16, %17 : vector<2x3xf32>
    %19 = arith.truncf %18 : vector<2x3xf32> to vector<2x3xbf16>
    %c1_9 = arith.constant 1 : index
    %c0_10 = arith.constant 0 : index
    %c0_11 = arith.constant 0 : index
    %20 = vector.load %arg3[%c1_9, %c0_10, %c0_11] : memref<4x2x3xbf16, #tpu.memory_space<vmem>>, vector<1x2x3xbf16>
    %21 = vector.shape_cast %20 : vector<1x2x3xbf16> to vector<2x3xbf16>
    %22 = vector.shape_cast %19 : vector<2x3xbf16> to vector<1x2x3xbf16>
    tpu.vector_store %arg3[%c1_9, %c0_10, %c0_11], %22 {strides = array<i32>} : memref<4x2x3xbf16, #tpu.memory_space<vmem>>, vector<1x2x3xbf16>,
    %c2 = arith.constant 2 : index
    %c0_12 = arith.constant 0 : index
    %c0_13 = arith.constant 0 : index
    %23 = vector.load %arg2[%c2, %c0_12, %c0_13] : memref<4x1x3xbf16, #tpu.memory_space<vmem>>, vector<1x1x3xbf16>
    %24 = vector.shape_cast %23 : vector<1x1x3xbf16> to vector<1x3xbf16>
    %25 = arith.extf %0 : vector<2x1xbf16> to vector<2x1xf32>
    %26 = arith.extf %24 : vector<1x3xbf16> to vector<1x3xf32>
    %27 = vector.broadcast %25 : vector<2x1xf32> to vector<2x3xf32>
    %28 = vector.broadcast %26 : vector<1x3xf32> to vector<2x3xf32>
    %29 = arith.mulf %27, %28 : vector<2x3xf32>
    %30 = arith.truncf %29 : vector<2x3xf32> to vector<2x3xbf16>
    %c2_14 = arith.constant 2 : index
    %c0_15 = arith.constant 0 : index
    %c0_16 = arith.constant 0 : index
    %31 = vector.load %arg3[%c2_14, %c0_15, %c0_16] : memref<4x2x3xbf16, #tpu.memory_space<vmem>>, vector<1x2x3xbf16>
    %32 = vector.shape_cast %31 : vector<1x2x3xbf16> to vector<2x3xbf16>
    %33 = vector.shape_cast %30 : vector<2x3xbf16> to vector<1x2x3xbf16>
    tpu.vector_store %arg3[%c2_14, %c0_15, %c0_16], %33 {strides = array<i32>} : memref<4x2x3xbf16, #tpu.memory_space<vmem>>, vector<1x2x3xbf16>,
    %c3 = arith.constant 3 : index
    %c0_17 = arith.constant 0 : index
    %c0_18 = arith.constant 0 : index
    %34 = vector.load %arg2[%c3, %c0_17, %c0_18] : memref<4x1x3xbf16, #tpu.memory_space<vmem>>, vector<1x1x3xbf16>
    %35 = vector.shape_cast %34 : vector<1x1x3xbf16> to vector<1x3xbf16>
    %36 = arith.extf %0 : vector<2x1xbf16> to vector<2x1xf32>
    %37 = arith.extf %35 : vector<1x3xbf16> to vector<1x3xf32>
    %38 = vector.broadcast %36 : vector<2x1xf32> to vector<2x3xf32>
    %39 = vector.broadcast %37 : vector<1x3xf32> to vector<2x3xf32>
    %40 = arith.mulf %38, %39 : vector<2x3xf32>
    %41 = arith.truncf %40 : vector<2x3xf32> to vector<2x3xbf16>
    %c3_19 = arith.constant 3 : index
    %c0_20 = arith.constant 0 : index
    %c0_21 = arith.constant 0 : index
    %42 = vector.load %arg3[%c3_19, %c0_20, %c0_21] : memref<4x2x3xbf16, #tpu.memory_space<vmem>>, vector<1x2x3xbf16>
    %43 = vector.shape_cast %42 : vector<1x2x3xbf16> to vector<2x3xbf16>
    %44 = vector.shape_cast %41 : vector<2x3xbf16> to vector<1x2x3xbf16>
    tpu.vector_store %arg3[%c3_19, %c0_20, %c0_21], %44 {strides = array<i32>} : memref<4x2x3xbf16, #tpu.memory_space<vmem>>, vector<1x2x3xbf16>,
    return
  }
  func.func @transform_0(%arg0: i32) -> (i32, i32) {
    %c0_i32 = arith.constant 0 : i32
    %c0_i32_0 = arith.constant 0 : i32
    %c0_i32_1 = arith.constant 0 : i32
    return %c0_i32, %c0_i32_0 : i32, i32
  }
  func.func @transform_1(%arg0: i32) -> (i32, i32, i32) {
    %c0_i32 = arith.constant 0 : i32
    %c0_i32_0 = arith.constant 0 : i32
    %c0_i32_1 = arith.constant 0 : i32
    return %arg0, %c0_i32, %c0_i32_0 : i32, i32, i32
  }
  func.func @transform_2(%arg0: i32) -> (i32, i32, i32) {
    %c0_i32 = arith.constant 0 : i32
    %c0_i32_0 = arith.constant 0 : i32
    %c0_i32_1 = arith.constant 0 : i32
    return %arg0, %c0_i32, %c0_i32_0 : i32, i32, i32
  }
}

module attributes {stable_mosaic.version = 11 : i64} {
  func.func @_mm_res_kernel(%arg0: i32, %arg1: memref<8x32xbf16, #tpu.memory_space<vmem>>, %arg2: memref<32x3xbf16, #tpu.memory_space<vmem>>, %arg3: memref<1x3xf32, #tpu.memory_space<vmem>>, %arg4: memref<1x3xf32, #tpu.memory_space<vmem>>, %arg5: memref<8x3xbf16, #tpu.memory_space<vmem>>, %arg6: memref<8x3xbf16, #tpu.memory_space<vmem>>) attributes {dimension_semantics = [#tpu.dimension_semantics<parallel>], iteration_bounds = array<i64: 1>, scalar_prefetch = 0 : i64, scratch_operands = 0 : i64, tpu.core_type = #tpu.core_type<tc>, window_params = [{transform_indices = @transform_0, window_bounds = array<i64: 8, 32>}, {pipeline_mode = #tpu.pipeline_mode<synchronous>, transform_indices = @transform_1, window_bounds = array<i64: 32, 3>}, {pipeline_mode = #tpu.pipeline_mode<synchronous>, transform_indices = @transform_2, window_bounds = array<i64: 1, 3>}, {pipeline_mode = #tpu.pipeline_mode<synchronous>, transform_indices = @transform_3, window_bounds = array<i64: 1, 3>}, {transform_indices = @transform_4, window_bounds = array<i64: 8, 3>}, {transform_indices = @transform_5, window_bounds = array<i64: 8, 3>}]} {
    %c0 = arith.constant 0 : index
    %c0_0 = arith.constant 0 : index
    %0 = vector.load %arg1[%c0, %c0_0] : memref<8x32xbf16, #tpu.memory_space<vmem>>, vector<8x32xbf16>
    %c0_1 = arith.constant 0 : index
    %c0_2 = arith.constant 0 : index
    %1 = vector.load %arg2[%c0_1, %c0_2] : memref<32x3xbf16, #tpu.memory_space<vmem>>, vector<32x3xbf16>
    %cst = arith.constant dense<0.000000e+00> : vector<8x3xf32>
    %2 = tpu.matmul %0, %1, %cst {dimension_numbers = #tpu.dot_dimension_numbers<[1], [0], [0], [1], [0, 0, 1, 1], [], []>} : vector<8x32xbf16>, vector<32x3xbf16>, vector<8x3xf32> -> vector<8x3xf32>
    %c0_3 = arith.constant 0 : index
    %c0_4 = arith.constant 0 : index
    %3 = vector.load %arg3[%c0_3, %c0_4] : memref<1x3xf32, #tpu.memory_space<vmem>>, vector<1x3xf32>
    %4 = vector.broadcast %3 : vector<1x3xf32> to vector<8x3xf32>
    %5 = arith.mulf %2, %4 : vector<8x3xf32>
    %c0_5 = arith.constant 0 : index
    %c0_6 = arith.constant 0 : index
    %6 = vector.load %arg4[%c0_5, %c0_6] : memref<1x3xf32, #tpu.memory_space<vmem>>, vector<1x3xf32>
    %7 = vector.broadcast %6 : vector<1x3xf32> to vector<8x3xf32>
    %8 = arith.addf %5, %7 : vector<8x3xf32>
    %c0_7 = arith.constant 0 : index
    %c0_8 = arith.constant 0 : index
    %9 = vector.load %arg5[%c0_7, %c0_8] : memref<8x3xbf16, #tpu.memory_space<vmem>>, vector<8x3xbf16>
    %10 = arith.extf %9 : vector<8x3xbf16> to vector<8x3xf32>
    %11 = arith.addf %8, %10 : vector<8x3xf32>
    %12 = arith.truncf %11 : vector<8x3xf32> to vector<8x3xbf16>
    %c0_9 = arith.constant 0 : index
    %c0_10 = arith.constant 0 : index
    %13 = vector.load %arg6[%c0_9, %c0_10] : memref<8x3xbf16, #tpu.memory_space<vmem>>, vector<8x3xbf16>
    tpu.vector_store %arg6[%c0_9, %c0_10], %12 {strides = array<i32>} : memref<8x3xbf16, #tpu.memory_space<vmem>>, vector<8x3xbf16>,
    return
  }
  func.func @transform_0(%arg0: i32) -> (i32, i32) {
    %c0_i32 = arith.constant 0 : i32
    %c0_i32_0 = arith.constant 0 : i32
    return %arg0, %c0_i32 : i32, i32
  }
  func.func @transform_1(%arg0: i32) -> (i32, i32) {
    %c0_i32 = arith.constant 0 : i32
    %c0_i32_0 = arith.constant 0 : i32
    %c0_i32_1 = arith.constant 0 : i32
    return %c0_i32, %c0_i32_0 : i32, i32
  }
  func.func @transform_2(%arg0: i32) -> (i32, i32) {
    %c0_i32 = arith.constant 0 : i32
    %c0_i32_0 = arith.constant 0 : i32
    %c0_i32_1 = arith.constant 0 : i32
    return %c0_i32, %c0_i32_0 : i32, i32
  }
  func.func @transform_3(%arg0: i32) -> (i32, i32) {
    %c0_i32 = arith.constant 0 : i32
    %c0_i32_0 = arith.constant 0 : i32
    %c0_i32_1 = arith.constant 0 : i32
    return %c0_i32, %c0_i32_0 : i32, i32
  }
  func.func @transform_4(%arg0: i32) -> (i32, i32) {
    %c0_i32 = arith.constant 0 : i32
    %c0_i32_0 = arith.constant 0 : i32
    return %arg0, %c0_i32 : i32, i32
  }
  func.func @transform_5(%arg0: i32) -> (i32, i32) {
    %c0_i32 = arith.constant 0 : i32
    %c0_i32_0 = arith.constant 0 : i32
    return %arg0, %c0_i32 : i32, i32
  }
}

module attributes {stable_mosaic.version = 11 : i64} {
  func.func @_interp_kernel(%arg0: i32, %arg1: memref<2x1xbf16, #tpu.memory_space<vmem>>, %arg2: memref<2x1x3xbf16, #tpu.memory_space<vmem>>, %arg3: memref<2x2x3xbf16, #tpu.memory_space<vmem>>) attributes {dimension_semantics = [#tpu.dimension_semantics<parallel>], iteration_bounds = array<i64: 1>, scalar_prefetch = 0 : i64, scratch_operands = 0 : i64, tpu.core_type = #tpu.core_type<tc>, window_params = [{pipeline_mode = #tpu.pipeline_mode<synchronous>, transform_indices = @transform_0, window_bounds = array<i64: 2, 1>}, {transform_indices = @transform_1, window_bounds = array<i64: 2, 1, 3>}, {transform_indices = @transform_2, window_bounds = array<i64: 2, 2, 3>}]} {
    %c0 = arith.constant 0 : index
    %c0_0 = arith.constant 0 : index
    %0 = vector.load %arg1[%c0, %c0_0] : memref<2x1xbf16, #tpu.memory_space<vmem>>, vector<2x1xbf16>
    %c0_1 = arith.constant 0 : index
    %c0_2 = arith.constant 0 : index
    %c0_3 = arith.constant 0 : index
    %1 = vector.load %arg2[%c0_1, %c0_2, %c0_3] : memref<2x1x3xbf16, #tpu.memory_space<vmem>>, vector<1x1x3xbf16>
    %2 = vector.shape_cast %1 : vector<1x1x3xbf16> to vector<1x3xbf16>
    %3 = arith.extf %0 : vector<2x1xbf16> to vector<2x1xf32>
    %4 = arith.extf %2 : vector<1x3xbf16> to vector<1x3xf32>
    %5 = vector.broadcast %3 : vector<2x1xf32> to vector<2x3xf32>
    %6 = vector.broadcast %4 : vector<1x3xf32> to vector<2x3xf32>
    %7 = arith.mulf %5, %6 : vector<2x3xf32>
    %8 = arith.truncf %7 : vector<2x3xf32> to vector<2x3xbf16>
    %c0_4 = arith.constant 0 : index
    %c0_5 = arith.constant 0 : index
    %c0_6 = arith.constant 0 : index
    %9 = vector.load %arg3[%c0_4, %c0_5, %c0_6] : memref<2x2x3xbf16, #tpu.memory_space<vmem>>, vector<1x2x3xbf16>
    %10 = vector.shape_cast %9 : vector<1x2x3xbf16> to vector<2x3xbf16>
    %11 = vector.shape_cast %8 : vector<2x3xbf16> to vector<1x2x3xbf16>
    tpu.vector_store %arg3[%c0_4, %c0_5, %c0_6], %11 {strides = array<i32>} : memref<2x2x3xbf16, #tpu.memory_space<vmem>>, vector<1x2x3xbf16>,
    %c1 = arith.constant 1 : index
    %c0_7 = arith.constant 0 : index
    %c0_8 = arith.constant 0 : index
    %12 = vector.load %arg2[%c1, %c0_7, %c0_8] : memref<2x1x3xbf16, #tpu.memory_space<vmem>>, vector<1x1x3xbf16>
    %13 = vector.shape_cast %12 : vector<1x1x3xbf16> to vector<1x3xbf16>
    %14 = arith.extf %0 : vector<2x1xbf16> to vector<2x1xf32>
    %15 = arith.extf %13 : vector<1x3xbf16> to vector<1x3xf32>
    %16 = vector.broadcast %14 : vector<2x1xf32> to vector<2x3xf32>
    %17 = vector.broadcast %15 : vector<1x3xf32> to vector<2x3xf32>
    %18 = arith.mulf %16, %17 : vector<2x3xf32>
    %19 = arith.truncf %18 : vector<2x3xf32> to vector<2x3xbf16>
    %c1_9 = arith.constant 1 : index
    %c0_10 = arith.constant 0 : index
    %c0_11 = arith.constant 0 : index
    %20 = vector.load %arg3[%c1_9, %c0_10, %c0_11] : memref<2x2x3xbf16, #tpu.memory_space<vmem>>, vector<1x2x3xbf16>
    %21 = vector.shape_cast %20 : vector<1x2x3xbf16> to vector<2x3xbf16>
    %22 = vector.shape_cast %19 : vector<2x3xbf16> to vector<1x2x3xbf16>
    tpu.vector_store %arg3[%c1_9, %c0_10, %c0_11], %22 {strides = array<i32>} : memref<2x2x3xbf16, #tpu.memory_space<vmem>>, vector<1x2x3xbf16>,
    return
  }
  func.func @transform_0(%arg0: i32) -> (i32, i32) {
    %c0_i32 = arith.constant 0 : i32
    %c0_i32_0 = arith.constant 0 : i32
    %c0_i32_1 = arith.constant 0 : i32
    return %c0_i32, %c0_i32_0 : i32, i32
  }
  func.func @transform_1(%arg0: i32) -> (i32, i32, i32) {
    %c0_i32 = arith.constant 0 : i32
    %c0_i32_0 = arith.constant 0 : i32
    %c0_i32_1 = arith.constant 0 : i32
    return %arg0, %c0_i32, %c0_i32_0 : i32, i32, i32
  }
  func.func @transform_2(%arg0: i32) -> (i32, i32, i32) {
    %c0_i32 = arith.constant 0 : i32
    %c0_i32_0 = arith.constant 0 : i32
    %c0_i32_1 = arith.constant 0 : i32
    return %arg0, %c0_i32, %c0_i32_0 : i32, i32, i32
  }
}

module attributes {stable_mosaic.version = 11 : i64} {
  func.func @_interp_kernel(%arg0: i32, %arg1: memref<4x2xbf16, #tpu.memory_space<vmem>>, %arg2: memref<2x2x6xbf16, #tpu.memory_space<vmem>>, %arg3: memref<2x4x6xbf16, #tpu.memory_space<vmem>>) attributes {dimension_semantics = [#tpu.dimension_semantics<parallel>], iteration_bounds = array<i64: 1>, scalar_prefetch = 0 : i64, scratch_operands = 0 : i64, tpu.core_type = #tpu.core_type<tc>, window_params = [{pipeline_mode = #tpu.pipeline_mode<synchronous>, transform_indices = @transform_0, window_bounds = array<i64: 4, 2>}, {transform_indices = @transform_1, window_bounds = array<i64: 2, 2, 6>}, {transform_indices = @transform_2, window_bounds = array<i64: 2, 4, 6>}]} {
    %c0 = arith.constant 0 : index
    %c0_0 = arith.constant 0 : index
    %0 = vector.load %arg1[%c0, %c0_0] : memref<4x2xbf16, #tpu.memory_space<vmem>>, vector<4x2xbf16>
    %c0_1 = arith.constant 0 : index
    %c0_2 = arith.constant 0 : index
    %c0_3 = arith.constant 0 : index
    %1 = vector.load %arg2[%c0_1, %c0_2, %c0_3] : memref<2x2x6xbf16, #tpu.memory_space<vmem>>, vector<1x2x6xbf16>
    %2 = vector.shape_cast %1 : vector<1x2x6xbf16> to vector<2x6xbf16>
    %cst = arith.constant dense<0.000000e+00> : vector<4x6xf32>
    %3 = tpu.matmul %0, %2, %cst {dimension_numbers = #tpu.dot_dimension_numbers<[1], [0], [0], [1], [0, 0, 1, 1], [], []>} : vector<4x2xbf16>, vector<2x6xbf16>, vector<4x6xf32> -> vector<4x6xf32>
    %4 = arith.truncf %3 : vector<4x6xf32> to vector<4x6xbf16>
    %c0_4 = arith.constant 0 : index
    %c0_5 = arith.constant 0 : index
    %c0_6 = arith.constant 0 : index
    %5 = vector.load %arg3[%c0_4, %c0_5, %c0_6] : memref<2x4x6xbf16, #tpu.memory_space<vmem>>, vector<1x4x6xbf16>
    %6 = vector.shape_cast %5 : vector<1x4x6xbf16> to vector<4x6xbf16>
    %7 = vector.shape_cast %4 : vector<4x6xbf16> to vector<1x4x6xbf16>
    tpu.vector_store %arg3[%c0_4, %c0_5, %c0_6], %7 {strides = array<i32>} : memref<2x4x6xbf16, #tpu.memory_space<vmem>>, vector<1x4x6xbf16>,
    %c1 = arith.constant 1 : index
    %c0_7 = arith.constant 0 : index
    %c0_8 = arith.constant 0 : index
    %8 = vector.load %arg2[%c1, %c0_7, %c0_8] : memref<2x2x6xbf16, #tpu.memory_space<vmem>>, vector<1x2x6xbf16>
    %9 = vector.shape_cast %8 : vector<1x2x6xbf16> to vector<2x6xbf16>
    %cst_9 = arith.constant dense<0.000000e+00> : vector<4x6xf32>
    %10 = tpu.matmul %0, %9, %cst_9 {dimension_numbers = #tpu.dot_dimension_numbers<[1], [0], [0], [1], [0, 0, 1, 1], [], []>} : vector<4x2xbf16>, vector<2x6xbf16>, vector<4x6xf32> -> vector<4x6xf32>
    %11 = arith.truncf %10 : vector<4x6xf32> to vector<4x6xbf16>
    %c1_10 = arith.constant 1 : index
    %c0_11 = arith.constant 0 : index
    %c0_12 = arith.constant 0 : index
    %12 = vector.load %arg3[%c1_10, %c0_11, %c0_12] : memref<2x4x6xbf16, #tpu.memory_space<vmem>>, vector<1x4x6xbf16>
    %13 = vector.shape_cast %12 : vector<1x4x6xbf16> to vector<4x6xbf16>
    %14 = vector.shape_cast %11 : vector<4x6xbf16> to vector<1x4x6xbf16>
    tpu.vector_store %arg3[%c1_10, %c0_11, %c0_12], %14 {strides = array<i32>} : memref<2x4x6xbf16, #tpu.memory_space<vmem>>, vector<1x4x6xbf16>,
    return
  }
  func.func @transform_0(%arg0: i32) -> (i32, i32) {
    %c0_i32 = arith.constant 0 : i32
    %c0_i32_0 = arith.constant 0 : i32
    %c0_i32_1 = arith.constant 0 : i32
    return %c0_i32, %c0_i32_0 : i32, i32
  }
  func.func @transform_1(%arg0: i32) -> (i32, i32, i32) {
    %c0_i32 = arith.constant 0 : i32
    %c0_i32_0 = arith.constant 0 : i32
    %c0_i32_1 = arith.constant 0 : i32
    return %arg0, %c0_i32, %c0_i32_0 : i32, i32, i32
  }
  func.func @transform_2(%arg0: i32) -> (i32, i32, i32) {
    %c0_i32 = arith.constant 0 : i32
    %c0_i32_0 = arith.constant 0 : i32
    %c0_i32_1 = arith.constant 0 : i32
    return %arg0, %c0_i32, %c0_i32_0 : i32, i32, i32
  }
}

module attributes {stable_mosaic.version = 11 : i64} {
  func.func @_interp_kernel(%arg0: i32, %arg1: memref<4x2xbf16, #tpu.memory_space<vmem>>, %arg2: memref<8x2x3xbf16, #tpu.memory_space<vmem>>, %arg3: memref<8x4x3xbf16, #tpu.memory_space<vmem>>) attributes {dimension_semantics = [#tpu.dimension_semantics<parallel>], iteration_bounds = array<i64: 1>, scalar_prefetch = 0 : i64, scratch_operands = 0 : i64, tpu.core_type = #tpu.core_type<tc>, window_params = [{pipeline_mode = #tpu.pipeline_mode<synchronous>, transform_indices = @transform_0, window_bounds = array<i64: 4, 2>}, {transform_indices = @transform_1, window_bounds = array<i64: 8, 2, 3>}, {transform_indices = @transform_2, window_bounds = array<i64: 8, 4, 3>}]} {
    %c0 = arith.constant 0 : index
    %c0_0 = arith.constant 0 : index
    %0 = vector.load %arg1[%c0, %c0_0] : memref<4x2xbf16, #tpu.memory_space<vmem>>, vector<4x2xbf16>
    %c0_1 = arith.constant 0 : index
    %c0_2 = arith.constant 0 : index
    %c0_3 = arith.constant 0 : index
    %1 = vector.load %arg2[%c0_1, %c0_2, %c0_3] : memref<8x2x3xbf16, #tpu.memory_space<vmem>>, vector<1x2x3xbf16>
    %2 = vector.shape_cast %1 : vector<1x2x3xbf16> to vector<2x3xbf16>
    %cst = arith.constant dense<0.000000e+00> : vector<4x3xf32>
    %3 = tpu.matmul %0, %2, %cst {dimension_numbers = #tpu.dot_dimension_numbers<[1], [0], [0], [1], [0, 0, 1, 1], [], []>} : vector<4x2xbf16>, vector<2x3xbf16>, vector<4x3xf32> -> vector<4x3xf32>
    %4 = arith.truncf %3 : vector<4x3xf32> to vector<4x3xbf16>
    %c0_4 = arith.constant 0 : index
    %c0_5 = arith.constant 0 : index
    %c0_6 = arith.constant 0 : index
    %5 = vector.load %arg3[%c0_4, %c0_5, %c0_6] : memref<8x4x3xbf16, #tpu.memory_space<vmem>>, vector<1x4x3xbf16>
    %6 = vector.shape_cast %5 : vector<1x4x3xbf16> to vector<4x3xbf16>
    %7 = vector.shape_cast %4 : vector<4x3xbf16> to vector<1x4x3xbf16>
    tpu.vector_store %arg3[%c0_4, %c0_5, %c0_6], %7 {strides = array<i32>} : memref<8x4x3xbf16, #tpu.memory_space<vmem>>, vector<1x4x3xbf16>,
    %c1 = arith.constant 1 : index
    %c0_7 = arith.constant 0 : index
    %c0_8 = arith.constant 0 : index
    %8 = vector.load %arg2[%c1, %c0_7, %c0_8] : memref<8x2x3xbf16, #tpu.memory_space<vmem>>, vector<1x2x3xbf16>
    %9 = vector.shape_cast %8 : vector<1x2x3xbf16> to vector<2x3xbf16>
    %cst_9 = arith.constant dense<0.000000e+00> : vector<4x3xf32>
    %10 = tpu.matmul %0, %9, %cst_9 {dimension_numbers = #tpu.dot_dimension_numbers<[1], [0], [0], [1], [0, 0, 1, 1], [], []>} : vector<4x2xbf16>, vector<2x3xbf16>, vector<4x3xf32> -> vector<4x3xf32>
    %11 = arith.truncf %10 : vector<4x3xf32> to vector<4x3xbf16>
    %c1_10 = arith.constant 1 : index
    %c0_11 = arith.constant 0 : index
    %c0_12 = arith.constant 0 : index
    %12 = vector.load %arg3[%c1_10, %c0_11, %c0_12] : memref<8x4x3xbf16, #tpu.memory_space<vmem>>, vector<1x4x3xbf16>
    %13 = vector.shape_cast %12 : vector<1x4x3xbf16> to vector<4x3xbf16>
    %14 = vector.shape_cast %11 : vector<4x3xbf16> to vector<1x4x3xbf16>
    tpu.vector_store %arg3[%c1_10, %c0_11, %c0_12], %14 {strides = array<i32>} : memref<8x4x3xbf16, #tpu.memory_space<vmem>>, vector<1x4x3xbf16>,
    %c2 = arith.constant 2 : index
    %c0_13 = arith.constant 0 : index
    %c0_14 = arith.constant 0 : index
    %15 = vector.load %arg2[%c2, %c0_13, %c0_14] : memref<8x2x3xbf16, #tpu.memory_space<vmem>>, vector<1x2x3xbf16>
    %16 = vector.shape_cast %15 : vector<1x2x3xbf16> to vector<2x3xbf16>
    %cst_15 = arith.constant dense<0.000000e+00> : vector<4x3xf32>
    %17 = tpu.matmul %0, %16, %cst_15 {dimension_numbers = #tpu.dot_dimension_numbers<[1], [0], [0], [1], [0, 0, 1, 1], [], []>} : vector<4x2xbf16>, vector<2x3xbf16>, vector<4x3xf32> -> vector<4x3xf32>
    %18 = arith.truncf %17 : vector<4x3xf32> to vector<4x3xbf16>
    %c2_16 = arith.constant 2 : index
    %c0_17 = arith.constant 0 : index
    %c0_18 = arith.constant 0 : index
    %19 = vector.load %arg3[%c2_16, %c0_17, %c0_18] : memref<8x4x3xbf16, #tpu.memory_space<vmem>>, vector<1x4x3xbf16>
    %20 = vector.shape_cast %19 : vector<1x4x3xbf16> to vector<4x3xbf16>
    %21 = vector.shape_cast %18 : vector<4x3xbf16> to vector<1x4x3xbf16>
    tpu.vector_store %arg3[%c2_16, %c0_17, %c0_18], %21 {strides = array<i32>} : memref<8x4x3xbf16, #tpu.memory_space<vmem>>, vector<1x4x3xbf16>,
    %c3 = arith.constant 3 : index
    %c0_19 = arith.constant 0 : index
    %c0_20 = arith.constant 0 : index
    %22 = vector.load %arg2[%c3, %c0_19, %c0_20] : memref<8x2x3xbf16, #tpu.memory_space<vmem>>, vector<1x2x3xbf16>
    %23 = vector.shape_cast %22 : vector<1x2x3xbf16> to vector<2x3xbf16>
    %cst_21 = arith.constant dense<0.000000e+00> : vector<4x3xf32>
    %24 = tpu.matmul %0, %23, %cst_21 {dimension_numbers = #tpu.dot_dimension_numbers<[1], [0], [0], [1], [0, 0, 1, 1], [], []>} : vector<4x2xbf16>, vector<2x3xbf16>, vector<4x3xf32> -> vector<4x3xf32>
    %25 = arith.truncf %24 : vector<4x3xf32> to vector<4x3xbf16>
    %c3_22 = arith.constant 3 : index
    %c0_23 = arith.constant 0 : index
    %c0_24 = arith.constant 0 : index
    %26 = vector.load %arg3[%c3_22, %c0_23, %c0_24] : memref<8x4x3xbf16, #tpu.memory_space<vmem>>, vector<1x4x3xbf16>
    %27 = vector.shape_cast %26 : vector<1x4x3xbf16> to vector<4x3xbf16>
    %28 = vector.shape_cast %25 : vector<4x3xbf16> to vector<1x4x3xbf16>
    tpu.vector_store %arg3[%c3_22, %c0_23, %c0_24], %28 {strides = array<i32>} : memref<8x4x3xbf16, #tpu.memory_space<vmem>>, vector<1x4x3xbf16>,
    %c4 = arith.constant 4 : index
    %c0_25 = arith.constant 0 : index
    %c0_26 = arith.constant 0 : index
    %29 = vector.load %arg2[%c4, %c0_25, %c0_26] : memref<8x2x3xbf16, #tpu.memory_space<vmem>>, vector<1x2x3xbf16>
    %30 = vector.shape_cast %29 : vector<1x2x3xbf16> to vector<2x3xbf16>
    %cst_27 = arith.constant dense<0.000000e+00> : vector<4x3xf32>
    %31 = tpu.matmul %0, %30, %cst_27 {dimension_numbers = #tpu.dot_dimension_numbers<[1], [0], [0], [1], [0, 0, 1, 1], [], []>} : vector<4x2xbf16>, vector<2x3xbf16>, vector<4x3xf32> -> vector<4x3xf32>
    %32 = arith.truncf %31 : vector<4x3xf32> to vector<4x3xbf16>
    %c4_28 = arith.constant 4 : index
    %c0_29 = arith.constant 0 : index
    %c0_30 = arith.constant 0 : index
    %33 = vector.load %arg3[%c4_28, %c0_29, %c0_30] : memref<8x4x3xbf16, #tpu.memory_space<vmem>>, vector<1x4x3xbf16>
    %34 = vector.shape_cast %33 : vector<1x4x3xbf16> to vector<4x3xbf16>
    %35 = vector.shape_cast %32 : vector<4x3xbf16> to vector<1x4x3xbf16>
    tpu.vector_store %arg3[%c4_28, %c0_29, %c0_30], %35 {strides = array<i32>} : memref<8x4x3xbf16, #tpu.memory_space<vmem>>, vector<1x4x3xbf16>,
    %c5 = arith.constant 5 : index
    %c0_31 = arith.constant 0 : index
    %c0_32 = arith.constant 0 : index
    %36 = vector.load %arg2[%c5, %c0_31, %c0_32] : memref<8x2x3xbf16, #tpu.memory_space<vmem>>, vector<1x2x3xbf16>
    %37 = vector.shape_cast %36 : vector<1x2x3xbf16> to vector<2x3xbf16>
    %cst_33 = arith.constant dense<0.000000e+00> : vector<4x3xf32>
    %38 = tpu.matmul %0, %37, %cst_33 {dimension_numbers = #tpu.dot_dimension_numbers<[1], [0], [0], [1], [0, 0, 1, 1], [], []>} : vector<4x2xbf16>, vector<2x3xbf16>, vector<4x3xf32> -> vector<4x3xf32>
    %39 = arith.truncf %38 : vector<4x3xf32> to vector<4x3xbf16>
    %c5_34 = arith.constant 5 : index
    %c0_35 = arith.constant 0 : index
    %c0_36 = arith.constant 0 : index
    %40 = vector.load %arg3[%c5_34, %c0_35, %c0_36] : memref<8x4x3xbf16, #tpu.memory_space<vmem>>, vector<1x4x3xbf16>
    %41 = vector.shape_cast %40 : vector<1x4x3xbf16> to vector<4x3xbf16>
    %42 = vector.shape_cast %39 : vector<4x3xbf16> to vector<1x4x3xbf16>
    tpu.vector_store %arg3[%c5_34, %c0_35, %c0_36], %42 {strides = array<i32>} : memref<8x4x3xbf16, #tpu.memory_space<vmem>>, vector<1x4x3xbf16>,
    %c6 = arith.constant 6 : index
    %c0_37 = arith.constant 0 : index
    %c0_38 = arith.constant 0 : index
    %43 = vector.load %arg2[%c6, %c0_37, %c0_38] : memref<8x2x3xbf16, #tpu.memory_space<vmem>>, vector<1x2x3xbf16>
    %44 = vector.shape_cast %43 : vector<1x2x3xbf16> to vector<2x3xbf16>
    %cst_39 = arith.constant dense<0.000000e+00> : vector<4x3xf32>
    %45 = tpu.matmul %0, %44, %cst_39 {dimension_numbers = #tpu.dot_dimension_numbers<[1], [0], [0], [1], [0, 0, 1, 1], [], []>} : vector<4x2xbf16>, vector<2x3xbf16>, vector<4x3xf32> -> vector<4x3xf32>
    %46 = arith.truncf %45 : vector<4x3xf32> to vector<4x3xbf16>
    %c6_40 = arith.constant 6 : index
    %c0_41 = arith.constant 0 : index
    %c0_42 = arith.constant 0 : index
    %47 = vector.load %arg3[%c6_40, %c0_41, %c0_42] : memref<8x4x3xbf16, #tpu.memory_space<vmem>>, vector<1x4x3xbf16>
    %48 = vector.shape_cast %47 : vector<1x4x3xbf16> to vector<4x3xbf16>
    %49 = vector.shape_cast %46 : vector<4x3xbf16> to vector<1x4x3xbf16>
    tpu.vector_store %arg3[%c6_40, %c0_41, %c0_42], %49 {strides = array<i32>} : memref<8x4x3xbf16, #tpu.memory_space<vmem>>, vector<1x4x3xbf16>,
    %c7 = arith.constant 7 : index
    %c0_43 = arith.constant 0 : index
    %c0_44 = arith.constant 0 : index
    %50 = vector.load %arg2[%c7, %c0_43, %c0_44] : memref<8x2x3xbf16, #tpu.memory_space<vmem>>, vector<1x2x3xbf16>
    %51 = vector.shape_cast %50 : vector<1x2x3xbf16> to vector<2x3xbf16>
    %cst_45 = arith.constant dense<0.000000e+00> : vector<4x3xf32>
    %52 = tpu.matmul %0, %51, %cst_45 {dimension_numbers = #tpu.dot_dimension_numbers<[1], [0], [0], [1], [0, 0, 1, 1], [], []>} : vector<4x2xbf16>, vector<2x3xbf16>, vector<4x3xf32> -> vector<4x3xf32>
    %53 = arith.truncf %52 : vector<4x3xf32> to vector<4x3xbf16>
    %c7_46 = arith.constant 7 : index
    %c0_47 = arith.constant 0 : index
    %c0_48 = arith.constant 0 : index
    %54 = vector.load %arg3[%c7_46, %c0_47, %c0_48] : memref<8x4x3xbf16, #tpu.memory_space<vmem>>, vector<1x4x3xbf16>
    %55 = vector.shape_cast %54 : vector<1x4x3xbf16> to vector<4x3xbf16>
    %56 = vector.shape_cast %53 : vector<4x3xbf16> to vector<1x4x3xbf16>
    tpu.vector_store %arg3[%c7_46, %c0_47, %c0_48], %56 {strides = array<i32>} : memref<8x4x3xbf16, #tpu.memory_space<vmem>>, vector<1x4x3xbf16>,
    return
  }
  func.func @transform_0(%arg0: i32) -> (i32, i32) {
    %c0_i32 = arith.constant 0 : i32
    %c0_i32_0 = arith.constant 0 : i32
    %c0_i32_1 = arith.constant 0 : i32
    return %c0_i32, %c0_i32_0 : i32, i32
  }
  func.func @transform_1(%arg0: i32) -> (i32, i32, i32) {
    %c0_i32 = arith.constant 0 : i32
    %c0_i32_0 = arith.constant 0 : i32
    %c0_i32_1 = arith.constant 0 : i32
    return %arg0, %c0_i32, %c0_i32_0 : i32, i32, i32
  }
  func.func @transform_2(%arg0: i32) -> (i32, i32, i32) {
    %c0_i32 = arith.constant 0 : i32
    %c0_i32_0 = arith.constant 0 : i32
    %c0_i32_1 = arith.constant 0 : i32
    return %arg0, %c0_i32, %c0_i32_0 : i32, i32, i32
  }
}

module attributes {stable_mosaic.version = 11 : i64} {
  func.func @_mm_res_kernel(%arg0: i32, %arg1: memref<32x16xbf16, #tpu.memory_space<vmem>>, %arg2: memref<16x3xbf16, #tpu.memory_space<vmem>>, %arg3: memref<1x3xf32, #tpu.memory_space<vmem>>, %arg4: memref<1x3xf32, #tpu.memory_space<vmem>>, %arg5: memref<32x3xbf16, #tpu.memory_space<vmem>>, %arg6: memref<32x3xbf16, #tpu.memory_space<vmem>>) attributes {dimension_semantics = [#tpu.dimension_semantics<parallel>], iteration_bounds = array<i64: 1>, scalar_prefetch = 0 : i64, scratch_operands = 0 : i64, tpu.core_type = #tpu.core_type<tc>, window_params = [{transform_indices = @transform_0, window_bounds = array<i64: 32, 16>}, {pipeline_mode = #tpu.pipeline_mode<synchronous>, transform_indices = @transform_1, window_bounds = array<i64: 16, 3>}, {pipeline_mode = #tpu.pipeline_mode<synchronous>, transform_indices = @transform_2, window_bounds = array<i64: 1, 3>}, {pipeline_mode = #tpu.pipeline_mode<synchronous>, transform_indices = @transform_3, window_bounds = array<i64: 1, 3>}, {transform_indices = @transform_4, window_bounds = array<i64: 32, 3>}, {transform_indices = @transform_5, window_bounds = array<i64: 32, 3>}]} {
    %c0 = arith.constant 0 : index
    %c0_0 = arith.constant 0 : index
    %0 = vector.load %arg1[%c0, %c0_0] : memref<32x16xbf16, #tpu.memory_space<vmem>>, vector<32x16xbf16>
    %c0_1 = arith.constant 0 : index
    %c0_2 = arith.constant 0 : index
    %1 = vector.load %arg2[%c0_1, %c0_2] : memref<16x3xbf16, #tpu.memory_space<vmem>>, vector<16x3xbf16>
    %cst = arith.constant dense<0.000000e+00> : vector<32x3xf32>
    %2 = tpu.matmul %0, %1, %cst {dimension_numbers = #tpu.dot_dimension_numbers<[1], [0], [0], [1], [0, 0, 1, 1], [], []>} : vector<32x16xbf16>, vector<16x3xbf16>, vector<32x3xf32> -> vector<32x3xf32>
    %c0_3 = arith.constant 0 : index
    %c0_4 = arith.constant 0 : index
    %3 = vector.load %arg3[%c0_3, %c0_4] : memref<1x3xf32, #tpu.memory_space<vmem>>, vector<1x3xf32>
    %4 = vector.broadcast %3 : vector<1x3xf32> to vector<32x3xf32>
    %5 = arith.mulf %2, %4 : vector<32x3xf32>
    %c0_5 = arith.constant 0 : index
    %c0_6 = arith.constant 0 : index
    %6 = vector.load %arg4[%c0_5, %c0_6] : memref<1x3xf32, #tpu.memory_space<vmem>>, vector<1x3xf32>
    %7 = vector.broadcast %6 : vector<1x3xf32> to vector<32x3xf32>
    %8 = arith.addf %5, %7 : vector<32x3xf32>
    %c0_7 = arith.constant 0 : index
    %c0_8 = arith.constant 0 : index
    %9 = vector.load %arg5[%c0_7, %c0_8] : memref<32x3xbf16, #tpu.memory_space<vmem>>, vector<32x3xbf16>
    %10 = arith.extf %9 : vector<32x3xbf16> to vector<32x3xf32>
    %11 = arith.addf %8, %10 : vector<32x3xf32>
    %12 = arith.truncf %11 : vector<32x3xf32> to vector<32x3xbf16>
    %c0_9 = arith.constant 0 : index
    %c0_10 = arith.constant 0 : index
    %13 = vector.load %arg6[%c0_9, %c0_10] : memref<32x3xbf16, #tpu.memory_space<vmem>>, vector<32x3xbf16>
    tpu.vector_store %arg6[%c0_9, %c0_10], %12 {strides = array<i32>} : memref<32x3xbf16, #tpu.memory_space<vmem>>, vector<32x3xbf16>,
    return
  }
  func.func @transform_0(%arg0: i32) -> (i32, i32) {
    %c0_i32 = arith.constant 0 : i32
    %c0_i32_0 = arith.constant 0 : i32
    return %arg0, %c0_i32 : i32, i32
  }
  func.func @transform_1(%arg0: i32) -> (i32, i32) {
    %c0_i32 = arith.constant 0 : i32
    %c0_i32_0 = arith.constant 0 : i32
    %c0_i32_1 = arith.constant 0 : i32
    return %c0_i32, %c0_i32_0 : i32, i32
  }
  func.func @transform_2(%arg0: i32) -> (i32, i32) {
    %c0_i32 = arith.constant 0 : i32
    %c0_i32_0 = arith.constant 0 : i32
    %c0_i32_1 = arith.constant 0 : i32
    return %c0_i32, %c0_i32_0 : i32, i32
  }
  func.func @transform_3(%arg0: i32) -> (i32, i32) {
    %c0_i32 = arith.constant 0 : i32
    %c0_i32_0 = arith.constant 0 : i32
    %c0_i32_1 = arith.constant 0 : i32
    return %c0_i32, %c0_i32_0 : i32, i32
  }
  func.func @transform_4(%arg0: i32) -> (i32, i32) {
    %c0_i32 = arith.constant 0 : i32
    %c0_i32_0 = arith.constant 0 : i32
    return %arg0, %c0_i32 : i32, i32
  }
  func.func @transform_5(%arg0: i32) -> (i32, i32) {
    %c0_i32 = arith.constant 0 : i32
    %c0_i32_0 = arith.constant 0 : i32
    return %arg0, %c0_i32 : i32, i32
  }
}

module attributes {stable_mosaic.version = 11 : i64} {
  func.func @_interp_kernel(%arg0: i32, %arg1: memref<8x4xbf16, #tpu.memory_space<vmem>>, %arg2: memref<2x4x12xbf16, #tpu.memory_space<vmem>>, %arg3: memref<2x8x12xbf16, #tpu.memory_space<vmem>>) attributes {dimension_semantics = [#tpu.dimension_semantics<parallel>], iteration_bounds = array<i64: 1>, scalar_prefetch = 0 : i64, scratch_operands = 0 : i64, tpu.core_type = #tpu.core_type<tc>, window_params = [{pipeline_mode = #tpu.pipeline_mode<synchronous>, transform_indices = @transform_0, window_bounds = array<i64: 8, 4>}, {transform_indices = @transform_1, window_bounds = array<i64: 2, 4, 12>}, {transform_indices = @transform_2, window_bounds = array<i64: 2, 8, 12>}]} {
    %c0 = arith.constant 0 : index
    %c0_0 = arith.constant 0 : index
    %0 = vector.load %arg1[%c0, %c0_0] : memref<8x4xbf16, #tpu.memory_space<vmem>>, vector<8x4xbf16>
    %c0_1 = arith.constant 0 : index
    %c0_2 = arith.constant 0 : index
    %c0_3 = arith.constant 0 : index
    %1 = vector.load %arg2[%c0_1, %c0_2, %c0_3] : memref<2x4x12xbf16, #tpu.memory_space<vmem>>, vector<1x4x12xbf16>
    %2 = vector.shape_cast %1 : vector<1x4x12xbf16> to vector<4x12xbf16>
    %cst = arith.constant dense<0.000000e+00> : vector<8x12xf32>
    %3 = tpu.matmul %0, %2, %cst {dimension_numbers = #tpu.dot_dimension_numbers<[1], [0], [0], [1], [0, 0, 1, 1], [], []>} : vector<8x4xbf16>, vector<4x12xbf16>, vector<8x12xf32> -> vector<8x12xf32>
    %4 = arith.truncf %3 : vector<8x12xf32> to vector<8x12xbf16>
    %c0_4 = arith.constant 0 : index
    %c0_5 = arith.constant 0 : index
    %c0_6 = arith.constant 0 : index
    %5 = vector.load %arg3[%c0_4, %c0_5, %c0_6] : memref<2x8x12xbf16, #tpu.memory_space<vmem>>, vector<1x8x12xbf16>
    %6 = vector.shape_cast %5 : vector<1x8x12xbf16> to vector<8x12xbf16>
    %7 = vector.shape_cast %4 : vector<8x12xbf16> to vector<1x8x12xbf16>
    tpu.vector_store %arg3[%c0_4, %c0_5, %c0_6], %7 {strides = array<i32>} : memref<2x8x12xbf16, #tpu.memory_space<vmem>>, vector<1x8x12xbf16>,
    %c1 = arith.constant 1 : index
    %c0_7 = arith.constant 0 : index
    %c0_8 = arith.constant 0 : index
    %8 = vector.load %arg2[%c1, %c0_7, %c0_8] : memref<2x4x12xbf16, #tpu.memory_space<vmem>>, vector<1x4x12xbf16>
    %9 = vector.shape_cast %8 : vector<1x4x12xbf16> to vector<4x12xbf16>
    %cst_9 = arith.constant dense<0.000000e+00> : vector<8x12xf32>
    %10 = tpu.matmul %0, %9, %cst_9 {dimension_numbers = #tpu.dot_dimension_numbers<[1], [0], [0], [1], [0, 0, 1, 1], [], []>} : vector<8x4xbf16>, vector<4x12xbf16>, vector<8x12xf32> -> vector<8x12xf32>
    %11 = arith.truncf %10 : vector<8x12xf32> to vector<8x12xbf16>
    %c1_10 = arith.constant 1 : index
    %c0_11 = arith.constant 0 : index
    %c0_12 = arith.constant 0 : index
    %12 = vector.load %arg3[%c1_10, %c0_11, %c0_12] : memref<2x8x12xbf16, #tpu.memory_space<vmem>>, vector<1x8x12xbf16>
    %13 = vector.shape_cast %12 : vector<1x8x12xbf16> to vector<8x12xbf16>
    %14 = vector.shape_cast %11 : vector<8x12xbf16> to vector<1x8x12xbf16>
    tpu.vector_store %arg3[%c1_10, %c0_11, %c0_12], %14 {strides = array<i32>} : memref<2x8x12xbf16, #tpu.memory_space<vmem>>, vector<1x8x12xbf16>,
    return
  }
  func.func @transform_0(%arg0: i32) -> (i32, i32) {
    %c0_i32 = arith.constant 0 : i32
    %c0_i32_0 = arith.constant 0 : i32
    %c0_i32_1 = arith.constant 0 : i32
    return %c0_i32, %c0_i32_0 : i32, i32
  }
  func.func @transform_1(%arg0: i32) -> (i32, i32, i32) {
    %c0_i32 = arith.constant 0 : i32
    %c0_i32_0 = arith.constant 0 : i32
    %c0_i32_1 = arith.constant 0 : i32
    return %arg0, %c0_i32, %c0_i32_0 : i32, i32, i32
  }
  func.func @transform_2(%arg0: i32) -> (i32, i32, i32) {
    %c0_i32 = arith.constant 0 : i32
    %c0_i32_0 = arith.constant 0 : i32
    %c0_i32_1 = arith.constant 0 : i32
    return %arg0, %c0_i32, %c0_i32_0 : i32, i32, i32
  }
}

module attributes {stable_mosaic.version = 11 : i64} {
  func.func @_interp_kernel(%arg0: i32, %arg1: memref<8x4xbf16, #tpu.memory_space<vmem>>, %arg2: memref<8x4x3xbf16, #tpu.memory_space<vmem>>, %arg3: memref<8x8x3xbf16, #tpu.memory_space<vmem>>) attributes {dimension_semantics = [#tpu.dimension_semantics<parallel>], iteration_bounds = array<i64: 2>, scalar_prefetch = 0 : i64, scratch_operands = 0 : i64, tpu.core_type = #tpu.core_type<tc>, window_params = [{pipeline_mode = #tpu.pipeline_mode<synchronous>, transform_indices = @transform_0, window_bounds = array<i64: 8, 4>}, {transform_indices = @transform_1, window_bounds = array<i64: 8, 4, 3>}, {transform_indices = @transform_2, window_bounds = array<i64: 8, 8, 3>}]} {
    %c0 = arith.constant 0 : index
    %c0_0 = arith.constant 0 : index
    %0 = vector.load %arg1[%c0, %c0_0] : memref<8x4xbf16, #tpu.memory_space<vmem>>, vector<8x4xbf16>
    %c0_1 = arith.constant 0 : index
    %c0_2 = arith.constant 0 : index
    %c0_3 = arith.constant 0 : index
    %1 = vector.load %arg2[%c0_1, %c0_2, %c0_3] : memref<8x4x3xbf16, #tpu.memory_space<vmem>>, vector<1x4x3xbf16>
    %2 = vector.shape_cast %1 : vector<1x4x3xbf16> to vector<4x3xbf16>
    %cst = arith.constant dense<0.000000e+00> : vector<8x3xf32>
    %3 = tpu.matmul %0, %2, %cst {dimension_numbers = #tpu.dot_dimension_numbers<[1], [0], [0], [1], [0, 0, 1, 1], [], []>} : vector<8x4xbf16>, vector<4x3xbf16>, vector<8x3xf32> -> vector<8x3xf32>
    %4 = arith.truncf %3 : vector<8x3xf32> to vector<8x3xbf16>
    %c0_4 = arith.constant 0 : index
    %c0_5 = arith.constant 0 : index
    %c0_6 = arith.constant 0 : index
    %5 = vector.load %arg3[%c0_4, %c0_5, %c0_6] : memref<8x8x3xbf16, #tpu.memory_space<vmem>>, vector<1x8x3xbf16>
    %6 = vector.shape_cast %5 : vector<1x8x3xbf16> to vector<8x3xbf16>
    %7 = vector.shape_cast %4 : vector<8x3xbf16> to vector<1x8x3xbf16>
    tpu.vector_store %arg3[%c0_4, %c0_5, %c0_6], %7 {strides = array<i32>} : memref<8x8x3xbf16, #tpu.memory_space<vmem>>, vector<1x8x3xbf16>,
    %c1 = arith.constant 1 : index
    %c0_7 = arith.constant 0 : index
    %c0_8 = arith.constant 0 : index
    %8 = vector.load %arg2[%c1, %c0_7, %c0_8] : memref<8x4x3xbf16, #tpu.memory_space<vmem>>, vector<1x4x3xbf16>
    %9 = vector.shape_cast %8 : vector<1x4x3xbf16> to vector<4x3xbf16>
    %cst_9 = arith.constant dense<0.000000e+00> : vector<8x3xf32>
    %10 = tpu.matmul %0, %9, %cst_9 {dimension_numbers = #tpu.dot_dimension_numbers<[1], [0], [0], [1], [0, 0, 1, 1], [], []>} : vector<8x4xbf16>, vector<4x3xbf16>, vector<8x3xf32> -> vector<8x3xf32>
    %11 = arith.truncf %10 : vector<8x3xf32> to vector<8x3xbf16>
    %c1_10 = arith.constant 1 : index
    %c0_11 = arith.constant 0 : index
    %c0_12 = arith.constant 0 : index
    %12 = vector.load %arg3[%c1_10, %c0_11, %c0_12] : memref<8x8x3xbf16, #tpu.memory_space<vmem>>, vector<1x8x3xbf16>
    %13 = vector.shape_cast %12 : vector<1x8x3xbf16> to vector<8x3xbf16>
    %14 = vector.shape_cast %11 : vector<8x3xbf16> to vector<1x8x3xbf16>
    tpu.vector_store %arg3[%c1_10, %c0_11, %c0_12], %14 {strides = array<i32>} : memref<8x8x3xbf16, #tpu.memory_space<vmem>>, vector<1x8x3xbf16>,
    %c2 = arith.constant 2 : index
    %c0_13 = arith.constant 0 : index
    %c0_14 = arith.constant 0 : index
    %15 = vector.load %arg2[%c2, %c0_13, %c0_14] : memref<8x4x3xbf16, #tpu.memory_space<vmem>>, vector<1x4x3xbf16>
    %16 = vector.shape_cast %15 : vector<1x4x3xbf16> to vector<4x3xbf16>
    %cst_15 = arith.constant dense<0.000000e+00> : vector<8x3xf32>
    %17 = tpu.matmul %0, %16, %cst_15 {dimension_numbers = #tpu.dot_dimension_numbers<[1], [0], [0], [1], [0, 0, 1, 1], [], []>} : vector<8x4xbf16>, vector<4x3xbf16>, vector<8x3xf32> -> vector<8x3xf32>
    %18 = arith.truncf %17 : vector<8x3xf32> to vector<8x3xbf16>
    %c2_16 = arith.constant 2 : index
    %c0_17 = arith.constant 0 : index
    %c0_18 = arith.constant 0 : index
    %19 = vector.load %arg3[%c2_16, %c0_17, %c0_18] : memref<8x8x3xbf16, #tpu.memory_space<vmem>>, vector<1x8x3xbf16>
    %20 = vector.shape_cast %19 : vector<1x8x3xbf16> to vector<8x3xbf16>
    %21 = vector.shape_cast %18 : vector<8x3xbf16> to vector<1x8x3xbf16>
    tpu.vector_store %arg3[%c2_16, %c0_17, %c0_18], %21 {strides = array<i32>} : memref<8x8x3xbf16, #tpu.memory_space<vmem>>, vector<1x8x3xbf16>,
    %c3 = arith.constant 3 : index
    %c0_19 = arith.constant 0 : index
    %c0_20 = arith.constant 0 : index
    %22 = vector.load %arg2[%c3, %c0_19, %c0_20] : memref<8x4x3xbf16, #tpu.memory_space<vmem>>, vector<1x4x3xbf16>
    %23 = vector.shape_cast %22 : vector<1x4x3xbf16> to vector<4x3xbf16>
    %cst_21 = arith.constant dense<0.000000e+00> : vector<8x3xf32>
    %24 = tpu.matmul %0, %23, %cst_21 {dimension_numbers = #tpu.dot_dimension_numbers<[1], [0], [0], [1], [0, 0, 1, 1], [], []>} : vector<8x4xbf16>, vector<4x3xbf16>, vector<8x3xf32> -> vector<8x3xf32>
    %25 = arith.truncf %24 : vector<8x3xf32> to vector<8x3xbf16>
    %c3_22 = arith.constant 3 : index
    %c0_23 = arith.constant 0 : index
    %c0_24 = arith.constant 0 : index
    %26 = vector.load %arg3[%c3_22, %c0_23, %c0_24] : memref<8x8x3xbf16, #tpu.memory_space<vmem>>, vector<1x8x3xbf16>
    %27 = vector.shape_cast %26 : vector<1x8x3xbf16> to vector<8x3xbf16>
    %28 = vector.shape_cast %25 : vector<8x3xbf16> to vector<1x8x3xbf16>
    tpu.vector_store %arg3[%c3_22, %c0_23, %c0_24], %28 {strides = array<i32>} : memref<8x8x3xbf16, #tpu.memory_space<vmem>>, vector<1x8x3xbf16>,
    %c4 = arith.constant 4 : index
    %c0_25 = arith.constant 0 : index
    %c0_26 = arith.constant 0 : index
    %29 = vector.load %arg2[%c4, %c0_25, %c0_26] : memref<8x4x3xbf16, #tpu.memory_space<vmem>>, vector<1x4x3xbf16>
    %30 = vector.shape_cast %29 : vector<1x4x3xbf16> to vector<4x3xbf16>
    %cst_27 = arith.constant dense<0.000000e+00> : vector<8x3xf32>
    %31 = tpu.matmul %0, %30, %cst_27 {dimension_numbers = #tpu.dot_dimension_numbers<[1], [0], [0], [1], [0, 0, 1, 1], [], []>} : vector<8x4xbf16>, vector<4x3xbf16>, vector<8x3xf32> -> vector<8x3xf32>
    %32 = arith.truncf %31 : vector<8x3xf32> to vector<8x3xbf16>
    %c4_28 = arith.constant 4 : index
    %c0_29 = arith.constant 0 : index
    %c0_30 = arith.constant 0 : index
    %33 = vector.load %arg3[%c4_28, %c0_29, %c0_30] : memref<8x8x3xbf16, #tpu.memory_space<vmem>>, vector<1x8x3xbf16>
    %34 = vector.shape_cast %33 : vector<1x8x3xbf16> to vector<8x3xbf16>
    %35 = vector.shape_cast %32 : vector<8x3xbf16> to vector<1x8x3xbf16>
    tpu.vector_store %arg3[%c4_28, %c0_29, %c0_30], %35 {strides = array<i32>} : memref<8x8x3xbf16, #tpu.memory_space<vmem>>, vector<1x8x3xbf16>,
    %c5 = arith.constant 5 : index
    %c0_31 = arith.constant 0 : index
    %c0_32 = arith.constant 0 : index
    %36 = vector.load %arg2[%c5, %c0_31, %c0_32] : memref<8x4x3xbf16, #tpu.memory_space<vmem>>, vector<1x4x3xbf16>
    %37 = vector.shape_cast %36 : vector<1x4x3xbf16> to vector<4x3xbf16>
    %cst_33 = arith.constant dense<0.000000e+00> : vector<8x3xf32>
    %38 = tpu.matmul %0, %37, %cst_33 {dimension_numbers = #tpu.dot_dimension_numbers<[1], [0], [0], [1], [0, 0, 1, 1], [], []>} : vector<8x4xbf16>, vector<4x3xbf16>, vector<8x3xf32> -> vector<8x3xf32>
    %39 = arith.truncf %38 : vector<8x3xf32> to vector<8x3xbf16>
    %c5_34 = arith.constant 5 : index
    %c0_35 = arith.constant 0 : index
    %c0_36 = arith.constant 0 : index
    %40 = vector.load %arg3[%c5_34, %c0_35, %c0_36] : memref<8x8x3xbf16, #tpu.memory_space<vmem>>, vector<1x8x3xbf16>
    %41 = vector.shape_cast %40 : vector<1x8x3xbf16> to vector<8x3xbf16>
    %42 = vector.shape_cast %39 : vector<8x3xbf16> to vector<1x8x3xbf16>
    tpu.vector_store %arg3[%c5_34, %c0_35, %c0_36], %42 {strides = array<i32>} : memref<8x8x3xbf16, #tpu.memory_space<vmem>>, vector<1x8x3xbf16>,
    %c6 = arith.constant 6 : index
    %c0_37 = arith.constant 0 : index
    %c0_38 = arith.constant 0 : index
    %43 = vector.load %arg2[%c6, %c0_37, %c0_38] : memref<8x4x3xbf16, #tpu.memory_space<vmem>>, vector<1x4x3xbf16>
    %44 = vector.shape_cast %43 : vector<1x4x3xbf16> to vector<4x3xbf16>
    %cst_39 = arith.constant dense<0.000000e+00> : vector<8x3xf32>
    %45 = tpu.matmul %0, %44, %cst_39 {dimension_numbers = #tpu.dot_dimension_numbers<[1], [0], [0], [1], [0, 0, 1, 1], [], []>} : vector<8x4xbf16>, vector<4x3xbf16>, vector<8x3xf32> -> vector<8x3xf32>
    %46 = arith.truncf %45 : vector<8x3xf32> to vector<8x3xbf16>
    %c6_40 = arith.constant 6 : index
    %c0_41 = arith.constant 0 : index
    %c0_42 = arith.constant 0 : index
    %47 = vector.load %arg3[%c6_40, %c0_41, %c0_42] : memref<8x8x3xbf16, #tpu.memory_space<vmem>>, vector<1x8x3xbf16>
    %48 = vector.shape_cast %47 : vector<1x8x3xbf16> to vector<8x3xbf16>
    %49 = vector.shape_cast %46 : vector<8x3xbf16> to vector<1x8x3xbf16>
    tpu.vector_store %arg3[%c6_40, %c0_41, %c0_42], %49 {strides = array<i32>} : memref<8x8x3xbf16, #tpu.memory_space<vmem>>, vector<1x8x3xbf16>,
    %c7 = arith.constant 7 : index
    %c0_43 = arith.constant 0 : index
    %c0_44 = arith.constant 0 : index
    %50 = vector.load %arg2[%c7, %c0_43, %c0_44] : memref<8x4x3xbf16, #tpu.memory_space<vmem>>, vector<1x4x3xbf16>
    %51 = vector.shape_cast %50 : vector<1x4x3xbf16> to vector<4x3xbf16>
    %cst_45 = arith.constant dense<0.000000e+00> : vector<8x3xf32>
    %52 = tpu.matmul %0, %51, %cst_45 {dimension_numbers = #tpu.dot_dimension_numbers<[1], [0], [0], [1], [0, 0, 1, 1], [], []>} : vector<8x4xbf16>, vector<4x3xbf16>, vector<8x3xf32> -> vector<8x3xf32>
    %53 = arith.truncf %52 : vector<8x3xf32> to vector<8x3xbf16>
    %c7_46 = arith.constant 7 : index
    %c0_47 = arith.constant 0 : index
    %c0_48 = arith.constant 0 : index
    %54 = vector.load %arg3[%c7_46, %c0_47, %c0_48] : memref<8x8x3xbf16, #tpu.memory_space<vmem>>, vector<1x8x3xbf16>
    %55 = vector.shape_cast %54 : vector<1x8x3xbf16> to vector<8x3xbf16>
    %56 = vector.shape_cast %53 : vector<8x3xbf16> to vector<1x8x3xbf16>
    tpu.vector_store %arg3[%c7_46, %c0_47, %c0_48], %56 {strides = array<i32>} : memref<8x8x3xbf16, #tpu.memory_space<vmem>>, vector<1x8x3xbf16>,
    return
  }
  func.func @transform_0(%arg0: i32) -> (i32, i32) {
    %c0_i32 = arith.constant 0 : i32
    %c0_i32_0 = arith.constant 0 : i32
    %c0_i32_1 = arith.constant 0 : i32
    return %c0_i32, %c0_i32_0 : i32, i32
  }
  func.func @transform_1(%arg0: i32) -> (i32, i32, i32) {
    %c0_i32 = arith.constant 0 : i32
    %c0_i32_0 = arith.constant 0 : i32
    %c0_i32_1 = arith.constant 0 : i32
    return %arg0, %c0_i32, %c0_i32_0 : i32, i32, i32
  }
  func.func @transform_2(%arg0: i32) -> (i32, i32, i32) {
    %c0_i32 = arith.constant 0 : i32
    %c0_i32_0 = arith.constant 0 : i32
    %c0_i32_1 = arith.constant 0 : i32
    return %arg0, %c0_i32, %c0_i32_0 : i32, i32, i32
  }
}

module attributes {stable_mosaic.version = 11 : i64} {
  func.func @_mm_res_kernel(%arg0: i32, %arg1: memref<128x8xbf16, #tpu.memory_space<vmem>>, %arg2: memref<8x3xbf16, #tpu.memory_space<vmem>>, %arg3: memref<1x3xf32, #tpu.memory_space<vmem>>, %arg4: memref<1x3xf32, #tpu.memory_space<vmem>>, %arg5: memref<128x3xbf16, #tpu.memory_space<vmem>>, %arg6: memref<128x3xbf16, #tpu.memory_space<vmem>>) attributes {dimension_semantics = [#tpu.dimension_semantics<parallel>], iteration_bounds = array<i64: 1>, scalar_prefetch = 0 : i64, scratch_operands = 0 : i64, tpu.core_type = #tpu.core_type<tc>, window_params = [{transform_indices = @transform_0, window_bounds = array<i64: 128, 8>}, {pipeline_mode = #tpu.pipeline_mode<synchronous>, transform_indices = @transform_1, window_bounds = array<i64: 8, 3>}, {pipeline_mode = #tpu.pipeline_mode<synchronous>, transform_indices = @transform_2, window_bounds = array<i64: 1, 3>}, {pipeline_mode = #tpu.pipeline_mode<synchronous>, transform_indices = @transform_3, window_bounds = array<i64: 1, 3>}, {transform_indices = @transform_4, window_bounds = array<i64: 128, 3>}, {transform_indices = @transform_5, window_bounds = array<i64: 128, 3>}]} {
    %c0 = arith.constant 0 : index
    %c0_0 = arith.constant 0 : index
    %0 = vector.load %arg1[%c0, %c0_0] : memref<128x8xbf16, #tpu.memory_space<vmem>>, vector<128x8xbf16>
    %c0_1 = arith.constant 0 : index
    %c0_2 = arith.constant 0 : index
    %1 = vector.load %arg2[%c0_1, %c0_2] : memref<8x3xbf16, #tpu.memory_space<vmem>>, vector<8x3xbf16>
    %cst = arith.constant dense<0.000000e+00> : vector<128x3xf32>
    %2 = tpu.matmul %0, %1, %cst {dimension_numbers = #tpu.dot_dimension_numbers<[1], [0], [0], [1], [0, 0, 1, 1], [], []>} : vector<128x8xbf16>, vector<8x3xbf16>, vector<128x3xf32> -> vector<128x3xf32>
    %c0_3 = arith.constant 0 : index
    %c0_4 = arith.constant 0 : index
    %3 = vector.load %arg3[%c0_3, %c0_4] : memref<1x3xf32, #tpu.memory_space<vmem>>, vector<1x3xf32>
    %4 = vector.broadcast %3 : vector<1x3xf32> to vector<128x3xf32>
    %5 = arith.mulf %2, %4 : vector<128x3xf32>
    %c0_5 = arith.constant 0 : index
    %c0_6 = arith.constant 0 : index
    %6 = vector.load %arg4[%c0_5, %c0_6] : memref<1x3xf32, #tpu.memory_space<vmem>>, vector<1x3xf32>
    %7 = vector.broadcast %6 : vector<1x3xf32> to vector<128x3xf32>
    %8 = arith.addf %5, %7 : vector<128x3xf32>
    %c0_7 = arith.constant 0 : index
    %c0_8 = arith.constant 0 : index
    %9 = vector.load %arg5[%c0_7, %c0_8] : memref<128x3xbf16, #tpu.memory_space<vmem>>, vector<128x3xbf16>
    %10 = arith.extf %9 : vector<128x3xbf16> to vector<128x3xf32>
    %11 = arith.addf %8, %10 : vector<128x3xf32>
    %12 = arith.truncf %11 : vector<128x3xf32> to vector<128x3xbf16>
    %c0_9 = arith.constant 0 : index
    %c0_10 = arith.constant 0 : index
    %13 = vector.load %arg6[%c0_9, %c0_10] : memref<128x3xbf16, #tpu.memory_space<vmem>>, vector<128x3xbf16>
    tpu.vector_store %arg6[%c0_9, %c0_10], %12 {strides = array<i32>} : memref<128x3xbf16, #tpu.memory_space<vmem>>, vector<128x3xbf16>,
    return
  }
  func.func @transform_0(%arg0: i32) -> (i32, i32) {
    %c0_i32 = arith.constant 0 : i32
    %c0_i32_0 = arith.constant 0 : i32
    return %arg0, %c0_i32 : i32, i32
  }
  func.func @transform_1(%arg0: i32) -> (i32, i32) {
    %c0_i32 = arith.constant 0 : i32
    %c0_i32_0 = arith.constant 0 : i32
    %c0_i32_1 = arith.constant 0 : i32
    return %c0_i32, %c0_i32_0 : i32, i32
  }
  func.func @transform_2(%arg0: i32) -> (i32, i32) {
    %c0_i32 = arith.constant 0 : i32
    %c0_i32_0 = arith.constant 0 : i32
    %c0_i32_1 = arith.constant 0 : i32
    return %c0_i32, %c0_i32_0 : i32, i32
  }
  func.func @transform_3(%arg0: i32) -> (i32, i32) {
    %c0_i32 = arith.constant 0 : i32
    %c0_i32_0 = arith.constant 0 : i32
    %c0_i32_1 = arith.constant 0 : i32
    return %c0_i32, %c0_i32_0 : i32, i32
  }
  func.func @transform_4(%arg0: i32) -> (i32, i32) {
    %c0_i32 = arith.constant 0 : i32
    %c0_i32_0 = arith.constant 0 : i32
    return %arg0, %c0_i32 : i32, i32
  }
  func.func @transform_5(%arg0: i32) -> (i32, i32) {
    %c0_i32 = arith.constant 0 : i32
    %c0_i32_0 = arith.constant 0 : i32
    return %arg0, %c0_i32 : i32, i32
  }
}

module attributes {stable_mosaic.version = 11 : i64} {
  func.func @_interp_kernel(%arg0: i32, %arg1: memref<32x8xbf16, #tpu.memory_space<vmem>>, %arg2: memref<2x8x24xbf16, #tpu.memory_space<vmem>>, %arg3: memref<2x32x24xbf16, #tpu.memory_space<vmem>>) attributes {dimension_semantics = [#tpu.dimension_semantics<parallel>], iteration_bounds = array<i64: 1>, scalar_prefetch = 0 : i64, scratch_operands = 0 : i64, tpu.core_type = #tpu.core_type<tc>, window_params = [{pipeline_mode = #tpu.pipeline_mode<synchronous>, transform_indices = @transform_0, window_bounds = array<i64: 32, 8>}, {transform_indices = @transform_1, window_bounds = array<i64: 2, 8, 24>}, {transform_indices = @transform_2, window_bounds = array<i64: 2, 32, 24>}]} {
    %c0 = arith.constant 0 : index
    %c0_0 = arith.constant 0 : index
    %0 = vector.load %arg1[%c0, %c0_0] : memref<32x8xbf16, #tpu.memory_space<vmem>>, vector<32x8xbf16>
    %c0_1 = arith.constant 0 : index
    %c0_2 = arith.constant 0 : index
    %c0_3 = arith.constant 0 : index
    %1 = vector.load %arg2[%c0_1, %c0_2, %c0_3] : memref<2x8x24xbf16, #tpu.memory_space<vmem>>, vector<1x8x24xbf16>
    %2 = vector.shape_cast %1 : vector<1x8x24xbf16> to vector<8x24xbf16>
    %cst = arith.constant dense<0.000000e+00> : vector<32x24xf32>
    %3 = tpu.matmul %0, %2, %cst {dimension_numbers = #tpu.dot_dimension_numbers<[1], [0], [0], [1], [0, 0, 1, 1], [], []>} : vector<32x8xbf16>, vector<8x24xbf16>, vector<32x24xf32> -> vector<32x24xf32>
    %4 = arith.truncf %3 : vector<32x24xf32> to vector<32x24xbf16>
    %c0_4 = arith.constant 0 : index
    %c0_5 = arith.constant 0 : index
    %c0_6 = arith.constant 0 : index
    %5 = vector.load %arg3[%c0_4, %c0_5, %c0_6] : memref<2x32x24xbf16, #tpu.memory_space<vmem>>, vector<1x32x24xbf16>
    %6 = vector.shape_cast %5 : vector<1x32x24xbf16> to vector<32x24xbf16>
    %7 = vector.shape_cast %4 : vector<32x24xbf16> to vector<1x32x24xbf16>
    tpu.vector_store %arg3[%c0_4, %c0_5, %c0_6], %7 {strides = array<i32>} : memref<2x32x24xbf16, #tpu.memory_space<vmem>>, vector<1x32x24xbf16>,
    %c1 = arith.constant 1 : index
    %c0_7 = arith.constant 0 : index
    %c0_8 = arith.constant 0 : index
    %8 = vector.load %arg2[%c1, %c0_7, %c0_8] : memref<2x8x24xbf16, #tpu.memory_space<vmem>>, vector<1x8x24xbf16>
    %9 = vector.shape_cast %8 : vector<1x8x24xbf16> to vector<8x24xbf16>
    %cst_9 = arith.constant dense<0.000000e+00> : vector<32x24xf32>
    %10 = tpu.matmul %0, %9, %cst_9 {dimension_numbers = #tpu.dot_dimension_numbers<[1], [0], [0], [1], [0, 0, 1, 1], [], []>} : vector<32x8xbf16>, vector<8x24xbf16>, vector<32x24xf32> -> vector<32x24xf32>
    %11 = arith.truncf %10 : vector<32x24xf32> to vector<32x24xbf16>
    %c1_10 = arith.constant 1 : index
    %c0_11 = arith.constant 0 : index
    %c0_12 = arith.constant 0 : index
    %12 = vector.load %arg3[%c1_10, %c0_11, %c0_12] : memref<2x32x24xbf16, #tpu.memory_space<vmem>>, vector<1x32x24xbf16>
    %13 = vector.shape_cast %12 : vector<1x32x24xbf16> to vector<32x24xbf16>
    %14 = vector.shape_cast %11 : vector<32x24xbf16> to vector<1x32x24xbf16>
    tpu.vector_store %arg3[%c1_10, %c0_11, %c0_12], %14 {strides = array<i32>} : memref<2x32x24xbf16, #tpu.memory_space<vmem>>, vector<1x32x24xbf16>,
    return
  }
  func.func @transform_0(%arg0: i32) -> (i32, i32) {
    %c0_i32 = arith.constant 0 : i32
    %c0_i32_0 = arith.constant 0 : i32
    %c0_i32_1 = arith.constant 0 : i32
    return %c0_i32, %c0_i32_0 : i32, i32
  }
  func.func @transform_1(%arg0: i32) -> (i32, i32, i32) {
    %c0_i32 = arith.constant 0 : i32
    %c0_i32_0 = arith.constant 0 : i32
    %c0_i32_1 = arith.constant 0 : i32
    return %arg0, %c0_i32, %c0_i32_0 : i32, i32, i32
  }
  func.func @transform_2(%arg0: i32) -> (i32, i32, i32) {
    %c0_i32 = arith.constant 0 : i32
    %c0_i32_0 = arith.constant 0 : i32
    %c0_i32_1 = arith.constant 0 : i32
    return %arg0, %c0_i32, %c0_i32_0 : i32, i32, i32
  }
}

module attributes {stable_mosaic.version = 11 : i64} {
  func.func @_interp_kernel(%arg0: i32, %arg1: memref<32x8xbf16, #tpu.memory_space<vmem>>, %arg2: memref<8x8x3xbf16, #tpu.memory_space<vmem>>, %arg3: memref<8x32x3xbf16, #tpu.memory_space<vmem>>) attributes {dimension_semantics = [#tpu.dimension_semantics<parallel>], iteration_bounds = array<i64: 8>, scalar_prefetch = 0 : i64, scratch_operands = 0 : i64, tpu.core_type = #tpu.core_type<tc>, window_params = [{pipeline_mode = #tpu.pipeline_mode<synchronous>, transform_indices = @transform_0, window_bounds = array<i64: 32, 8>}, {transform_indices = @transform_1, window_bounds = array<i64: 8, 8, 3>}, {transform_indices = @transform_2, window_bounds = array<i64: 8, 32, 3>}]} {
    %c0 = arith.constant 0 : index
    %c0_0 = arith.constant 0 : index
    %0 = vector.load %arg1[%c0, %c0_0] : memref<32x8xbf16, #tpu.memory_space<vmem>>, vector<32x8xbf16>
    %c0_1 = arith.constant 0 : index
    %c0_2 = arith.constant 0 : index
    %c0_3 = arith.constant 0 : index
    %1 = vector.load %arg2[%c0_1, %c0_2, %c0_3] : memref<8x8x3xbf16, #tpu.memory_space<vmem>>, vector<1x8x3xbf16>
    %2 = vector.shape_cast %1 : vector<1x8x3xbf16> to vector<8x3xbf16>
    %cst = arith.constant dense<0.000000e+00> : vector<32x3xf32>
    %3 = tpu.matmul %0, %2, %cst {dimension_numbers = #tpu.dot_dimension_numbers<[1], [0], [0], [1], [0, 0, 1, 1], [], []>} : vector<32x8xbf16>, vector<8x3xbf16>, vector<32x3xf32> -> vector<32x3xf32>
    %4 = arith.truncf %3 : vector<32x3xf32> to vector<32x3xbf16>
    %c0_4 = arith.constant 0 : index
    %c0_5 = arith.constant 0 : index
    %c0_6 = arith.constant 0 : index
    %5 = vector.load %arg3[%c0_4, %c0_5, %c0_6] : memref<8x32x3xbf16, #tpu.memory_space<vmem>>, vector<1x32x3xbf16>
    %6 = vector.shape_cast %5 : vector<1x32x3xbf16> to vector<32x3xbf16>
    %7 = vector.shape_cast %4 : vector<32x3xbf16> to vector<1x32x3xbf16>
    tpu.vector_store %arg3[%c0_4, %c0_5, %c0_6], %7 {strides = array<i32>} : memref<8x32x3xbf16, #tpu.memory_space<vmem>>, vector<1x32x3xbf16>,
    %c1 = arith.constant 1 : index
    %c0_7 = arith.constant 0 : index
    %c0_8 = arith.constant 0 : index
    %8 = vector.load %arg2[%c1, %c0_7, %c0_8] : memref<8x8x3xbf16, #tpu.memory_space<vmem>>, vector<1x8x3xbf16>
    %9 = vector.shape_cast %8 : vector<1x8x3xbf16> to vector<8x3xbf16>
    %cst_9 = arith.constant dense<0.000000e+00> : vector<32x3xf32>
    %10 = tpu.matmul %0, %9, %cst_9 {dimension_numbers = #tpu.dot_dimension_numbers<[1], [0], [0], [1], [0, 0, 1, 1], [], []>} : vector<32x8xbf16>, vector<8x3xbf16>, vector<32x3xf32> -> vector<32x3xf32>
    %11 = arith.truncf %10 : vector<32x3xf32> to vector<32x3xbf16>
    %c1_10 = arith.constant 1 : index
    %c0_11 = arith.constant 0 : index
    %c0_12 = arith.constant 0 : index
    %12 = vector.load %arg3[%c1_10, %c0_11, %c0_12] : memref<8x32x3xbf16, #tpu.memory_space<vmem>>, vector<1x32x3xbf16>
    %13 = vector.shape_cast %12 : vector<1x32x3xbf16> to vector<32x3xbf16>
    %14 = vector.shape_cast %11 : vector<32x3xbf16> to vector<1x32x3xbf16>
    tpu.vector_store %arg3[%c1_10, %c0_11, %c0_12], %14 {strides = array<i32>} : memref<8x32x3xbf16, #tpu.memory_space<vmem>>, vector<1x32x3xbf16>,
    %c2 = arith.constant 2 : index
    %c0_13 = arith.constant 0 : index
    %c0_14 = arith.constant 0 : index
    %15 = vector.load %arg2[%c2, %c0_13, %c0_14] : memref<8x8x3xbf16, #tpu.memory_space<vmem>>, vector<1x8x3xbf16>
    %16 = vector.shape_cast %15 : vector<1x8x3xbf16> to vector<8x3xbf16>
    %cst_15 = arith.constant dense<0.000000e+00> : vector<32x3xf32>
    %17 = tpu.matmul %0, %16, %cst_15 {dimension_numbers = #tpu.dot_dimension_numbers<[1], [0], [0], [1], [0, 0, 1, 1], [], []>} : vector<32x8xbf16>, vector<8x3xbf16>, vector<32x3xf32> -> vector<32x3xf32>
    %18 = arith.truncf %17 : vector<32x3xf32> to vector<32x3xbf16>
    %c2_16 = arith.constant 2 : index
    %c0_17 = arith.constant 0 : index
    %c0_18 = arith.constant 0 : index
    %19 = vector.load %arg3[%c2_16, %c0_17, %c0_18] : memref<8x32x3xbf16, #tpu.memory_space<vmem>>, vector<1x32x3xbf16>
    %20 = vector.shape_cast %19 : vector<1x32x3xbf16> to vector<32x3xbf16>
    %21 = vector.shape_cast %18 : vector<32x3xbf16> to vector<1x32x3xbf16>
    tpu.vector_store %arg3[%c2_16, %c0_17, %c0_18], %21 {strides = array<i32>} : memref<8x32x3xbf16, #tpu.memory_space<vmem>>, vector<1x32x3xbf16>,
    %c3 = arith.constant 3 : index
    %c0_19 = arith.constant 0 : index
    %c0_20 = arith.constant 0 : index
    %22 = vector.load %arg2[%c3, %c0_19, %c0_20] : memref<8x8x3xbf16, #tpu.memory_space<vmem>>, vector<1x8x3xbf16>
    %23 = vector.shape_cast %22 : vector<1x8x3xbf16> to vector<8x3xbf16>
    %cst_21 = arith.constant dense<0.000000e+00> : vector<32x3xf32>
    %24 = tpu.matmul %0, %23, %cst_21 {dimension_numbers = #tpu.dot_dimension_numbers<[1], [0], [0], [1], [0, 0, 1, 1], [], []>} : vector<32x8xbf16>, vector<8x3xbf16>, vector<32x3xf32> -> vector<32x3xf32>
    %25 = arith.truncf %24 : vector<32x3xf32> to vector<32x3xbf16>
    %c3_22 = arith.constant 3 : index
    %c0_23 = arith.constant 0 : index
    %c0_24 = arith.constant 0 : index
    %26 = vector.load %arg3[%c3_22, %c0_23, %c0_24] : memref<8x32x3xbf16, #tpu.memory_space<vmem>>, vector<1x32x3xbf16>
    %27 = vector.shape_cast %26 : vector<1x32x3xbf16> to vector<32x3xbf16>
    %28 = vector.shape_cast %25 : vector<32x3xbf16> to vector<1x32x3xbf16>
    tpu.vector_store %arg3[%c3_22, %c0_23, %c0_24], %28 {strides = array<i32>} : memref<8x32x3xbf16, #tpu.memory_space<vmem>>, vector<1x32x3xbf16>,
    %c4 = arith.constant 4 : index
    %c0_25 = arith.constant 0 : index
    %c0_26 = arith.constant 0 : index
    %29 = vector.load %arg2[%c4, %c0_25, %c0_26] : memref<8x8x3xbf16, #tpu.memory_space<vmem>>, vector<1x8x3xbf16>
    %30 = vector.shape_cast %29 : vector<1x8x3xbf16> to vector<8x3xbf16>
    %cst_27 = arith.constant dense<0.000000e+00> : vector<32x3xf32>
    %31 = tpu.matmul %0, %30, %cst_27 {dimension_numbers = #tpu.dot_dimension_numbers<[1], [0], [0], [1], [0, 0, 1, 1], [], []>} : vector<32x8xbf16>, vector<8x3xbf16>, vector<32x3xf32> -> vector<32x3xf32>
    %32 = arith.truncf %31 : vector<32x3xf32> to vector<32x3xbf16>
    %c4_28 = arith.constant 4 : index
    %c0_29 = arith.constant 0 : index
    %c0_30 = arith.constant 0 : index
    %33 = vector.load %arg3[%c4_28, %c0_29, %c0_30] : memref<8x32x3xbf16, #tpu.memory_space<vmem>>, vector<1x32x3xbf16>
    %34 = vector.shape_cast %33 : vector<1x32x3xbf16> to vector<32x3xbf16>
    %35 = vector.shape_cast %32 : vector<32x3xbf16> to vector<1x32x3xbf16>
    tpu.vector_store %arg3[%c4_28, %c0_29, %c0_30], %35 {strides = array<i32>} : memref<8x32x3xbf16, #tpu.memory_space<vmem>>, vector<1x32x3xbf16>,
    %c5 = arith.constant 5 : index
    %c0_31 = arith.constant 0 : index
    %c0_32 = arith.constant 0 : index
    %36 = vector.load %arg2[%c5, %c0_31, %c0_32] : memref<8x8x3xbf16, #tpu.memory_space<vmem>>, vector<1x8x3xbf16>
    %37 = vector.shape_cast %36 : vector<1x8x3xbf16> to vector<8x3xbf16>
    %cst_33 = arith.constant dense<0.000000e+00> : vector<32x3xf32>
    %38 = tpu.matmul %0, %37, %cst_33 {dimension_numbers = #tpu.dot_dimension_numbers<[1], [0], [0], [1], [0, 0, 1, 1], [], []>} : vector<32x8xbf16>, vector<8x3xbf16>, vector<32x3xf32> -> vector<32x3xf32>
    %39 = arith.truncf %38 : vector<32x3xf32> to vector<32x3xbf16>
    %c5_34 = arith.constant 5 : index
    %c0_35 = arith.constant 0 : index
    %c0_36 = arith.constant 0 : index
    %40 = vector.load %arg3[%c5_34, %c0_35, %c0_36] : memref<8x32x3xbf16, #tpu.memory_space<vmem>>, vector<1x32x3xbf16>
    %41 = vector.shape_cast %40 : vector<1x32x3xbf16> to vector<32x3xbf16>
    %42 = vector.shape_cast %39 : vector<32x3xbf16> to vector<1x32x3xbf16>
    tpu.vector_store %arg3[%c5_34, %c0_35, %c0_36], %42 {strides = array<i32>} : memref<8x32x3xbf16, #tpu.memory_space<vmem>>, vector<1x32x3xbf16>,
    %c6 = arith.constant 6 : index
    %c0_37 = arith.constant 0 : index
    %c0_38 = arith.constant 0 : index
    %43 = vector.load %arg2[%c6, %c0_37, %c0_38] : memref<8x8x3xbf16, #tpu.memory_space<vmem>>, vector<1x8x3xbf16>
    %44 = vector.shape_cast %43 : vector<1x8x3xbf16> to vector<8x3xbf16>
    %cst_39 = arith.constant dense<0.000000e+00> : vector<32x3xf32>
    %45 = tpu.matmul %0, %44, %cst_39 {dimension_numbers = #tpu.dot_dimension_numbers<[1], [0], [0], [1], [0, 0, 1, 1], [], []>} : vector<32x8xbf16>, vector<8x3xbf16>, vector<32x3xf32> -> vector<32x3xf32>
    %46 = arith.truncf %45 : vector<32x3xf32> to vector<32x3xbf16>
    %c6_40 = arith.constant 6 : index
    %c0_41 = arith.constant 0 : index
    %c0_42 = arith.constant 0 : index
    %47 = vector.load %arg3[%c6_40, %c0_41, %c0_42] : memref<8x32x3xbf16, #tpu.memory_space<vmem>>, vector<1x32x3xbf16>
    %48 = vector.shape_cast %47 : vector<1x32x3xbf16> to vector<32x3xbf16>
    %49 = vector.shape_cast %46 : vector<32x3xbf16> to vector<1x32x3xbf16>
    tpu.vector_store %arg3[%c6_40, %c0_41, %c0_42], %49 {strides = array<i32>} : memref<8x32x3xbf16, #tpu.memory_space<vmem>>, vector<1x32x3xbf16>,
    %c7 = arith.constant 7 : index
    %c0_43 = arith.constant 0 : index
    %c0_44 = arith.constant 0 : index
    %50 = vector.load %arg2[%c7, %c0_43, %c0_44] : memref<8x8x3xbf16, #tpu.memory_space<vmem>>, vector<1x8x3xbf16>
    %51 = vector.shape_cast %50 : vector<1x8x3xbf16> to vector<8x3xbf16>
    %cst_45 = arith.constant dense<0.000000e+00> : vector<32x3xf32>
    %52 = tpu.matmul %0, %51, %cst_45 {dimension_numbers = #tpu.dot_dimension_numbers<[1], [0], [0], [1], [0, 0, 1, 1], [], []>} : vector<32x8xbf16>, vector<8x3xbf16>, vector<32x3xf32> -> vector<32x3xf32>
    %53 = arith.truncf %52 : vector<32x3xf32> to vector<32x3xbf16>
    %c7_46 = arith.constant 7 : index
    %c0_47 = arith.constant 0 : index
    %c0_48 = arith.constant 0 : index
    %54 = vector.load %arg3[%c7_46, %c0_47, %c0_48] : memref<8x32x3xbf16, #tpu.memory_space<vmem>>, vector<1x32x3xbf16>
    %55 = vector.shape_cast %54 : vector<1x32x3xbf16> to vector<32x3xbf16>
    %56 = vector.shape_cast %53 : vector<32x3xbf16> to vector<1x32x3xbf16>
    tpu.vector_store %arg3[%c7_46, %c0_47, %c0_48], %56 {strides = array<i32>} : memref<8x32x3xbf16, #tpu.memory_space<vmem>>, vector<1x32x3xbf16>,
    return
  }
  func.func @transform_0(%arg0: i32) -> (i32, i32) {
    %c0_i32 = arith.constant 0 : i32
    %c0_i32_0 = arith.constant 0 : i32
    %c0_i32_1 = arith.constant 0 : i32
    return %c0_i32, %c0_i32_0 : i32, i32
  }
  func.func @transform_1(%arg0: i32) -> (i32, i32, i32) {
    %c0_i32 = arith.constant 0 : i32
    %c0_i32_0 = arith.constant 0 : i32
    %c0_i32_1 = arith.constant 0 : i32
    return %arg0, %c0_i32, %c0_i32_0 : i32, i32, i32
  }
  func.func @transform_2(%arg0: i32) -> (i32, i32, i32) {
    %c0_i32 = arith.constant 0 : i32
    %c0_i32_0 = arith.constant 0 : i32
    %c0_i32_1 = arith.constant 0 : i32
    return %arg0, %c0_i32, %c0_i32_0 : i32, i32, i32
  }
}

</mosaic_0001>

<bundles_post_ra>
// kernel: _lambda_.25
= control target key start
LH: loop header
LB: loop body
LE: loop exit
PB: predicated region body
PF: predicated region fallthrough
CT: control target
= control target key end

     0   :  { %s978_s15 = smov 0   ;;  %s980_s16 = smov 0   ;;  %s1108_s0 = inlined_call_operand.vmem [shape: bf16[2,19,19,12], index: 0, kind: input, shape index: {}]   ;;  %s1109_s1 = inlined_call_operand.vmem [shape: bf16[4,4,12,8], index: 1, kind: input, shape index: {}]   ;;  %s1110_s2 = inlined_call_operand.vmem [shape: f32[1,8], index: 2, kind: input, shape index: {}]   ;;  %s1111_s3 = inlined_call_operand.vmem [shape: f32[1,8], index: 3, kind: input, shape index: {}]   ;;  %s1112_s4 = inlined_call_operand.vmem [shape: bf16[2,16,16,8], index: 4, kind: output, shape index: {}]  }
   0x1   :  { %s982_s17 = smov 0   ;;  %s984_s18 = smov 0  }
   0x2   :  { %s986_s19 = smov 0   ;;  %s988_s20 = smov 0  }
   0x3   :  { %s990_s21 = smov 0  }
   0x4 LB: > { %s26_s22 = sadd.s32 1, %s936_s18  ;;  %s29_s23 = sadd.s32 1, %s940_s19  ;;  %s948_s21 = sphi %s990_s21, %s14_s21   ;;  %s944_s20 = sphi %s988_s20, %s1122_s20   ;;  %s940_s19 = sphi %s986_s19, %s1121_s19   ;;  %s936_s18 = sphi %s984_s18, %s1120_s18   ;;  %s932_s17 = sphi %s982_s17, %s1119_s17   ;;  %s928_s16 = sphi %s980_s16, %s1118_s16   ;;  %s924_s15 = sphi %s978_s15, %s1117_s15  }
   0x5   : > { %p27_p0 = scmp.ge.s32.totalorder %s26_s22, 4  ;;  %p751_p1 = scmp.ge.s32.totalorder %s948_s21, 1 }
   0x6   : > { %p203_p2 = scmp.lt.s32.totalorder %s948_s21, 129  ;;  %s33_s24 = sadd.s32 1, %s944_s20 }
   0x7   : > { %s1124_s22 = smov (%p27_p0, %s26_s22), 0  ;;  %s1126_s23 = smov (!%p27_p0, %s29_s23), %s940_s19 }
   0x8   : > { %p204_p3 = pnand %p751_p1, %p203_p2  ;;  %p31_p4 = scmp.ge.s32.totalorder %s1126_s23, 16 }
   0x9   : > { %s243_s25 = sadd.s32 (!%p204_p3), %s924_s15, %s928_s16  ;;  %p244_p6 = scmp.lt.s32.totalorder (!%p204_p3), %s932_s17, 1 }
   0xa   : > { %s1128_s23 = smov (%p31_p4, %s1126_s23), 0  ;;  %s1130_s24 = smov (!%p31_p4, %s33_s24), %s944_s20 }
   0xb   : > { %1113 = sst [smem:[#allocation3_spill]] %s1128_s23  ;;  %p35_p5 = scmp.ge.s32.totalorder %s1130_s24, 2 }
   0xc   : > { %207 = sbr.rel (%p204_p3) target bundleno = 283 (0x11b), region = 36  ;;  %p246_p7 = scmp.lt.s32.totalorder (!%p204_p3), %s243_s25, 18 }
   0xd   : > { %s1132_s24 = smov (%p35_p5, %s1130_s24), 0  ;;  %p254_p8 = scmp.lt.s32.totalorder (!%p204_p3), %s924_s15, 3 }
   0xe   : > { %1114 = sst [smem:[#allocation4_spill]] %s1132_s24  ;;  %p261_p9 = scmp.lt.s32.totalorder (!%p204_p3), %s928_s16, 15 }
   0xf   : > { %p758_p10 = scmp.ne.s32.totalorder (!%p204_p3), %s924_s15, 0 }
  0x11   : > { %s1134_s17 = smov (!%p244_p6, %s932_s17), 1  ;;  %s1136_s25 = smov (!%p246_p7, %s243_s25), 18 }
  0x12   : > { %s823_s26 = smul.u32 57, %s1134_s17  ;;  %s756_s30 = sshll.u32 %s1134_s17, 5 }
  0x13   : > { %s822_s27 = smul.u32 3, %s1136_s25  ;;  %s1138_s16 = smov (!%p261_p9, %s928_s16), 15 }
  0x14   : > { %s255_s28 = scalar_select %p254_p8, %s924_s15, 3 }
  0x15   : > { %s250_s29 = sadd.s32 %s823_s26, %s822_s27  ;;  %s755_s13 = sshll.u32 %s1138_s16, 1 }
  0x16   : > { %s752_s5 = sshll.u32 %s250_s29, 2  ;;  %s787_s6 = sshll.u32 %s255_s28, 5 }
  0x17   : > { %s1032_s9 = scalar_lea.vmem %s1108_s0, %s752_s5  ;;  %s1037_s12 = scalar_lea.vmem %s1109_s1, %s787_s6 }
  0x18   : > { %s265_s14 = sadd.s32 %s756_s30, %s755_s13  ;;  %272 = sbr.rel (%p758_p10) target bundleno = 31 (0x1f), region = 40 }
  0x19   : > { %s757_s25 = sshll.u32 %s265_s14, 2 }
  0x1a   : > { %s1043_s17 = scalar_lea.vmem %s1112_s4, %s757_s25 }
  0x1d   : > { %vm273_vm0 = vcmask 64512   ;;  %v950_v0 = vmov 0.0  }
  0x1e   : > { %274 = vst.msk [vmem:[#allocation2] sm:$0xff] %vm273_vm0, %v950_v0  ;;  %275 = vst.msk [vmem:[#allocation2 + $0x8] sm:$0xff] %vm273_vm0, %v950_v0 }
  0x1f PF: > { %vm296_vm1 = vcmask 1045504   ;;  %v951_v1 = vmov 0.0   ;;  %v883_v2 = vld [vmem:[%s1037_s12] sm:$0x3f]   ;;  %vm952_vm2 = vmmov 0   ;;  %vm292_vm3 = vcmask 97280  }
  0x20   : > { %798 = vmatprep.subr.bf16.mxu0 %v951_v1  ;;  %v884_v3 = vld [vmem:[%s1032_s9] sm:$0xff]   ;;  %804 = vmatprep.subr.bf16.mxu1 %v951_v1  ;;  %v298_v5 = vsel %vm296_vm1, %v883_v2, 0  ;;  %v885_v6 = vld [vmem:[%s1037_s12 + $0x8] sm:$0x3f]   ;;  %vm362_vm4 = vsmask.f32 7424 }
  0x21   : > { %800 = vmatprep.mubr.msk.bf16.mxu0 %vm952_vm2, %v951_v1  ;;  %806 = vmatprep.mubr.msk.bf16.mxu1 %vm952_vm2, %v951_v1  ;;  %v886_v4 = vld [vmem:[%s1032_s9] sm:$0xff]   ;;  %v384_v7 = vsel %vm296_vm1, %v885_v6, 0  ;;  %v887_v8 = vld [vmem:[%s1032_s9 + $0x8] ss:$0 sps:$4 sm:$0x11]   ;;  %vm447_vm5 = vcmask 1046528  }
  0x22   : > { %799 = vmatpush3.bf16.msra.mxu0 %v298_v5  ;;  %805 = vmatpush3.bf16.msra.mxu1 %v384_v7  ;;  %v364_v9 = vshrl.u32 %v886_v4, 16  ;;  %v366_v10 = vshll.u32 %v886_v4, 16  ;;  %v371_v11 = vshll.u32 %v887_v8, 16  ;;  %v888_v12 = vld [vmem:[%s1037_s12 + $0x10] sm:$0x3f]   ;;  %vm343_vm7 = vcmask 64512  }
  0x23   : > { %810 = vmatprep.subr.bf16.mxu0 %v951_v1  ;;  %816 = vmatprep.subr.bf16.mxu1 %v951_v1  ;;  %v460_v15 = vsel %vm296_vm1, %v888_v12, 0  ;;  %v889_v16 = vld [vmem:[%s1032_s9] sm:$0xfe]   ;;  %v890_v18 = vld [vmem:[%s1032_s9 + $0x8] ss:$0 sps:$4 sm:$0x11]  }
  0x24   : > { %v368_v13 = vrot.slane %v366_v10, 1  ;;  %v373_v14 = vrot.slane %v371_v11, 1  ;;  %v448_v19 = vrot.slane %v889_v16, 1  ;;  %v891_v20 = vld [vmem:[%s1037_s12 + $0x18] sm:$0x3f]   ;;  %v449_v22 = vrot.slane %v890_v18, 1 }
  0x25   : > { %801 = vmatmul.mubr.msk.bf16.vlgmr.msra.gmra.mxu0 %vm292_vm3, %v884_v3  ;;  %v550_v23 = vsel %vm296_vm1, %v891_v20, 0  ;;  %v892_v24 = vld [vmem:[%s1032_s9] sm:$0xfe]   ;;  %v893_v25 = vld [vmem:[%s1032_s9 + $0x8] ss:$0 sps:$4 sm:$0x33]  }
  0x26   : > { %812 = vmatprep.mubr.msk.bf16.mxu0 %vm952_vm2, %v951_v1  ;;  %v369_v17 = vor.u32 %v368_v13, %v364_v9  ;;  %811 = vmatpush3.bf16.msra.mxu0 %v460_v15  ;;  %v450_v26 = vsel %vm447_vm5, %v448_v19, %v449_v22  ;;  %v525_v27 = vshrl.u32 %v892_v24, 16  ;;  %v528_v28 = vshll.u32 %v892_v24, 16  ;;  %v278_v38 = vld [vmem:[#allocation2] sm:$0xff]  ;;  %v279_v42 = vld [vmem:[#allocation2 + $0x8] sm:$0xff]  ;;  %p780_p11 = scmp.ne.s32.totalorder %s924_s15, 3 }
  0x27   : > { %v533_v29 = vshrl.u32 %v893_v25, 16  ;;  %v536_v30 = vshll.u32 %v893_v25, 16  ;;  %vm523_vm6 = vsmask.f32 6400 }
  0x28   : > { %v374_v21 = vsel %vm362_vm4, %v369_v17, %v373_v14  ;;  %v527_v31 = vrot.slane %v525_v27, 1  ;;  %v530_v32 = vrot.slane %v528_v28, 2 }
  0x29   : > { %807 = vmatmul.mubr.msk.bf16.vlgmr.msra.gmra.mxu1 %vm292_vm3, %v374_v21  ;;  %v535_v33 = vrot.slane %v533_v29, 1  ;;  %v538_v34 = vrot.slane %v536_v30, 2 }
  0x2a   : > { %817 = vmatpush3.bf16.msra.mxu1 %v550_v23  ;;  %818 = vmatprep.mubr.msk.bf16.mxu1 %vm952_vm2, %v951_v1  ;;  %v531_v35 = vor.u32 %v530_v32, %v527_v31 }
  0x2b   : > { %v539_v36 = vor.u32 %v538_v34, %v535_v33 }
  0x2d   : > { %813 = vmatmul.mubr.msk.bf16.vlgmr.msra.gmra.mxu0 %vm292_vm3, %v450_v26  ;;  %v540_v37 = vsel %vm523_vm6, %v531_v35, %v539_v36 }
  0x31   : > { %819 = vmatmul.mubr.msk.bf16.vlgmr.msra.gmra.mxu1 %vm292_vm3, %v540_v37 }
  0xe5   : > { %v334_v39 = vpop.f32.mrf.mxu0 }
  0xe6   : > { %v341_v40 = vadd.f32 %v334_v39, %v278_v38 }
  0xe7   : > { %v802_v41 = vpop.f32.mrf.mxu0 }
  0xe8   : > { %344 = vst.msk [vmem:[#allocation2] sm:$0xff] %vm343_vm7, %v341_v40 }
  0xe9   : > { %v337_v43 = vpop.f32.mrf.mxu0  ;;  %v420_v45 = vpop.f32.mrf.mxu1 }
  0xea   : > { %v342_v44 = vadd.f32 %v337_v43, %v279_v42 }
  0xeb   : > { %v803_v46 = vpop.f32.mrf.mxu0  ;;  %v808_v47 = vpop.f32.mrf.mxu1 }
  0xec   : > { %345 = vst.msk [vmem:[#allocation2 + $0x8] sm:$0xff] %vm343_vm7, %v342_v44 }
  0xed   : > { %v496_v48 = vpop.f32.mrf.mxu0  ;;  %v423_v50 = vpop.f32.mrf.mxu1 }
  0xef   : > { %v349_v49 = vld [vmem:[#allocation2] sm:$0xff]  ;;  %v814_v51 = vpop.f32.mrf.mxu0  ;;  %v809_v53 = vpop.f32.mrf.mxu1 }
  0xf0   : > { %v427_v52 = vadd.f32 %v420_v45, %v349_v49 }
  0xf1   : > { %v499_v54 = vpop.f32.mrf.mxu0  ;;  %v586_v58 = vpop.f32.mrf.mxu1 }
  0xf2   : > { %429 = vst.msk [vmem:[#allocation2] sm:$0xff] %vm343_vm7, %v427_v52 }
  0xf3   : > { %v350_v55 = vld [vmem:[#allocation2 + $0x8] sm:$0xff]  ;;  %v815_v56 = vpop.f32.mrf.mxu0  ;;  %v820_v59 = vpop.f32.mrf.mxu1 }
  0xf4   : > { %v428_v57 = vadd.f32 %v423_v50, %v350_v55 }
  0xf5   : > { %v589_v60 = vpop.f32.mrf.mxu1 }
  0xf6   : > { %430 = vst.msk [vmem:[#allocation2 + $0x8] sm:$0xff] %vm343_vm7, %v428_v57 }
  0xf7   : > { %v821_v63 = vpop.f32.mrf.mxu1 }
  0xf9   : > { %v434_v61 = vld [vmem:[#allocation2] sm:$0xff] }
  0xfa   : > { %v503_v62 = vadd.f32 %v496_v48, %v434_v61 }
  0xfc   : > { %505 = vst.msk [vmem:[#allocation2] sm:$0xff] %vm343_vm7, %v503_v62 }
  0xfd   : > { %v435_v0 = vld [vmem:[#allocation2 + $0x8] sm:$0xff] }
  0xfe   : > { %v504_v1 = vadd.f32 %v499_v54, %v435_v0 }
 0x100   : > { %506 = vst.msk [vmem:[#allocation2 + $0x8] sm:$0xff] %vm343_vm7, %v504_v1 }
 0x103   : > { %v510_v2 = vld [vmem:[#allocation2] sm:$0xff] }
 0x104   : > { %v593_v3 = vadd.f32 %v586_v58, %v510_v2 }
 0x106   : > { %595 = vst.msk [vmem:[#allocation2] sm:$0xff] %vm343_vm7, %v593_v3  ;;  %600 = sbr.rel (%p780_p11) target bundleno = 283 (0x11b), region = 44 }
 0x107   : > { %v511_v4 = vld [vmem:[#allocation2 + $0x8] sm:$0xff] }
 0x108   : > { %v594_v5 = vadd.f32 %v589_v60, %v511_v4 }
 0x10a   : > { %596 = vst.msk [vmem:[#allocation2 + $0x8] sm:$0xff] %vm343_vm7, %v594_v5 }
 0x10b   : > { %v781_v7 = vld [vmem:[%s1110_s2] ss:$0 sm:$0xff]  ;;  %vm631_vm8 = vcmask 60416  }
 0x10c   : > { %v782_v8 = vld [vmem:[%s1111_s3] ss:$0 sm:$0xff] }
 0x10d   : > { %v601_v6 = vld [vmem:[#allocation2] sm:$0xff] }
 0x10e   : > { %v610_v9 = vmul.f32 %v781_v7, %v601_v6 }
 0x110   : > { %v619_v12 = vadd.f32 %v782_v8, %v610_v9 }
 0x111   : > { %v602_v10 = vld [vmem:[#allocation2 + $0x8] sm:$0xff] }
 0x112   : > { %v611_v11 = vmul.f32 %v781_v7, %v602_v10  ;;  %v621_v14 = vmax.f32 %v619_v12, 0.0 }
 0x114   : > { %v620_v13 = vadd.f32 %v782_v8, %v611_v11  ;;  %v788_v16 = vpack.c.bf16 %v621_v14, %v621_v14 }
 0x116   : > { %v622_v15 = vmax.f32 %v620_v13, 0.0  ;;  %632 = vst.msk [vmem:[%s1043_s17] sm:$0xf] %vm631_vm8, %v788_v16 }
 0x118   : > { %v789_v17 = vpack.c.bf16 %v622_v15, %v622_v15 }
 0x11a   : > { %633 = vst.msk [vmem:[%s1043_s17 + $0x4] sm:$0xf] %vm631_vm8, %v789_v17 }
 0x11b PF: > { %s14_s21 = sadd.s32 1, %s948_s21   ;;  %s1115_s27 = sld [smem:[#allocation3_spill]] }
 0x11c   : > { %p11_p12 = scmp.ge.s32.totalorder %s14_s21, 130   ;;  %s1116_s28 = sld [smem:[#allocation4_spill]] }
 0x11d   : > { %s1117_s15 = smov %s936_s18  ;;  %s1118_s16 = smov %s940_s19 }
 0x11e   : > { %s1119_s17 = smov %s944_s20  ;;  %s1120_s18 = smov %s1124_s22 }
 0x11f   :  { %13 = sbr.rel (!%p11_p12) target bundleno = 4 (0x4), region = 80 }
 0x121   : > { %s1121_s19 = smov %s1115_s27 }
 0x122   : > { %s1122_s20 = smov %s1116_s28 }

// kernel: _lambda_.26
= control target key start
LH: loop header
LB: loop body
LE: loop exit
PB: predicated region body
PF: predicated region fallthrough
CT: control target
= control target key end

     0   :  { %s158_s22 = smov 120   ;;  %vm136_vm0 = vcmask 60416   ;;  %s369_s0 = inlined_call_operand.vmem [shape: bf16[16,2,8,16], index: 0, kind: input, shape index: {}]   ;;  %s370_s1 = inlined_call_operand.vmem [shape: bf16[16,8,8], index: 1, kind: output, shape index: {}]  }
   0x1   :  { %v12_v0 = vld [vmem:[%s369_s0 + $0x10] sm:$0xf]  ;;  %v13_v1 = vld [vmem:[%s369_s0 + $0x14] sm:$0xf]  ;;  %v8_v2 = vld [vmem:[%s369_s0] sm:$0xf] }
   0x2   :  { %v178_v3 = vmax.bf16 %v13_v1, %v12_v0  ;;  %v9_v4 = vld [vmem:[%s369_s0 + $0x4] sm:$0xf]  ;;  %v14_v5 = vld [vmem:[%s369_s0 + $0x18] sm:$0xf]  ;;  %v15_v6 = vld [vmem:[%s369_s0 + $0x1c] sm:$0xf] }
   0x3   :  { %v189_v7 = vmax.bf16 %v9_v4, %v8_v2  ;;  %v10_v8 = vld [vmem:[%s369_s0 + $0x8] sm:$0xf]  ;;  %v11_v9 = vld [vmem:[%s369_s0 + $0xc] sm:$0xf]  ;;  %v199_v10 = vmax.bf16 %v15_v6, %v14_v5  ;;  %v16_v14 = vld [vmem:[%s369_s0 + $0x20] sm:$0xf] }
   0x4   :  { %76 = vrot.lane.b32.xlu1 %v178_v3, %s158_s22  ;;  %v203_v11 = vmax.bf16 %v11_v9, %v10_v8  ;;  %v18_v12 = vld [vmem:[%s369_s0 + $0x28] sm:$0xf]  ;;  %v19_v13 = vld [vmem:[%s369_s0 + $0x2c] sm:$0xf]  ;;  %v17_v15 = vld [vmem:[%s369_s0 + $0x24] sm:$0xf] }
   0x5   :  { %72 = vrot.lane.b32.xlu0 %v189_v7, %s158_s22  ;;  %v219_v16 = vmax.bf16 %v19_v13, %v18_v12  ;;  %v223_v17 = vmax.bf16 %v17_v15, %v16_v14  ;;  %v22_v18 = vld [vmem:[%s369_s0 + $0x38] sm:$0xf]  ;;  %v23_v19 = vld [vmem:[%s369_s0 + $0x3c] sm:$0xf]  ;;  %v20_v20 = vld [vmem:[%s369_s0 + $0x30] sm:$0xf] }
   0x6   :  { %v21_v21 = vld [vmem:[%s369_s0 + $0x34] sm:$0xf]  ;;  %v47_v22 = vmax.bf16 %v23_v19, %v22_v18  ;;  %v26_v24 = vld [vmem:[%s369_s0 + $0x48] sm:$0xf]  ;;  %v27_v25 = vld [vmem:[%s369_s0 + $0x4c] sm:$0xf] }
   0x7   :  { %v46_v23 = vmax.bf16 %v21_v21, %v20_v20  ;;  %v24_v26 = vld [vmem:[%s369_s0 + $0x40] sm:$0xf]  ;;  %v25_v27 = vld [vmem:[%s369_s0 + $0x44] sm:$0xf]  ;;  %v49_v28 = vmax.bf16 %v27_v25, %v26_v24  ;;  %v30_v30 = vld [vmem:[%s369_s0 + $0x58] sm:$0xf] }
   0x8   :  { %78 = vrot.lane.b32.xlu1 %v199_v10, %s158_s22  ;;  %v48_v29 = vmax.bf16 %v25_v27, %v24_v26  ;;  %v31_v31 = vld [vmem:[%s369_s0 + $0x5c] sm:$0xf]  ;;  %v28_v32 = vld [vmem:[%s369_s0 + $0x50] sm:$0xf]  ;;  %v29_v33 = vld [vmem:[%s369_s0 + $0x54] sm:$0xf] }
   0x9   :  { %74 = vrot.lane.b32.xlu0 %v203_v11, %s158_s22  ;;  %v51_v34 = vmax.bf16 %v31_v31, %v30_v30  ;;  %v50_v35 = vmax.bf16 %v29_v33, %v28_v32  ;;  %v34_v36 = vld [vmem:[%s369_s0 + $0x68] sm:$0xf]  ;;  %v35_v37 = vld [vmem:[%s369_s0 + $0x6c] sm:$0xf]  ;;  %v32_v38 = vld [vmem:[%s369_s0 + $0x60] sm:$0xf] }
   0xa   :  { %v33_v39 = vld [vmem:[%s369_s0 + $0x64] sm:$0xf]  ;;  %v53_v40 = vmax.bf16 %v35_v37, %v34_v36  ;;  %v38_v42 = vld [vmem:[%s369_s0 + $0x78] sm:$0xf]  ;;  %v39_v43 = vld [vmem:[%s369_s0 + $0x7c] sm:$0xf] }
   0xb   :  { %v52_v41 = vmax.bf16 %v33_v39, %v32_v38  ;;  %v36_v44 = vld [vmem:[%s369_s0 + $0x70] sm:$0xf]  ;;  %v37_v45 = vld [vmem:[%s369_s0 + $0x74] sm:$0xf]  ;;  %v55_v46 = vmax.bf16 %v39_v43, %v38_v42 }
   0xc   :  { %82 = vrot.lane.b32.xlu1 %v219_v16, %s158_s22  ;;  %v54_v47 = vmax.bf16 %v37_v45, %v36_v44 }
   0xd   :  { %80 = vrot.lane.b32.xlu0 %v223_v17, %s158_s22 }
  0x10   :  { %86 = vrot.lane.b32.xlu1 %v47_v22, %s158_s22 }
  0x11   :  { %84 = vrot.lane.b32.xlu0 %v46_v23, %s158_s22 }
  0x14   :  { %90 = vrot.lane.b32.xlu1 %v49_v28, %s158_s22 }
  0x15   :  { %88 = vrot.lane.b32.xlu0 %v48_v29, %s158_s22 }
  0x18   :  { %94 = vrot.lane.b32.xlu1 %v51_v34, %s158_s22 }
  0x19   :  { %92 = vrot.lane.b32.xlu0 %v50_v35, %s158_s22 }
  0x1c   :  { %98 = vrot.lane.b32.xlu1 %v53_v40, %s158_s22 }
  0x1d   :  { %96 = vrot.lane.b32.xlu0 %v52_v41, %s158_s22 }
  0x20   :  { %102 = vrot.lane.b32.xlu1 %v55_v46, %s158_s22 }
  0x21   :  { %100 = vrot.lane.b32.xlu0 %v54_v47, %s158_s22 }
  0x76   :  { %v77_v48 = vpop.permute.xlu1 %76 }
  0x77   :  { %v122_v49 = vmax.bf16 %v77_v48, %v178_v3  ;;  %v73_v50 = vpop.permute.xlu0 %72 }
  0x78   :  { %v120_v51 = vmax.bf16 %v73_v50, %v189_v7 }
  0x79   :  { %139 = vst.msk [vmem:[%s370_s1 + $0x8] sm:$0xf] %vm136_vm0, %v122_v49 }
  0x7a   :  { %137 = vst.msk [vmem:[%s370_s1] sm:$0xf] %vm136_vm0, %v120_v51  ;;  %v79_v52 = vpop.permute.xlu1 %78 }
  0x7b   :  { %v123_v53 = vmax.bf16 %v79_v52, %v199_v10  ;;  %v75_v54 = vpop.permute.xlu0 %74 }
  0x7c   :  { %v121_v55 = vmax.bf16 %v75_v54, %v203_v11 }
  0x7d   :  { %140 = vst.msk [vmem:[%s370_s1 + $0xc] sm:$0xf] %vm136_vm0, %v123_v53 }
  0x7e   :  { %138 = vst.msk [vmem:[%s370_s1 + $0x4] sm:$0xf] %vm136_vm0, %v121_v55  ;;  %v83_v56 = vpop.permute.xlu1 %82 }
  0x7f   :  { %v125_v57 = vmax.bf16 %v83_v56, %v219_v16  ;;  %v81_v58 = vpop.permute.xlu0 %80 }
  0x80   :  { %v124_v59 = vmax.bf16 %v81_v58, %v223_v17 }
  0x81   :  { %142 = vst.msk [vmem:[%s370_s1 + $0x14] sm:$0xf] %vm136_vm0, %v125_v57 }
  0x82   :  { %141 = vst.msk [vmem:[%s370_s1 + $0x10] sm:$0xf] %vm136_vm0, %v124_v59  ;;  %v87_v60 = vpop.permute.xlu1 %86 }
  0x83   :  { %v127_v61 = vmax.bf16 %v87_v60, %v47_v22  ;;  %v85_v62 = vpop.permute.xlu0 %84 }
  0x84   :  { %v126_v63 = vmax.bf16 %v85_v62, %v46_v23 }
  0x85   :  { %144 = vst.msk [vmem:[%s370_s1 + $0x1c] sm:$0xf] %vm136_vm0, %v127_v61 }
  0x86   :  { %143 = vst.msk [vmem:[%s370_s1 + $0x18] sm:$0xf] %vm136_vm0, %v126_v63  ;;  %v91_v0 = vpop.permute.xlu1 %90 }
  0x87   :  { %v129_v1 = vmax.bf16 %v91_v0, %v49_v28  ;;  %v89_v2 = vpop.permute.xlu0 %88 }
  0x88   :  { %v128_v3 = vmax.bf16 %v89_v2, %v48_v29 }
  0x89   :  { %146 = vst.msk [vmem:[%s370_s1 + $0x24] sm:$0xf] %vm136_vm0, %v129_v1 }
  0x8a   :  { %145 = vst.msk [vmem:[%s370_s1 + $0x20] sm:$0xf] %vm136_vm0, %v128_v3  ;;  %v95_v4 = vpop.permute.xlu1 %94 }
  0x8b   :  { %v131_v5 = vmax.bf16 %v95_v4, %v51_v34  ;;  %v93_v6 = vpop.permute.xlu0 %92 }
  0x8c   :  { %v130_v7 = vmax.bf16 %v93_v6, %v50_v35 }
  0x8d   :  { %148 = vst.msk [vmem:[%s370_s1 + $0x2c] sm:$0xf] %vm136_vm0, %v131_v5 }
  0x8e   :  { %147 = vst.msk [vmem:[%s370_s1 + $0x28] sm:$0xf] %vm136_vm0, %v130_v7  ;;  %v99_v8 = vpop.permute.xlu1 %98 }
  0x8f   :  { %v133_v9 = vmax.bf16 %v99_v8, %v53_v40  ;;  %v97_v10 = vpop.permute.xlu0 %96 }
  0x90   :  { %v132_v11 = vmax.bf16 %v97_v10, %v52_v41 }
  0x91   :  { %150 = vst.msk [vmem:[%s370_s1 + $0x34] sm:$0xf] %vm136_vm0, %v133_v9 }
  0x92   :  { %149 = vst.msk [vmem:[%s370_s1 + $0x30] sm:$0xf] %vm136_vm0, %v132_v11  ;;  %v103_v12 = vpop.permute.xlu1 %102 }
  0x93   :  { %v135_v13 = vmax.bf16 %v103_v12, %v55_v46  ;;  %v101_v14 = vpop.permute.xlu0 %100 }
  0x94   :  { %v134_v15 = vmax.bf16 %v101_v14, %v54_v47 }
  0x95   :  { %152 = vst.msk [vmem:[%s370_s1 + $0x3c] sm:$0xf] %vm136_vm0, %v135_v13 }
  0x96   :  { %151 = vst.msk [vmem:[%s370_s1 + $0x38] sm:$0xf] %vm136_vm0, %v134_v15 }

// kernel: _lambda_.27
= control target key start
LH: loop header
LB: loop body
LE: loop exit
PB: predicated region body
PF: predicated region fallthrough
CT: control target
= control target key end

     0   :  { %s776_s15 = smov 0   ;;  %s778_s16 = smov 0   ;;  %s886_s0 = inlined_call_operand.vmem [shape: bf16[2,10,10,8], index: 0, kind: input, shape index: {}]   ;;  %s887_s1 = inlined_call_operand.vmem [shape: bf16[3,3,8,8], index: 1, kind: input, shape index: {}]   ;;  %s888_s2 = inlined_call_operand.vmem [shape: f32[1,8], index: 2, kind: input, shape index: {}]   ;;  %s889_s3 = inlined_call_operand.vmem [shape: f32[1,8], index: 3, kind: input, shape index: {}]   ;;  %s890_s4 = inlined_call_operand.vmem [shape: bf16[2,8,8,8], index: 4, kind: output, shape index: {}]  }
   0x1   :  { %s780_s17 = smov 0   ;;  %s782_s18 = smov 0  }
   0x2   :  { %s784_s19 = smov 0   ;;  %s786_s20 = smov 0  }
   0x3   :  { %s788_s21 = smov 0  }
   0x4 LB: > { %s26_s22 = sadd.s32 1, %s734_s18  ;;  %s29_s23 = sadd.s32 1, %s738_s19  ;;  %s746_s21 = sphi %s788_s21, %s14_s21   ;;  %s742_s20 = sphi %s786_s20, %s898_s20   ;;  %s738_s19 = sphi %s784_s19, %s897_s19   ;;  %s734_s18 = sphi %s782_s18, %s896_s18   ;;  %s730_s17 = sphi %s780_s17, %s895_s17   ;;  %s726_s16 = sphi %s778_s16, %s894_s16   ;;  %s722_s15 = sphi %s776_s15, %s893_s15  }
   0x5   : > { %p27_p0 = scmp.ge.s32.totalorder %s26_s22, 3  ;;  %p586_p1 = scmp.ge.s32.totalorder %s746_s21, 1 }
   0x6   : > { %p203_p2 = scmp.lt.s32.totalorder %s746_s21, 49  ;;  %s33_s24 = sadd.s32 1, %s742_s20 }
   0x7   : > { %s900_s22 = smov (%p27_p0, %s26_s22), 0  ;;  %s902_s23 = smov (!%p27_p0, %s29_s23), %s738_s19 }
   0x8   : > { %p204_p3 = pnand %p586_p1, %p203_p2  ;;  %p31_p4 = scmp.ge.s32.totalorder %s902_s23, 8 }
   0x9   : > { %s242_s25 = sadd.s32 (!%p204_p3), %s722_s15, %s726_s16  ;;  %p243_p6 = scmp.lt.s32.totalorder (!%p204_p3), %s730_s17, 1 }
   0xa   : > { %s904_s23 = smov (%p31_p4, %s902_s23), 0  ;;  %s906_s24 = smov (!%p31_p4, %s33_s24), %s742_s20 }
   0xb   : > { %p35_p5 = scmp.ge.s32.totalorder %s906_s24, 2  ;;  %207 = sbr.rel (%p204_p3) target bundleno = 267 (0x10b), region = 36 }
   0xc   : > { %p245_p7 = scmp.lt.s32.totalorder (!%p204_p3), %s242_s25, 9  ;;  %p253_p8 = scmp.lt.s32.totalorder (!%p204_p3), %s722_s15, 2 }
   0xd   : > { %s908_s24 = smov (%p35_p5, %s906_s24), 0  ;;  %p260_p9 = scmp.lt.s32.totalorder (!%p204_p3), %s726_s16, 7 }
   0xe   : > { %891 = sst [smem:[#allocation3_spill]] %s908_s24  ;;  %p592_p10 = scmp.ne.s32.totalorder (!%p204_p3), %s722_s15, 0 }
  0x10   : > { %s910_s17 = smov (!%p243_p6, %s730_s17), 1  ;;  %s912_s25 = smov (!%p245_p7, %s242_s25), 9 }
  0x11   : > { %s629_s26 = smul.u32 20, %s910_s17  ;;  %s587_s27 = sshll.u32 %s912_s25, 1 }
  0x12   : > { %s590_s7 = sshll.u32 %s910_s17, 3  ;;  %s914_s16 = smov (!%p260_p9, %s726_s16), 7 }
  0x13   : > { %s249_s28 = sadd.s32 %s629_s26, %s587_s27  ;;  %s263_s10 = sadd.s32 %s590_s7, %s914_s16 }
  0x14   : > { %s588_s29 = sshll.u32 %s249_s28, 2  ;;  %s591_s14 = sshll.u32 %s263_s10, 2 }
  0x15   : > { %s829_s6 = scalar_lea.vmem %s886_s0, %s588_s29  ;;  %s839_s26 = scalar_lea.vmem %s890_s4, %s591_s14 }
  0x16   : > { %s254_s8 = scalar_select %p253_p8, %s722_s15, 2 }
  0x17   : > { %270 = sbr.rel (%p592_p10) target bundleno = 30 (0x1e), region = 40 }
  0x18   : > { %s630_s9 = smul.u32 12, %s254_s8 }
  0x1a   : > { %s257_s13 = scalar_lea.vmem %s887_s1, %s630_s9 }
  0x1c   : > { %vm271_vm0 = vcmask 64512   ;;  %v748_v0 = vmov 0.0  }
  0x1d   : > { %272 = vst.msk [vmem:[#allocation2] sm:$0xff] %vm271_vm0, %v748_v0 }
  0x1e PF: > { %v275_v1 = vld [vmem:[%s257_s13] sm:$0xf]  ;;  %vm280_vm1 = vcmask 1043456   ;;  %v749_v2 = vmov 0.0   ;;  %vm750_vm2 = vmmov 0   ;;  %vm276_vm3 = vcmask 64512  }
  0x1f   : > { %611 = vmatprep.subr.bf16.mxu0 %v749_v2  ;;  %v282_v3 = vsel %vm280_vm1, %v275_v1, 0  ;;  %613 = vmatprep.mubr.msk.bf16.mxu0 %vm750_vm2, %v749_v2  ;;  %v273_v4 = vld [vmem:[%s829_s6] sm:$0xf]  ;;  %v594_v5 = vld [vmem:[%s257_s13 + $0x4] sm:$0xf]  ;;  %p600_p11 = scmp.ne.s32.totalorder %s722_s15, 2 }
  0x20   : > { %612 = vmatpush3.bf16.msra.mxu0 %v282_v3  ;;  %617 = vmatprep.subr.bf16.mxu1 %v749_v2  ;;  %v347_v6 = vsel %vm280_vm1, %v594_v5, 0  ;;  %v690_v7 = vld [vmem:[%s829_s6] sm:$0x1f]   ;;  %v597_v8 = vld [vmem:[%s257_s13 + $0x8] sm:$0xf] }
  0x21   : > { %618 = vmatpush3.bf16.msra.mxu1 %v347_v6  ;;  %619 = vmatprep.mubr.msk.bf16.mxu1 %vm750_vm2, %v749_v2  ;;  %v406_v9 = vsel %vm280_vm1, %v597_v8, 0  ;;  %v337_v10 = vshrl.u32 %v690_v7, 16  ;;  %v339_v11 = vshll.u32 %v690_v7, 16  ;;  %v691_v12 = vld [vmem:[%s829_s6] sm:$0x1e]  }
  0x22   : > { %623 = vmatprep.subr.bf16.mxu0 %v749_v2  ;;  %v401_v15 = vrot.slane %v691_v12, 1 }
  0x23   : > { %614 = vmatmul.mubr.msk.bf16.vlgmr.msra.gmra.mxu0 %vm276_vm3, %v273_v4  ;;  %v341_v13 = vrot.slane %v339_v11, 1 }
  0x24   : > { %624 = vmatpush3.bf16.msra.mxu0 %v406_v9  ;;  %625 = vmatprep.mubr.msk.bf16.mxu0 %vm750_vm2, %v749_v2  ;;  %v274_v16 = vld [vmem:[#allocation2] sm:$0xff] }
  0x25   : > { %v342_v14 = vor.u32 %v341_v13, %v337_v10 }
  0x27   : > { %620 = vmatmul.mubr.msk.bf16.vlgmr.msra.gmra.mxu1 %vm276_vm3, %v342_v14 }
  0x2b   : > { %626 = vmatmul.mubr.msk.bf16.vlgmr.msra.gmra.mxu0 %vm276_vm3, %v401_v15 }
  0xe3   : > { %v318_v17 = vpop.f32.mrf.mxu0 }
  0xe4   : > { %v324_v18 = vadd.f32 %v318_v17, %v274_v16 }
  0xe5   : > { %v615_v19 = vpop.f32.mrf.mxu0 }
  0xe6   : > { %325 = vst.msk [vmem:[#allocation2] sm:$0xff] %vm276_vm3, %v324_v18 }
  0xe7   : > { %v321_v20 = vpop.f32.mrf.mxu0  ;;  %v383_v21 = vpop.f32.mrf.mxu1 }
  0xe9   : > { %v616_v22 = vpop.f32.mrf.mxu0  ;;  %v621_v23 = vpop.f32.mrf.mxu1 }
  0xeb   : > { %v442_v24 = vpop.f32.mrf.mxu0  ;;  %v386_v26 = vpop.f32.mrf.mxu1 }
  0xed   : > { %v328_v25 = vld [vmem:[#allocation2] sm:$0xff]  ;;  %v627_v27 = vpop.f32.mrf.mxu0  ;;  %v622_v29 = vpop.f32.mrf.mxu1 }
  0xee   : > { %v389_v28 = vadd.f32 %v383_v21, %v328_v25 }
  0xef   : > { %v445_v30 = vpop.f32.mrf.mxu0 }
  0xf0   : > { %390 = vst.msk [vmem:[#allocation2] sm:$0xff] %vm276_vm3, %v389_v28 }
  0xf1   : > { %v628_v31 = vpop.f32.mrf.mxu0 }
  0xf6   : > { %453 = sbr.rel (%p600_p11) target bundleno = 267 (0x10b), region = 44 }
  0xf7   : > { %v393_v32 = vld [vmem:[#allocation2] sm:$0xff] }
  0xf8   : > { %v448_v33 = vadd.f32 %v442_v24, %v393_v32 }
  0xfa   : > { %449 = vst.msk [vmem:[#allocation2] sm:$0xff] %vm276_vm3, %v448_v33 }
  0xfb   : > { %v601_v35 = vld [vmem:[%s888_s2] ss:$0 sm:$0xff]  ;;  %vm473_vm4 = vcmask 60416  }
  0xfc   : > { %v602_v36 = vld [vmem:[%s889_s3] ss:$0 sm:$0xff] }
 0x101   : > { %v454_v34 = vld [vmem:[#allocation2] sm:$0xff] }
 0x102   : > { %v462_v37 = vmul.f32 %v601_v35, %v454_v34 }
 0x104   : > { %v470_v38 = vadd.f32 %v602_v36, %v462_v37 }
 0x106   : > { %v471_v39 = vmax.f32 %v470_v38, 0.0 }
 0x108   : > { %v472_v40 = vpack.c.bf16 %v471_v39, %v471_v39 }
 0x10a   : > { %474 = vst.msk [vmem:[%s839_s26] sm:$0xf] %vm473_vm4, %v472_v40 }
 0x10b PF: > { %s14_s21 = sadd.s32 1, %s746_s21   ;;  %s892_s28 = sld [smem:[#allocation3_spill]] }
 0x10c   : > { %p11_p12 = scmp.ge.s32.totalorder %s14_s21, 50   ;;  %s893_s15 = smov %s734_s18 }
 0x10d   : > { %s894_s16 = smov %s738_s19  ;;  %s895_s17 = smov %s742_s20 }
 0x10e   : > { %s896_s18 = smov %s900_s22  ;;  %s897_s19 = smov %s904_s23 }
 0x10f   :  { %13 = sbr.rel (!%p11_p12) target bundleno = 4 (0x4), region = 79 }
 0x111   : > { %s898_s20 = smov %s892_s28 }

// kernel: _lambda_.28
= control target key start
LH: loop header
LB: loop body
LE: loop exit
PB: predicated region body
PF: predicated region fallthrough
CT: control target
= control target key end

     0   :  { %s862_s18 = smov 0   ;;  %s864_s19 = smov 0   ;;  %s978_s0 = inlined_call_operand.vmem [shape: bf16[2,10,10,8], index: 0, kind: input, shape index: {}]   ;;  %s979_s1 = inlined_call_operand.vmem [shape: bf16[3,3,8,8], index: 1, kind: input, shape index: {}]   ;;  %s980_s2 = inlined_call_operand.vmem [shape: f32[1,8], index: 2, kind: input, shape index: {}]   ;;  %s981_s3 = inlined_call_operand.vmem [shape: f32[1,8], index: 3, kind: input, shape index: {}]   ;;  %s982_s4 = inlined_call_operand.vmem [shape: bf16[2,8,8,8], index: 4, kind: input, shape index: {}]   ;;  %s983_s5 = inlined_call_operand.vmem [shape: bf16[2,8,8,8], index: 5, kind: output, shape index: {}]  }
   0x1   :  { %s866_s20 = smov 0   ;;  %s868_s21 = smov 0  }
   0x2   :  { %s870_s22 = smov 0   ;;  %s872_s23 = smov 0  }
   0x3   :  { %s874_s24 = smov 0  }
   0x4 LB: > { %s27_s25 = sadd.s32 1, %s815_s21  ;;  %s30_s26 = sadd.s32 1, %s819_s22  ;;  %s827_s24 = sphi %s874_s24, %s15_s24   ;;  %s823_s23 = sphi %s872_s23, %s993_s23   ;;  %s819_s22 = sphi %s870_s22, %s992_s22   ;;  %s815_s21 = sphi %s868_s21, %s991_s21   ;;  %s811_s20 = sphi %s866_s20, %s990_s20   ;;  %s807_s19 = sphi %s864_s19, %s989_s19   ;;  %s803_s18 = sphi %s862_s18, %s988_s18  }
   0x5   : > { %p28_p0 = scmp.ge.s32.totalorder %s27_s25, 3  ;;  %p665_p1 = scmp.ge.s32.totalorder %s827_s24, 1 }
   0x6   : > { %p243_p2 = scmp.lt.s32.totalorder %s827_s24, 49  ;;  %s34_s27 = sadd.s32 1, %s823_s23 }
   0x7   : > { %s995_s25 = smov (%p28_p0, %s27_s25), 0  ;;  %s997_s26 = smov (!%p28_p0, %s30_s26), %s819_s22 }
   0x8   : > { %p244_p3 = pnand %p665_p1, %p243_p2  ;;  %p32_p4 = scmp.ge.s32.totalorder %s997_s26, 8 }
   0x9   : > { %s292_s28 = sadd.s32 (!%p244_p3), %s803_s18, %s807_s19  ;;  %p293_p6 = scmp.lt.s32.totalorder (!%p244_p3), %s811_s20, 1 }
   0xa   : > { %s999_s26 = smov (%p32_p4, %s997_s26), 0  ;;  %s1001_s27 = smov (!%p32_p4, %s34_s27), %s823_s23 }
   0xb   : > { %984 = sst [smem:[#allocation3_spill]] %s999_s26  ;;  %p36_p5 = scmp.ge.s32.totalorder %s1001_s27, 2 }
   0xc   : > { %247 = sbr.rel (%p244_p3) target bundleno = 270 (0x10e), region = 40  ;;  %p295_p7 = scmp.lt.s32.totalorder (!%p244_p3), %s292_s28, 9 }
   0xd   : > { %s1003_s27 = smov (%p36_p5, %s1001_s27), 0  ;;  %p303_p8 = scmp.lt.s32.totalorder (!%p244_p3), %s803_s18, 2 }
   0xe   : > { %985 = sst [smem:[#allocation4_spill]] %s1003_s27  ;;  %p310_p9 = scmp.lt.s32.totalorder (!%p244_p3), %s807_s19, 7 }
   0xf   : > { %p673_p10 = scmp.ne.s32.totalorder (!%p244_p3), %s803_s18, 0 }
  0x11   : > { %s1005_s20 = smov (!%p293_p6, %s811_s20), 1  ;;  %s1007_s28 = smov (!%p295_p7, %s292_s28), 9 }
  0x12   : > { %s710_s29 = smul.u32 20, %s1005_s20  ;;  %s666_s30 = sshll.u32 %s1007_s28, 1 }
  0x13   : > { %s669_s11 = sshll.u32 %s1005_s20, 3  ;;  %s1009_s19 = smov (!%p310_p9, %s807_s19), 7 }
  0x14   : > { %s299_s6 = sadd.s32 %s710_s29, %s666_s30  ;;  %s313_s14 = sadd.s32 %s669_s11, %s1009_s19 }
  0x15   : > { %s667_s7 = sshll.u32 %s299_s6, 2  ;;  %s670_s27 = sshll.u32 %s313_s14, 2 }
  0x16   : > { %s915_s10 = scalar_lea.vmem %s978_s0, %s667_s7  ;;  %s925_s29 = scalar_lea.vmem %s982_s4, %s670_s27 }
  0x17   : > { %s304_s12 = scalar_select %p303_p8, %s803_s18, 2 }
  0x18   : > { %s930_s7 = scalar_lea.vmem %s983_s5, %s670_s27  ;;  %328 = sbr.rel (%p673_p10) target bundleno = 31 (0x1f), region = 44 }
  0x19   : > { %s711_s13 = smul.u32 12, %s304_s12 }
  0x1b   : > { %s307_s17 = scalar_lea.vmem %s979_s1, %s711_s13 }
  0x1d   : > { %vm329_vm0 = vcmask 64512   ;;  %v829_v0 = vmov 0.0  }
  0x1e   : > { %330 = vst.msk [vmem:[#allocation2] sm:$0xff] %vm329_vm0, %v829_v0 }
  0x1f PF: > { %v333_v1 = vld [vmem:[%s307_s17] sm:$0xf]  ;;  %vm338_vm1 = vcmask 1043456   ;;  %v830_v2 = vmov 0.0   ;;  %vm831_vm2 = vmmov 0   ;;  %vm334_vm3 = vcmask 64512  }
  0x20   : > { %692 = vmatprep.subr.bf16.mxu0 %v830_v2  ;;  %v340_v3 = vsel %vm338_vm1, %v333_v1, 0  ;;  %694 = vmatprep.mubr.msk.bf16.mxu0 %vm831_vm2, %v830_v2  ;;  %v331_v4 = vld [vmem:[%s915_s10] sm:$0xf]  ;;  %v675_v5 = vld [vmem:[%s307_s17 + $0x4] sm:$0xf]  ;;  %p681_p11 = scmp.ne.s32.totalorder %s803_s18, 2 }
  0x21   : > { %693 = vmatpush3.bf16.msra.mxu0 %v340_v3  ;;  %698 = vmatprep.subr.bf16.mxu1 %v830_v2  ;;  %v405_v6 = vsel %vm338_vm1, %v675_v5, 0  ;;  %v771_v7 = vld [vmem:[%s915_s10] sm:$0x1f]   ;;  %v678_v8 = vld [vmem:[%s307_s17 + $0x8] sm:$0xf] }
  0x22   : > { %699 = vmatpush3.bf16.msra.mxu1 %v405_v6  ;;  %700 = vmatprep.mubr.msk.bf16.mxu1 %vm831_vm2, %v830_v2  ;;  %v464_v9 = vsel %vm338_vm1, %v678_v8, 0  ;;  %v395_v10 = vshrl.u32 %v771_v7, 16  ;;  %v397_v11 = vshll.u32 %v771_v7, 16  ;;  %v772_v12 = vld [vmem:[%s915_s10] sm:$0x1e]  }
  0x23   : > { %704 = vmatprep.subr.bf16.mxu0 %v830_v2  ;;  %v459_v15 = vrot.slane %v772_v12, 1 }
  0x24   : > { %695 = vmatmul.mubr.msk.bf16.vlgmr.msra.gmra.mxu0 %vm334_vm3, %v331_v4  ;;  %v399_v13 = vrot.slane %v397_v11, 1 }
  0x25   : > { %705 = vmatpush3.bf16.msra.mxu0 %v464_v9  ;;  %706 = vmatprep.mubr.msk.bf16.mxu0 %vm831_vm2, %v830_v2  ;;  %v332_v16 = vld [vmem:[#allocation2] sm:$0xff] }
  0x26   : > { %v400_v14 = vor.u32 %v399_v13, %v395_v10 }
  0x28   : > { %701 = vmatmul.mubr.msk.bf16.vlgmr.msra.gmra.mxu1 %vm334_vm3, %v400_v14 }
  0x2c   : > { %707 = vmatmul.mubr.msk.bf16.vlgmr.msra.gmra.mxu0 %vm334_vm3, %v459_v15 }
  0xe4   : > { %v376_v17 = vpop.f32.mrf.mxu0 }
  0xe5   : > { %v382_v18 = vadd.f32 %v376_v17, %v332_v16 }
  0xe6   : > { %v696_v19 = vpop.f32.mrf.mxu0 }
  0xe7   : > { %383 = vst.msk [vmem:[#allocation2] sm:$0xff] %vm334_vm3, %v382_v18 }
  0xe8   : > { %v379_v20 = vpop.f32.mrf.mxu0  ;;  %v441_v21 = vpop.f32.mrf.mxu1 }
  0xea   : > { %v697_v22 = vpop.f32.mrf.mxu0  ;;  %v702_v23 = vpop.f32.mrf.mxu1 }
  0xec   : > { %v500_v24 = vpop.f32.mrf.mxu0  ;;  %v444_v26 = vpop.f32.mrf.mxu1 }
  0xee   : > { %v386_v25 = vld [vmem:[#allocation2] sm:$0xff]  ;;  %v708_v27 = vpop.f32.mrf.mxu0  ;;  %v703_v29 = vpop.f32.mrf.mxu1 }
  0xef   : > { %v447_v28 = vadd.f32 %v441_v21, %v386_v25 }
  0xf0   : > { %v503_v30 = vpop.f32.mrf.mxu0 }
  0xf1   : > { %448 = vst.msk [vmem:[#allocation2] sm:$0xff] %vm334_vm3, %v447_v28 }
  0xf2   : > { %v709_v31 = vpop.f32.mrf.mxu0 }
  0xf7   : > { %511 = sbr.rel (%p681_p11) target bundleno = 270 (0x10e), region = 48 }
  0xf8   : > { %v451_v32 = vld [vmem:[#allocation2] sm:$0xff] }
  0xf9   : > { %v506_v33 = vadd.f32 %v500_v24, %v451_v32 }
  0xfb   : > { %507 = vst.msk [vmem:[#allocation2] sm:$0xff] %vm334_vm3, %v506_v33 }
  0xfc   : > { %v682_v35 = vld [vmem:[%s980_s2] ss:$0 sm:$0xff]  ;;  %vm534_vm4 = vcmask 60416  }
  0xfd   : > { %v683_v36 = vld [vmem:[%s981_s3] ss:$0 sm:$0xff] }
  0xfe   : > { %v529_v38 = vld [vmem:[%s925_s29] sm:$0xf] }
  0xff   : > { %v530_v39 = vunpack.c.l.bf16 %v529_v38 }
 0x102   : > { %v512_v34 = vld [vmem:[#allocation2] sm:$0xff] }
 0x103   : > { %v520_v37 = vmul.f32 %v682_v35, %v512_v34 }
 0x105   : > { %v528_v40 = vadd.f32 %v683_v36, %v520_v37 }
 0x107   : > { %v531_v41 = vadd.f32 %v530_v39, %v528_v40 }
 0x109   : > { %v532_v42 = vmax.f32 %v531_v41, 0.0 }
 0x10b   : > { %v533_v43 = vpack.c.bf16 %v532_v42, %v532_v42 }
 0x10d   : > { %535 = vst.msk [vmem:[%s930_s7] sm:$0xf] %vm534_vm4, %v533_v43 }
 0x10e PF: > { %s15_s24 = sadd.s32 1, %s827_s24   ;;  %s986_s8 = sld [smem:[#allocation3_spill]] }
 0x10f   : > { %p12_p12 = scmp.ge.s32.totalorder %s15_s24, 50   ;;  %s987_s9 = sld [smem:[#allocation4_spill]] }
 0x110   : > { %s988_s18 = smov %s815_s21  ;;  %s989_s19 = smov %s819_s22 }
 0x111   : > { %s990_s20 = smov %s823_s23  ;;  %s991_s21 = smov %s995_s25 }
 0x112   :  { %14 = sbr.rel (!%p12_p12) target bundleno = 4 (0x4), region = 86 }
 0x114   : > { %s992_s22 = smov %s986_s8 }
 0x115   : > { %s993_s23 = smov %s987_s9 }

// kernel: _lambda_.29
= control target key start
LH: loop header
LB: loop body
LE: loop exit
PB: predicated region body
PF: predicated region fallthrough
CT: control target
= control target key end

     0   :  { %vm40_vm0 = vcmask 1043456   ;;  %vm33_vm1 = vcmask 64512   ;;  %vm131_vm2 = vcmask 125952   ;;  %s218_s1 = inlined_call_operand.vmem [shape: bf16[8,16], index: 1, kind: input, shape index: {}]   ;;  %s219_s0 = inlined_call_operand.vmem [shape: bf16[32,8], index: 0, kind: input, shape index: {}]   ;;  %s220_s2 = inlined_call_operand.vmem [shape: f32[1,16], index: 2, kind: input, shape index: {}]   ;;  %s221_s3 = inlined_call_operand.vmem [shape: f32[1,16], index: 3, kind: input, shape index: {}]   ;;  %s222_s4 = inlined_call_operand.vmem [shape: bf16[32,16], index: 4, kind: output, shape index: {}]  }
   0x1   :  { %v22_v0 = vld [vmem:[%s218_s1] sm:$0xf]  ;;  %v165_v3 = vld [vmem:[%s219_s0 + $0x8] sm:$0xff]  }
   0x2   :  { %163 = vmatprep.subr.msk.bf16.mxu0 %vm40_vm0, %v22_v0  ;;  %v42_v1 = vsel %vm40_vm0, %v22_v0, 0  ;;  %v164_v2 = vld [vmem:[%s219_s0] sm:$0xff]  }
   0x3   :  { %158 = vmatpush3.bf16.msra.mxu0 %v42_v1  ;;  %159 = vmatprep.mubr.msk.bf16.mxu0 %vm33_vm1, %v164_v2  ;;  %v144_v4 = vld [vmem:[%s220_s2] ss:$0 sm:$0xff] }
   0x4   :  { %v145_v6 = vld [vmem:[%s221_s3] ss:$0 sm:$0xff] }
   0x6   :  { %160 = vmatmul.mubr.msk.bf16.vlgmr.msra.gmra.mxu0 %vm33_vm1, %v165_v3 }
  0xc6   :  { %v161_v5 = vpop.f32.mrf.mxu0 }
  0xc7   :  { %v102_v7 = vmul.f32 %v161_v5, %v144_v4 }
  0xc8   :  { %v78_v8 = vpop.f32.mrf.mxu0 }
  0xc9   :  { %v113_v9 = vadd.f32 %v145_v6, %v102_v7  ;;  %v100_v10 = vmul.f32 %v144_v4, %v78_v8 }
  0xca   :  { %v162_v11 = vpop.f32.mrf.mxu0 }
  0xcb   :  { %v152_v12 = vpack.c.bf16 %v113_v9, %v113_v9  ;;  %v111_v13 = vadd.f32 %v145_v6, %v100_v10  ;;  %v103_v14 = vmul.f32 %v162_v11, %v144_v4 }
  0xcc   :  { %v81_v15 = vpop.f32.mrf.mxu0 }
  0xcd   :  { %134 = vst.msk [vmem:[%s222_s4 + $0x8] sm:$0xf] %vm131_vm2, %v152_v12  ;;  %v150_v16 = vpack.c.bf16 %v111_v13, %v111_v13  ;;  %v114_v17 = vadd.f32 %v145_v6, %v103_v14  ;;  %v101_v18 = vmul.f32 %v144_v4, %v81_v15 }
  0xcf   :  { %132 = vst.msk [vmem:[%s222_s4] sm:$0xf] %vm131_vm2, %v150_v16  ;;  %v153_v19 = vpack.c.bf16 %v114_v17, %v114_v17  ;;  %v112_v20 = vadd.f32 %v145_v6, %v101_v18 }
  0xd1   :  { %135 = vst.msk [vmem:[%s222_s4 + $0xc] sm:$0xf] %vm131_vm2, %v153_v19  ;;  %v151_v21 = vpack.c.bf16 %v112_v20, %v112_v20 }
  0xd3   :  { %133 = vst.msk [vmem:[%s222_s4 + $0x4] sm:$0xf] %vm131_vm2, %v151_v21 }

// kernel: _lambda_.30
= control target key start
LH: loop header
LB: loop body
LE: loop exit
PB: predicated region body
PF: predicated region fallthrough
CT: control target
= control target key end

     0   :  { %s737_s15 = smov 0   ;;  %s739_s16 = smov 0   ;;  %s830_s0 = inlined_call_operand.vmem [shape: bf16[2,5,5,32], index: 0, kind: input, shape index: {}]   ;;  %s831_s1 = inlined_call_operand.vmem [shape: bf16[2,2,32,16], index: 1, kind: input, shape index: {}]   ;;  %s832_s2 = inlined_call_operand.vmem [shape: f32[1,16], index: 2, kind: input, shape index: {}]   ;;  %s833_s3 = inlined_call_operand.vmem [shape: f32[1,16], index: 3, kind: input, shape index: {}]   ;;  %s834_s4 = inlined_call_operand.vmem [shape: bf16[2,4,4,16], index: 4, kind: output, shape index: {}]  }
   0x1   :  { %s741_s17 = smov 0   ;;  %s743_s18 = smov 0  }
   0x2   :  { %s745_s19 = smov 0   ;;  %s747_s20 = smov 0  }
   0x3   :  { %s749_s21 = smov 0  }
   0x4 LB: > { %s26_s22 = sadd.s32 1, %s695_s18  ;;  %s29_s23 = sadd.s32 1, %s699_s19  ;;  %s707_s21 = sphi %s749_s21, %s14_s21   ;;  %s703_s20 = sphi %s747_s20, %s844_s20   ;;  %s699_s19 = sphi %s745_s19, %s843_s19   ;;  %s695_s18 = sphi %s743_s18, %s842_s18   ;;  %s691_s17 = sphi %s741_s17, %s841_s17   ;;  %s687_s16 = sphi %s739_s16, %s840_s16   ;;  %s683_s15 = sphi %s737_s15, %s839_s15  }
   0x5   : > { %p27_p0 = scmp.ge.s32.totalorder %s26_s22, 2  ;;  %p542_p1 = scmp.ge.s32.totalorder %s707_s21, 1 }
   0x6   : > { %p202_p2 = scmp.lt.s32.totalorder %s707_s21, 17  ;;  %s33_s24 = sadd.s32 1, %s703_s20 }
   0x7   : > { %s846_s22 = smov (%p27_p0, %s26_s22), 0  ;;  %s848_s23 = smov (!%p27_p0, %s29_s23), %s699_s19 }
   0x8   : > { %p203_p3 = pnand %p542_p1, %p202_p2  ;;  %p31_p4 = scmp.ge.s32.totalorder %s848_s23, 4 }
   0x9   : > { %s240_s25 = sadd.s32 (!%p203_p3), %s683_s15, %s687_s16  ;;  %p241_p6 = scmp.lt.s32.totalorder (!%p203_p3), %s691_s17, 1 }
   0xa   : > { %s850_s23 = smov (%p31_p4, %s848_s23), 0  ;;  %s852_s24 = smov (!%p31_p4, %s33_s24), %s703_s20 }
   0xb   : > { %835 = sst [smem:[#allocation3_spill]] %s850_s23  ;;  %p35_p5 = scmp.ge.s32.totalorder %s852_s24, 2 }
   0xc   : > { %206 = sbr.rel (%p203_p3) target bundleno = 261 (0x105), region = 36  ;;  %p243_p7 = scmp.lt.s32.totalorder (!%p203_p3), %s240_s25, 4 }
   0xd   : > { %s854_s24 = smov (%p35_p5, %s852_s24), 0  ;;  %p250_p8 = scmp.lt.s32.totalorder (!%p203_p3), %s683_s15, 1 }
   0xe   : > { %836 = sst [smem:[#allocation4_spill]] %s854_s24  ;;  %p257_p9 = scmp.lt.s32.totalorder (!%p203_p3), %s687_s16, 3 }
   0xf   : > { %p548_p10 = scmp.ne.s32.totalorder (!%p203_p3), %s683_s15, 0 }
  0x11   : > { %s856_s17 = smov (!%p241_p6, %s691_s17), 1  ;;  %s858_s25 = smov (!%p243_p7, %s240_s25), 4 }
  0x12   : > { %s588_s26 = smul.u32 5, %s856_s17  ;;  %s546_s29 = sshll.u32 %s856_s17, 2 }
  0x13   : > { %s251_s27 = scalar_select %p250_p8, %s683_s15, 1 }
  0x14   : > { %s246_s28 = sadd.s32 %s588_s26, %s858_s25  ;;  %s860_s16 = smov (!%p257_p9, %s687_s16), 3 }
  0x15   : > { %s543_s30 = sshll.u32 %s246_s28, 2  ;;  %s565_s5 = sshll.u32 %s251_s27, 5 }
  0x16   : > { %s248_s8 = scalar_lea.vmem %s830_s0, %s543_s30  ;;  %s254_s11 = scalar_lea.vmem %s831_s1, %s565_s5 }
  0x17   : > { %s260_s12 = sadd.s32 %s546_s29, %s860_s16  ;;  %267 = sbr.rel (%p548_p10) target bundleno = 30 (0x1e), region = 40 }
  0x18   : > { %s547_s13 = sshll.u32 %s260_s12, 1 }
  0x19   : > { %s798_s23 = scalar_lea.vmem %s834_s4, %s547_s13 }
  0x1c   : > { %vm268_vm0 = vcmask 125952   ;;  %v709_v0 = vmov 0.0  }
  0x1d   : > { %269 = vst.msk [vmem:[#allocation2] sm:$0xf] %vm268_vm0, %v709_v0 }
  0x1e PF: > { %v648_v1 = vld [vmem:[%s254_s11 + $0x8] sm:$0xff]   ;;  %v710_v2 = vmov 0.0   ;;  %v649_v3 = vld [vmem:[%s254_s11 + $0x18] sm:$0xff]   ;;  %v650_v4 = vld [vmem:[%s254_s11] sm:$0xff]   ;;  %vm711_vm1 = vmmov 0   ;;  %vm288_vm2 = vcmask 261120  }
  0x1f   : > { %572 = vmatprep.subr.bf16.mxu0 %v710_v2  ;;  %580 = vmatprep.subr.bf16.mxu1 %v710_v2  ;;  %v651_v5 = vld [vmem:[%s254_s11 + $0x10] sm:$0xff]   ;;  %v652_v6 = vld [vmem:[%s248_s8] ss:$0 sps:$4 sm:$0x77]   ;;  %vm333_vm3 = vcmask 125952   ;;  %p560_p11 = scmp.ne.s32.totalorder %s683_s15, 1 }
  0x20   : > { %573 = vmatpush3.bf16.msra.mxu0 %v648_v1  ;;  %576 = vmatprep.mubr.msk.bf16.mxu0 %vm711_vm1, %v710_v2  ;;  %v270_v7 = vld [vmem:[%s248_s8] sm:$0x3]  ;;  %v346_v8 = vshrl.u32 %v652_v6, 16  ;;  %v348_v9 = vshll.u32 %v652_v6, 16 }
  0x21   : > { %581 = vmatpush3.bf16.msra.mxu1 %v649_v3  ;;  %574 = vmatprep.subr.bf16.mxu0 %v710_v2 }
  0x22   : > { %582 = vmatprep.subr.bf16.mxu1 %v710_v2  ;;  %584 = vmatprep.mubr.msk.bf16.mxu1 %vm711_vm1, %v710_v2  ;;  %v350_v10 = vrot.slane %v348_v9, 1 }
  0x24   : > { %575 = vmatpush3.bf16.msra.mxu0 %v650_v4  ;;  %v351_v11 = vor.u32 %v350_v10, %v346_v8  ;;  %v271_v12 = vld [vmem:[#allocation2] sm:$0xf] }
  0x25   : > { %583 = vmatpush3.bf16.msra.mxu1 %v651_v5 }
  0x27   : > { %577 = vmatmul.mubr.msk.bf16.vlgmr.msra.gmra.mxu0 %vm288_vm2, %v270_v7 }
  0x28   : > { %585 = vmatmul.mubr.msk.bf16.vlgmr.msra.gmra.mxu1 %vm288_vm2, %v351_v11 }
  0xe7   : > { %v326_v13 = vpop.f32.mrf.mxu0 }
  0xe8   : > { %v332_v14 = vadd.f32 %v326_v13, %v271_v12  ;;  %v401_v16 = vpop.f32.mrf.mxu1 }
  0xe9   : > { %v578_v15 = vpop.f32.mrf.mxu0 }
  0xea   : > { %334 = vst.msk [vmem:[#allocation2] sm:$0xf] %vm333_vm3, %v332_v14  ;;  %v586_v18 = vpop.f32.mrf.mxu1 }
  0xeb   : > { %v329_v17 = vpop.f32.mrf.mxu0 }
  0xec   : > { %v404_v20 = vpop.f32.mrf.mxu1 }
  0xed   : > { %v579_v19 = vpop.f32.mrf.mxu0 }
  0xee   : > { %v587_v22 = vpop.f32.mrf.mxu1 }
  0xf0   : > { %412 = sbr.rel (%p560_p11) target bundleno = 261 (0x105), region = 44 }
  0xf1   : > { %v336_v21 = vld [vmem:[#allocation2] sm:$0xf] }
  0xf2   : > { %v407_v23 = vadd.f32 %v401_v16, %v336_v21 }
  0xf4   : > { %408 = vst.msk [vmem:[#allocation2] sm:$0xf] %vm333_vm3, %v407_v23 }
  0xf5   : > { %v561_v25 = vld [vmem:[%s832_s2] ss:$0 sm:$0xff]  ;;  %vm432_vm4 = vcmask 123904  }
  0xf6   : > { %v562_v26 = vld [vmem:[%s833_s3] ss:$0 sm:$0xff] }
  0xfb   : > { %v413_v24 = vld [vmem:[#allocation2] sm:$0xf] }
  0xfc   : > { %v421_v27 = vmul.f32 %v561_v25, %v413_v24 }
  0xfe   : > { %v429_v28 = vadd.f32 %v562_v26, %v421_v27 }
 0x100   : > { %v430_v29 = vmax.f32 %v429_v28, 0.0 }
 0x102   : > { %v431_v30 = vpack.c.bf16 %v430_v29, %v430_v29 }
 0x104   : > { %433 = vst.msk [vmem:[%s798_s23] sm:$0x3] %vm432_vm4, %v431_v30 }
 0x105 PF: > { %s14_s21 = sadd.s32 1, %s707_s21   ;;  %s837_s26 = sld [smem:[#allocation3_spill]] }
 0x106   : > { %p11_p12 = scmp.ge.s32.totalorder %s14_s21, 18   ;;  %s838_s27 = sld [smem:[#allocation4_spill]] }
 0x107   : > { %s839_s15 = smov %s695_s18  ;;  %s840_s16 = smov %s699_s19 }
 0x108   : > { %s841_s17 = smov %s703_s20  ;;  %s842_s18 = smov %s846_s22 }
 0x109   :  { %13 = sbr.rel (!%p11_p12) target bundleno = 4 (0x4), region = 78 }
 0x10b   : > { %s843_s19 = smov %s837_s26 }
 0x10c   : > { %s844_s20 = smov %s838_s27 }

// kernel: _lambda_.31
= control target key start
LH: loop header
LB: loop body
LE: loop exit
PB: predicated region body
PF: predicated region fallthrough
CT: control target
= control target key end

     0   :  { %s869_s18 = smov 0   ;;  %s871_s19 = smov 0   ;;  %s979_s0 = inlined_call_operand.vmem [shape: bf16[2,6,6,16], index: 0, kind: input, shape index: {}]   ;;  %s980_s1 = inlined_call_operand.vmem [shape: bf16[3,3,16,16], index: 1, kind: input, shape index: {}]   ;;  %s981_s2 = inlined_call_operand.vmem [shape: f32[1,16], index: 2, kind: input, shape index: {}]   ;;  %s982_s3 = inlined_call_operand.vmem [shape: f32[1,16], index: 3, kind: input, shape index: {}]   ;;  %s983_s4 = inlined_call_operand.vmem [shape: bf16[2,4,4,16], index: 4, kind: input, shape index: {}]   ;;  %s984_s5 = inlined_call_operand.vmem [shape: bf16[2,4,4,16], index: 5, kind: output, shape index: {}]  }
   0x1   :  { %s873_s20 = smov 0   ;;  %s875_s21 = smov 0  }
   0x2   :  { %s877_s22 = smov 0   ;;  %s879_s23 = smov 0  }
   0x3   :  { %s881_s24 = smov 0  }
   0x4 LB: > { %s27_s25 = sadd.s32 1, %s822_s21  ;;  %s30_s26 = sadd.s32 1, %s826_s22  ;;  %s834_s24 = sphi %s881_s24, %s15_s24   ;;  %s830_s23 = sphi %s879_s23, %s994_s23   ;;  %s826_s22 = sphi %s877_s22, %s993_s22   ;;  %s822_s21 = sphi %s875_s21, %s992_s21   ;;  %s818_s20 = sphi %s873_s20, %s991_s20   ;;  %s814_s19 = sphi %s871_s19, %s990_s19   ;;  %s810_s18 = sphi %s869_s18, %s989_s18  }
   0x5   : > { %p28_p0 = scmp.ge.s32.totalorder %s27_s25, 3  ;;  %p665_p1 = scmp.ge.s32.totalorder %s834_s24, 1 }
   0x6   : > { %p242_p2 = scmp.lt.s32.totalorder %s834_s24, 25  ;;  %s34_s27 = sadd.s32 1, %s830_s23 }
   0x7   : > { %s996_s25 = smov (%p28_p0, %s27_s25), 0  ;;  %s998_s26 = smov (!%p28_p0, %s30_s26), %s826_s22 }
   0x8   : > { %p243_p3 = pnand %p665_p1, %p242_p2  ;;  %p32_p4 = scmp.ge.s32.totalorder %s998_s26, 4 }
   0x9   : > { %s290_s28 = sadd.s32 (!%p243_p3), %s810_s18, %s814_s19  ;;  %p291_p6 = scmp.lt.s32.totalorder (!%p243_p3), %s818_s20, 1 }
   0xa   : > { %s1000_s26 = smov (%p32_p4, %s998_s26), 0  ;;  %s1002_s27 = smov (!%p32_p4, %s34_s27), %s830_s23 }
   0xb   : > { %985 = sst [smem:[#allocation3_spill]] %s1000_s26  ;;  %p36_p5 = scmp.ge.s32.totalorder %s1002_s27, 2 }
   0xc   : > { %246 = sbr.rel (%p243_p3) target bundleno = 271 (0x10f), region = 40  ;;  %p293_p7 = scmp.lt.s32.totalorder (!%p243_p3), %s290_s28, 5 }
   0xd   : > { %s1004_s27 = smov (%p36_p5, %s1002_s27), 0  ;;  %p300_p8 = scmp.lt.s32.totalorder (!%p243_p3), %s810_s18, 2 }
   0xe   : > { %986 = sst [smem:[#allocation4_spill]] %s1004_s27  ;;  %p307_p9 = scmp.lt.s32.totalorder (!%p243_p3), %s814_s19, 3 }
   0xf   : > { %p672_p10 = scmp.ne.s32.totalorder (!%p243_p3), %s810_s18, 0 }
  0x11   : > { %s1006_s20 = smov (!%p291_p6, %s818_s20), 1  ;;  %s1008_s28 = smov (!%p293_p7, %s290_s28), 5 }
  0x12   : > { %s714_s29 = smul.u32 6, %s1006_s20  ;;  %s668_s15 = sshll.u32 %s1006_s20, 2 }
  0x13   : > { %s301_s30 = scalar_select %p300_p8, %s810_s18, 2 }
  0x14   : > { %s296_s6 = sadd.s32 %s714_s29, %s1008_s28  ;;  %s1010_s19 = smov (!%p307_p9, %s814_s19), 3 }
  0x15   : > { %s666_s7 = sshll.u32 %s296_s6, 2  ;;  %s715_s8 = smul.u32 24, %s301_s30 }
  0x16   : > { %s923_s11 = scalar_lea.vmem %s979_s0, %s666_s7  ;;  %s310_s16 = sadd.s32 %s668_s15, %s1010_s19 }
  0x17   : > { %s304_s14 = scalar_lea.vmem %s980_s1, %s715_s8  ;;  %s669_s17 = sshll.u32 %s310_s16, 1 }
  0x18   : > { %s932_s28 = scalar_lea.vmem %s983_s4, %s669_s17  ;;  %s937_s6 = scalar_lea.vmem %s984_s5, %s669_s17 }
  0x19   : > { %325 = sbr.rel (%p672_p10) target bundleno = 32 (0x20), region = 44 }
  0x1e   : > { %vm326_vm0 = vcmask 125952   ;;  %v836_v0 = vmov 0.0  }
  0x1f   : > { %327 = vst.msk [vmem:[#allocation2] sm:$0xf] %vm326_vm0, %v836_v0 }
  0x20 PF: > { %v775_v1 = vld [vmem:[%s304_s14] sm:$0xff]   ;;  %v837_v2 = vmov 0.0   ;;  %vm838_vm1 = vmmov 0   ;;  %vm338_vm2 = vcmask 130048   ;;  %v776_v4 = vld [vmem:[%s304_s14 + $0x8] sm:$0xff]   ;;  %v778_v6 = vld [vmem:[%s304_s14 + $0x10] sm:$0xff]  }
  0x21   : > { %696 = vmatprep.subr.bf16.mxu0 %v837_v2  ;;  %v328_v3 = vld [vmem:[%s923_s11] sm:$0x3]  ;;  %702 = vmatprep.subr.bf16.mxu1 %v837_v2  ;;  %vm383_vm3 = vcmask 125952   ;;  %p685_p11 = scmp.ne.s32.totalorder %s810_s18, 2 }
  0x22   : > { %697 = vmatpush3.bf16.msra.mxu0 %v775_v1  ;;  %698 = vmatprep.mubr.msk.bf16.mxu0 %vm838_vm1, %v837_v2  ;;  %v777_v5 = vld [vmem:[%s923_s11] ss:$0 sps:$4 sm:$0x77]  }
  0x23   : > { %704 = vmatprep.mubr.msk.bf16.mxu1 %vm838_vm1, %v837_v2  ;;  %708 = vmatprep.subr.bf16.mxu0 %v837_v2  ;;  %v394_v7 = vshrl.u32 %v777_v5, 16  ;;  %v396_v8 = vshll.u32 %v777_v5, 16  ;;  %v779_v9 = vld [vmem:[%s923_s11] ss:$0 sps:$4 sm:$0x66]  }
  0x24   : > { %703 = vmatpush3.bf16.msra.mxu1 %v776_v4  ;;  %v459_v12 = vrot.slane %v779_v9, 1 }
  0x25   : > { %699 = vmatmul.mubr.msk.bf16.vlgmr.msra.gmra.mxu0 %vm338_vm2, %v328_v3  ;;  %v398_v10 = vrot.slane %v396_v8, 1 }
  0x26   : > { %709 = vmatpush3.bf16.msra.mxu0 %v778_v6  ;;  %710 = vmatprep.mubr.msk.bf16.mxu0 %vm838_vm1, %v837_v2  ;;  %v329_v13 = vld [vmem:[#allocation2] sm:$0xf] }
  0x27   : > { %v399_v11 = vor.u32 %v398_v10, %v394_v7 }
  0x29   : > { %705 = vmatmul.mubr.msk.bf16.vlgmr.msra.gmra.mxu1 %vm338_vm2, %v399_v11 }
  0x2d   : > { %711 = vmatmul.mubr.msk.bf16.vlgmr.msra.gmra.mxu0 %vm338_vm2, %v459_v12 }
  0xe5   : > { %v376_v14 = vpop.f32.mrf.mxu0 }
  0xe6   : > { %v382_v15 = vadd.f32 %v376_v14, %v329_v13 }
  0xe7   : > { %v700_v16 = vpop.f32.mrf.mxu0 }
  0xe8   : > { %384 = vst.msk [vmem:[#allocation2] sm:$0xf] %vm383_vm3, %v382_v15 }
  0xe9   : > { %v379_v17 = vpop.f32.mrf.mxu0  ;;  %v443_v18 = vpop.f32.mrf.mxu1 }
  0xeb   : > { %v701_v19 = vpop.f32.mrf.mxu0  ;;  %v706_v20 = vpop.f32.mrf.mxu1 }
  0xed   : > { %v503_v21 = vpop.f32.mrf.mxu0  ;;  %v446_v23 = vpop.f32.mrf.mxu1 }
  0xef   : > { %v386_v22 = vld [vmem:[#allocation2] sm:$0xf]  ;;  %v712_v24 = vpop.f32.mrf.mxu0  ;;  %v707_v26 = vpop.f32.mrf.mxu1 }
  0xf0   : > { %v449_v25 = vadd.f32 %v443_v18, %v386_v22 }
  0xf1   : > { %v506_v27 = vpop.f32.mrf.mxu0 }
  0xf2   : > { %450 = vst.msk [vmem:[#allocation2] sm:$0xf] %vm383_vm3, %v449_v25 }
  0xf3   : > { %v713_v28 = vpop.f32.mrf.mxu0 }
  0xf8   : > { %514 = sbr.rel (%p685_p11) target bundleno = 271 (0x10f), region = 48 }
  0xf9   : > { %v452_v29 = vld [vmem:[#allocation2] sm:$0xf] }
  0xfa   : > { %v509_v30 = vadd.f32 %v503_v21, %v452_v29 }
  0xfc   : > { %510 = vst.msk [vmem:[#allocation2] sm:$0xf] %vm383_vm3, %v509_v30 }
  0xfd   : > { %v686_v32 = vld [vmem:[%s981_s2] ss:$0 sm:$0xff]  ;;  %vm537_vm4 = vcmask 123904  }
  0xfe   : > { %v687_v33 = vld [vmem:[%s982_s3] ss:$0 sm:$0xff] }
  0xff   : > { %v532_v35 = vld [vmem:[%s932_s28] sm:$0x3] }
 0x100   : > { %v533_v36 = vunpack.c.l.bf16 %v532_v35 }
 0x103   : > { %v515_v31 = vld [vmem:[#allocation2] sm:$0xf] }
 0x104   : > { %v523_v34 = vmul.f32 %v686_v32, %v515_v31 }
 0x106   : > { %v531_v37 = vadd.f32 %v687_v33, %v523_v34 }
 0x108   : > { %v534_v38 = vadd.f32 %v533_v36, %v531_v37 }
 0x10a   : > { %v535_v39 = vmax.f32 %v534_v38, 0.0 }
 0x10c   : > { %v536_v40 = vpack.c.bf16 %v535_v39, %v535_v39 }
 0x10e   : > { %538 = vst.msk [vmem:[%s937_s6] sm:$0x3] %vm537_vm4, %v536_v40 }
 0x10f PF: > { %s15_s24 = sadd.s32 1, %s834_s24   ;;  %s987_s7 = sld [smem:[#allocation3_spill]] }
 0x110   : > { %p12_p12 = scmp.ge.s32.totalorder %s15_s24, 26   ;;  %s988_s8 = sld [smem:[#allocation4_spill]] }
 0x111   : > { %s989_s18 = smov %s822_s21  ;;  %s990_s19 = smov %s826_s22 }
 0x112   : > { %s991_s20 = smov %s830_s23  ;;  %s992_s21 = smov %s996_s25 }
 0x113   :  { %14 = sbr.rel (!%p12_p12) target bundleno = 4 (0x4), region = 86 }
 0x115   : > { %s993_s22 = smov %s987_s7 }
 0x116   : > { %s994_s23 = smov %s988_s8 }

// kernel: _lambda_.32
= control target key start
LH: loop header
LB: loop body
LE: loop exit
PB: predicated region body
PF: predicated region fallthrough
CT: control target
= control target key end

     0   :  { %v109_v0 = vmov 0.0   ;;  %vm110_vm0 = vmmov 0   ;;  %vm27_vm1 = vcmask 130048   ;;  %vm88_vm2 = vcmask 257024   ;;  %s151_s1 = inlined_call_operand.vmem [shape: bf16[16,32], index: 1, kind: input, shape index: {}]   ;;  %s152_s0 = inlined_call_operand.vmem [shape: bf16[8,16], index: 0, kind: input, shape index: {}]   ;;  %s153_s2 = inlined_call_operand.vmem [shape: f32[1,32], index: 2, kind: input, shape index: {}]   ;;  %s154_s3 = inlined_call_operand.vmem [shape: f32[1,32], index: 3, kind: input, shape index: {}]   ;;  %s155_s4 = inlined_call_operand.vmem [shape: bf16[8,32], index: 4, kind: output, shape index: {}]  }
   0x1   :  { %100 = vmatprep.subr.bf16.mxu0 %v109_v0  ;;  %v108_v1 = vld [vmem:[%s151_s1] sm:$0xff]   ;;  %102 = vmatprep.mubr.msk.bf16.mxu0 %vm110_vm0, %v109_v0 }
   0x2   :  { %101 = vmatpush3.bf16.msra.mxu0 %v108_v1  ;;  %v18_v2 = vld [vmem:[%s152_s0] sm:$0xf] }
   0x3   :  { %v96_v3 = vld [vmem:[%s153_s2] ss:$0 sm:$0xff] }
   0x4   :  { %v97_v5 = vld [vmem:[%s154_s3] ss:$0 sm:$0xff] }
   0x5   :  { %103 = vmatmul.mubr.msk.bf16.vlgmr.msra.gmra.mxu0 %vm27_vm1, %v18_v2 }
  0xc5   :  { %v65_v4 = vpop.f32.mrf.mxu0 }
  0xc6   :  { %v78_v6 = vmul.f32 %v96_v3, %v65_v4 }
  0xc7   :  { %v104_v7 = vpop.f32.mrf.mxu0 }
  0xc8   :  { %v86_v8 = vadd.f32 %v97_v5, %v78_v6 }
  0xc9   :  { %v68_v9 = vpop.f32.mrf.mxu0 }
  0xca   :  { %v87_v10 = vpack.c.bf16 %v86_v8, %v86_v8 }
  0xcb   :  { %v105_v11 = vpop.f32.mrf.mxu0 }
  0xcc   :  { %89 = vst.msk [vmem:[%s155_s4] sm:$0xf] %vm88_vm2, %v87_v10 }

// kernel: _lambda_.33
= control target key start
LH: loop header
LB: loop body
LE: loop exit
PB: predicated region body
PF: predicated region fallthrough
CT: control target
= control target key end

     0   :  { %s782_s15 = smov 0   ;;  %s784_s16 = smov 0   ;;  %s891_s0 = inlined_call_operand.vmem [shape: bf16[2,4,4,16], index: 0, kind: input, shape index: {}]   ;;  %s892_s1 = inlined_call_operand.vmem [shape: bf16[3,3,16,32], index: 1, kind: input, shape index: {}]   ;;  %s893_s2 = inlined_call_operand.vmem [shape: f32[1,32], index: 2, kind: input, shape index: {}]   ;;  %s894_s3 = inlined_call_operand.vmem [shape: f32[1,32], index: 3, kind: input, shape index: {}]   ;;  %s895_s4 = inlined_call_operand.vmem [shape: bf16[2,2,2,32], index: 4, kind: output, shape index: {}]  }
   0x1   :  { %s786_s17 = smov 0   ;;  %s788_s18 = smov 0  }
   0x2   :  { %s790_s19 = smov 0   ;;  %s792_s20 = smov 0  }
   0x3   :  { %s794_s21 = smov 0  }
   0x4 LB: > { %s26_s22 = sadd.s32 1, %s740_s18  ;;  %s29_s23 = sadd.s32 1, %s744_s19  ;;  %s752_s21 = sphi %s794_s21, %s14_s21   ;;  %s748_s20 = sphi %s792_s20, %s901_s20   ;;  %s744_s19 = sphi %s790_s19, %s900_s19   ;;  %s740_s18 = sphi %s788_s18, %s899_s18   ;;  %s736_s17 = sphi %s786_s17, %s898_s17   ;;  %s732_s16 = sphi %s784_s16, %s897_s16   ;;  %s728_s15 = sphi %s782_s15, %s896_s15  }
   0x5   : > { %p27_p0 = scmp.ge.s32.totalorder %s26_s22, 3  ;;  %p588_p1 = scmp.ge.s32.totalorder %s752_s21, 1 }
   0x6   : > { %p202_p2 = scmp.lt.s32.totalorder %s752_s21, 13  ;;  %s33_s24 = sadd.s32 1, %s748_s20 }
   0x7   : > { %s903_s22 = smov (%p27_p0, %s26_s22), 0  ;;  %s905_s23 = smov (!%p27_p0, %s29_s23), %s744_s19 }
   0x8   : > { %p203_p3 = pnand %p588_p1, %p202_p2  ;;  %p31_p4 = scmp.ge.s32.totalorder %s905_s23, 2 }
   0x9   : > { %s239_s25 = sadd.s32 (!%p203_p3), %s728_s15, %s732_s16  ;;  %p240_p6 = scmp.lt.s32.totalorder (!%p203_p3), %s736_s17, 1 }
   0xa   : > { %s907_s23 = smov (%p31_p4, %s905_s23), 0  ;;  %s909_s24 = smov (!%p31_p4, %s33_s24), %s748_s20 }
   0xb   : > { %p35_p5 = scmp.ge.s32.totalorder %s909_s24, 2  ;;  %206 = sbr.rel (%p203_p3) target bundleno = 266 (0x10a), region = 36 }
   0xc   : > { %p242_p7 = scmp.lt.s32.totalorder (!%p203_p3), %s239_s25, 3  ;;  %p249_p8 = scmp.lt.s32.totalorder (!%p203_p3), %s728_s15, 2 }
   0xd   : > { %s911_s24 = smov (%p35_p5, %s909_s24), 0  ;;  %p256_p9 = scmp.lt.s32.totalorder (!%p203_p3), %s732_s16, 1 }
   0xe   : > { %p593_p10 = scmp.ne.s32.totalorder (!%p203_p3), %s728_s15, 0 }
  0x10   : > { %s913_s17 = smov (!%p240_p6, %s736_s17), 1  ;;  %s915_s25 = smov (!%p242_p7, %s239_s25), 3 }
  0x11   : > { %s589_s26 = sshll.u32 %s913_s17, 2  ;;  %s592_s6 = sshll.u32 %s913_s17, 1 }
  0x12   : > { %s245_s27 = sadd.s32 %s589_s26, %s915_s25  ;;  %s917_s16 = smov (!%p256_p9, %s732_s16), 1 }
  0x13   : > { %s590_s28 = sshll.u32 %s245_s27, 1  ;;  %s839_s9 = sadd.s32 %s592_s6, %s917_s16 }
  0x14   : > { %s835_s5 = scalar_lea.vmem %s891_s0, %s590_s28  ;;  %s260_s25 = scalar_lea.vmem %s895_s4, %s839_s9 }
  0x15   : > { %s250_s7 = scalar_select %p249_p8, %s728_s15, 2 }
  0x16   : > { %265 = sbr.rel (%p593_p10) target bundleno = 29 (0x1d), region = 40 }
  0x17   : > { %s635_s8 = smul.u32 24, %s250_s7 }
  0x19   : > { %s253_s12 = scalar_lea.vmem %s892_s1, %s635_s8 }
  0x1b   : > { %vm266_vm0 = vcmask 254976   ;;  %v754_v0 = vmov 0.0  }
  0x1c   : > { %267 = vst.msk [vmem:[#allocation2] sm:$0x3] %vm266_vm0, %v754_v0 }
  0x1d PF: > { %v695_v1 = vld [vmem:[%s253_s12] sm:$0xff]   ;;  %v755_v2 = vmov 0.0   ;;  %vm756_vm1 = vmmov 0   ;;  %vm278_vm2 = vcmask 130048   ;;  %v696_v4 = vld [vmem:[%s253_s12 + $0x8] sm:$0xff]   ;;  %v697_v8 = vld [vmem:[%s253_s12 + $0x10] sm:$0xff]  }
  0x1e   : > { %617 = vmatprep.subr.bf16.mxu0 %v755_v2  ;;  %v268_v3 = vld [vmem:[%s835_s5] sm:$0x1]  ;;  %623 = vmatprep.subr.bf16.mxu1 %v755_v2  ;;  %v603_v10 = vld.sshfl [vmem:[%s835_s5] sm:$0x2 pattern:$0x76325410] }
  0x1f   : > { %618 = vmatpush3.bf16.msra.mxu0 %v695_v1  ;;  %619 = vmatprep.mubr.msk.bf16.mxu0 %vm756_vm1, %v755_v2  ;;  %v598_v5 = vld.sshfl [vmem:[%s835_s5] sm:$0x3 pattern:$0x76325410]  ;;  %v409_v12 = vrot.slane %v603_v10, 1  ;;  %vm323_vm3 = vcmask 254976  }
  0x20   : > { %625 = vmatprep.mubr.msk.bf16.mxu1 %vm756_vm1, %v755_v2  ;;  %629 = vmatprep.subr.bf16.mxu0 %v755_v2  ;;  %v339_v6 = vshrl.u32 %v598_v5, 16  ;;  %v341_v7 = vshll.u32 %v598_v5, 16  ;;  %p606_p11 = scmp.ne.s32.totalorder %s728_s15, 2 }
  0x21   : > { %624 = vmatpush3.bf16.msra.mxu1 %v696_v4 }
  0x22   : > { %620 = vmatmul.mubr.msk.bf16.vlgmr.msra.gmra.mxu0 %vm278_vm2, %v268_v3  ;;  %v343_v9 = vrot.slane %v341_v7, 1 }
  0x23   : > { %630 = vmatpush3.bf16.msra.mxu0 %v697_v8  ;;  %631 = vmatprep.mubr.msk.bf16.mxu0 %vm756_vm1, %v755_v2  ;;  %v269_v13 = vld [vmem:[#allocation2] sm:$0x3] }
  0x24   : > { %v344_v11 = vor.u32 %v343_v9, %v339_v6 }
  0x26   : > { %626 = vmatmul.mubr.msk.bf16.vlgmr.msra.gmra.mxu1 %vm278_vm2, %v344_v11 }
  0x2a   : > { %632 = vmatmul.mubr.msk.bf16.vlgmr.msra.gmra.mxu0 %vm278_vm2, %v409_v12 }
  0xe2   : > { %v316_v14 = vpop.f32.mrf.mxu0 }
  0xe3   : > { %v322_v15 = vadd.f32 %v316_v14, %v269_v13 }
  0xe4   : > { %v621_v16 = vpop.f32.mrf.mxu0 }
  0xe5   : > { %324 = vst.msk [vmem:[#allocation2] sm:$0x3] %vm323_vm3, %v322_v15 }
  0xe6   : > { %v319_v17 = vpop.f32.mrf.mxu0  ;;  %v388_v18 = vpop.f32.mrf.mxu1 }
  0xe8   : > { %v622_v19 = vpop.f32.mrf.mxu0  ;;  %v627_v20 = vpop.f32.mrf.mxu1 }
  0xea   : > { %v453_v21 = vpop.f32.mrf.mxu0  ;;  %v391_v22 = vpop.f32.mrf.mxu1 }
  0xec   : > { %v326_v23 = vld [vmem:[#allocation2] sm:$0x3]  ;;  %v633_v24 = vpop.f32.mrf.mxu0  ;;  %v628_v26 = vpop.f32.mrf.mxu1 }
  0xed   : > { %v394_v25 = vadd.f32 %v388_v18, %v326_v23 }
  0xee   : > { %v456_v27 = vpop.f32.mrf.mxu0 }
  0xef   : > { %395 = vst.msk [vmem:[#allocation2] sm:$0x3] %vm323_vm3, %v394_v25 }
  0xf0   : > { %v634_v28 = vpop.f32.mrf.mxu0 }
  0xf5   : > { %464 = sbr.rel (%p606_p11) target bundleno = 266 (0x10a), region = 44 }
  0xf6   : > { %v397_v29 = vld [vmem:[#allocation2] sm:$0x3] }
  0xf7   : > { %v459_v30 = vadd.f32 %v453_v21, %v397_v29 }
  0xf9   : > { %460 = vst.msk [vmem:[#allocation2] sm:$0x3] %vm323_vm3, %v459_v30 }
  0xfa   : > { %v607_v32 = vld [vmem:[%s893_s2] ss:$0 sm:$0xff]  ;;  %vm484_vm4 = vcmask 253952  }
  0xfb   : > { %v608_v33 = vld [vmem:[%s894_s3] ss:$0 sm:$0xff] }
 0x100   : > { %v465_v31 = vld [vmem:[#allocation2] sm:$0x3] }
 0x101   : > { %v473_v34 = vmul.f32 %v607_v32, %v465_v31 }
 0x103   : > { %v481_v35 = vadd.f32 %v608_v33, %v473_v34 }
 0x105   : > { %v482_v36 = vmax.f32 %v481_v35, 0.0 }
 0x107   : > { %v483_v37 = vpack.c.bf16 %v482_v36, %v482_v36 }
 0x109   : > { %485 = vst.msk [vmem:[%s260_s25] sm:$0x1] %vm484_vm4, %v483_v37 }
 0x10a PF: > { %s14_s21 = sadd.s32 1, %s752_s21   ;;  %s896_s15 = smov %s740_s18 }
 0x10b   : > { %p11_p12 = scmp.ge.s32.totalorder %s14_s21, 14   ;;  %s897_s16 = smov %s744_s19 }
 0x10c   : > { %s898_s17 = smov %s748_s20  ;;  %s899_s18 = smov %s903_s22 }
 0x10d   : > { %s900_s19 = smov %s907_s23  ;;  %s901_s20 = smov %s911_s24 }
 0x10e   :  { %13 = sbr.rel (!%p11_p12) target bundleno = 4 (0x4), region = 79 }

// kernel: _lambda_.34
= control target key start
LH: loop header
LB: loop body
LE: loop exit
PB: predicated region body
PF: predicated region fallthrough
CT: control target
= control target key end

     0   :  { %s900_s18 = smov 0   ;;  %s902_s19 = smov 0   ;;  %s1026_s0 = inlined_call_operand.vmem [shape: bf16[2,6,6,32], index: 0, kind: input, shape index: {}]   ;;  %s1027_s1 = inlined_call_operand.vmem [shape: bf16[3,3,32,32], index: 1, kind: input, shape index: {}]   ;;  %s1028_s2 = inlined_call_operand.vmem [shape: f32[1,32], index: 2, kind: input, shape index: {}]   ;;  %s1029_s3 = inlined_call_operand.vmem [shape: f32[1,32], index: 3, kind: input, shape index: {}]   ;;  %s1030_s4 = inlined_call_operand.vmem [shape: bf16[2,2,2,32], index: 4, kind: input, shape index: {}]   ;;  %s1031_s5 = inlined_call_operand.vmem [shape: bf16[2,2,2,32], index: 5, kind: output, shape index: {}]  }
   0x1   :  { %s904_s20 = smov 0   ;;  %s906_s21 = smov 0  }
   0x2   :  { %s908_s22 = smov 0   ;;  %s910_s23 = smov 0  }
   0x3   :  { %s912_s24 = smov 0  }
   0x4 LB: > { %s27_s25 = sadd.s32 1, %s853_s21  ;;  %s30_s26 = sadd.s32 1, %s857_s22  ;;  %s865_s24 = sphi %s912_s24, %s15_s24   ;;  %s861_s23 = sphi %s910_s23, %s1037_s23   ;;  %s857_s22 = sphi %s908_s22, %s1036_s22   ;;  %s853_s21 = sphi %s906_s21, %s1035_s21   ;;  %s849_s20 = sphi %s904_s20, %s1034_s20   ;;  %s845_s19 = sphi %s902_s19, %s1033_s19   ;;  %s841_s18 = sphi %s900_s18, %s1032_s18  }
   0x5   : > { %p28_p0 = scmp.ge.s32.totalorder %s27_s25, 3  ;;  %p678_p1 = scmp.ge.s32.totalorder %s865_s24, 1 }
   0x6   : > { %p245_p2 = scmp.lt.s32.totalorder %s865_s24, 13  ;;  %s34_s27 = sadd.s32 1, %s861_s23 }
   0x7   : > { %s1039_s25 = smov (%p28_p0, %s27_s25), 0  ;;  %s1041_s26 = smov (!%p28_p0, %s30_s26), %s857_s22 }
   0x8   : > { %p246_p3 = pnand %p678_p1, %p245_p2  ;;  %p32_p4 = scmp.ge.s32.totalorder %s1041_s26, 2 }
   0x9   : > { %s679_s28 = sshll.u32 (!%p246_p3), %s841_s18, 1  ;;  %p294_p6 = scmp.lt.s32.totalorder (!%p246_p3), %s849_s20, 1 }
   0xa   : > { %s1043_s26 = smov (%p32_p4, %s1041_s26), 0  ;;  %s1045_s27 = smov (!%p32_p4, %s34_s27), %s861_s23 }
   0xb   : > { %p36_p5 = scmp.ge.s32.totalorder %s1045_s27, 2  ;;  %249 = sbr.rel (%p246_p3) target bundleno = 273 (0x111), region = 40 }
   0xc   : > { %s293_s29 = sadd.s32 (!%p246_p3), %s845_s19, %s679_s28  ;;  %p304_p7 = scmp.lt.s32.totalorder (!%p246_p3), %s841_s18, 2 }
   0xd   : > { %s1047_s27 = smov (%p36_p5, %s1045_s27), 0  ;;  %p296_p8 = scmp.lt.s32.totalorder (!%p246_p3), %s293_s29, 5 }
   0xe   : > { %p311_p9 = scmp.lt.s32.totalorder (!%p246_p3), %s845_s19, 1  ;;  %p684_p10 = scmp.ne.s32.totalorder (!%p246_p3), %s841_s18, 0 }
  0x10   : > { %s1049_s20 = smov (!%p294_p6, %s849_s20), 1  ;;  %s1051_s29 = smov (!%p296_p8, %s293_s29), 5 }
  0x11   : > { %s742_s30 = smul.u32 6, %s1049_s20  ;;  %s682_s16 = sshll.u32 %s1049_s20, 1 }
  0x12   : > { %s305_s6 = scalar_select %p304_p7, %s841_s18, 2 }
  0x13   : > { %s299_s7 = sadd.s32 %s742_s30, %s1051_s29  ;;  %s1053_s19 = smov (!%p311_p9, %s845_s19), 1 }
  0x14   : > { %s680_s8 = sshll.u32 %s299_s7, 2  ;;  %s743_s9 = smul.u32 48, %s305_s6 }
  0x15   : > { %s954_s12 = scalar_lea.vmem %s1026_s0, %s680_s8  ;;  %s962_s17 = sadd.s32 %s682_s16, %s1053_s19 }
  0x16   : > { %s959_s15 = scalar_lea.vmem %s1027_s1, %s743_s9  ;;  %s315_s30 = scalar_lea.vmem %s1030_s4, %s962_s17 }
  0x17   : > { %s322_s8 = scalar_lea.vmem %s1031_s5, %s962_s17  ;;  %327 = sbr.rel (%p684_p10) target bundleno = 30 (0x1e), region = 44 }
  0x1c   : > { %vm328_vm0 = vcmask 254976   ;;  %v867_v0 = vmov 0.0  }
  0x1d   : > { %329 = vst.msk [vmem:[#allocation2] sm:$0x3] %vm328_vm0, %v867_v0 }
  0x1e PF: > { %v803_v1 = vld [vmem:[%s959_s15 + $0x8] sm:$0xff]   ;;  %v868_v2 = vmov 0.0   ;;  %v804_v3 = vld [vmem:[%s959_s15] sm:$0xff]   ;;  %v805_v4 = vld [vmem:[%s959_s15 + $0x18] sm:$0xff]   ;;  %vm869_vm1 = vmmov 0   ;;  %vm348_vm2 = vcmask 261120  }
  0x1f   : > { %718 = vmatprep.subr.bf16.mxu0 %v868_v2  ;;  %726 = vmatprep.subr.bf16.mxu1 %v868_v2  ;;  %v806_v5 = vld [vmem:[%s959_s15 + $0x10] sm:$0xff]   ;;  %v807_v6 = vld [vmem:[%s954_s12] ss:$0 sps:$4 sm:$0x22]   ;;  %v808_v8 = vld [vmem:[%s959_s15 + $0x28] sm:$0xff]   ;;  %vm393_vm3 = vcmask 254976  }
  0x20   : > { %719 = vmatpush3.bf16.msra.mxu0 %v803_v1  ;;  %722 = vmatprep.mubr.msk.bf16.mxu0 %vm869_vm1, %v868_v2  ;;  %v330_v7 = vld [vmem:[%s954_s12] sm:$0x1]  ;;  %v405_v9 = vrot.slane %v807_v6, 1  ;;  %p704_p11 = scmp.ne.s32.totalorder %s841_s18, 2 }
  0x21   : > { %720 = vmatprep.subr.bf16.mxu0 %v868_v2  ;;  %730 = vmatprep.mubr.msk.bf16.mxu1 %vm869_vm1, %v868_v2  ;;  %v810_v10 = vld [vmem:[%s954_s12] ss:$0 sps:$4 sm:$0x44]  }
  0x22   : > { %727 = vmatpush3.bf16.msra.mxu1 %v805_v4  ;;  %v809_v11 = vld [vmem:[%s959_s15 + $0x20] sm:$0xff]   ;;  %v473_v12 = vrot.slane %v810_v10, 2 }
  0x23   : > { %728 = vmatprep.subr.bf16.mxu1 %v868_v2 }
  0x24   : > { %721 = vmatpush3.bf16.msra.mxu0 %v804_v3  ;;  %v331_v13 = vld [vmem:[#allocation2] sm:$0x3] }
  0x25   : > { %734 = vmatprep.subr.bf16.mxu0 %v868_v2 }
  0x26   : > { %729 = vmatpush3.bf16.msra.mxu1 %v806_v5 }
  0x27   : > { %723 = vmatmul.mubr.msk.bf16.vlgmr.msra.gmra.mxu0 %vm348_vm2, %v330_v7 }
  0x28   : > { %735 = vmatpush3.bf16.msra.mxu0 %v808_v8  ;;  %738 = vmatprep.mubr.msk.bf16.mxu0 %vm869_vm1, %v868_v2 }
  0x29   : > { %731 = vmatmul.mubr.msk.bf16.vlgmr.msra.gmra.mxu1 %vm348_vm2, %v405_v9  ;;  %736 = vmatprep.subr.bf16.mxu0 %v868_v2 }
  0x2c   : > { %737 = vmatpush3.bf16.msra.mxu0 %v809_v11 }
  0x2f   : > { %739 = vmatmul.mubr.msk.bf16.vlgmr.msra.gmra.mxu0 %vm348_vm2, %v473_v12 }
  0xe7   : > { %v386_v14 = vpop.f32.mrf.mxu0 }
  0xe8   : > { %v392_v15 = vadd.f32 %v386_v14, %v331_v13 }
  0xe9   : > { %v724_v16 = vpop.f32.mrf.mxu0  ;;  %v455_v17 = vpop.f32.mrf.mxu1 }
  0xea   : > { %394 = vst.msk [vmem:[#allocation2] sm:$0x3] %vm393_vm3, %v392_v15 }
  0xeb   : > { %v389_v18 = vpop.f32.mrf.mxu0  ;;  %v732_v19 = vpop.f32.mrf.mxu1 }
  0xed   : > { %v725_v20 = vpop.f32.mrf.mxu0  ;;  %v458_v21 = vpop.f32.mrf.mxu1 }
  0xef   : > { %v733_v22 = vpop.f32.mrf.mxu1  ;;  %v523_v23 = vpop.f32.mrf.mxu0 }
  0xf1   : > { %v396_v24 = vld [vmem:[#allocation2] sm:$0x3]  ;;  %v740_v25 = vpop.f32.mrf.mxu0 }
  0xf2   : > { %v461_v26 = vadd.f32 %v455_v17, %v396_v24 }
  0xf3   : > { %v526_v27 = vpop.f32.mrf.mxu0 }
  0xf4   : > { %462 = vst.msk [vmem:[#allocation2] sm:$0x3] %vm393_vm3, %v461_v26 }
  0xf5   : > { %v741_v28 = vpop.f32.mrf.mxu0 }
  0xfa   : > { %534 = sbr.rel (%p704_p11) target bundleno = 273 (0x111), region = 48 }
  0xfb   : > { %v464_v29 = vld [vmem:[#allocation2] sm:$0x3] }
  0xfc   : > { %v529_v30 = vadd.f32 %v523_v23, %v464_v29 }
  0xfe   : > { %530 = vst.msk [vmem:[#allocation2] sm:$0x3] %vm393_vm3, %v529_v30 }
  0xff   : > { %v705_v32 = vld [vmem:[%s1028_s2] ss:$0 sm:$0xff]  ;;  %vm557_vm4 = vcmask 253952  }
 0x100   : > { %v706_v33 = vld [vmem:[%s1029_s3] ss:$0 sm:$0xff] }
 0x101   : > { %v552_v35 = vld [vmem:[%s315_s30] sm:$0x1] }
 0x102   : > { %v553_v36 = vunpack.c.l.bf16 %v552_v35 }
 0x105   : > { %v535_v31 = vld [vmem:[#allocation2] sm:$0x3] }
 0x106   : > { %v543_v34 = vmul.f32 %v705_v32, %v535_v31 }
 0x108   : > { %v551_v37 = vadd.f32 %v706_v33, %v543_v34 }
 0x10a   : > { %v554_v38 = vadd.f32 %v553_v36, %v551_v37 }
 0x10c   : > { %v555_v39 = vmax.f32 %v554_v38, 0.0 }
 0x10e   : > { %v556_v40 = vpack.c.bf16 %v555_v39, %v555_v39 }
 0x110   : > { %558 = vst.msk [vmem:[%s322_s8] sm:$0x1] %vm557_vm4, %v556_v40 }
 0x111 PF: > { %s15_s24 = sadd.s32 1, %s865_s24   ;;  %s1032_s18 = smov %s853_s21 }
 0x112   : > { %p12_p12 = scmp.ge.s32.totalorder %s15_s24, 14   ;;  %s1033_s19 = smov %s857_s22 }
 0x113   : > { %s1034_s20 = smov %s861_s23  ;;  %s1035_s21 = smov %s1039_s25 }
 0x114   : > { %s1036_s22 = smov %s1043_s26  ;;  %s1037_s23 = smov %s1047_s27 }
 0x115   :  { %14 = sbr.rel (!%p12_p12) target bundleno = 4 (0x4), region = 86 }

// kernel: _lambda_.35
= control target key start
LH: loop header
LB: loop body
LE: loop exit
PB: predicated region body
PF: predicated region fallthrough
CT: control target
= control target key end

     0   :  { %v122_v0 = vmov 0.0   ;;  %vm123_vm0 = vmmov 0   ;;  %vm35_vm1 = vcmask 261120   ;;  %vm96_vm2 = vcmask 519168   ;;  %s167_s1 = inlined_call_operand.vmem [shape: bf16[32,64], index: 1, kind: input, shape index: {}]   ;;  %s168_s0 = inlined_call_operand.vmem [shape: bf16[8,32], index: 0, kind: input, shape index: {}]   ;;  %s169_s2 = inlined_call_operand.vmem [shape: f32[1,64], index: 2, kind: input, shape index: {}]   ;;  %s170_s3 = inlined_call_operand.vmem [shape: f32[1,64], index: 3, kind: input, shape index: {}]   ;;  %s171_s4 = inlined_call_operand.vmem [shape: bf16[8,64], index: 4, kind: output, shape index: {}]  }
   0x1   :  { %110 = vmatprep.subr.bf16.mxu0 %v122_v0  ;;  %v120_v1 = vld [vmem:[%s167_s1 + $0x8] sm:$0xff]   ;;  %114 = vmatprep.mubr.msk.bf16.mxu0 %vm123_vm0, %v122_v0  ;;  %v121_v2 = vld [vmem:[%s167_s1] sm:$0xff]  }
   0x2   :  { %111 = vmatpush3.bf16.msra.mxu0 %v120_v1  ;;  %v18_v3 = vld [vmem:[%s168_s0] sm:$0xf] }
   0x3   :  { %112 = vmatprep.subr.bf16.mxu0 %v122_v0  ;;  %v105_v4 = vld [vmem:[%s169_s2] ss:$0 sm:$0xff] }
   0x4   :  { %v106_v6 = vld [vmem:[%s170_s3] ss:$0 sm:$0xff] }
   0x6   :  { %113 = vmatpush3.bf16.msra.mxu0 %v121_v2 }
   0x9   :  { %115 = vmatmul.mubr.msk.bf16.vlgmr.msra.gmra.mxu0 %vm35_vm1, %v18_v3 }
  0xc9   :  { %v73_v5 = vpop.f32.mrf.mxu0 }
  0xca   :  { %v86_v7 = vmul.f32 %v105_v4, %v73_v5 }
  0xcb   :  { %v116_v8 = vpop.f32.mrf.mxu0 }
  0xcc   :  { %v94_v9 = vadd.f32 %v106_v6, %v86_v7 }
  0xcd   :  { %v76_v10 = vpop.f32.mrf.mxu0 }
  0xce   :  { %v95_v11 = vpack.c.bf16 %v94_v9, %v94_v9 }
  0xcf   :  { %v117_v12 = vpop.f32.mrf.mxu0 }
  0xd0   :  { %97 = vst.msk [vmem:[%s171_s4] sm:$0xf] %vm96_vm2, %v95_v11 }

// kernel: _lambda_.36
= control target key start
LH: loop header
LB: loop body
LE: loop exit
PB: predicated region body
PF: predicated region fallthrough
CT: control target
= control target key end

     0   :  { %s767_s15 = smov 0   ;;  %s769_s16 = smov 0   ;;  %s857_s0 = inlined_call_operand.vmem [shape: bf16[2,3,3,32], index: 0, kind: input, shape index: {}]   ;;  %s858_s1 = inlined_call_operand.vmem [shape: bf16[3,3,32,64], index: 1, kind: input, shape index: {}]   ;;  %s859_s2 = inlined_call_operand.vmem [shape: f32[1,64], index: 2, kind: input, shape index: {}]   ;;  %s860_s3 = inlined_call_operand.vmem [shape: f32[1,64], index: 3, kind: input, shape index: {}]   ;;  %s861_s4 = inlined_call_operand.vmem [shape: bf16[2,1,1,64], index: 4, kind: output, shape index: {}]  }
   0x1   :  { %s771_s17 = smov 0   ;;  %s773_s18 = smov 0  }
   0x2   :  { %s775_s19 = smov 0  }
   0x3 LB: > { %s26_s20 = sadd.s32 1, %s729_s17  ;;  %s33_s21 = sadd.s32 1, %s733_s18  ;;  %s737_s19 = sphi %s775_s19, %s14_s19   ;;  %s733_s18 = sphi %s773_s18, %s865_s18   ;;  %s729_s17 = sphi %s771_s17, %s864_s17   ;;  %s725_s16 = sphi %s769_s16, %s863_s16   ;;  %s721_s15 = sphi %s767_s15, %s862_s15  }
   0x4   : > { %p27_p0 = scmp.ge.s32.totalorder %s26_s20, 3  ;;  %p589_p1 = scmp.ge.s32.totalorder %s737_s19, 1 }
   0x5   : > { %p202_p2 = scmp.lt.s32.totalorder %s737_s19, 7 }
   0x6   : > { %s867_s20 = smov (%p27_p0, %s26_s20), 0  ;;  %s869_s21 = smov (!%p27_p0, %s33_s21), %s733_s18 }
   0x7   : > { %p203_p3 = pnand %p589_p1, %p202_p2  ;;  %p35_p4 = scmp.ge.s32.totalorder %s869_s21, 2 }
   0x8   : > { %p239_p5 = scmp.lt.s32.totalorder (!%p203_p3), %s725_s16, 1  ;;  %p241_p6 = scmp.lt.s32.totalorder (!%p203_p3), %s721_s15, 2 }
   0x9   : > { %s871_s21 = smov (%p35_p4, %s869_s21), 0  ;;  %206 = sbr.rel (%p203_p3) target bundleno = 267 (0x10b), region = 36 }
   0xa   : > { %p592_p7 = scmp.ne.s32.totalorder (!%p203_p3), %s721_s15, 0 }
   0xe   : > { %s873_s16 = smov (!%p239_p5, %s725_s16), 1 }
   0xf   : > { %s242_s22 = scalar_select %p241_p6, %s721_s15, 2 }
  0x10   : > { %s648_s23 = smul.u32 3, %s873_s16  ;;  %s804_s26 = scalar_lea.vmem %s861_s4, %s873_s16 }
  0x11   : > { %s649_s27 = smul.u32 48, %s242_s22 }
  0x12   : > { %s244_s28 = sadd.s32 %s648_s23, %s242_s22  ;;  %263 = sbr.rel (%p592_p7) target bundleno = 25 (0x19), region = 40 }
  0x13   : > { %s590_s29 = sshll.u32 %s244_s28, 1  ;;  %s809_s6 = scalar_lea.vmem %s858_s1, %s649_s27 }
  0x14   : > { %s814_s9 = scalar_lea.vmem %s857_s0, %s590_s29 }
  0x17   : > { %vm264_vm0 = vcmask 516096   ;;  %v739_v0 = vmov 0.0  }
  0x18   : > { %265 = vst.msk [vmem:[#allocation2] sm:$0x1] %vm264_vm0, %v739_v0 }
  0x19 PF: > { %v693_v1 = vld [vmem:[%s809_s6 + $0x8] sm:$0xff]   ;;  %v740_v2 = vmov 0.0   ;;  %v694_v3 = vld [vmem:[%s809_s6] sm:$0xff]   ;;  %v695_v4 = vld [vmem:[%s809_s6 + $0x18] sm:$0xff]   ;;  %vm741_vm1 = vmmov 0   ;;  %vm284_vm2 = vcmask 261120  }
  0x1a   : > { %624 = vmatprep.subr.bf16.mxu0 %v740_v2  ;;  %632 = vmatprep.subr.bf16.mxu1 %v740_v2  ;;  %v696_v5 = vld [vmem:[%s809_s6 + $0x10] sm:$0xff]   ;;  %v600_v6 = vld.sshfl [vmem:[%s814_s9] sm:$0x1 pattern:$0x76325410]  ;;  %v697_v8 = vld [vmem:[%s809_s6 + $0x28] sm:$0xff]  }
  0x1b   : > { %625 = vmatpush3.bf16.msra.mxu0 %v693_v1  ;;  %628 = vmatprep.mubr.msk.bf16.mxu0 %vm741_vm1, %v740_v2  ;;  %v266_v7 = vld [vmem:[%s814_s9] sm:$0x1]  ;;  %v347_v9 = vshrl.u32 %v600_v6, 16  ;;  %vm329_vm3 = vcmask 516096   ;;  %p612_p8 = scmp.ne.s32.totalorder %s721_s15, 2 }
  0x1c   : > { %626 = vmatprep.subr.bf16.mxu0 %v740_v2  ;;  %636 = vmatprep.mubr.msk.bf16.mxu1 %vm741_vm1, %v740_v2  ;;  %v698_v10 = vld [vmem:[%s809_s6 + $0x20] sm:$0xff]  }
  0x1d   : > { %633 = vmatpush3.bf16.msra.mxu1 %v695_v4  ;;  %v608_v11 = vld.sshfl [vmem:[%s814_s9] sm:$0x2 pattern:$0x76325410] }
  0x1e   : > { %634 = vmatprep.subr.bf16.mxu1 %v740_v2  ;;  %v421_v12 = vrot.slane %v608_v11, 1 }
  0x1f   : > { %627 = vmatpush3.bf16.msra.mxu0 %v694_v3  ;;  %v267_v13 = vld [vmem:[#allocation2] sm:$0x1] }
  0x20   : > { %640 = vmatprep.subr.bf16.mxu0 %v740_v2 }
  0x21   : > { %635 = vmatpush3.bf16.msra.mxu1 %v696_v5 }
  0x22   : > { %629 = vmatmul.mubr.msk.bf16.vlgmr.msra.gmra.mxu0 %vm284_vm2, %v266_v7 }
  0x23   : > { %641 = vmatpush3.bf16.msra.mxu0 %v697_v8  ;;  %644 = vmatprep.mubr.msk.bf16.mxu0 %vm741_vm1, %v740_v2 }
  0x24   : > { %637 = vmatmul.mubr.msk.bf16.vlgmr.msra.gmra.mxu1 %vm284_vm2, %v347_v9  ;;  %642 = vmatprep.subr.bf16.mxu0 %v740_v2 }
  0x27   : > { %643 = vmatpush3.bf16.msra.mxu0 %v698_v10 }
  0x2a   : > { %645 = vmatmul.mubr.msk.bf16.vlgmr.msra.gmra.mxu0 %vm284_vm2, %v421_v12 }
  0xe2   : > { %v322_v14 = vpop.f32.mrf.mxu0 }
  0xe3   : > { %v328_v15 = vadd.f32 %v322_v14, %v267_v13 }
  0xe4   : > { %v630_v16 = vpop.f32.mrf.mxu0  ;;  %v398_v17 = vpop.f32.mrf.mxu1 }
  0xe5   : > { %330 = vst.msk [vmem:[#allocation2] sm:$0x1] %vm329_vm3, %v328_v15 }
  0xe6   : > { %v325_v18 = vpop.f32.mrf.mxu0  ;;  %v638_v19 = vpop.f32.mrf.mxu1 }
  0xe8   : > { %v631_v20 = vpop.f32.mrf.mxu0  ;;  %v401_v21 = vpop.f32.mrf.mxu1 }
  0xea   : > { %v639_v22 = vpop.f32.mrf.mxu1  ;;  %v471_v23 = vpop.f32.mrf.mxu0 }
  0xec   : > { %v332_v24 = vld [vmem:[#allocation2] sm:$0x1]  ;;  %v646_v25 = vpop.f32.mrf.mxu0 }
  0xed   : > { %v404_v26 = vadd.f32 %v398_v17, %v332_v24 }
  0xee   : > { %v474_v27 = vpop.f32.mrf.mxu0 }
  0xef   : > { %405 = vst.msk [vmem:[#allocation2] sm:$0x1] %vm329_vm3, %v404_v26 }
  0xf0   : > { %v647_v28 = vpop.f32.mrf.mxu0 }
  0xf5   : > { %482 = sbr.rel (%p612_p8) target bundleno = 267 (0x10b), region = 44 }
  0xf6   : > { %v407_v29 = vld [vmem:[#allocation2] sm:$0x1] }
  0xf7   : > { %v477_v30 = vadd.f32 %v471_v23, %v407_v29 }
  0xf9   : > { %478 = vst.msk [vmem:[#allocation2] sm:$0x1] %vm329_vm3, %v477_v30 }
  0xfa   : > { %v484_v32 = vld [vmem:[%s859_s2] sm:$0x1]  ;;  %vm491_vm4 = vsmask.f32 256 }
  0xfb   : > { %v486_v33 = vld [vmem:[%s860_s3] sm:$0x1]  ;;  %vm492_vm5 = vmand %vm329_vm3, %vm491_vm4 }
  0xfc   : > { %v493_v37 = vld [vmem:[%s804_s26] sm:$0x1] }
 0x100   : > { %v483_v31 = vld [vmem:[#allocation2] sm:$0x1] }
 0x101   : > { %v485_v34 = vmul.f32 %v484_v32, %v483_v31 }
 0x103   : > { %v487_v35 = vadd.f32 %v486_v33, %v485_v34 }
 0x105   : > { %v488_v36 = vmax.f32 %v487_v35, 0.0 }
 0x107   : > { %v489_v38 = vpack.c.bf16 %v488_v36, %v488_v36 }
 0x109   : > { %v494_v39 = vsel %vm492_vm5, %v489_v38, %v493_v37 }
 0x10a   : > { %495 = vst [vmem:[%s804_s26] sm:$0x1] %v494_v39 }
 0x10b PF: > { %s14_s19 = sadd.s32 1, %s737_s19   ;;  %s862_s15 = smov %s729_s17 }
 0x10c   : > { %p11_p9 = scmp.ge.s32.totalorder %s14_s19, 8   ;;  %s863_s16 = smov %s733_s18 }
 0x10d   : > { %s864_s17 = smov %s867_s20  ;;  %s865_s18 = smov %s871_s21 }
 0x10e   :  { %13 = sbr.rel (!%p11_p9) target bundleno = 3 (0x3), region = 79 }

// kernel: _lambda_.37
= control target key start
LH: loop header
LB: loop body
LE: loop exit
PB: predicated region body
PF: predicated region fallthrough
CT: control target
= control target key end

     0   :  { %s925_s18 = smov 0   ;;  %s927_s19 = smov 0   ;;  %s1038_s0 = inlined_call_operand.vmem [shape: bf16[2,5,5,64], index: 0, kind: input, shape index: {}]   ;;  %s1039_s1 = inlined_call_operand.vmem [shape: bf16[3,3,64,64], index: 1, kind: input, shape index: {}]   ;;  %s1040_s2 = inlined_call_operand.vmem [shape: f32[1,64], index: 2, kind: input, shape index: {}]   ;;  %s1041_s3 = inlined_call_operand.vmem [shape: f32[1,64], index: 3, kind: input, shape index: {}]   ;;  %s1042_s4 = inlined_call_operand.vmem [shape: bf16[2,1,1,64], index: 4, kind: input, shape index: {}]   ;;  %s1043_s5 = inlined_call_operand.vmem [shape: bf16[2,1,1,64], index: 5, kind: output, shape index: {}]  }
   0x1   :  { %s929_s20 = smov 0   ;;  %s931_s21 = smov 0  }
   0x2   :  { %s933_s22 = smov 0  }
   0x3 LB: > { %s27_s23 = sadd.s32 1, %s882_s20  ;;  %s34_s24 = sadd.s32 1, %s886_s21  ;;  %s890_s22 = sphi %s933_s22, %s15_s22   ;;  %s886_s21 = sphi %s931_s21, %s1047_s21   ;;  %s882_s20 = sphi %s929_s20, %s1046_s20   ;;  %s878_s19 = sphi %s927_s19, %s1045_s19   ;;  %s874_s18 = sphi %s925_s18, %s1044_s18  }
   0x4   : > { %p28_p0 = scmp.ge.s32.totalorder %s27_s23, 3  ;;  %p701_p1 = scmp.ge.s32.totalorder %s890_s22, 1 }
   0x5   : > { %p244_p2 = scmp.lt.s32.totalorder %s890_s22, 7 }
   0x6   : > { %s1049_s23 = smov (%p28_p0, %s27_s23), 0  ;;  %s1051_s24 = smov (!%p28_p0, %s34_s24), %s886_s21 }
   0x7   : > { %p245_p3 = pnand %p701_p1, %p244_p2  ;;  %p36_p4 = scmp.ge.s32.totalorder %s1051_s24, 2 }
   0x8   : > { %s702_s25 = sshll.u32 (!%p245_p3), %s874_s18, 1  ;;  %p291_p5 = scmp.lt.s32.totalorder (!%p245_p3), %s878_s19, 1 }
   0x9   : > { %s1053_s24 = smov (%p36_p4, %s1051_s24), 0  ;;  %248 = sbr.rel (%p245_p3) target bundleno = 278 (0x116), region = 40 }
   0xa   : > { %p293_p6 = scmp.lt.s32.totalorder (!%p245_p3), %s702_s25, 4  ;;  %p301_p7 = scmp.lt.s32.totalorder (!%p245_p3), %s874_s18, 2 }
   0xb   : > { %p705_p8 = scmp.ne.s32.totalorder (!%p245_p3), %s874_s18, 0 }
   0xe   : > { %s1055_s19 = smov (!%p291_p5, %s878_s19), 1  ;;  %s1057_s25 = smov (!%p293_p6, %s702_s25), 4 }
   0xf   : > { %s793_s26 = smul.u32 5, %s1055_s19  ;;  %s311_s29 = scalar_lea.vmem %s1042_s4, %s1055_s19 }
  0x10   : > { %s302_s30 = scalar_select %p301_p7, %s874_s18, 2 }
  0x11   : > { %s296_s6 = sadd.s32 %s793_s26, %s1057_s25  ;;  %s971_s9 = scalar_lea.vmem %s1043_s5, %s1055_s19 }
  0x12   : > { %s703_s10 = sshll.u32 %s296_s6, 2  ;;  %s794_s11 = smul.u32 96, %s302_s30 }
  0x13   : > { %s976_s14 = scalar_lea.vmem %s1038_s0, %s703_s10  ;;  %322 = sbr.rel (%p705_p8) target bundleno = 26 (0x1a), region = 44 }
  0x14   : > { %s981_s17 = scalar_lea.vmem %s1039_s1, %s794_s11 }
  0x18   : > { %vm323_vm0 = vcmask 516096   ;;  %v892_v0 = vmov 0.0  }
  0x19   : > { %324 = vst.msk [vmem:[#allocation2] sm:$0x1] %vm323_vm0, %v892_v0 }
  0x1a PF: > { %v838_v1 = vld [vmem:[%s981_s17 + $0x18] sm:$0xff]   ;;  %v893_v2 = vmov 0.0   ;;  %v839_v3 = vld [vmem:[%s981_s17 + $0x10] sm:$0xff]   ;;  %vm894_vm1 = vmmov 0   ;;  %v841_v6 = vld [vmem:[%s981_s17 + $0x8] sm:$0xff]   ;;  %vm359_vm2 = vcmask 523264  }
  0x1b   : > { %757 = vmatprep.subr.bf16.mxu0 %v893_v2  ;;  %769 = vmatprep.subr.bf16.mxu1 %v893_v2  ;;  %v840_v4 = vld [vmem:[%s981_s17 + $0x38] sm:$0xff]   ;;  %v842_v5 = vld [vmem:[%s981_s17 + $0x30] sm:$0xff]   ;;  %v844_v7 = vld [vmem:[%s981_s17 + $0x28] sm:$0xff]   ;;  %vm404_vm3 = vcmask 516096   ;;  %p739_p9 = scmp.ne.s32.totalorder %s874_s18, 2 }
  0x1c   : > { %758 = vmatpush3.bf16.msra.mxu0 %v838_v1  ;;  %765 = vmatprep.mubr.msk.bf16.mxu0 %vm894_vm1, %v893_v2  ;;  %v847_v8 = vld [vmem:[%s976_s14] ss:$0 sps:$4 sm:$0x22]   ;;  %v846_v12 = vld [vmem:[%s981_s17 + $0x58] sm:$0xff]   ;;  %v848_v14 = vld [vmem:[%s981_s17 + $0x50] sm:$0xff]  }
  0x1d   : > { %759 = vmatprep.subr.bf16.mxu0 %v893_v2  ;;  %777 = vmatprep.mubr.msk.bf16.mxu1 %vm894_vm1, %v893_v2  ;;  %v843_v9 = vld [vmem:[%s981_s17] sm:$0xff]   ;;  %v420_v13 = vrot.slane %v847_v8, 1  ;;  %v849_v15 = vld [vmem:[%s981_s17 + $0x48] sm:$0xff]  }
  0x1e   : > { %770 = vmatpush3.bf16.msra.mxu1 %v840_v4  ;;  %v845_v10 = vld [vmem:[%s981_s17 + $0x20] sm:$0xff]  }
  0x1f   : > { %771 = vmatprep.subr.bf16.mxu1 %v893_v2  ;;  %v325_v11 = vld [vmem:[%s976_s14] sm:$0x1] }
  0x20   : > { %760 = vmatpush3.bf16.msra.mxu0 %v839_v3  ;;  %v851_v16 = vld [vmem:[%s976_s14] ss:$0 sps:$4 sm:$0x44]  }
  0x21   : > { %761 = vmatprep.subr.bf16.mxu0 %v893_v2  ;;  %v850_v17 = vld [vmem:[%s981_s17 + $0x40] sm:$0xff]   ;;  %v504_v18 = vrot.slane %v851_v16, 2 }
  0x22   : > { %772 = vmatpush3.bf16.msra.mxu1 %v842_v5  ;;  %v326_v19 = vld [vmem:[#allocation2] sm:$0x1] }
  0x23   : > { %773 = vmatprep.subr.bf16.mxu1 %v893_v2 }
  0x24   : > { %762 = vmatpush3.bf16.msra.mxu0 %v841_v6 }
  0x25   : > { %763 = vmatprep.subr.bf16.mxu0 %v893_v2 }
  0x26   : > { %774 = vmatpush3.bf16.msra.mxu1 %v844_v7 }
  0x27   : > { %775 = vmatprep.subr.bf16.mxu1 %v893_v2 }
  0x28   : > { %764 = vmatpush3.bf16.msra.mxu0 %v843_v9 }
  0x29   : > { %781 = vmatprep.subr.bf16.mxu0 %v893_v2 }
  0x2a   : > { %776 = vmatpush3.bf16.msra.mxu1 %v845_v10 }
  0x2b   : > { %766 = vmatmul.mubr.msk.bf16.vlgmr.msra.gmra.mxu0 %vm359_vm2, %v325_v11 }
  0x2c   : > { %782 = vmatpush3.bf16.msra.mxu0 %v846_v12  ;;  %789 = vmatprep.mubr.msk.bf16.mxu0 %vm894_vm1, %v893_v2 }
  0x2d   : > { %778 = vmatmul.mubr.msk.bf16.vlgmr.msra.gmra.mxu1 %vm359_vm2, %v420_v13  ;;  %783 = vmatprep.subr.bf16.mxu0 %v893_v2 }
  0x30   : > { %784 = vmatpush3.bf16.msra.mxu0 %v848_v14 }
  0x31   : > { %785 = vmatprep.subr.bf16.mxu0 %v893_v2 }
  0x34   : > { %786 = vmatpush3.bf16.msra.mxu0 %v849_v15 }
  0x35   : > { %787 = vmatprep.subr.bf16.mxu0 %v893_v2 }
  0x38   : > { %788 = vmatpush3.bf16.msra.mxu0 %v850_v17 }
  0x3b   : > { %790 = vmatmul.mubr.msk.bf16.vlgmr.msra.gmra.mxu0 %vm359_vm2, %v504_v18 }
  0xeb   : > { %v397_v20 = vpop.f32.mrf.mxu0 }
  0xec   : > { %v403_v21 = vadd.f32 %v397_v20, %v326_v19 }
  0xed   : > { %v767_v22 = vpop.f32.mrf.mxu0  ;;  %v482_v23 = vpop.f32.mrf.mxu1 }
  0xee   : > { %405 = vst.msk [vmem:[#allocation2] sm:$0x1] %vm404_vm3, %v403_v21 }
  0xef   : > { %v400_v24 = vpop.f32.mrf.mxu0  ;;  %v779_v25 = vpop.f32.mrf.mxu1 }
  0xf1   : > { %v768_v26 = vpop.f32.mrf.mxu0  ;;  %v485_v27 = vpop.f32.mrf.mxu1 }
  0xf3   : > { %v780_v28 = vpop.f32.mrf.mxu1 }
  0xf5   : > { %v407_v29 = vld [vmem:[#allocation2] sm:$0x1] }
  0xf6   : > { %v488_v30 = vadd.f32 %v482_v23, %v407_v29 }
  0xf8   : > { %489 = vst.msk [vmem:[#allocation2] sm:$0x1] %vm404_vm3, %v488_v30 }
  0xfb   : > { %v566_v31 = vpop.f32.mrf.mxu0 }
  0xfd   : > { %v791_v32 = vpop.f32.mrf.mxu0 }
  0xfe   : > { %577 = sbr.rel (%p739_p9) target bundleno = 278 (0x116), region = 48 }
  0xff   : > { %v491_v33 = vld [vmem:[#allocation2] sm:$0x1]  ;;  %v569_v34 = vpop.f32.mrf.mxu0 }
 0x100   : > { %v572_v35 = vadd.f32 %v566_v31, %v491_v33 }
 0x101   : > { %v792_v36 = vpop.f32.mrf.mxu0 }
 0x102   : > { %573 = vst.msk [vmem:[#allocation2] sm:$0x1] %vm404_vm3, %v572_v35 }
 0x103   : > { %v579_v38 = vld [vmem:[%s1040_s2] sm:$0x1]  ;;  %vm589_vm4 = vsmask.f32 256 }
 0x104   : > { %v581_v39 = vld [vmem:[%s1041_s3] sm:$0x1]  ;;  %vm590_vm5 = vmand %vm404_vm3, %vm589_vm4 }
 0x105   : > { %v583_v41 = vld [vmem:[%s311_s29] sm:$0x1] }
 0x106   : > { %v584_v42 = vunpack.c.l.bf16 %v583_v41  ;;  %v591_v46 = vld [vmem:[%s971_s9] sm:$0x1] }
 0x109   : > { %v578_v37 = vld [vmem:[#allocation2] sm:$0x1] }
 0x10a   : > { %v580_v40 = vmul.f32 %v579_v38, %v578_v37 }
 0x10c   : > { %v582_v43 = vadd.f32 %v581_v39, %v580_v40 }
 0x10e   : > { %v585_v44 = vadd.f32 %v584_v42, %v582_v43 }
 0x110   : > { %v586_v45 = vmax.f32 %v585_v44, 0.0 }
 0x112   : > { %v587_v47 = vpack.c.bf16 %v586_v45, %v586_v45 }
 0x114   : > { %v592_v48 = vsel %vm590_vm5, %v587_v47, %v591_v46 }
 0x115   : > { %593 = vst [vmem:[%s971_s9] sm:$0x1] %v592_v48 }
 0x116 PF: > { %s15_s22 = sadd.s32 1, %s890_s22   ;;  %s1044_s18 = smov %s882_s20 }
 0x117   : > { %p12_p10 = scmp.ge.s32.totalorder %s15_s22, 8   ;;  %s1045_s19 = smov %s886_s21 }
 0x118   : > { %s1046_s20 = smov %s1049_s23  ;;  %s1047_s21 = smov %s1053_s24 }
 0x119   :  { %14 = sbr.rel (!%p12_p10) target bundleno = 3 (0x3), region = 86 }

// kernel: _lambda_.38
= control target key start
LH: loop header
LB: loop body
LE: loop exit
PB: predicated region body
PF: predicated region fallthrough
CT: control target
= control target key end

     0   :  { %v148_v0 = vmov 0.0   ;;  %vm149_vm0 = vmmov 0   ;;  %vm51_vm1 = vcmask 523264   ;;  %vm112_vm2 = vcmask 19456   ;;  %s199_s1 = inlined_call_operand.vmem [shape: bf16[64,3], index: 1, kind: input, shape index: {}]   ;;  %s200_s0 = inlined_call_operand.vmem [shape: bf16[8,64], index: 0, kind: input, shape index: {}]   ;;  %s201_s2 = inlined_call_operand.vmem [shape: f32[1,3], index: 2, kind: input, shape index: {}]   ;;  %s202_s3 = inlined_call_operand.vmem [shape: f32[1,3], index: 3, kind: input, shape index: {}]   ;;  %s203_s4 = inlined_call_operand.vmem [shape: bf16[8,3], index: 4, kind: output, shape index: {}]  }
   0x1   :  { %130 = vmatprep.subr.bf16.mxu0 %v148_v0  ;;  %v144_v1 = vld [vmem:[%s199_s1 + $0x18] sm:$0xff]   ;;  %138 = vmatprep.mubr.msk.bf16.mxu0 %vm149_vm0, %v148_v0  ;;  %v145_v2 = vld [vmem:[%s199_s1 + $0x10] sm:$0xff]   ;;  %v146_v3 = vld [vmem:[%s199_s1 + $0x8] sm:$0xff]  }
   0x2   :  { %131 = vmatpush3.bf16.msra.mxu0 %v144_v1  ;;  %v147_v4 = vld [vmem:[%s199_s1] sm:$0xff]  }
   0x3   :  { %132 = vmatprep.subr.bf16.mxu0 %v148_v0  ;;  %v18_v5 = vld [vmem:[%s200_s0] sm:$0xf] }
   0x4   :  { %v123_v6 = vld [vmem:[%s201_s2] ss:$0 sm:$0xff] }
   0x5   :  { %v124_v8 = vld [vmem:[%s202_s3] ss:$0 sm:$0xff] }
   0x6   :  { %133 = vmatpush3.bf16.msra.mxu0 %v145_v2 }
   0x7   :  { %134 = vmatprep.subr.bf16.mxu0 %v148_v0 }
   0xa   :  { %135 = vmatpush3.bf16.msra.mxu0 %v146_v3 }
   0xb   :  { %136 = vmatprep.subr.bf16.mxu0 %v148_v0 }
   0xe   :  { %137 = vmatpush3.bf16.msra.mxu0 %v147_v4 }
  0x11   :  { %139 = vmatmul.mubr.msk.bf16.vlgmr.msra.gmra.mxu0 %vm51_vm1, %v18_v5 }
  0xd1   :  { %v89_v7 = vpop.f32.mrf.mxu0 }
  0xd2   :  { %v102_v9 = vmul.f32 %v123_v6, %v89_v7 }
  0xd3   :  { %v140_v10 = vpop.f32.mrf.mxu0 }
  0xd4   :  { %v110_v11 = vadd.f32 %v124_v8, %v102_v9 }
  0xd5   :  { %v92_v12 = vpop.f32.mrf.mxu0 }
  0xd6   :  { %v111_v13 = vpack.c.bf16 %v110_v11, %v110_v11 }
  0xd7   :  { %v141_v14 = vpop.f32.mrf.mxu0 }
  0xd8   :  { %113 = vst.msk [vmem:[%s203_s4] sm:$0xf] %vm112_vm2, %v111_v13 }

// kernel: _lambda_.40
= control target key start
LH: loop header
LB: loop body
LE: loop exit
PB: predicated region body
PF: predicated region fallthrough
CT: control target
= control target key end

     0   :  { %v81_v0 = vmov 0   ;;  %v23_v3 = vlaneseq  ;;  %v82_v4 = vmov 269488144   ;;  %vm33_vm0 = vcmask 16384   ;;  %s125_s0 = inlined_call_operand.vmem [shape: bf16[2,1], index: 0, kind: input, shape index: {}]   ;;  %s126_s1 = inlined_call_operand.vmem [shape: bf16[4,1,3], index: 1, kind: input, shape index: {}]   ;;  %s127_s2 = inlined_call_operand.vmem [shape: bf16[4,2,3], index: 2, kind: output, shape index: {}]  }
   0x1   :  { %80 = vset.pattern.permute.xlu0 %v81_v0  ;;  %v11_v1 = vld [vmem:[%s125_s0] sm:$0x1]  ;;  %v21_v5 = vunpack.c.l.s4 %v82_v4  ;;  %v72_v8 = vld [vmem:[%s126_s1 + $0x1] sm:$0x1]  ;;  %v74_v9 = vld [vmem:[%s126_s1 + $0x2] sm:$0x1] }
   0x2   :  { %v13_v2 = vunpack.c.l.bf16 %v11_v1  ;;  %v12_v6 = vld [vmem:[%s126_s1] sm:$0x1]  ;;  %v24_v7 = vshrl.u32 %v23_v3, 7  ;;  %v76_v10 = vld [vmem:[%s126_s1 + $0x3] sm:$0x1]  ;;  %v37_v14 = vunpack.c.l.bf16 %v72_v8  ;;  %v48_v15 = vunpack.c.l.bf16 %v74_v9 }
   0x3   :  { %v22_v11 = vunpack.c.0.s8 %v21_v5  ;;  %v14_v12 = vunpack.c.l.bf16 %v12_v6  ;;  %v59_v16 = vunpack.c.l.bf16 %v76_v10 }
   0x4   :  { %17 = vperm.xlu0 %80, %v13_v2   ;;  %v29_v13 = vsub.s32 0, %v24_v7 }
   0x5   :  { %v25_v17 = vsub.s32 %v22_v11, %v24_v7 }
   0x6   :  { %v30_v18 = vrot.slane %v14_v12, %v29_v13  ;;  %v41_v19 = vrot.slane %v37_v14, %v29_v13  ;;  %v52_v20 = vrot.slane %v48_v15, %v29_v13  ;;  %v63_v21 = vrot.slane %v59_v16, %v29_v13 }
  0x7f   :  { %v18_v22 = vpop.permute.xlu0 %17 }
  0x80   :  { %v26_v23 = vrot.slane %v18_v22, %v25_v17 }
  0x82   :  { %v31_v24 = vmul.f32 %v30_v18, %v26_v23  ;;  %v42_v25 = vmul.f32 %v41_v19, %v26_v23  ;;  %v53_v26 = vmul.f32 %v52_v20, %v26_v23  ;;  %v64_v27 = vmul.f32 %v63_v21, %v26_v23 }
  0x84   :  { %v32_v28 = vpack.c.bf16 %v31_v24, %v31_v24  ;;  %v43_v29 = vpack.c.bf16 %v42_v25, %v42_v25  ;;  %v54_v30 = vpack.c.bf16 %v53_v26, %v53_v26  ;;  %v65_v31 = vpack.c.bf16 %v64_v27, %v64_v27 }
  0x86   :  { %34 = vst.msk [vmem:[%s127_s2] sm:$0x1] %vm33_vm0, %v32_v28  ;;  %73 = vst.msk [vmem:[%s127_s2 + $0x1] sm:$0x1] %vm33_vm0, %v43_v29 }
  0x87   :  { %75 = vst.msk [vmem:[%s127_s2 + $0x2] sm:$0x1] %vm33_vm0, %v54_v30  ;;  %77 = vst.msk [vmem:[%s127_s2 + $0x3] sm:$0x1] %vm33_vm0, %v65_v31 }

// kernel: _lambda_.39
= control target key start
LH: loop header
LB: loop body
LE: loop exit
PB: predicated region body
PF: predicated region fallthrough
CT: control target
= control target key end

     0   :  { %v55_v0 = vmov 0   ;;  %v23_v3 = vlaneseq  ;;  %v56_v4 = vmov 269488144   ;;  %vm33_vm0 = vcmask 16384   ;;  %s87_s0 = inlined_call_operand.vmem [shape: bf16[2,1], index: 0, kind: input, shape index: {}]   ;;  %s88_s1 = inlined_call_operand.vmem [shape: bf16[2,1,3], index: 1, kind: input, shape index: {}]   ;;  %s89_s2 = inlined_call_operand.vmem [shape: bf16[2,2,3], index: 2, kind: output, shape index: {}]  }
   0x1   :  { %54 = vset.pattern.permute.xlu0 %v55_v0  ;;  %v11_v1 = vld [vmem:[%s87_s0] sm:$0x1]  ;;  %v21_v5 = vunpack.c.l.s4 %v56_v4  ;;  %v50_v8 = vld [vmem:[%s88_s1 + $0x1] sm:$0x1] }
   0x2   :  { %v13_v2 = vunpack.c.l.bf16 %v11_v1  ;;  %v24_v6 = vshrl.u32 %v23_v3, 7  ;;  %v12_v7 = vld [vmem:[%s88_s1] sm:$0x1]  ;;  %v37_v12 = vunpack.c.l.bf16 %v50_v8 }
   0x3   :  { %v22_v9 = vunpack.c.0.s8 %v21_v5  ;;  %v14_v10 = vunpack.c.l.bf16 %v12_v7 }
   0x4   :  { %17 = vperm.xlu0 %54, %v13_v2   ;;  %v29_v11 = vsub.s32 0, %v24_v6 }
   0x5   :  { %v25_v13 = vsub.s32 %v22_v9, %v24_v6 }
   0x6   :  { %v30_v14 = vrot.slane %v14_v10, %v29_v11  ;;  %v41_v15 = vrot.slane %v37_v12, %v29_v11 }
  0x7f   :  { %v18_v16 = vpop.permute.xlu0 %17 }
  0x80   :  { %v26_v17 = vrot.slane %v18_v16, %v25_v13 }
  0x82   :  { %v31_v18 = vmul.f32 %v30_v14, %v26_v17  ;;  %v42_v19 = vmul.f32 %v41_v15, %v26_v17 }
  0x84   :  { %v32_v20 = vpack.c.bf16 %v31_v18, %v31_v18  ;;  %v43_v21 = vpack.c.bf16 %v42_v19, %v42_v19 }
  0x86   :  { %34 = vst.msk [vmem:[%s89_s2] sm:$0x1] %vm33_vm0, %v32_v20  ;;  %51 = vst.msk [vmem:[%s89_s2 + $0x1] sm:$0x1] %vm33_vm0, %v43_v21 }

// kernel: _lambda_.41
= control target key start
LH: loop header
LB: loop body
LE: loop exit
PB: predicated region body
PF: predicated region fallthrough
CT: control target
= control target key end

     0   :  { %v128_v0 = vmov 0.0   ;;  %vm129_vm0 = vmmov 0   ;;  %vm38_vm1 = vcmask 261120   ;;  %vm102_vm2 = vcmask 19456   ;;  %s181_s1 = inlined_call_operand.vmem [shape: bf16[32,3], index: 1, kind: input, shape index: {}]   ;;  %s182_s0 = inlined_call_operand.vmem [shape: bf16[8,32], index: 0, kind: input, shape index: {}]   ;;  %s183_s2 = inlined_call_operand.vmem [shape: f32[1,3], index: 2, kind: input, shape index: {}]   ;;  %s184_s4 = inlined_call_operand.vmem [shape: bf16[8,3], index: 4, kind: input, shape index: {}]   ;;  %s185_s3 = inlined_call_operand.vmem [shape: f32[1,3], index: 3, kind: input, shape index: {}]   ;;  %s186_s5 = inlined_call_operand.vmem [shape: bf16[8,3], index: 5, kind: output, shape index: {}]  }
   0x1   :  { %116 = vmatprep.subr.bf16.mxu0 %v128_v0  ;;  %v126_v1 = vld [vmem:[%s181_s1 + $0x8] sm:$0xff]   ;;  %120 = vmatprep.mubr.msk.bf16.mxu0 %vm129_vm0, %v128_v0  ;;  %v127_v2 = vld [vmem:[%s181_s1] sm:$0xff]  }
   0x2   :  { %117 = vmatpush3.bf16.msra.mxu0 %v126_v1  ;;  %v21_v3 = vld [vmem:[%s182_s0] sm:$0xf] }
   0x3   :  { %118 = vmatprep.subr.bf16.mxu0 %v128_v0  ;;  %v111_v4 = vld [vmem:[%s183_s2] ss:$0 sm:$0xff] }
   0x4   :  { %v98_v5 = vld [vmem:[%s184_s4] sm:$0xf] }
   0x5   :  { %v112_v7 = vld [vmem:[%s185_s3] ss:$0 sm:$0xff]  ;;  %v99_v9 = vunpack.c.l.bf16 %v98_v5 }
   0x6   :  { %119 = vmatpush3.bf16.msra.mxu0 %v127_v2 }
   0x9   :  { %121 = vmatmul.mubr.msk.bf16.vlgmr.msra.gmra.mxu0 %vm38_vm1, %v21_v3 }
  0xc9   :  { %v76_v6 = vpop.f32.mrf.mxu0 }
  0xca   :  { %v89_v8 = vmul.f32 %v111_v4, %v76_v6 }
  0xcb   :  { %v122_v10 = vpop.f32.mrf.mxu0 }
  0xcc   :  { %v97_v11 = vadd.f32 %v112_v7, %v89_v8 }
  0xcd   :  { %v79_v12 = vpop.f32.mrf.mxu0 }
  0xce   :  { %v100_v13 = vadd.f32 %v99_v9, %v97_v11 }
  0xcf   :  { %v123_v14 = vpop.f32.mrf.mxu0 }
  0xd0   :  { %v101_v15 = vpack.c.bf16 %v100_v13, %v100_v13 }
  0xd2   :  { %103 = vst.msk [vmem:[%s186_s5] sm:$0xf] %vm102_vm2, %v101_v15 }

// kernel: _lambda_.42
= control target key start
LH: loop header
LB: loop body
LE: loop exit
PB: predicated region body
PF: predicated region fallthrough
CT: control target
= control target key end

     0   :  { %vm18_vm0 = vcmask 1040384   ;;  %v139_v0 = vmov 0.0   ;;  %vm140_vm1 = vmmov 0   ;;  %vm14_vm2 = vcmask 15360   ;;  %s171_s1 = inlined_call_operand.vmem [shape: bf16[2,2,6], index: 1, kind: input, shape index: {}]   ;;  %s172_s0 = inlined_call_operand.vmem [shape: bf16[4,2], index: 0, kind: input, shape index: {}]   ;;  %s173_s2 = inlined_call_operand.vmem [shape: bf16[2,4,6], index: 2, kind: output, shape index: {}]  }
   0x1   :  { %125 = vmatprep.subr.bf16.mxu0 %v139_v0  ;;  %131 = vmatprep.subr.bf16.mxu1 %v139_v0  ;;  %v13_v1 = vld [vmem:[%s171_s1] sm:$0x1]  ;;  %v118_v2 = vld [vmem:[%s171_s1 + $0x1] sm:$0x1]  ;;  %vm63_vm3 = vcmask 41984  }
   0x2   :  { %v20_v3 = vsel %vm18_vm0, %v13_v1, 0  ;;  %v68_v4 = vsel %vm18_vm0, %v118_v2, 0  ;;  %127 = vmatprep.mubr.msk.bf16.mxu0 %vm140_vm1, %v139_v0  ;;  %133 = vmatprep.mubr.msk.bf16.mxu1 %vm140_vm1, %v139_v0  ;;  %v12_v5 = vld [vmem:[%s172_s0] sm:$0x3] }
   0x3   :  { %126 = vmatpush3.bf16.msra.mxu0 %v20_v3  ;;  %132 = vmatpush3.bf16.msra.mxu1 %v68_v4 }
   0x6   :  { %128 = vmatmul.mubr.msk.bf16.vlgmr.msra.gmra.mxu0 %vm14_vm2, %v12_v5  ;;  %134 = vmatmul.mubr.msk.bf16.vlgmr.msra.gmra.mxu1 %vm14_vm2, %v12_v5 }
  0xc6   :  { %v56_v6 = vpop.f32.mrf.mxu0  ;;  %v104_v7 = vpop.f32.mrf.mxu1 }
  0xc7   :  { %v62_v8 = vpack.c.bf16 %v56_v6, %v56_v6  ;;  %v110_v9 = vpack.c.bf16 %v104_v7, %v104_v7 }
  0xc8   :  { %v129_v10 = vpop.f32.mrf.mxu0  ;;  %v135_v11 = vpop.f32.mrf.mxu1 }
  0xc9   :  { %64 = vst.msk [vmem:[%s173_s2] sm:$0x3] %vm63_vm3, %v62_v8  ;;  %120 = vst.msk [vmem:[%s173_s2 + $0x2] sm:$0x3] %vm63_vm3, %v110_v9 }
  0xca   :  { %v59_v12 = vpop.f32.mrf.mxu0  ;;  %v107_v13 = vpop.f32.mrf.mxu1 }
  0xcc   :  { %v130_v14 = vpop.f32.mrf.mxu0  ;;  %v136_v15 = vpop.f32.mrf.mxu1 }

// kernel: _lambda_.44
= control target key start
LH: loop header
LB: loop body
LE: loop exit
PB: predicated region body
PF: predicated region fallthrough
CT: control target
= control target key end

     0   :  { %vm43_vm0 = vcmask 130048   ;;  %vm149_vm1 = vcmask 19456   ;;  %s261_s1 = inlined_call_operand.vmem [shape: bf16[16,3], index: 1, kind: input, shape index: {}]   ;;  %s262_s0 = inlined_call_operand.vmem [shape: bf16[32,16], index: 0, kind: input, shape index: {}]   ;;  %s263_s2 = inlined_call_operand.vmem [shape: f32[1,3], index: 2, kind: input, shape index: {}]   ;;  %s264_s4 = inlined_call_operand.vmem [shape: bf16[32,3], index: 4, kind: input, shape index: {}]   ;;  %s265_s3 = inlined_call_operand.vmem [shape: f32[1,3], index: 3, kind: input, shape index: {}]   ;;  %s266_s5 = inlined_call_operand.vmem [shape: bf16[32,3], index: 5, kind: output, shape index: {}]  }
   0x1   :  { %v191_v0 = vld [vmem:[%s261_s1] sm:$0xff]   ;;  %v193_v2 = vld [vmem:[%s262_s0 + $0x8] sm:$0xff]  }
   0x2   :  { %v192_v1 = vld [vmem:[%s262_s0] sm:$0xff]   ;;  %185 = vmatprep.subr.bf16.mxu0 %v191_v0  ;;  %v181_v4 = vld [vmem:[%s264_s4 + $0x8] sm:$0xff]  }
   0x3   :  { %186 = vmatpush3.bf16.msra.mxu0 %v191_v0  ;;  %187 = vmatprep.mubr.msk.bf16.mxu0 %vm43_vm0, %v192_v1  ;;  %v163_v3 = vld [vmem:[%s263_s2] ss:$0 sm:$0xff]  ;;  %v179_v9 = vunpack.c.l.bf16 %v181_v4  ;;  %v180_v18 = vunpack.c.h.bf16 %v181_v4 }
   0x4   :  { %v164_v6 = vld [vmem:[%s265_s3] ss:$0 sm:$0xff] }
   0x5   :  { %v174_v7 = vld [vmem:[%s264_s4] sm:$0xff]  }
   0x6   :  { %188 = vmatmul.mubr.msk.bf16.vlgmr.msra.gmra.mxu0 %vm43_vm0, %v193_v2  ;;  %v175_v13 = vunpack.c.l.bf16 %v174_v7  ;;  %v176_v20 = vunpack.c.h.bf16 %v174_v7 }
  0xc6   :  { %v189_v5 = vpop.f32.mrf.mxu0 }
  0xc7   :  { %v108_v8 = vmul.f32 %v189_v5, %v163_v3 }
  0xc8   :  { %v84_v10 = vpop.f32.mrf.mxu0 }
  0xc9   :  { %v119_v11 = vadd.f32 %v164_v6, %v108_v8  ;;  %v106_v12 = vmul.f32 %v163_v3, %v84_v10 }
  0xca   :  { %v190_v14 = vpop.f32.mrf.mxu0 }
  0xcb   :  { %v131_v15 = vadd.f32 %v179_v9, %v119_v11  ;;  %v117_v16 = vadd.f32 %v164_v6, %v106_v12  ;;  %v109_v17 = vmul.f32 %v190_v14, %v163_v3 }
  0xcc   :  { %v87_v19 = vpop.f32.mrf.mxu0 }
  0xcd   :  { %v171_v21 = vpack.c.bf16 %v131_v15, %v131_v15  ;;  %v129_v22 = vadd.f32 %v175_v13, %v117_v16  ;;  %v120_v23 = vadd.f32 %v164_v6, %v109_v17  ;;  %v107_v24 = vmul.f32 %v163_v3, %v87_v19 }
  0xcf   :  { %152 = vst.msk [vmem:[%s266_s5 + $0x8] sm:$0xf] %vm149_vm1, %v171_v21  ;;  %v169_v25 = vpack.c.bf16 %v129_v22, %v129_v22  ;;  %v132_v26 = vadd.f32 %v180_v18, %v120_v23  ;;  %v118_v27 = vadd.f32 %v164_v6, %v107_v24 }
  0xd1   :  { %150 = vst.msk [vmem:[%s266_s5] sm:$0xf] %vm149_vm1, %v169_v25  ;;  %v172_v28 = vpack.c.bf16 %v132_v26, %v132_v26  ;;  %v130_v29 = vadd.f32 %v176_v20, %v118_v27 }
  0xd3   :  { %153 = vst.msk [vmem:[%s266_s5 + $0xc] sm:$0xf] %vm149_vm1, %v172_v28  ;;  %v170_v30 = vpack.c.bf16 %v130_v29, %v130_v29 }
  0xd5   :  { %151 = vst.msk [vmem:[%s266_s5 + $0x4] sm:$0xf] %vm149_vm1, %v170_v30 }

// kernel: _lambda_.43
= control target key start
LH: loop header
LB: loop body
LE: loop exit
PB: predicated region body
PF: predicated region fallthrough
CT: control target
= control target key end

     0   :  { %vm18_vm0 = vcmask 1040384   ;;  %v493_v0 = vmov 0.0   ;;  %vm494_vm1 = vmmov 0   ;;  %vm14_vm2 = vcmask 15360   ;;  %s593_s1 = inlined_call_operand.vmem [shape: bf16[8,2,3], index: 1, kind: input, shape index: {}]   ;;  %s594_s0 = inlined_call_operand.vmem [shape: bf16[4,2], index: 0, kind: input, shape index: {}]   ;;  %s595_s2 = inlined_call_operand.vmem [shape: bf16[8,4,3], index: 2, kind: output, shape index: {}]  }
   0x1   :  { %443 = vmatprep.subr.bf16.mxu0 %v493_v0  ;;  %449 = vmatprep.subr.bf16.mxu1 %v493_v0  ;;  %v13_v1 = vld [vmem:[%s593_s1] sm:$0x1]  ;;  %v406_v2 = vld [vmem:[%s593_s1 + $0x1] sm:$0x1]  ;;  %v409_v5 = vld [vmem:[%s593_s1 + $0x2] sm:$0x1] }
   0x2   :  { %v20_v3 = vsel %vm18_vm0, %v13_v1, 0  ;;  %v68_v4 = vsel %vm18_vm0, %v406_v2, 0  ;;  %445 = vmatprep.mubr.msk.bf16.mxu0 %vm494_vm1, %v493_v0  ;;  %451 = vmatprep.mubr.msk.bf16.mxu1 %vm494_vm1, %v493_v0  ;;  %v412_v6 = vld [vmem:[%s593_s1 + $0x3] sm:$0x1]  ;;  %v12_v7 = vld [vmem:[%s594_s0] sm:$0x3] }
   0x3   :  { %444 = vmatpush3.bf16.msra.mxu0 %v20_v3  ;;  %450 = vmatpush3.bf16.msra.mxu1 %v68_v4  ;;  %v116_v8 = vsel %vm18_vm0, %v409_v5, 0  ;;  %v164_v9 = vsel %vm18_vm0, %v412_v6, 0  ;;  %v415_v10 = vld [vmem:[%s593_s1 + $0x4] sm:$0x1]  ;;  %v418_v11 = vld [vmem:[%s593_s1 + $0x5] sm:$0x1] }
   0x4   :  { %455 = vmatprep.subr.bf16.mxu0 %v493_v0  ;;  %461 = vmatprep.subr.bf16.mxu1 %v493_v0  ;;  %v212_v12 = vsel %vm18_vm0, %v415_v10, 0  ;;  %v260_v13 = vsel %vm18_vm0, %v418_v11, 0  ;;  %v421_v14 = vld [vmem:[%s593_s1 + $0x6] sm:$0x1]  ;;  %v424_v15 = vld [vmem:[%s593_s1 + $0x7] sm:$0x1] }
   0x5   :  { %v308_v16 = vsel %vm18_vm0, %v421_v14, 0  ;;  %v356_v17 = vsel %vm18_vm0, %v424_v15, 0  ;;  %vm63_vm3 = vcmask 17408  }
   0x6   :  { %446 = vmatmul.mubr.msk.bf16.vlgmr.msra.gmra.mxu0 %vm14_vm2, %v12_v7  ;;  %452 = vmatmul.mubr.msk.bf16.vlgmr.msra.gmra.mxu1 %vm14_vm2, %v12_v7 }
   0x7   :  { %456 = vmatpush3.bf16.msra.mxu0 %v116_v8  ;;  %462 = vmatpush3.bf16.msra.mxu1 %v164_v9 }
   0x8   :  { %457 = vmatprep.mubr.msk.bf16.mxu0 %vm494_vm1, %v493_v0  ;;  %463 = vmatprep.mubr.msk.bf16.mxu1 %vm494_vm1, %v493_v0 }
   0x9   :  { %467 = vmatprep.subr.bf16.mxu0 %v493_v0  ;;  %473 = vmatprep.subr.bf16.mxu1 %v493_v0 }
   0xe   :  { %458 = vmatmul.mubr.msk.bf16.vlgmr.msra.gmra.mxu0 %vm14_vm2, %v12_v7  ;;  %464 = vmatmul.mubr.msk.bf16.vlgmr.msra.gmra.mxu1 %vm14_vm2, %v12_v7 }
   0xf   :  { %468 = vmatpush3.bf16.msra.mxu0 %v212_v12  ;;  %474 = vmatpush3.bf16.msra.mxu1 %v260_v13 }
  0x10   :  { %469 = vmatprep.mubr.msk.bf16.mxu0 %vm494_vm1, %v493_v0  ;;  %475 = vmatprep.mubr.msk.bf16.mxu1 %vm494_vm1, %v493_v0 }
  0x11   :  { %479 = vmatprep.subr.bf16.mxu0 %v493_v0  ;;  %485 = vmatprep.subr.bf16.mxu1 %v493_v0 }
  0x16   :  { %470 = vmatmul.mubr.msk.bf16.vlgmr.msra.gmra.mxu0 %vm14_vm2, %v12_v7  ;;  %476 = vmatmul.mubr.msk.bf16.vlgmr.msra.gmra.mxu1 %vm14_vm2, %v12_v7 }
  0x17   :  { %480 = vmatpush3.bf16.msra.mxu0 %v308_v16  ;;  %486 = vmatpush3.bf16.msra.mxu1 %v356_v17 }
  0x18   :  { %481 = vmatprep.mubr.msk.bf16.mxu0 %vm494_vm1, %v493_v0  ;;  %487 = vmatprep.mubr.msk.bf16.mxu1 %vm494_vm1, %v493_v0 }
  0x1e   :  { %482 = vmatmul.mubr.msk.bf16.vlgmr.msra.gmra.mxu0 %vm14_vm2, %v12_v7  ;;  %488 = vmatmul.mubr.msk.bf16.vlgmr.msra.gmra.mxu1 %vm14_vm2, %v12_v7 }
  0xc6   :  { %v56_v18 = vpop.f32.mrf.mxu0  ;;  %v104_v19 = vpop.f32.mrf.mxu1 }
  0xc7   :  { %v62_v20 = vpack.c.bf16 %v56_v18, %v56_v18  ;;  %v110_v21 = vpack.c.bf16 %v104_v19, %v104_v19 }
  0xc8   :  { %v447_v22 = vpop.f32.mrf.mxu0  ;;  %v453_v23 = vpop.f32.mrf.mxu1 }
  0xc9   :  { %64 = vst.msk [vmem:[%s595_s2] sm:$0x3] %vm63_vm3, %v62_v20  ;;  %408 = vst.msk [vmem:[%s595_s2 + $0x2] sm:$0x3] %vm63_vm3, %v110_v21 }
  0xca   :  { %v59_v24 = vpop.f32.mrf.mxu0  ;;  %v107_v25 = vpop.f32.mrf.mxu1 }
  0xcc   :  { %v448_v26 = vpop.f32.mrf.mxu0  ;;  %v454_v27 = vpop.f32.mrf.mxu1 }
  0xce   :  { %v152_v28 = vpop.f32.mrf.mxu0  ;;  %v200_v29 = vpop.f32.mrf.mxu1 }
  0xcf   :  { %v158_v30 = vpack.c.bf16 %v152_v28, %v152_v28  ;;  %v206_v31 = vpack.c.bf16 %v200_v29, %v200_v29 }
  0xd0   :  { %v459_v32 = vpop.f32.mrf.mxu0  ;;  %v465_v33 = vpop.f32.mrf.mxu1 }
  0xd1   :  { %411 = vst.msk [vmem:[%s595_s2 + $0x4] sm:$0x3] %vm63_vm3, %v158_v30  ;;  %414 = vst.msk [vmem:[%s595_s2 + $0x6] sm:$0x3] %vm63_vm3, %v206_v31 }
  0xd2   :  { %v155_v34 = vpop.f32.mrf.mxu0  ;;  %v203_v35 = vpop.f32.mrf.mxu1 }
  0xd4   :  { %v460_v36 = vpop.f32.mrf.mxu0  ;;  %v466_v37 = vpop.f32.mrf.mxu1 }
  0xd6   :  { %v248_v38 = vpop.f32.mrf.mxu0  ;;  %v296_v39 = vpop.f32.mrf.mxu1 }
  0xd7   :  { %v254_v40 = vpack.c.bf16 %v248_v38, %v248_v38  ;;  %v302_v41 = vpack.c.bf16 %v296_v39, %v296_v39 }
  0xd8   :  { %v471_v42 = vpop.f32.mrf.mxu0  ;;  %v477_v43 = vpop.f32.mrf.mxu1 }
  0xd9   :  { %417 = vst.msk [vmem:[%s595_s2 + $0x8] sm:$0x3] %vm63_vm3, %v254_v40  ;;  %420 = vst.msk [vmem:[%s595_s2 + $0xa] sm:$0x3] %vm63_vm3, %v302_v41 }
  0xda   :  { %v251_v44 = vpop.f32.mrf.mxu0  ;;  %v299_v45 = vpop.f32.mrf.mxu1 }
  0xdc   :  { %v472_v46 = vpop.f32.mrf.mxu0  ;;  %v478_v47 = vpop.f32.mrf.mxu1 }
  0xde   :  { %v344_v48 = vpop.f32.mrf.mxu0  ;;  %v392_v49 = vpop.f32.mrf.mxu1 }
  0xdf   :  { %v350_v50 = vpack.c.bf16 %v344_v48, %v344_v48  ;;  %v398_v51 = vpack.c.bf16 %v392_v49, %v392_v49 }
  0xe0   :  { %v483_v52 = vpop.f32.mrf.mxu0  ;;  %v489_v53 = vpop.f32.mrf.mxu1 }
  0xe1   :  { %423 = vst.msk [vmem:[%s595_s2 + $0xc] sm:$0x3] %vm63_vm3, %v350_v50  ;;  %426 = vst.msk [vmem:[%s595_s2 + $0xe] sm:$0x3] %vm63_vm3, %v398_v51 }
  0xe2   :  { %v347_v54 = vpop.f32.mrf.mxu0  ;;  %v395_v55 = vpop.f32.mrf.mxu1 }
  0xe4   :  { %v484_v56 = vpop.f32.mrf.mxu0  ;;  %v490_v57 = vpop.f32.mrf.mxu1 }

// kernel: _lambda_.45
= control target key start
LH: loop header
LB: loop body
LE: loop exit
PB: predicated region body
PF: predicated region fallthrough
CT: control target
= control target key end

     0   :  { %vm18_vm0 = vcmask 1041408   ;;  %v139_v0 = vmov 0.0   ;;  %vm140_vm1 = vmmov 0   ;;  %vm14_vm2 = vcmask 31744   ;;  %s171_s1 = inlined_call_operand.vmem [shape: bf16[2,4,12], index: 1, kind: input, shape index: {}]   ;;  %s172_s0 = inlined_call_operand.vmem [shape: bf16[8,4], index: 0, kind: input, shape index: {}]   ;;  %s173_s2 = inlined_call_operand.vmem [shape: bf16[2,8,12], index: 2, kind: output, shape index: {}]  }
   0x1   :  { %125 = vmatprep.subr.bf16.mxu0 %v139_v0  ;;  %131 = vmatprep.subr.bf16.mxu1 %v139_v0  ;;  %v13_v1 = vld [vmem:[%s171_s1] sm:$0x3]  ;;  %v118_v2 = vld [vmem:[%s171_s1 + $0x2] sm:$0x3]  ;;  %vm63_vm3 = vcmask 93184  }
   0x2   :  { %v20_v3 = vsel %vm18_vm0, %v13_v1, 0  ;;  %v68_v4 = vsel %vm18_vm0, %v118_v2, 0  ;;  %127 = vmatprep.mubr.msk.bf16.mxu0 %vm140_vm1, %v139_v0  ;;  %133 = vmatprep.mubr.msk.bf16.mxu1 %vm140_vm1, %v139_v0  ;;  %v12_v5 = vld [vmem:[%s172_s0] sm:$0xf] }
   0x3   :  { %126 = vmatpush3.bf16.msra.mxu0 %v20_v3  ;;  %132 = vmatpush3.bf16.msra.mxu1 %v68_v4 }
   0x6   :  { %128 = vmatmul.mubr.msk.bf16.vlgmr.msra.gmra.mxu0 %vm14_vm2, %v12_v5  ;;  %134 = vmatmul.mubr.msk.bf16.vlgmr.msra.gmra.mxu1 %vm14_vm2, %v12_v5 }
  0xc6   :  { %v56_v6 = vpop.f32.mrf.mxu0  ;;  %v104_v7 = vpop.f32.mrf.mxu1 }
  0xc7   :  { %v62_v8 = vpack.c.bf16 %v56_v6, %v56_v6  ;;  %v110_v9 = vpack.c.bf16 %v104_v7, %v104_v7 }
  0xc8   :  { %v129_v10 = vpop.f32.mrf.mxu0  ;;  %v135_v11 = vpop.f32.mrf.mxu1 }
  0xc9   :  { %64 = vst.msk [vmem:[%s173_s2] sm:$0xf] %vm63_vm3, %v62_v8  ;;  %120 = vst.msk [vmem:[%s173_s2 + $0x4] sm:$0xf] %vm63_vm3, %v110_v9 }
  0xca   :  { %v59_v12 = vpop.f32.mrf.mxu0  ;;  %v107_v13 = vpop.f32.mrf.mxu1 }
  0xcc   :  { %v130_v14 = vpop.f32.mrf.mxu0  ;;  %v136_v15 = vpop.f32.mrf.mxu1 }

// kernel: _lambda_.46
= control target key start
LH: loop header
LB: loop body
LE: loop exit
PB: predicated region body
PF: predicated region fallthrough
CT: control target
= control target key end

     0   :  { %s725_s9 = smov 0   ;;  %s801_s0 = inlined_call_operand.vmem [shape: bf16[8,4], index: 0, kind: input, shape index: {}]   ;;  %s802_s1 = inlined_call_operand.vmem [shape: bf16[16,4,3], index: 1, kind: input, shape index: {}]   ;;  %s803_s2 = inlined_call_operand.vmem [shape: bf16[16,8,3], index: 2, kind: output, shape index: {}]  }
   0x1 LB: > { %s593_s10 = sadd.s32 4294967295, %s706_s9   ;;  %p597_p0 = scmp.ge.s32.totalorder %s706_s9, 1  ;;  %s706_s9 = sphi %s725_s9, %s12_s9  }
   0x2   : > { %p113_p1 = scmp.lt.s32.totalorder %s706_s9, 3 }
   0x4   : > { %p114_p2 = pnand %p597_p0, %p113_p1 }
   0x5   : > { %s598_s11 = sshll.u32 (!%p114_p2), %s593_s10, 3 }
   0x6   : > { %117 = sbr.rel (%p114_p2) target bundleno = 242 (0xf2), region = 28  ;;  %p136_p3 = scmp.lt.s32.totalorder (!%p114_p2), %s598_s11, 15 }
   0xb   : > { %v708_v0 = vmov 0.0   ;;  %vm709_vm0 = vmmov 0   ;;  %s805_s11 = smov (!%p136_p3, %s598_s11), 15  ;;  %vm154_vm1 = vcmask 1041408   ;;  %v148_v7 = vld [vmem:[%s801_s0] sm:$0xf] }
   0xc   : > { %642 = vmatprep.subr.bf16.mxu0 %v708_v0  ;;  %648 = vmatprep.subr.bf16.mxu1 %v708_v0  ;;  %s599_s12 = sshll.u32 %s805_s11, 1  ;;  %vm150_vm2 = vcmask 31744   ;;  %s601_s18 = sshll.u32 %s805_s11, 2  ;;  %vm199_vm3 = vcmask 19456  }
   0xd   : > { %644 = vmatprep.mubr.msk.bf16.mxu0 %vm709_vm0, %v708_v0  ;;  %650 = vmatprep.mubr.msk.bf16.mxu1 %vm709_vm0, %v708_v0  ;;  %s741_s15 = scalar_lea.vmem %s802_s1, %s599_s12  ;;  %s780_s21 = scalar_lea.vmem %s803_s2, %s601_s18 }
   0xe   : > { %v149_v1 = vld [vmem:[%s741_s15] sm:$0x3]  ;;  %v603_v2 = vld [vmem:[%s741_s15 + $0x2] sm:$0x3]  ;;  %v606_v3 = vld [vmem:[%s741_s15 + $0x4] sm:$0x3] }
   0xf   : > { %v156_v4 = vsel %vm154_vm1, %v149_v1, 0  ;;  %v204_v5 = vsel %vm154_vm1, %v603_v2, 0  ;;  %v609_v6 = vld [vmem:[%s741_s15 + $0x6] sm:$0x3]  ;;  %v252_v8 = vsel %vm154_vm1, %v606_v3, 0 }
  0x10   : > { %643 = vmatpush3.bf16.msra.mxu0 %v156_v4  ;;  %649 = vmatpush3.bf16.msra.mxu1 %v204_v5  ;;  %v300_v9 = vsel %vm154_vm1, %v609_v6, 0  ;;  %v612_v10 = vld [vmem:[%s741_s15 + $0x8] sm:$0x3]  ;;  %v615_v11 = vld [vmem:[%s741_s15 + $0xa] sm:$0x3] }
  0x11   : > { %654 = vmatprep.subr.bf16.mxu0 %v708_v0  ;;  %660 = vmatprep.subr.bf16.mxu1 %v708_v0  ;;  %v348_v12 = vsel %vm154_vm1, %v612_v10, 0  ;;  %v396_v13 = vsel %vm154_vm1, %v615_v11, 0  ;;  %v618_v14 = vld [vmem:[%s741_s15 + $0xc] sm:$0x3]  ;;  %v621_v15 = vld [vmem:[%s741_s15 + $0xe] sm:$0x3] }
  0x12   : > { %v444_v16 = vsel %vm154_vm1, %v618_v14, 0  ;;  %v492_v17 = vsel %vm154_vm1, %v621_v15, 0 }
  0x13   : > { %645 = vmatmul.mubr.msk.bf16.vlgmr.msra.gmra.mxu0 %vm150_vm2, %v148_v7  ;;  %651 = vmatmul.mubr.msk.bf16.vlgmr.msra.gmra.mxu1 %vm150_vm2, %v148_v7 }
  0x14   : > { %655 = vmatpush3.bf16.msra.mxu0 %v252_v8  ;;  %661 = vmatpush3.bf16.msra.mxu1 %v300_v9 }
  0x15   : > { %656 = vmatprep.mubr.msk.bf16.mxu0 %vm709_vm0, %v708_v0  ;;  %662 = vmatprep.mubr.msk.bf16.mxu1 %vm709_vm0, %v708_v0 }
  0x16   : > { %666 = vmatprep.subr.bf16.mxu0 %v708_v0  ;;  %672 = vmatprep.subr.bf16.mxu1 %v708_v0 }
  0x1b   : > { %657 = vmatmul.mubr.msk.bf16.vlgmr.msra.gmra.mxu0 %vm150_vm2, %v148_v7  ;;  %663 = vmatmul.mubr.msk.bf16.vlgmr.msra.gmra.mxu1 %vm150_vm2, %v148_v7 }
  0x1c   : > { %667 = vmatpush3.bf16.msra.mxu0 %v348_v12  ;;  %673 = vmatpush3.bf16.msra.mxu1 %v396_v13 }
  0x1d   : > { %668 = vmatprep.mubr.msk.bf16.mxu0 %vm709_vm0, %v708_v0  ;;  %674 = vmatprep.mubr.msk.bf16.mxu1 %vm709_vm0, %v708_v0 }
  0x1e   : > { %678 = vmatprep.subr.bf16.mxu0 %v708_v0  ;;  %684 = vmatprep.subr.bf16.mxu1 %v708_v0 }
  0x23   : > { %669 = vmatmul.mubr.msk.bf16.vlgmr.msra.gmra.mxu0 %vm150_vm2, %v148_v7  ;;  %675 = vmatmul.mubr.msk.bf16.vlgmr.msra.gmra.mxu1 %vm150_vm2, %v148_v7 }
  0x24   : > { %679 = vmatpush3.bf16.msra.mxu0 %v444_v16  ;;  %685 = vmatpush3.bf16.msra.mxu1 %v492_v17 }
  0x25   : > { %680 = vmatprep.mubr.msk.bf16.mxu0 %vm709_vm0, %v708_v0  ;;  %686 = vmatprep.mubr.msk.bf16.mxu1 %vm709_vm0, %v708_v0 }
  0x2b   : > { %681 = vmatmul.mubr.msk.bf16.vlgmr.msra.gmra.mxu0 %vm150_vm2, %v148_v7  ;;  %687 = vmatmul.mubr.msk.bf16.vlgmr.msra.gmra.mxu1 %vm150_vm2, %v148_v7 }
  0xd3   : > { %v192_v18 = vpop.f32.mrf.mxu0  ;;  %v240_v19 = vpop.f32.mrf.mxu1 }
  0xd4   : > { %v198_v20 = vpack.c.bf16 %v192_v18, %v192_v18  ;;  %v246_v21 = vpack.c.bf16 %v240_v19, %v240_v19 }
  0xd5   : > { %v646_v22 = vpop.f32.mrf.mxu0  ;;  %v652_v23 = vpop.f32.mrf.mxu1 }
  0xd6   : > { %200 = vst.msk [vmem:[%s780_s21] sm:$0xf] %vm199_vm3, %v198_v20  ;;  %605 = vst.msk [vmem:[%s780_s21 + $0x4] sm:$0xf] %vm199_vm3, %v246_v21 }
  0xd7   : > { %v195_v24 = vpop.f32.mrf.mxu0  ;;  %v243_v25 = vpop.f32.mrf.mxu1 }
  0xd9   : > { %v647_v26 = vpop.f32.mrf.mxu0  ;;  %v653_v27 = vpop.f32.mrf.mxu1 }
  0xdb   : > { %v288_v28 = vpop.f32.mrf.mxu0  ;;  %v336_v29 = vpop.f32.mrf.mxu1 }
  0xdc   : > { %v294_v30 = vpack.c.bf16 %v288_v28, %v288_v28  ;;  %v342_v31 = vpack.c.bf16 %v336_v29, %v336_v29 }
  0xdd   : > { %v658_v32 = vpop.f32.mrf.mxu0  ;;  %v664_v33 = vpop.f32.mrf.mxu1 }
  0xde   : > { %608 = vst.msk [vmem:[%s780_s21 + $0x8] sm:$0xf] %vm199_vm3, %v294_v30  ;;  %611 = vst.msk [vmem:[%s780_s21 + $0xc] sm:$0xf] %vm199_vm3, %v342_v31 }
  0xdf   : > { %v291_v34 = vpop.f32.mrf.mxu0  ;;  %v339_v35 = vpop.f32.mrf.mxu1 }
  0xe1   : > { %v659_v36 = vpop.f32.mrf.mxu0  ;;  %v665_v37 = vpop.f32.mrf.mxu1 }
  0xe3   : > { %v384_v38 = vpop.f32.mrf.mxu0  ;;  %v432_v39 = vpop.f32.mrf.mxu1 }
  0xe4   : > { %v390_v40 = vpack.c.bf16 %v384_v38, %v384_v38  ;;  %v438_v41 = vpack.c.bf16 %v432_v39, %v432_v39 }
  0xe5   : > { %v670_v42 = vpop.f32.mrf.mxu0  ;;  %v676_v43 = vpop.f32.mrf.mxu1 }
  0xe6   : > { %614 = vst.msk [vmem:[%s780_s21 + $0x10] sm:$0xf] %vm199_vm3, %v390_v40  ;;  %617 = vst.msk [vmem:[%s780_s21 + $0x14] sm:$0xf] %vm199_vm3, %v438_v41 }
  0xe7   : > { %v387_v44 = vpop.f32.mrf.mxu0  ;;  %v435_v45 = vpop.f32.mrf.mxu1 }
  0xe9   : > { %v671_v46 = vpop.f32.mrf.mxu0  ;;  %v677_v47 = vpop.f32.mrf.mxu1 }
  0xeb   : > { %v480_v48 = vpop.f32.mrf.mxu0  ;;  %v528_v49 = vpop.f32.mrf.mxu1 }
  0xec   : > { %v486_v50 = vpack.c.bf16 %v480_v48, %v480_v48  ;;  %v534_v51 = vpack.c.bf16 %v528_v49, %v528_v49 }
  0xed   : > { %v682_v52 = vpop.f32.mrf.mxu0  ;;  %v688_v53 = vpop.f32.mrf.mxu1 }
  0xee   : > { %620 = vst.msk [vmem:[%s780_s21 + $0x18] sm:$0xf] %vm199_vm3, %v486_v50  ;;  %623 = vst.msk [vmem:[%s780_s21 + $0x1c] sm:$0xf] %vm199_vm3, %v534_v51 }
  0xef   : > { %v483_v54 = vpop.f32.mrf.mxu0  ;;  %v531_v55 = vpop.f32.mrf.mxu1 }
  0xf1   : > { %v683_v56 = vpop.f32.mrf.mxu0  ;;  %v689_v57 = vpop.f32.mrf.mxu1 }
  0xf2 PF: > { %s12_s9 = sadd.s32 1, %s706_s9  }
  0xf3   : > { %p9_p4 = scmp.ge.s32.totalorder %s12_s9, 4  }
  0xf5   :  { %11 = sbr.rel (!%p9_p4) target bundleno = 1 (0x1), region = 72 }

// kernel: _lambda_.47
= control target key start
LH: loop header
LB: loop body
LE: loop exit
PB: predicated region body
PF: predicated region fallthrough
CT: control target
= control target key end

     0   :  { %vm103_vm0 = vcmask 1043456   ;;  %vm78_vm1 = vcmask 64512   ;;  %vm362_vm2 = vcmask 19456   ;;  %s748_s1 = inlined_call_operand.vmem [shape: bf16[8,3], index: 1, kind: input, shape index: {}]   ;;  %s749_s0 = inlined_call_operand.vmem [shape: bf16[128,8], index: 0, kind: input, shape index: {}]   ;;  %s750_s4 = inlined_call_operand.vmem [shape: bf16[128,3], index: 4, kind: input, shape index: {}]   ;;  %s751_s2 = inlined_call_operand.vmem [shape: f32[1,3], index: 2, kind: input, shape index: {}]   ;;  %s752_s3 = inlined_call_operand.vmem [shape: f32[1,3], index: 3, kind: input, shape index: {}]   ;;  %s753_s5 = inlined_call_operand.vmem [shape: bf16[128,3], index: 5, kind: output, shape index: {}]  }
   0x1   :  { %v37_v0 = vld [vmem:[%s748_s1] sm:$0xf]  ;;  %v505_v4 = vld [vmem:[%s749_s0 + $0x8] sm:$0xff]   ;;  %v507_v6 = vld [vmem:[%s749_s0 + $0x10] sm:$0xff]  }
   0x2   :  { %501 = vmatprep.subr.msk.bf16.mxu0 %vm103_vm0, %v37_v0  ;;  %502 = vmatprep.subr.msk.bf16.mxu1 %vm103_vm0, %v37_v0  ;;  %v105_v1 = vsel %vm103_vm0, %v37_v0, 0  ;;  %v503_v2 = vld [vmem:[%s749_s0] sm:$0xff]   ;;  %v506_v5 = vld [vmem:[%s749_s0 + $0x28] sm:$0xff]   ;;  %v508_v7 = vld [vmem:[%s749_s0 + $0x30] sm:$0xff]  }
   0x3   :  { %482 = vmatpush3.bf16.msra.mxu0 %v105_v1  ;;  %500 = vmatpush3.bf16.msra.mxu1 %v105_v1  ;;  %v504_v3 = vld [vmem:[%s749_s0 + $0x20] sm:$0xff]   ;;  %v509_v8 = vld [vmem:[%s749_s0 + $0x18] sm:$0xff]   ;;  %v465_v10 = vld [vmem:[%s750_s4 + $0x8] sm:$0xff]  }
   0x4   :  { %483 = vmatprep.mubr.msk.bf16.mxu0 %vm78_vm1, %v503_v2  ;;  %491 = vmatprep.mubr.msk.bf16.mxu1 %vm78_vm1, %v504_v3  ;;  %v510_v9 = vld [vmem:[%s749_s0 + $0x38] sm:$0xff]   ;;  %v582_v11 = vld [vmem:[%s750_s4 + $0x28] sm:$0xff]   ;;  %v587_v12 = vld [vmem:[%s750_s4] sm:$0xff]   ;;  %v439_v15 = vunpack.c.l.bf16 %v465_v10  ;;  %v440_v27 = vunpack.c.h.bf16 %v465_v10 }
   0x5   :  { %v592_v13 = vld [vmem:[%s750_s4 + $0x20] sm:$0xff]   ;;  %v602_v16 = vld [vmem:[%s750_s4 + $0x18] sm:$0xff]   ;;  %v455_v20 = vunpack.c.l.bf16 %v582_v11  ;;  %v435_v21 = vunpack.c.l.bf16 %v587_v12  ;;  %v620_v23 = vld [vmem:[%s750_s4 + $0x10] sm:$0xff]   ;;  %v456_v28 = vunpack.c.h.bf16 %v582_v11  ;;  %v436_v29 = vunpack.c.h.bf16 %v587_v12 }
   0x6   :  { %484 = vmatmul.mubr.msk.bf16.vlgmr.msra.gmra.mxu0 %vm78_vm1, %v505_v4  ;;  %492 = vmatmul.mubr.msk.bf16.vlgmr.msra.gmra.mxu1 %vm78_vm1, %v506_v5  ;;  %v597_v14 = vld [vmem:[%s751_s2] ss:$0 sm:$0xff]  ;;  %v607_v17 = vld [vmem:[%s750_s4 + $0x38] sm:$0xff]   ;;  %v451_v22 = vunpack.c.l.bf16 %v592_v13  ;;  %v625_v24 = vld [vmem:[%s750_s4 + $0x30] sm:$0xff]   ;;  %v452_v32 = vunpack.c.h.bf16 %v592_v13  ;;  %v447_v33 = vunpack.c.l.bf16 %v602_v16  ;;  %v443_v38 = vunpack.c.l.bf16 %v620_v23 }
   0x7   :  { %487 = vmatprep.mubr.msk.bf16.mxu0 %vm78_vm1, %v507_v6  ;;  %495 = vmatprep.mubr.msk.bf16.mxu1 %vm78_vm1, %v508_v7  ;;  %v612_v19 = vld [vmem:[%s752_s3] ss:$0 sm:$0xff]  ;;  %v463_v34 = vunpack.c.l.bf16 %v607_v17  ;;  %v459_v39 = vunpack.c.l.bf16 %v625_v24  ;;  %v448_v43 = vunpack.c.h.bf16 %v602_v16  ;;  %v464_v44 = vunpack.c.h.bf16 %v607_v17 }
   0x8   :  { %v444_v49 = vunpack.c.h.bf16 %v620_v23  ;;  %v460_v54 = vunpack.c.h.bf16 %v625_v24 }
   0xe   :  { %488 = vmatmul.mubr.msk.bf16.gmra.mxu0 %vm78_vm1, %v509_v8  ;;  %496 = vmatmul.mubr.msk.bf16.gmra.mxu1 %vm78_vm1, %v510_v9 }
  0xc6   :  { %v485_v18 = vpop.f32.mrf.mxu0  ;;  %v493_v26 = vpop.f32.mrf.mxu1 }
  0xc7   :  { %v213_v25 = vmul.f32 %v485_v18, %v597_v14  ;;  %v221_v30 = vmul.f32 %v493_v26, %v597_v14 }
  0xc8   :  { %v141_v31 = vpop.f32.mrf.mxu0  ;;  %v173_v37 = vpop.f32.mrf.mxu1 }
  0xc9   :  { %v236_v35 = vadd.f32 %v612_v19, %v213_v25  ;;  %v211_v36 = vmul.f32 %v597_v14, %v141_v31  ;;  %v244_v40 = vadd.f32 %v612_v19, %v221_v30  ;;  %v219_v41 = vmul.f32 %v597_v14, %v173_v37 }
  0xca   :  { %v486_v42 = vpop.f32.mrf.mxu0  ;;  %v494_v48 = vpop.f32.mrf.mxu1 }
  0xcb   :  { %v284_v45 = vadd.f32 %v439_v15, %v236_v35  ;;  %v234_v46 = vadd.f32 %v612_v19, %v211_v36  ;;  %v214_v47 = vmul.f32 %v486_v42, %v597_v14  ;;  %v292_v50 = vadd.f32 %v455_v20, %v244_v40 }
  0xcc   :  { %v242_v51 = vadd.f32 %v612_v19, %v219_v41  ;;  %v222_v52 = vmul.f32 %v494_v48, %v597_v14  ;;  %v144_v53 = vpop.f32.mrf.mxu0  ;;  %v176_v59 = vpop.f32.mrf.mxu1 }
  0xcd   :  { %v419_v55 = vpack.c.bf16 %v284_v45, %v284_v45  ;;  %v282_v56 = vadd.f32 %v435_v21, %v234_v46  ;;  %v237_v57 = vadd.f32 %v612_v19, %v214_v47  ;;  %v212_v58 = vmul.f32 %v597_v14, %v144_v53 }
  0xce   :  { %v427_v60 = vpack.c.bf16 %v292_v50, %v292_v50  ;;  %v290_v61 = vadd.f32 %v451_v22, %v242_v51  ;;  %v245_v62 = vadd.f32 %v612_v19, %v222_v52  ;;  %v220_v63 = vmul.f32 %v597_v14, %v176_v59  ;;  %v489_v0 = vpop.f32.mrf.mxu0  ;;  %v497_v5 = vpop.f32.mrf.mxu1 }
  0xcf   :  { %365 = vst.msk [vmem:[%s753_s5 + $0x8] sm:$0xf] %vm362_vm2, %v419_v55  ;;  %v417_v1 = vpack.c.bf16 %v282_v56, %v282_v56  ;;  %v285_v2 = vadd.f32 %v440_v27, %v237_v57  ;;  %v235_v3 = vadd.f32 %v612_v19, %v212_v58  ;;  %v217_v4 = vmul.f32 %v489_v0, %v597_v14 }
  0xd0   :  { %373 = vst.msk [vmem:[%s753_s5 + $0x28] sm:$0xf] %vm362_vm2, %v427_v60  ;;  %v425_v6 = vpack.c.bf16 %v290_v61, %v290_v61  ;;  %v293_v7 = vadd.f32 %v456_v28, %v245_v62  ;;  %v243_v8 = vadd.f32 %v612_v19, %v220_v63  ;;  %v225_v9 = vmul.f32 %v497_v5, %v597_v14  ;;  %v157_v10 = vpop.f32.mrf.mxu0  ;;  %v189_v18 = vpop.f32.mrf.mxu1 }
  0xd1   :  { %363 = vst.msk [vmem:[%s753_s5] sm:$0xf] %vm362_vm2, %v417_v1  ;;  %v420_v11 = vpack.c.bf16 %v285_v2, %v285_v2  ;;  %v283_v12 = vadd.f32 %v436_v29, %v235_v3  ;;  %v240_v13 = vadd.f32 %v612_v19, %v217_v4  ;;  %v215_v15 = vmul.f32 %v597_v14, %v157_v10 }
  0xd2   :  { %371 = vst.msk [vmem:[%s753_s5 + $0x20] sm:$0xf] %vm362_vm2, %v425_v6  ;;  %v428_v20 = vpack.c.bf16 %v293_v7, %v293_v7  ;;  %v291_v21 = vadd.f32 %v452_v32, %v243_v8  ;;  %v248_v22 = vadd.f32 %v612_v19, %v225_v9  ;;  %v223_v25 = vmul.f32 %v597_v14, %v189_v18  ;;  %v490_v26 = vpop.f32.mrf.mxu0  ;;  %v498_v31 = vpop.f32.mrf.mxu1 }
  0xd3   :  { %366 = vst.msk [vmem:[%s753_s5 + $0xc] sm:$0xf] %vm362_vm2, %v420_v11  ;;  %v418_v27 = vpack.c.bf16 %v283_v12, %v283_v12  ;;  %v288_v28 = vadd.f32 %v447_v33, %v240_v13  ;;  %v238_v29 = vadd.f32 %v612_v19, %v215_v15  ;;  %v218_v30 = vmul.f32 %v490_v26, %v597_v14 }
  0xd4   :  { %374 = vst.msk [vmem:[%s753_s5 + $0x2c] sm:$0xf] %vm362_vm2, %v428_v20  ;;  %v426_v32 = vpack.c.bf16 %v291_v21, %v291_v21  ;;  %v296_v35 = vadd.f32 %v463_v34, %v248_v22  ;;  %v246_v36 = vadd.f32 %v612_v19, %v223_v25  ;;  %v226_v37 = vmul.f32 %v498_v31, %v597_v14  ;;  %v160_v40 = vpop.f32.mrf.mxu0  ;;  %v192_v46 = vpop.f32.mrf.mxu1 }
  0xd5   :  { %364 = vst.msk [vmem:[%s753_s5 + $0x4] sm:$0xf] %vm362_vm2, %v418_v27  ;;  %v423_v33 = vpack.c.bf16 %v288_v28, %v288_v28  ;;  %v286_v41 = vadd.f32 %v443_v38, %v238_v29  ;;  %v241_v42 = vadd.f32 %v612_v19, %v218_v30  ;;  %v216_v45 = vmul.f32 %v597_v14, %v160_v40 }
  0xd6   :  { %372 = vst.msk [vmem:[%s753_s5 + $0x24] sm:$0xf] %vm362_vm2, %v426_v32  ;;  %v431_v34 = vpack.c.bf16 %v296_v35, %v296_v35  ;;  %v294_v47 = vadd.f32 %v459_v39, %v246_v36  ;;  %v249_v48 = vadd.f32 %v612_v19, %v226_v37  ;;  %v224_v50 = vmul.f32 %v597_v14, %v192_v46 }
  0xd7   :  { %369 = vst.msk [vmem:[%s753_s5 + $0x18] sm:$0xf] %vm362_vm2, %v423_v33  ;;  %v421_v38 = vpack.c.bf16 %v286_v41, %v286_v41  ;;  %v289_v51 = vadd.f32 %v448_v43, %v241_v42  ;;  %v239_v52 = vadd.f32 %v612_v19, %v216_v45 }
  0xd8   :  { %377 = vst.msk [vmem:[%s753_s5 + $0x38] sm:$0xf] %vm362_vm2, %v431_v34  ;;  %v429_v39 = vpack.c.bf16 %v294_v47, %v294_v47  ;;  %v297_v14 = vadd.f32 %v464_v44, %v249_v48  ;;  %v247_v53 = vadd.f32 %v612_v19, %v224_v50 }
  0xd9   :  { %367 = vst.msk [vmem:[%s753_s5 + $0x10] sm:$0xf] %vm362_vm2, %v421_v38  ;;  %v424_v16 = vpack.c.bf16 %v289_v51, %v289_v51  ;;  %v287_v43 = vadd.f32 %v444_v49, %v239_v52 }
  0xda   :  { %375 = vst.msk [vmem:[%s753_s5 + $0x30] sm:$0xf] %vm362_vm2, %v429_v39  ;;  %v432_v55 = vpack.c.bf16 %v297_v14, %v297_v14  ;;  %v295_v17 = vadd.f32 %v460_v54, %v247_v53 }
  0xdb   :  { %370 = vst.msk [vmem:[%s753_s5 + $0x1c] sm:$0xf] %vm362_vm2, %v424_v16  ;;  %v422_v19 = vpack.c.bf16 %v287_v43, %v287_v43 }
  0xdc   :  { %378 = vst.msk [vmem:[%s753_s5 + $0x3c] sm:$0xf] %vm362_vm2, %v432_v55  ;;  %v430_v23 = vpack.c.bf16 %v295_v17, %v295_v17 }
  0xdd   :  { %368 = vst.msk [vmem:[%s753_s5 + $0x14] sm:$0xf] %vm362_vm2, %v422_v19 }
  0xde   :  { %376 = vst.msk [vmem:[%s753_s5 + $0x34] sm:$0xf] %vm362_vm2, %v430_v23 }

// kernel: _lambda_.48
= control target key start
LH: loop header
LB: loop body
LE: loop exit
PB: predicated region body
PF: predicated region fallthrough
CT: control target
= control target key end

     0   :  { %vm34_vm0 = vcmask 1043456   ;;  %vm27_vm1 = vcmask 64512   ;;  %vm103_vm2 = vcmask 191488   ;;  %s295_s1 = inlined_call_operand.vmem [shape: bf16[2,8,24], index: 1, kind: input, shape index: {}]   ;;  %s296_s0 = inlined_call_operand.vmem [shape: bf16[32,8], index: 0, kind: input, shape index: {}]   ;;  %s297_s2 = inlined_call_operand.vmem [shape: bf16[2,32,24], index: 2, kind: output, shape index: {}]  }
   0x1   :  { %v16_v0 = vld [vmem:[%s295_s1] sm:$0xf]  ;;  %v195_v1 = vld [vmem:[%s295_s1 + $0x4] sm:$0xf]  ;;  %v235_v5 = vld [vmem:[%s296_s0 + $0x8] sm:$0xff]  }
   0x2   :  { %232 = vmatprep.subr.msk.bf16.mxu0 %vm34_vm0, %v16_v0  ;;  %233 = vmatprep.subr.msk.bf16.mxu1 %vm34_vm0, %v195_v1  ;;  %v36_v2 = vsel %vm34_vm0, %v16_v0, 0  ;;  %v111_v3 = vsel %vm34_vm0, %v195_v1, 0  ;;  %v234_v4 = vld [vmem:[%s296_s0] sm:$0xff]  }
   0x3   :  { %221 = vmatpush3.bf16.msra.mxu0 %v36_v2  ;;  %227 = vmatpush3.bf16.msra.mxu1 %v111_v3 }
   0x4   :  { %222 = vmatprep.mubr.msk.bf16.mxu0 %vm27_vm1, %v234_v4  ;;  %228 = vmatprep.mubr.msk.bf16.mxu1 %vm27_vm1, %v234_v4 }
   0x6   :  { %223 = vmatmul.mubr.msk.bf16.vlgmr.msra.gmra.mxu0 %vm27_vm1, %v235_v5  ;;  %229 = vmatmul.mubr.msk.bf16.vlgmr.msra.gmra.mxu1 %vm27_vm1, %v235_v5 }
  0xc6   :  { %v224_v6 = vpop.f32.mrf.mxu0  ;;  %v230_v7 = vpop.f32.mrf.mxu1 }
  0xc7   :  { %v208_v8 = vpack.c.bf16 %v224_v6, %v224_v6  ;;  %v212_v9 = vpack.c.bf16 %v230_v7, %v230_v7 }
  0xc8   :  { %v72_v10 = vpop.f32.mrf.mxu0  ;;  %v147_v11 = vpop.f32.mrf.mxu1 }
  0xc9   :  { %106 = vst.msk [vmem:[%s297_s2 + $0x8] sm:$0xf] %vm103_vm2, %v208_v8  ;;  %204 = vst.msk [vmem:[%s297_s2 + $0x18] sm:$0xf] %vm103_vm2, %v212_v9  ;;  %v206_v12 = vpack.c.bf16 %v72_v10, %v72_v10  ;;  %v210_v13 = vpack.c.bf16 %v147_v11, %v147_v11 }
  0xca   :  { %v225_v14 = vpop.f32.mrf.mxu0  ;;  %v231_v15 = vpop.f32.mrf.mxu1 }
  0xcb   :  { %104 = vst.msk [vmem:[%s297_s2] sm:$0xf] %vm103_vm2, %v206_v12  ;;  %202 = vst.msk [vmem:[%s297_s2 + $0x10] sm:$0xf] %vm103_vm2, %v210_v13  ;;  %v209_v16 = vpack.c.bf16 %v225_v14, %v225_v14  ;;  %v213_v17 = vpack.c.bf16 %v231_v15, %v231_v15 }
  0xcc   :  { %v75_v18 = vpop.f32.mrf.mxu0  ;;  %v150_v19 = vpop.f32.mrf.mxu1 }
  0xcd   :  { %107 = vst.msk [vmem:[%s297_s2 + $0xc] sm:$0xf] %vm103_vm2, %v209_v16  ;;  %205 = vst.msk [vmem:[%s297_s2 + $0x1c] sm:$0xf] %vm103_vm2, %v213_v17  ;;  %v207_v20 = vpack.c.bf16 %v75_v18, %v75_v18  ;;  %v211_v21 = vpack.c.bf16 %v150_v19, %v150_v19 }
  0xcf   :  { %105 = vst.msk [vmem:[%s297_s2 + $0x4] sm:$0xf] %vm103_vm2, %v207_v20  ;;  %203 = vst.msk [vmem:[%s297_s2 + $0x14] sm:$0xf] %vm103_vm2, %v211_v21 }

// kernel: _lambda_.49
= control target key start
LH: loop header
LB: loop body
LE: loop exit
PB: predicated region body
PF: predicated region fallthrough
CT: control target
= control target key end

     0   :  { %s1072_s9 = smov 0   ;;  %s1207_s0 = inlined_call_operand.vmem [shape: bf16[32,8], index: 0, kind: input, shape index: {}]   ;;  %s1208_s1 = inlined_call_operand.vmem [shape: bf16[64,8,3], index: 1, kind: input, shape index: {}]   ;;  %s1209_s2 = inlined_call_operand.vmem [shape: bf16[64,32,3], index: 2, kind: output, shape index: {}]  }
   0x1 LB: > { %s829_s10 = sadd.s32 4294967295, %s1055_s9   ;;  %p833_p0 = scmp.ge.s32.totalorder %s1055_s9, 1  ;;  %s1055_s9 = sphi %s1072_s9, %s12_s9  }
   0x2   : > { %p113_p1 = scmp.lt.s32.totalorder %s1055_s9, 9 }
   0x4   : > { %p114_p2 = pnand %p833_p0, %p113_p1 }
   0x5   : > { %s834_s11 = sshll.u32 (!%p114_p2), %s829_s10, 3 }
   0x6   : > { %117 = sbr.rel (%p114_p2) target bundleno = 245 (0xf5), region = 28  ;;  %p137_p3 = scmp.lt.s32.totalorder (!%p114_p2), %s834_s11, 63 }
   0xb   : > { %v1047_v0 = vld [vmem:[%s1207_s0] sm:$0xff]   ;;  %vm165_vm0 = vcmask 64512   ;;  %s1211_s11 = smov (!%p137_p3, %s834_s11), 63  ;;  %vm172_vm1 = vcmask 1043456   ;;  %v1048_v6 = vld [vmem:[%s1207_s0 + $0x8] sm:$0xff]   ;;  %vm241_vm2 = vcmask 19456  }
   0xc   : > { %985 = vmatprep.mubr.msk.bf16.mxu0 %vm165_vm0, %v1047_v0  ;;  %991 = vmatprep.mubr.msk.bf16.mxu1 %vm165_vm0, %v1047_v0  ;;  %s835_s14 = sshll.u32 %s1211_s11, 2  ;;  %s926_s20 = sshll.u32 %s1211_s11, 4 }
   0xd   : > { %s1091_s17 = scalar_lea.vmem %s1208_s1, %s835_s14  ;;  %s1138_s23 = scalar_lea.vmem %s1209_s2, %s926_s20 }
   0xe   : > { %v154_v1 = vld [vmem:[%s1091_s17] sm:$0xf]  ;;  %v847_v2 = vld [vmem:[%s1091_s17 + $0x4] sm:$0xf]  ;;  %v858_v3 = vld [vmem:[%s1091_s17 + $0x8] sm:$0xf] }
   0xf   : > { %1031 = vmatprep.subr.msk.bf16.mxu0 %vm172_vm1, %v154_v1  ;;  %1032 = vmatprep.subr.msk.bf16.mxu1 %vm172_vm1, %v847_v2  ;;  %v174_v4 = vsel %vm172_vm1, %v154_v1, 0  ;;  %v249_v5 = vsel %vm172_vm1, %v847_v2, 0  ;;  %v869_v7 = vld [vmem:[%s1091_s17 + $0xc] sm:$0xf]  ;;  %v324_v8 = vsel %vm172_vm1, %v858_v3, 0 }
  0x10   : > { %984 = vmatpush3.bf16.msra.mxu0 %v174_v4  ;;  %990 = vmatpush3.bf16.msra.mxu1 %v249_v5  ;;  %v399_v9 = vsel %vm172_vm1, %v869_v7, 0  ;;  %v880_v10 = vld [vmem:[%s1091_s17 + $0x10] sm:$0xf]  ;;  %v891_v11 = vld [vmem:[%s1091_s17 + $0x14] sm:$0xf] }
  0x11   : > { %1033 = vmatprep.subr.msk.bf16.mxu0 %vm172_vm1, %v858_v3  ;;  %1034 = vmatprep.subr.msk.bf16.mxu1 %vm172_vm1, %v869_v7  ;;  %v474_v12 = vsel %vm172_vm1, %v880_v10, 0  ;;  %v549_v13 = vsel %vm172_vm1, %v891_v11, 0  ;;  %v902_v14 = vld [vmem:[%s1091_s17 + $0x18] sm:$0xf]  ;;  %v913_v15 = vld [vmem:[%s1091_s17 + $0x1c] sm:$0xf] }
  0x12   : > { %v624_v16 = vsel %vm172_vm1, %v902_v14, 0  ;;  %v699_v17 = vsel %vm172_vm1, %v913_v15, 0 }
  0x13   : > { %986 = vmatmul.mubr.msk.bf16.vlgmr.msra.gmra.mxu0 %vm165_vm0, %v1048_v6  ;;  %992 = vmatmul.mubr.msk.bf16.vlgmr.msra.gmra.mxu1 %vm165_vm0, %v1048_v6 }
  0x14   : > { %996 = vmatpush3.bf16.msra.mxu0 %v324_v8  ;;  %1002 = vmatpush3.bf16.msra.mxu1 %v399_v9 }
  0x15   : > { %997 = vmatprep.mubr.msk.bf16.mxu0 %vm165_vm0, %v1047_v0  ;;  %1003 = vmatprep.mubr.msk.bf16.mxu1 %vm165_vm0, %v1047_v0 }
  0x16   : > { %1035 = vmatprep.subr.msk.bf16.mxu0 %vm172_vm1, %v880_v10  ;;  %1036 = vmatprep.subr.msk.bf16.mxu1 %vm172_vm1, %v891_v11 }
  0x1b   : > { %998 = vmatmul.mubr.msk.bf16.vlgmr.msra.gmra.mxu0 %vm165_vm0, %v1048_v6  ;;  %1004 = vmatmul.mubr.msk.bf16.vlgmr.msra.gmra.mxu1 %vm165_vm0, %v1048_v6 }
  0x1c   : > { %1008 = vmatpush3.bf16.msra.mxu0 %v474_v12  ;;  %1014 = vmatpush3.bf16.msra.mxu1 %v549_v13 }
  0x1d   : > { %1009 = vmatprep.mubr.msk.bf16.mxu0 %vm165_vm0, %v1047_v0  ;;  %1015 = vmatprep.mubr.msk.bf16.mxu1 %vm165_vm0, %v1047_v0 }
  0x1e   : > { %1037 = vmatprep.subr.msk.bf16.mxu0 %vm172_vm1, %v902_v14  ;;  %1038 = vmatprep.subr.msk.bf16.mxu1 %vm172_vm1, %v913_v15 }
  0x23   : > { %1010 = vmatmul.mubr.msk.bf16.vlgmr.msra.gmra.mxu0 %vm165_vm0, %v1048_v6  ;;  %1016 = vmatmul.mubr.msk.bf16.vlgmr.msra.gmra.mxu1 %vm165_vm0, %v1048_v6 }
  0x24   : > { %1020 = vmatpush3.bf16.msra.mxu0 %v624_v16  ;;  %1026 = vmatpush3.bf16.msra.mxu1 %v699_v17 }
  0x25   : > { %1021 = vmatprep.mubr.msk.bf16.mxu0 %vm165_vm0, %v1047_v0  ;;  %1027 = vmatprep.mubr.msk.bf16.mxu1 %vm165_vm0, %v1047_v0 }
  0x2b   : > { %1022 = vmatmul.mubr.msk.bf16.vlgmr.msra.gmra.mxu0 %vm165_vm0, %v1048_v6  ;;  %1028 = vmatmul.mubr.msk.bf16.vlgmr.msra.gmra.mxu1 %vm165_vm0, %v1048_v6 }
  0xd3   : > { %v987_v18 = vpop.f32.mrf.mxu0  ;;  %v993_v19 = vpop.f32.mrf.mxu1 }
  0xd4   : > { %v929_v20 = vpack.c.bf16 %v987_v18, %v987_v18  ;;  %v933_v21 = vpack.c.bf16 %v993_v19, %v993_v19 }
  0xd5   : > { %v210_v22 = vpop.f32.mrf.mxu0  ;;  %v285_v23 = vpop.f32.mrf.mxu1 }
  0xd6   : > { %244 = vst.msk [vmem:[%s1138_s23 + $0x8] sm:$0xf] %vm241_vm2, %v929_v20  ;;  %856 = vst.msk [vmem:[%s1138_s23 + $0x18] sm:$0xf] %vm241_vm2, %v933_v21  ;;  %v927_v24 = vpack.c.bf16 %v210_v22, %v210_v22  ;;  %v931_v25 = vpack.c.bf16 %v285_v23, %v285_v23 }
  0xd7   : > { %v988_v26 = vpop.f32.mrf.mxu0  ;;  %v994_v27 = vpop.f32.mrf.mxu1 }
  0xd8   : > { %242 = vst.msk [vmem:[%s1138_s23] sm:$0xf] %vm241_vm2, %v927_v24  ;;  %854 = vst.msk [vmem:[%s1138_s23 + $0x10] sm:$0xf] %vm241_vm2, %v931_v25  ;;  %v930_v28 = vpack.c.bf16 %v988_v26, %v988_v26  ;;  %v934_v29 = vpack.c.bf16 %v994_v27, %v994_v27 }
  0xd9   : > { %v213_v30 = vpop.f32.mrf.mxu0  ;;  %v288_v31 = vpop.f32.mrf.mxu1 }
  0xda   : > { %245 = vst.msk [vmem:[%s1138_s23 + $0xc] sm:$0xf] %vm241_vm2, %v930_v28  ;;  %857 = vst.msk [vmem:[%s1138_s23 + $0x1c] sm:$0xf] %vm241_vm2, %v934_v29  ;;  %v928_v32 = vpack.c.bf16 %v213_v30, %v213_v30  ;;  %v932_v33 = vpack.c.bf16 %v288_v31, %v288_v31 }
  0xdb   : > { %v999_v34 = vpop.f32.mrf.mxu0  ;;  %v1005_v35 = vpop.f32.mrf.mxu1 }
  0xdc   : > { %243 = vst.msk [vmem:[%s1138_s23 + $0x4] sm:$0xf] %vm241_vm2, %v928_v32  ;;  %855 = vst.msk [vmem:[%s1138_s23 + $0x14] sm:$0xf] %vm241_vm2, %v932_v33  ;;  %v937_v36 = vpack.c.bf16 %v999_v34, %v999_v34  ;;  %v941_v37 = vpack.c.bf16 %v1005_v35, %v1005_v35 }
  0xdd   : > { %v360_v38 = vpop.f32.mrf.mxu0  ;;  %v435_v39 = vpop.f32.mrf.mxu1 }
  0xde   : > { %867 = vst.msk [vmem:[%s1138_s23 + $0x28] sm:$0xf] %vm241_vm2, %v937_v36  ;;  %878 = vst.msk [vmem:[%s1138_s23 + $0x38] sm:$0xf] %vm241_vm2, %v941_v37  ;;  %v935_v40 = vpack.c.bf16 %v360_v38, %v360_v38  ;;  %v939_v41 = vpack.c.bf16 %v435_v39, %v435_v39 }
  0xdf   : > { %v1000_v42 = vpop.f32.mrf.mxu0  ;;  %v1006_v43 = vpop.f32.mrf.mxu1 }
  0xe0   : > { %865 = vst.msk [vmem:[%s1138_s23 + $0x20] sm:$0xf] %vm241_vm2, %v935_v40  ;;  %876 = vst.msk [vmem:[%s1138_s23 + $0x30] sm:$0xf] %vm241_vm2, %v939_v41  ;;  %v938_v44 = vpack.c.bf16 %v1000_v42, %v1000_v42  ;;  %v942_v45 = vpack.c.bf16 %v1006_v43, %v1006_v43 }
  0xe1   : > { %v363_v46 = vpop.f32.mrf.mxu0  ;;  %v438_v47 = vpop.f32.mrf.mxu1 }
  0xe2   : > { %868 = vst.msk [vmem:[%s1138_s23 + $0x2c] sm:$0xf] %vm241_vm2, %v938_v44  ;;  %879 = vst.msk [vmem:[%s1138_s23 + $0x3c] sm:$0xf] %vm241_vm2, %v942_v45  ;;  %v936_v48 = vpack.c.bf16 %v363_v46, %v363_v46  ;;  %v940_v49 = vpack.c.bf16 %v438_v47, %v438_v47 }
  0xe3   : > { %v1011_v50 = vpop.f32.mrf.mxu0  ;;  %v1017_v51 = vpop.f32.mrf.mxu1 }
  0xe4   : > { %866 = vst.msk [vmem:[%s1138_s23 + $0x24] sm:$0xf] %vm241_vm2, %v936_v48  ;;  %877 = vst.msk [vmem:[%s1138_s23 + $0x34] sm:$0xf] %vm241_vm2, %v940_v49  ;;  %v945_v52 = vpack.c.bf16 %v1011_v50, %v1011_v50  ;;  %v949_v53 = vpack.c.bf16 %v1017_v51, %v1017_v51 }
  0xe5   : > { %v510_v54 = vpop.f32.mrf.mxu0  ;;  %v585_v55 = vpop.f32.mrf.mxu1 }
  0xe6   : > { %889 = vst.msk [vmem:[%s1138_s23 + $0x48] sm:$0xf] %vm241_vm2, %v945_v52  ;;  %900 = vst.msk [vmem:[%s1138_s23 + $0x58] sm:$0xf] %vm241_vm2, %v949_v53  ;;  %v943_v56 = vpack.c.bf16 %v510_v54, %v510_v54  ;;  %v947_v57 = vpack.c.bf16 %v585_v55, %v585_v55 }
  0xe7   : > { %v1012_v58 = vpop.f32.mrf.mxu0  ;;  %v1018_v59 = vpop.f32.mrf.mxu1 }
  0xe8   : > { %887 = vst.msk [vmem:[%s1138_s23 + $0x40] sm:$0xf] %vm241_vm2, %v943_v56  ;;  %898 = vst.msk [vmem:[%s1138_s23 + $0x50] sm:$0xf] %vm241_vm2, %v947_v57  ;;  %v946_v60 = vpack.c.bf16 %v1012_v58, %v1012_v58  ;;  %v950_v61 = vpack.c.bf16 %v1018_v59, %v1018_v59 }
  0xe9   : > { %v513_v62 = vpop.f32.mrf.mxu0  ;;  %v588_v63 = vpop.f32.mrf.mxu1 }
  0xea   : > { %890 = vst.msk [vmem:[%s1138_s23 + $0x4c] sm:$0xf] %vm241_vm2, %v946_v60  ;;  %901 = vst.msk [vmem:[%s1138_s23 + $0x5c] sm:$0xf] %vm241_vm2, %v950_v61  ;;  %v944_v0 = vpack.c.bf16 %v513_v62, %v513_v62  ;;  %v948_v1 = vpack.c.bf16 %v588_v63, %v588_v63 }
  0xeb   : > { %v1023_v2 = vpop.f32.mrf.mxu0  ;;  %v1029_v3 = vpop.f32.mrf.mxu1 }
  0xec   : > { %888 = vst.msk [vmem:[%s1138_s23 + $0x44] sm:$0xf] %vm241_vm2, %v944_v0  ;;  %899 = vst.msk [vmem:[%s1138_s23 + $0x54] sm:$0xf] %vm241_vm2, %v948_v1  ;;  %v953_v4 = vpack.c.bf16 %v1023_v2, %v1023_v2  ;;  %v957_v5 = vpack.c.bf16 %v1029_v3, %v1029_v3 }
  0xed   : > { %v660_v6 = vpop.f32.mrf.mxu0  ;;  %v735_v7 = vpop.f32.mrf.mxu1 }
  0xee   : > { %911 = vst.msk [vmem:[%s1138_s23 + $0x68] sm:$0xf] %vm241_vm2, %v953_v4  ;;  %922 = vst.msk [vmem:[%s1138_s23 + $0x78] sm:$0xf] %vm241_vm2, %v957_v5  ;;  %v951_v8 = vpack.c.bf16 %v660_v6, %v660_v6  ;;  %v955_v9 = vpack.c.bf16 %v735_v7, %v735_v7 }
  0xef   : > { %v1024_v10 = vpop.f32.mrf.mxu0  ;;  %v1030_v11 = vpop.f32.mrf.mxu1 }
  0xf0   : > { %909 = vst.msk [vmem:[%s1138_s23 + $0x60] sm:$0xf] %vm241_vm2, %v951_v8  ;;  %920 = vst.msk [vmem:[%s1138_s23 + $0x70] sm:$0xf] %vm241_vm2, %v955_v9  ;;  %v954_v12 = vpack.c.bf16 %v1024_v10, %v1024_v10  ;;  %v958_v13 = vpack.c.bf16 %v1030_v11, %v1030_v11 }
  0xf1   : > { %v663_v14 = vpop.f32.mrf.mxu0  ;;  %v738_v15 = vpop.f32.mrf.mxu1 }
  0xf2   : > { %912 = vst.msk [vmem:[%s1138_s23 + $0x6c] sm:$0xf] %vm241_vm2, %v954_v12  ;;  %923 = vst.msk [vmem:[%s1138_s23 + $0x7c] sm:$0xf] %vm241_vm2, %v958_v13  ;;  %v952_v16 = vpack.c.bf16 %v663_v14, %v663_v14  ;;  %v956_v17 = vpack.c.bf16 %v738_v15, %v738_v15 }
  0xf4   : > { %910 = vst.msk [vmem:[%s1138_s23 + $0x64] sm:$0xf] %vm241_vm2, %v952_v16  ;;  %921 = vst.msk [vmem:[%s1138_s23 + $0x74] sm:$0xf] %vm241_vm2, %v956_v17 }
  0xf5 PF: > { %s12_s9 = sadd.s32 1, %s1055_s9  }
  0xf6   : > { %p9_p4 = scmp.ge.s32.totalorder %s12_s9, 10  }
  0xf8   :  { %11 = sbr.rel (!%p9_p4) target bundleno = 1 (0x1), region = 72 }

</bundles_post_ra>
